<compile_context>
chip_gen: v6e
topology: v6e:2x2x1
jax: 0.10.0
libtpu: 0.0.40
codegen_flags: <defaults>
</compile_context>

<pallas_src>
import functools

import numpy as np

import jax
import jax.numpy as jnp
from jax.experimental import pallas as pl
from jax.experimental.pallas import tpu as pltpu

# Model constants (match the PyTorch module).
IN_H = 28
CONV_OUT = 26            # 28 - 3 + 1
POOL_OUT = 13            # 26 // 2
CH = 16                  # conv output channels
PATCH = 9                # 3*3*1 patch size
HID = 64                 # fc1 width
NUM_CLASSES = 10
K_FLAT = CH * POOL_OUT * POOL_OUT     # 2704 (HWC-flat fc1 input)
PW_PAD = 16                           # pool-width 13 padded to 16
PH_N = PW_PAD * CH                    # 256: per-pool-row feature width
ROW_N = 2 * PH_N                      # 512: conv matmul N (2 horizontal phases)
IMG_W_PAD = 32                        # image width 28 padded to 32 (conv K)
OUT_PAD = 128                         # lane-dense final output width


def _round_up(x, m):
    return (x + m - 1) // m * m


# ------------------------------ Pallas kernel ------------------------------ #

def cnn_fused_kernel(xr_ref, wd_ref, bcr_ref, w1p_ref, b1_ref, w2_ref, b2_ref,
                     o_ref):
    """Fully fused CNN forward for one batch tile.

    xr_ref : (28, TB, 32)  bf16  image rows, (row, batch, width padded 28->32)
    wd_ref : (3, 32, 512)  bf16  banded conv weights per vertical tap dy;
                                 col = wx*256 + pw*16 + c
    bcr_ref: (1, 256)      f32   conv bias tiled over pw (cols 208..255 = 0)
    w1p_ref: (13, 256, 64) bf16  fc1 weight per pooled row ph (rows 208..255=0)
    b1_ref : (1, 64)       f32
    w2_ref : (64, 128)     bf16  fc2 weight zero-padded 10 -> 128 cols
    b2_ref : (1, 128)      f32
    o_ref  : (TB, 128)     f32   padded logits (lane-dense store)
    """
    f32 = jnp.float32
    tb = o_ref.shape[0]

    bcr = bcr_ref[...]                       # (1, 256)
    wd0 = wd_ref[0]                          # (32, 512)
    wd1 = wd_ref[1]
    wd2 = wd_ref[2]

    h1 = jnp.zeros((tb, HID), f32)           # fc1 pre-activation accumulator

    for ph in range(POOL_OUT):               # 13 pooled output rows
        # The four image rows feeding pooled row ph (both vertical pool phases).
        r0 = xr_ref[2 * ph + 0]              # (TB, 32) bf16
        r1 = xr_ref[2 * ph + 1]
        r2 = xr_ref[2 * ph + 2]
        r3 = xr_ref[2 * ph + 3]

        # conv pre-activations for output rows i = 2ph (ha) and i = 2ph+1 (hb);
        # columns are (wx, pw, c) so the horizontal pool phases are the two
        # lane-aligned 256-column halves.
        ha = (jnp.dot(r0, wd0, preferred_element_type=f32)
              + jnp.dot(r1, wd1, preferred_element_type=f32)
              + jnp.dot(r2, wd2, preferred_element_type=f32))      # (TB, 512)
        hb = (jnp.dot(r1, wd0, preferred_element_type=f32)
              + jnp.dot(r2, wd1, preferred_element_type=f32)
              + jnp.dot(r3, wd2, preferred_element_type=f32))      # (TB, 512)

        hv = jnp.maximum(ha, hb)                                   # vertical max
        hp = jnp.maximum(hv[:, :PH_N], hv[:, PH_N:])               # horizontal max
        # bias + ReLU commute with the max (bias constant per channel).
        pooled = jnp.maximum(hp + bcr, 0.0)                        # (TB, 256)

        # fc1 partial contraction for this pooled row.
        h1 = h1 + jnp.dot(pooled.astype(w1p_ref.dtype), w1p_ref[ph],
                          preferred_element_type=f32)              # (TB, 64)

    h1 = jnp.maximum(h1 + b1_ref[...], 0.0)
    out = jnp.dot(h1.astype(w2_ref.dtype), w2_ref[...],
                  preferred_element_type=f32)
    o_ref[...] = out + b2_ref[...]


# ----------------------- one-time parameter pre-pack ----------------------- #

def prepare_params(params, compute_dtype=jnp.bfloat16):
    """Pack/pad/cast weights once (hoisted out of the forward pass)."""
    wc, bc, w1, b1, w2, b2 = params
    cd = jnp.dtype(compute_dtype)

    # Banded conv weights wd[dy] (32, 512) with cols (wx, pw, c):
    #   wd[dy][k, wx*256 + pw*16 + c] = wc[dy*3 + dx, c]  where dx = k-(2pw+wx)
    mask = np.zeros((3, IMG_W_PAD, 2, POOL_OUT), np.float32)   # (dx, k, wx, pw)
    for dx in range(3):
        for wx in range(2):
            for pw in range(POOL_OUT):
                mask[dx, 2 * pw + wx + dx, wx, pw] = 1.0
    wd5 = jnp.einsum("yxc,xkwp->ykwpc",
                     wc.reshape(3, 3, CH).astype(jnp.float32),
                     jnp.asarray(mask))                         # (3,32,2,13,16)
    wd5 = jnp.pad(wd5, ((0, 0), (0, 0), (0, 0), (0, PW_PAD - POOL_OUT), (0, 0)))
    wd = wd5.reshape(3, IMG_W_PAD, ROW_N).astype(cd)            # (3, 32, 512)

    # Conv bias tiled over pw, zero in the pw-padding columns.
    bc_row = jnp.pad(jnp.tile(bc.astype(jnp.float32), (1, POOL_OUT)),
                     ((0, 0), (0, (PW_PAD - POOL_OUT) * CH)))   # (1, 256)

    # fc1 weight regrouped per pooled row ph: (13, 256, 64), pad rows zero.
    w1p = w1.reshape(POOL_OUT, POOL_OUT, CH, HID)
    w1p = jnp.pad(w1p, ((0, 0), (0, PW_PAD - POOL_OUT), (0, 0), (0, 0)))
    w1p = w1p.reshape(POOL_OUT, PH_N, HID).astype(cd)           # (13, 256, 64)

    b1_row = b1.astype(jnp.float32).reshape(1, HID)
    w2p = jnp.pad(w2, ((0, 0), (0, OUT_PAD - NUM_CLASSES))).astype(cd)
    b2_row = jnp.pad(b2, ((0, 0), (0, OUT_PAD - NUM_CLASSES))).astype(jnp.float32)
    return wd, bc_row, w1p, b1_row, w2p, b2_row


# --------------------------------- wrapper --------------------------------- #

def cnn_forward(x, prepared, *, batch_tile=256, compute_dtype=jnp.bfloat16):
    """x: (B, 1, 28, 28) float32 -> logits (B, 10) float32."""
    wd, bc_row, w1p, b1_row, w2p, b2_row = prepared
    B = x.shape[0]
    cd = jnp.dtype(compute_dtype)

    # Batch tile: multiple of 16 (bf16 sublane tile), grid >= 2 (v7x megacore).
    TB = min(batch_tile, max(16, _round_up(-(-B // 2), 16)))
    Bpad = max(_round_up(B, TB), 2 * TB)
    grid = (Bpad // TB,)

    # Single cheap input layout pass: squeeze channel, cast, pad width 28->32,
    # put the image-row dim first so the kernel indexes rows on a leading axis.
    xs = x.reshape(B, IN_H, IN_H).astype(cd)
    xs = jnp.pad(xs, ((0, Bpad - B), (0, 0), (0, IMG_W_PAD - IN_H)))
    xr = jnp.transpose(xs, (1, 0, 2))                  # (28, Bpad, 32)

    flops = Bpad * (POOL_OUT * (6 * 2 * IMG_W_PAD * ROW_N + 2 * PH_N * HID)
                    + 2 * HID * OUT_PAD)
    bytes_accessed = (Bpad * IN_H * IMG_W_PAD * cd.itemsize
                      + Bpad * OUT_PAD * 4
                      + (wd.size + w1p.size + w2p.size) * cd.itemsize
                      + (bc_row.size + b1_row.size + b2_row.size) * 4)

    logits_pad = pl.pallas_call(
        cnn_fused_kernel,
        out_shape=jax.ShapeDtypeStruct((Bpad, OUT_PAD), jnp.float32),
        grid_spec=pltpu.PrefetchScalarGridSpec(
            num_scalar_prefetch=0,
            grid=grid,
            in_specs=[
                pl.BlockSpec((IN_H, TB, IMG_W_PAD), lambda i: (0, i, 0)),
                pl.BlockSpec((3, IMG_W_PAD, ROW_N), lambda i: (0, 0, 0)),
                pl.BlockSpec((1, PH_N), lambda i: (0, 0)),
                pl.BlockSpec((POOL_OUT, PH_N, HID), lambda i: (0, 0, 0)),
                pl.BlockSpec((1, HID), lambda i: (0, 0)),
                pl.BlockSpec((HID, OUT_PAD), lambda i: (0, 0)),
                pl.BlockSpec((1, OUT_PAD), lambda i: (0, 0)),
            ],
            out_specs=pl.BlockSpec((TB, OUT_PAD), lambda i: (i, 0)),
        ),
        compiler_params=pltpu.CompilerParams(
            dimension_semantics=("parallel",),
            vmem_limit_bytes=32 * 1024 * 1024),
        cost_estimate=pl.CostEstimate(
            flops=flops, transcendentals=0, bytes_accessed=bytes_accessed),
    )(xr, wd, bc_row, w1p, b1_row, w2p, b2_row)

    # Slice away batch padding and the lane padding of the 10-class output.
    return logits_pad[:B, :NUM_CLASSES]


# ---------------------------- params / reference --------------------------- #

def init_params(key):
    """PyTorch-default-style init (U[-1/sqrt(fan_in), 1/sqrt(fan_in)])."""
    k = jax.random.split(key, 6)
    bc_bound = 1.0 / jnp.sqrt(1.0 * 3 * 3)
    b1_bound = 1.0 / jnp.sqrt(float(K_FLAT))
    b2_bound = 1.0 / jnp.sqrt(float(HID))
    # conv weight stored as (ky*3+kx, out_channel); fc weights as (in, out),
    # fc1 indexed by the HWC-flattened pooled features ((ph*13+pw)*16 + c).
    wc = jax.random.uniform(k[0], (PATCH, CH), jnp.float32, -bc_bound, bc_bound)
    bc = jax.random.uniform(k[1], (1, CH), jnp.float32, -bc_bound, bc_bound)
    w1 = jax.random.uniform(k[2], (K_FLAT, HID), jnp.float32, -b1_bound, b1_bound)
    b1 = jax.random.uniform(k[3], (1, HID), jnp.float32, -b1_bound, b1_bound)
    w2 = jax.random.uniform(k[4], (HID, NUM_CLASSES), jnp.float32, -b2_bound, b2_bound)
    b2 = jax.random.uniform(k[5], (1, NUM_CLASSES), jnp.float32, -b2_bound, b2_bound)
    return wc, bc, w1, b1, w2, b2


def cnn_reference(x, params):
    """Plain-JAX f32 reference with identical semantics."""
    wc, bc, w1, b1, w2, b2 = params
    B = x.shape[0]
    xs = x[:, 0]
    pats = jnp.stack(
        [xs[:, dy:dy + CONV_OUT, dx:dx + CONV_OUT]
         for dy in range(3) for dx in range(3)],
        axis=-1)                                              # (B,26,26,9)
    conv = jnp.maximum(
        jnp.einsum("bijk,kc->bijc", pats, wc) + bc.reshape(1, 1, 1, CH), 0.0)
    pooled = jnp.max(conv.reshape(B, POOL_OUT, 2, POOL_OUT, 2, CH), axis=(2, 4))
    flat = pooled.reshape(B, K_FLAT)                          # HWC flatten
    h = jnp.maximum(flat @ w1 + b1, 0.0)
    return h @ w2 + b2


if __name__ == "__main__":
    key = jax.random.PRNGKey(0)
    kx, kp = jax.random.split(key)

    B = 2
    x = jax.random.normal(kx, (B, 1, IN_H, IN_H), jnp.float32)  # NCHW like MNIST
    params = init_params(kp)
    prepared = prepare_params(params)          # one-time weight pre-pack

    fwd = jax.jit(functools.partial(cnn_forward))
    out = fwd(x, prepared)
    jax.block_until_ready(out)

    ref = cnn_reference(x, params)
    assert out.shape == (B, NUM_CLASSES)
    # bf16 matmul inputs with f32 accumulation -> loose-but-safe tolerance.
    assert jnp.allclose(out, ref, atol=5e-2, rtol=5e-2), "mismatch vs reference"

    print("KERNEL_OK")
</pallas_src>

<mosaic_0001>
module attributes {stable_mosaic.version = 11 : i64} {
  func.func @cnn_fused_kernel(%arg0: i32, %arg1: memref<28x16x32xbf16, #tpu.memory_space<vmem>>, %arg2: memref<3x32x512xbf16, #tpu.memory_space<vmem>>, %arg3: memref<1x256xf32, #tpu.memory_space<vmem>>, %arg4: memref<13x256x64xbf16, #tpu.memory_space<vmem>>, %arg5: memref<1x64xf32, #tpu.memory_space<vmem>>, %arg6: memref<64x128xbf16, #tpu.memory_space<vmem>>, %arg7: memref<1x128xf32, #tpu.memory_space<vmem>>, %arg8: memref<16x128xf32, #tpu.memory_space<vmem>>) attributes {dimension_semantics = [#tpu.dimension_semantics<parallel>], iteration_bounds = array<i64: 2>, scalar_prefetch = 0 : i64, scratch_operands = 0 : i64, tpu.core_type = #tpu.core_type<tc>, window_params = [{transform_indices = @transform_0, window_bounds = array<i64: 28, 16, 32>}, {pipeline_mode = #tpu.pipeline_mode<synchronous>, transform_indices = @transform_1, window_bounds = array<i64: 3, 32, 512>}, {pipeline_mode = #tpu.pipeline_mode<synchronous>, transform_indices = @transform_2, window_bounds = array<i64: 1, 256>}, {pipeline_mode = #tpu.pipeline_mode<synchronous>, transform_indices = @transform_3, window_bounds = array<i64: 13, 256, 64>}, {pipeline_mode = #tpu.pipeline_mode<synchronous>, transform_indices = @transform_4, window_bounds = array<i64: 1, 64>}, {pipeline_mode = #tpu.pipeline_mode<synchronous>, transform_indices = @transform_5, window_bounds = array<i64: 64, 128>}, {pipeline_mode = #tpu.pipeline_mode<synchronous>, transform_indices = @transform_6, window_bounds = array<i64: 1, 128>}, {transform_indices = @transform_7, window_bounds = array<i64: 16, 128>}]} {
    %c0 = arith.constant 0 : index
    %c0_0 = arith.constant 0 : index
    %0 = vector.load %arg3[%c0, %c0_0] : memref<1x256xf32, #tpu.memory_space<vmem>>, vector<1x256xf32>
    %c0_1 = arith.constant 0 : index
    %c0_2 = arith.constant 0 : index
    %c0_3 = arith.constant 0 : index
    %1 = vector.load %arg2[%c0_1, %c0_2, %c0_3] : memref<3x32x512xbf16, #tpu.memory_space<vmem>>, vector<1x32x512xbf16>
    %2 = vector.shape_cast %1 : vector<1x32x512xbf16> to vector<32x512xbf16>
    %c1 = arith.constant 1 : index
    %c0_4 = arith.constant 0 : index
    %c0_5 = arith.constant 0 : index
    %3 = vector.load %arg2[%c1, %c0_4, %c0_5] : memref<3x32x512xbf16, #tpu.memory_space<vmem>>, vector<1x32x512xbf16>
    %4 = vector.shape_cast %3 : vector<1x32x512xbf16> to vector<32x512xbf16>
    %c2 = arith.constant 2 : index
    %c0_6 = arith.constant 0 : index
    %c0_7 = arith.constant 0 : index
    %5 = vector.load %arg2[%c2, %c0_6, %c0_7] : memref<3x32x512xbf16, #tpu.memory_space<vmem>>, vector<1x32x512xbf16>
    %6 = vector.shape_cast %5 : vector<1x32x512xbf16> to vector<32x512xbf16>
    %cst = arith.constant 0.000000e+00 : f32
    %7 = vector.broadcast %cst : f32 to vector<16x64xf32>
    %c0_8 = arith.constant 0 : index
    %c0_9 = arith.constant 0 : index
    %c0_10 = arith.constant 0 : index
    %8 = vector.load %arg1[%c0_8, %c0_9, %c0_10] : memref<28x16x32xbf16, #tpu.memory_space<vmem>>, vector<1x16x32xbf16>
    %9 = vector.shape_cast %8 : vector<1x16x32xbf16> to vector<16x32xbf16>
    %c1_11 = arith.constant 1 : index
    %c0_12 = arith.constant 0 : index
    %c0_13 = arith.constant 0 : index
    %10 = vector.load %arg1[%c1_11, %c0_12, %c0_13] : memref<28x16x32xbf16, #tpu.memory_space<vmem>>, vector<1x16x32xbf16>
    %11 = vector.shape_cast %10 : vector<1x16x32xbf16> to vector<16x32xbf16>
    %c2_14 = arith.constant 2 : index
    %c0_15 = arith.constant 0 : index
    %c0_16 = arith.constant 0 : index
    %12 = vector.load %arg1[%c2_14, %c0_15, %c0_16] : memref<28x16x32xbf16, #tpu.memory_space<vmem>>, vector<1x16x32xbf16>
    %13 = vector.shape_cast %12 : vector<1x16x32xbf16> to vector<16x32xbf16>
    %c3 = arith.constant 3 : index
    %c0_17 = arith.constant 0 : index
    %c0_18 = arith.constant 0 : index
    %14 = vector.load %arg1[%c3, %c0_17, %c0_18] : memref<28x16x32xbf16, #tpu.memory_space<vmem>>, vector<1x16x32xbf16>
    %15 = vector.shape_cast %14 : vector<1x16x32xbf16> to vector<16x32xbf16>
    %cst_19 = arith.constant dense<0.000000e+00> : vector<16x512xf32>
    %16 = tpu.matmul %9, %2, %cst_19 {dimension_numbers = #tpu.dot_dimension_numbers<[1], [0], [0], [1], [0, 0, 1, 1], [], []>} : vector<16x32xbf16>, vector<32x512xbf16>, vector<16x512xf32> -> vector<16x512xf32>
    %cst_20 = arith.constant dense<0.000000e+00> : vector<16x512xf32>
    %17 = tpu.matmul %11, %4, %cst_20 {dimension_numbers = #tpu.dot_dimension_numbers<[1], [0], [0], [1], [0, 0, 1, 1], [], []>} : vector<16x32xbf16>, vector<32x512xbf16>, vector<16x512xf32> -> vector<16x512xf32>
    %18 = arith.addf %16, %17 : vector<16x512xf32>
    %cst_21 = arith.constant dense<0.000000e+00> : vector<16x512xf32>
    %19 = tpu.matmul %13, %6, %cst_21 {dimension_numbers = #tpu.dot_dimension_numbers<[1], [0], [0], [1], [0, 0, 1, 1], [], []>} : vector<16x32xbf16>, vector<32x512xbf16>, vector<16x512xf32> -> vector<16x512xf32>
    %20 = arith.addf %18, %19 : vector<16x512xf32>
    %cst_22 = arith.constant dense<0.000000e+00> : vector<16x512xf32>
    %21 = tpu.matmul %11, %2, %cst_22 {dimension_numbers = #tpu.dot_dimension_numbers<[1], [0], [0], [1], [0, 0, 1, 1], [], []>} : vector<16x32xbf16>, vector<32x512xbf16>, vector<16x512xf32> -> vector<16x512xf32>
    %cst_23 = arith.constant dense<0.000000e+00> : vector<16x512xf32>
    %22 = tpu.matmul %13, %4, %cst_23 {dimension_numbers = #tpu.dot_dimension_numbers<[1], [0], [0], [1], [0, 0, 1, 1], [], []>} : vector<16x32xbf16>, vector<32x512xbf16>, vector<16x512xf32> -> vector<16x512xf32>
    %23 = arith.addf %21, %22 : vector<16x512xf32>
    %cst_24 = arith.constant dense<0.000000e+00> : vector<16x512xf32>
    %24 = tpu.matmul %15, %6, %cst_24 {dimension_numbers = #tpu.dot_dimension_numbers<[1], [0], [0], [1], [0, 0, 1, 1], [], []>} : vector<16x32xbf16>, vector<32x512xbf16>, vector<16x512xf32> -> vector<16x512xf32>
    %25 = arith.addf %23, %24 : vector<16x512xf32>
    %26 = arith.maximumf %20, %25 : vector<16x512xf32>
    %27 = vector.extract_strided_slice %26 {offsets = [0, 0], sizes = [16, 256], strides = [1, 1]} : vector<16x512xf32> to vector<16x256xf32>
    %28 = vector.extract_strided_slice %26 {offsets = [0, 256], sizes = [16, 256], strides = [1, 1]} : vector<16x512xf32> to vector<16x256xf32>
    %29 = arith.maximumf %27, %28 : vector<16x256xf32>
    %30 = vector.broadcast %0 : vector<1x256xf32> to vector<16x256xf32>
    %31 = arith.addf %29, %30 : vector<16x256xf32>
    %cst_25 = arith.constant 0.000000e+00 : f32
    %32 = vector.broadcast %cst_25 : f32 to vector<16x256xf32>
    %33 = arith.maximumf %31, %32 : vector<16x256xf32>
    %34 = arith.truncf %33 : vector<16x256xf32> to vector<16x256xbf16>
    %c0_26 = arith.constant 0 : index
    %c0_27 = arith.constant 0 : index
    %c0_28 = arith.constant 0 : index
    %35 = vector.load %arg4[%c0_26, %c0_27, %c0_28] : memref<13x256x64xbf16, #tpu.memory_space<vmem>>, vector<1x256x64xbf16>
    %36 = vector.shape_cast %35 : vector<1x256x64xbf16> to vector<256x64xbf16>
    %cst_29 = arith.constant dense<0.000000e+00> : vector<16x64xf32>
    %37 = tpu.matmul %34, %36, %cst_29 {dimension_numbers = #tpu.dot_dimension_numbers<[1], [0], [0], [1], [0, 0, 1, 1], [], []>} : vector<16x256xbf16>, vector<256x64xbf16>, vector<16x64xf32> -> vector<16x64xf32>
    %38 = arith.addf %7, %37 : vector<16x64xf32>
    %c2_30 = arith.constant 2 : index
    %c0_31 = arith.constant 0 : index
    %c0_32 = arith.constant 0 : index
    %39 = vector.load %arg1[%c2_30, %c0_31, %c0_32] : memref<28x16x32xbf16, #tpu.memory_space<vmem>>, vector<1x16x32xbf16>
    %40 = vector.shape_cast %39 : vector<1x16x32xbf16> to vector<16x32xbf16>
    %c3_33 = arith.constant 3 : index
    %c0_34 = arith.constant 0 : index
    %c0_35 = arith.constant 0 : index
    %41 = vector.load %arg1[%c3_33, %c0_34, %c0_35] : memref<28x16x32xbf16, #tpu.memory_space<vmem>>, vector<1x16x32xbf16>
    %42 = vector.shape_cast %41 : vector<1x16x32xbf16> to vector<16x32xbf16>
    %c4 = arith.constant 4 : index
    %c0_36 = arith.constant 0 : index
    %c0_37 = arith.constant 0 : index
    %43 = vector.load %arg1[%c4, %c0_36, %c0_37] : memref<28x16x32xbf16, #tpu.memory_space<vmem>>, vector<1x16x32xbf16>
    %44 = vector.shape_cast %43 : vector<1x16x32xbf16> to vector<16x32xbf16>
    %c5 = arith.constant 5 : index
    %c0_38 = arith.constant 0 : index
    %c0_39 = arith.constant 0 : index
    %45 = vector.load %arg1[%c5, %c0_38, %c0_39] : memref<28x16x32xbf16, #tpu.memory_space<vmem>>, vector<1x16x32xbf16>
    %46 = vector.shape_cast %45 : vector<1x16x32xbf16> to vector<16x32xbf16>
    %cst_40 = arith.constant dense<0.000000e+00> : vector<16x512xf32>
    %47 = tpu.matmul %40, %2, %cst_40 {dimension_numbers = #tpu.dot_dimension_numbers<[1], [0], [0], [1], [0, 0, 1, 1], [], []>} : vector<16x32xbf16>, vector<32x512xbf16>, vector<16x512xf32> -> vector<16x512xf32>
    %cst_41 = arith.constant dense<0.000000e+00> : vector<16x512xf32>
    %48 = tpu.matmul %42, %4, %cst_41 {dimension_numbers = #tpu.dot_dimension_numbers<[1], [0], [0], [1], [0, 0, 1, 1], [], []>} : vector<16x32xbf16>, vector<32x512xbf16>, vector<16x512xf32> -> vector<16x512xf32>
    %49 = arith.addf %47, %48 : vector<16x512xf32>
    %cst_42 = arith.constant dense<0.000000e+00> : vector<16x512xf32>
    %50 = tpu.matmul %44, %6, %cst_42 {dimension_numbers = #tpu.dot_dimension_numbers<[1], [0], [0], [1], [0, 0, 1, 1], [], []>} : vector<16x32xbf16>, vector<32x512xbf16>, vector<16x512xf32> -> vector<16x512xf32>
    %51 = arith.addf %49, %50 : vector<16x512xf32>
    %cst_43 = arith.constant dense<0.000000e+00> : vector<16x512xf32>
    %52 = tpu.matmul %42, %2, %cst_43 {dimension_numbers = #tpu.dot_dimension_numbers<[1], [0], [0], [1], [0, 0, 1, 1], [], []>} : vector<16x32xbf16>, vector<32x512xbf16>, vector<16x512xf32> -> vector<16x512xf32>
    %cst_44 = arith.constant dense<0.000000e+00> : vector<16x512xf32>
    %53 = tpu.matmul %44, %4, %cst_44 {dimension_numbers = #tpu.dot_dimension_numbers<[1], [0], [0], [1], [0, 0, 1, 1], [], []>} : vector<16x32xbf16>, vector<32x512xbf16>, vector<16x512xf32> -> vector<16x512xf32>
    %54 = arith.addf %52, %53 : vector<16x512xf32>
    %cst_45 = arith.constant dense<0.000000e+00> : vector<16x512xf32>
    %55 = tpu.matmul %46, %6, %cst_45 {dimension_numbers = #tpu.dot_dimension_numbers<[1], [0], [0], [1], [0, 0, 1, 1], [], []>} : vector<16x32xbf16>, vector<32x512xbf16>, vector<16x512xf32> -> vector<16x512xf32>
    %56 = arith.addf %54, %55 : vector<16x512xf32>
    %57 = arith.maximumf %51, %56 : vector<16x512xf32>
    %58 = vector.extract_strided_slice %57 {offsets = [0, 0], sizes = [16, 256], strides = [1, 1]} : vector<16x512xf32> to vector<16x256xf32>
    %59 = vector.extract_strided_slice %57 {offsets = [0, 256], sizes = [16, 256], strides = [1, 1]} : vector<16x512xf32> to vector<16x256xf32>
    %60 = arith.maximumf %58, %59 : vector<16x256xf32>
    %61 = vector.broadcast %0 : vector<1x256xf32> to vector<16x256xf32>
    %62 = arith.addf %60, %61 : vector<16x256xf32>
    %cst_46 = arith.constant 0.000000e+00 : f32
    %63 = vector.broadcast %cst_46 : f32 to vector<16x256xf32>
    %64 = arith.maximumf %62, %63 : vector<16x256xf32>
    %65 = arith.truncf %64 : vector<16x256xf32> to vector<16x256xbf16>
    %c1_47 = arith.constant 1 : index
    %c0_48 = arith.constant 0 : index
    %c0_49 = arith.constant 0 : index
    %66 = vector.load %arg4[%c1_47, %c0_48, %c0_49] : memref<13x256x64xbf16, #tpu.memory_space<vmem>>, vector<1x256x64xbf16>
    %67 = vector.shape_cast %66 : vector<1x256x64xbf16> to vector<256x64xbf16>
    %cst_50 = arith.constant dense<0.000000e+00> : vector<16x64xf32>
    %68 = tpu.matmul %65, %67, %cst_50 {dimension_numbers = #tpu.dot_dimension_numbers<[1], [0], [0], [1], [0, 0, 1, 1], [], []>} : vector<16x256xbf16>, vector<256x64xbf16>, vector<16x64xf32> -> vector<16x64xf32>
    %69 = arith.addf %38, %68 : vector<16x64xf32>
    %c4_51 = arith.constant 4 : index
    %c0_52 = arith.constant 0 : index
    %c0_53 = arith.constant 0 : index
    %70 = vector.load %arg1[%c4_51, %c0_52, %c0_53] : memref<28x16x32xbf16, #tpu.memory_space<vmem>>, vector<1x16x32xbf16>
    %71 = vector.shape_cast %70 : vector<1x16x32xbf16> to vector<16x32xbf16>
    %c5_54 = arith.constant 5 : index
    %c0_55 = arith.constant 0 : index
    %c0_56 = arith.constant 0 : index
    %72 = vector.load %arg1[%c5_54, %c0_55, %c0_56] : memref<28x16x32xbf16, #tpu.memory_space<vmem>>, vector<1x16x32xbf16>
    %73 = vector.shape_cast %72 : vector<1x16x32xbf16> to vector<16x32xbf16>
    %c6 = arith.constant 6 : index
    %c0_57 = arith.constant 0 : index
    %c0_58 = arith.constant 0 : index
    %74 = vector.load %arg1[%c6, %c0_57, %c0_58] : memref<28x16x32xbf16, #tpu.memory_space<vmem>>, vector<1x16x32xbf16>
    %75 = vector.shape_cast %74 : vector<1x16x32xbf16> to vector<16x32xbf16>
    %c7 = arith.constant 7 : index
    %c0_59 = arith.constant 0 : index
    %c0_60 = arith.constant 0 : index
    %76 = vector.load %arg1[%c7, %c0_59, %c0_60] : memref<28x16x32xbf16, #tpu.memory_space<vmem>>, vector<1x16x32xbf16>
    %77 = vector.shape_cast %76 : vector<1x16x32xbf16> to vector<16x32xbf16>
    %cst_61 = arith.constant dense<0.000000e+00> : vector<16x512xf32>
    %78 = tpu.matmul %71, %2, %cst_61 {dimension_numbers = #tpu.dot_dimension_numbers<[1], [0], [0], [1], [0, 0, 1, 1], [], []>} : vector<16x32xbf16>, vector<32x512xbf16>, vector<16x512xf32> -> vector<16x512xf32>
    %cst_62 = arith.constant dense<0.000000e+00> : vector<16x512xf32>
    %79 = tpu.matmul %73, %4, %cst_62 {dimension_numbers = #tpu.dot_dimension_numbers<[1], [0], [0], [1], [0, 0, 1, 1], [], []>} : vector<16x32xbf16>, vector<32x512xbf16>, vector<16x512xf32> -> vector<16x512xf32>
    %80 = arith.addf %78, %79 : vector<16x512xf32>
    %cst_63 = arith.constant dense<0.000000e+00> : vector<16x512xf32>
    %81 = tpu.matmul %75, %6, %cst_63 {dimension_numbers = #tpu.dot_dimension_numbers<[1], [0], [0], [1], [0, 0, 1, 1], [], []>} : vector<16x32xbf16>, vector<32x512xbf16>, vector<16x512xf32> -> vector<16x512xf32>
    %82 = arith.addf %80, %81 : vector<16x512xf32>
    %cst_64 = arith.constant dense<0.000000e+00> : vector<16x512xf32>
    %83 = tpu.matmul %73, %2, %cst_64 {dimension_numbers = #tpu.dot_dimension_numbers<[1], [0], [0], [1], [0, 0, 1, 1], [], []>} : vector<16x32xbf16>, vector<32x512xbf16>, vector<16x512xf32> -> vector<16x512xf32>
    %cst_65 = arith.constant dense<0.000000e+00> : vector<16x512xf32>
    %84 = tpu.matmul %75, %4, %cst_65 {dimension_numbers = #tpu.dot_dimension_numbers<[1], [0], [0], [1], [0, 0, 1, 1], [], []>} : vector<16x32xbf16>, vector<32x512xbf16>, vector<16x512xf32> -> vector<16x512xf32>
    %85 = arith.addf %83, %84 : vector<16x512xf32>
    %cst_66 = arith.constant dense<0.000000e+00> : vector<16x512xf32>
    %86 = tpu.matmul %77, %6, %cst_66 {dimension_numbers = #tpu.dot_dimension_numbers<[1], [0], [0], [1], [0, 0, 1, 1], [], []>} : vector<16x32xbf16>, vector<32x512xbf16>, vector<16x512xf32> -> vector<16x512xf32>
    %87 = arith.addf %85, %86 : vector<16x512xf32>
    %88 = arith.maximumf %82, %87 : vector<16x512xf32>
    %89 = vector.extract_strided_slice %88 {offsets = [0, 0], sizes = [16, 256], strides = [1, 1]} : vector<16x512xf32> to vector<16x256xf32>
    %90 = vector.extract_strided_slice %88 {offsets = [0, 256], sizes = [16, 256], strides = [1, 1]} : vector<16x512xf32> to vector<16x256xf32>
    %91 = arith.maximumf %89, %90 : vector<16x256xf32>
    %92 = vector.broadcast %0 : vector<1x256xf32> to vector<16x256xf32>
    %93 = arith.addf %91, %92 : vector<16x256xf32>
    %cst_67 = arith.constant 0.000000e+00 : f32
    %94 = vector.broadcast %cst_67 : f32 to vector<16x256xf32>
    %95 = arith.maximumf %93, %94 : vector<16x256xf32>
    %96 = arith.truncf %95 : vector<16x256xf32> to vector<16x256xbf16>
    %c2_68 = arith.constant 2 : index
    %c0_69 = arith.constant 0 : index
    %c0_70 = arith.constant 0 : index
    %97 = vector.load %arg4[%c2_68, %c0_69, %c0_70] : memref<13x256x64xbf16, #tpu.memory_space<vmem>>, vector<1x256x64xbf16>
    %98 = vector.shape_cast %97 : vector<1x256x64xbf16> to vector<256x64xbf16>
    %cst_71 = arith.constant dense<0.000000e+00> : vector<16x64xf32>
    %99 = tpu.matmul %96, %98, %cst_71 {dimension_numbers = #tpu.dot_dimension_numbers<[1], [0], [0], [1], [0, 0, 1, 1], [], []>} : vector<16x256xbf16>, vector<256x64xbf16>, vector<16x64xf32> -> vector<16x64xf32>
    %100 = arith.addf %69, %99 : vector<16x64xf32>
    %c6_72 = arith.constant 6 : index
    %c0_73 = arith.constant 0 : index
    %c0_74 = arith.constant 0 : index
    %101 = vector.load %arg1[%c6_72, %c0_73, %c0_74] : memref<28x16x32xbf16, #tpu.memory_space<vmem>>, vector<1x16x32xbf16>
    %102 = vector.shape_cast %101 : vector<1x16x32xbf16> to vector<16x32xbf16>
    %c7_75 = arith.constant 7 : index
    %c0_76 = arith.constant 0 : index
    %c0_77 = arith.constant 0 : index
    %103 = vector.load %arg1[%c7_75, %c0_76, %c0_77] : memref<28x16x32xbf16, #tpu.memory_space<vmem>>, vector<1x16x32xbf16>
    %104 = vector.shape_cast %103 : vector<1x16x32xbf16> to vector<16x32xbf16>
    %c8 = arith.constant 8 : index
    %c0_78 = arith.constant 0 : index
    %c0_79 = arith.constant 0 : index
    %105 = vector.load %arg1[%c8, %c0_78, %c0_79] : memref<28x16x32xbf16, #tpu.memory_space<vmem>>, vector<1x16x32xbf16>
    %106 = vector.shape_cast %105 : vector<1x16x32xbf16> to vector<16x32xbf16>
    %c9 = arith.constant 9 : index
    %c0_80 = arith.constant 0 : index
    %c0_81 = arith.constant 0 : index
    %107 = vector.load %arg1[%c9, %c0_80, %c0_81] : memref<28x16x32xbf16, #tpu.memory_space<vmem>>, vector<1x16x32xbf16>
    %108 = vector.shape_cast %107 : vector<1x16x32xbf16> to vector<16x32xbf16>
    %cst_82 = arith.constant dense<0.000000e+00> : vector<16x512xf32>
    %109 = tpu.matmul %102, %2, %cst_82 {dimension_numbers = #tpu.dot_dimension_numbers<[1], [0], [0], [1], [0, 0, 1, 1], [], []>} : vector<16x32xbf16>, vector<32x512xbf16>, vector<16x512xf32> -> vector<16x512xf32>
    %cst_83 = arith.constant dense<0.000000e+00> : vector<16x512xf32>
    %110 = tpu.matmul %104, %4, %cst_83 {dimension_numbers = #tpu.dot_dimension_numbers<[1], [0], [0], [1], [0, 0, 1, 1], [], []>} : vector<16x32xbf16>, vector<32x512xbf16>, vector<16x512xf32> -> vector<16x512xf32>
    %111 = arith.addf %109, %110 : vector<16x512xf32>
    %cst_84 = arith.constant dense<0.000000e+00> : vector<16x512xf32>
    %112 = tpu.matmul %106, %6, %cst_84 {dimension_numbers = #tpu.dot_dimension_numbers<[1], [0], [0], [1], [0, 0, 1, 1], [], []>} : vector<16x32xbf16>, vector<32x512xbf16>, vector<16x512xf32> -> vector<16x512xf32>
    %113 = arith.addf %111, %112 : vector<16x512xf32>
    %cst_85 = arith.constant dense<0.000000e+00> : vector<16x512xf32>
    %114 = tpu.matmul %104, %2, %cst_85 {dimension_numbers = #tpu.dot_dimension_numbers<[1], [0], [0], [1], [0, 0, 1, 1], [], []>} : vector<16x32xbf16>, vector<32x512xbf16>, vector<16x512xf32> -> vector<16x512xf32>
    %cst_86 = arith.constant dense<0.000000e+00> : vector<16x512xf32>
    %115 = tpu.matmul %106, %4, %cst_86 {dimension_numbers = #tpu.dot_dimension_numbers<[1], [0], [0], [1], [0, 0, 1, 1], [], []>} : vector<16x32xbf16>, vector<32x512xbf16>, vector<16x512xf32> -> vector<16x512xf32>
    %116 = arith.addf %114, %115 : vector<16x512xf32>
    %cst_87 = arith.constant dense<0.000000e+00> : vector<16x512xf32>
    %117 = tpu.matmul %108, %6, %cst_87 {dimension_numbers = #tpu.dot_dimension_numbers<[1], [0], [0], [1], [0, 0, 1, 1], [], []>} : vector<16x32xbf16>, vector<32x512xbf16>, vector<16x512xf32> -> vector<16x512xf32>
    %118 = arith.addf %116, %117 : vector<16x512xf32>
    %119 = arith.maximumf %113, %118 : vector<16x512xf32>
    %120 = vector.extract_strided_slice %119 {offsets = [0, 0], sizes = [16, 256], strides = [1, 1]} : vector<16x512xf32> to vector<16x256xf32>
    %121 = vector.extract_strided_slice %119 {offsets = [0, 256], sizes = [16, 256], strides = [1, 1]} : vector<16x512xf32> to vector<16x256xf32>
    %122 = arith.maximumf %120, %121 : vector<16x256xf32>
    %123 = vector.broadcast %0 : vector<1x256xf32> to vector<16x256xf32>
    %124 = arith.addf %122, %123 : vector<16x256xf32>
    %cst_88 = arith.constant 0.000000e+00 : f32
    %125 = vector.broadcast %cst_88 : f32 to vector<16x256xf32>
    %126 = arith.maximumf %124, %125 : vector<16x256xf32>
    %127 = arith.truncf %126 : vector<16x256xf32> to vector<16x256xbf16>
    %c3_89 = arith.constant 3 : index
    %c0_90 = arith.constant 0 : index
    %c0_91 = arith.constant 0 : index
    %128 = vector.load %arg4[%c3_89, %c0_90, %c0_91] : memref<13x256x64xbf16, #tpu.memory_space<vmem>>, vector<1x256x64xbf16>
    %129 = vector.shape_cast %128 : vector<1x256x64xbf16> to vector<256x64xbf16>
    %cst_92 = arith.constant dense<0.000000e+00> : vector<16x64xf32>
    %130 = tpu.matmul %127, %129, %cst_92 {dimension_numbers = #tpu.dot_dimension_numbers<[1], [0], [0], [1], [0, 0, 1, 1], [], []>} : vector<16x256xbf16>, vector<256x64xbf16>, vector<16x64xf32> -> vector<16x64xf32>
    %131 = arith.addf %100, %130 : vector<16x64xf32>
    %c8_93 = arith.constant 8 : index
    %c0_94 = arith.constant 0 : index
    %c0_95 = arith.constant 0 : index
    %132 = vector.load %arg1[%c8_93, %c0_94, %c0_95] : memref<28x16x32xbf16, #tpu.memory_space<vmem>>, vector<1x16x32xbf16>
    %133 = vector.shape_cast %132 : vector<1x16x32xbf16> to vector<16x32xbf16>
    %c9_96 = arith.constant 9 : index
    %c0_97 = arith.constant 0 : index
    %c0_98 = arith.constant 0 : index
    %134 = vector.load %arg1[%c9_96, %c0_97, %c0_98] : memref<28x16x32xbf16, #tpu.memory_space<vmem>>, vector<1x16x32xbf16>
    %135 = vector.shape_cast %134 : vector<1x16x32xbf16> to vector<16x32xbf16>
    %c10 = arith.constant 10 : index
    %c0_99 = arith.constant 0 : index
    %c0_100 = arith.constant 0 : index
    %136 = vector.load %arg1[%c10, %c0_99, %c0_100] : memref<28x16x32xbf16, #tpu.memory_space<vmem>>, vector<1x16x32xbf16>
    %137 = vector.shape_cast %136 : vector<1x16x32xbf16> to vector<16x32xbf16>
    %c11 = arith.constant 11 : index
    %c0_101 = arith.constant 0 : index
    %c0_102 = arith.constant 0 : index
    %138 = vector.load %arg1[%c11, %c0_101, %c0_102] : memref<28x16x32xbf16, #tpu.memory_space<vmem>>, vector<1x16x32xbf16>
    %139 = vector.shape_cast %138 : vector<1x16x32xbf16> to vector<16x32xbf16>
    %cst_103 = arith.constant dense<0.000000e+00> : vector<16x512xf32>
    %140 = tpu.matmul %133, %2, %cst_103 {dimension_numbers = #tpu.dot_dimension_numbers<[1], [0], [0], [1], [0, 0, 1, 1], [], []>} : vector<16x32xbf16>, vector<32x512xbf16>, vector<16x512xf32> -> vector<16x512xf32>
    %cst_104 = arith.constant dense<0.000000e+00> : vector<16x512xf32>
    %141 = tpu.matmul %135, %4, %cst_104 {dimension_numbers = #tpu.dot_dimension_numbers<[1], [0], [0], [1], [0, 0, 1, 1], [], []>} : vector<16x32xbf16>, vector<32x512xbf16>, vector<16x512xf32> -> vector<16x512xf32>
    %142 = arith.addf %140, %141 : vector<16x512xf32>
    %cst_105 = arith.constant dense<0.000000e+00> : vector<16x512xf32>
    %143 = tpu.matmul %137, %6, %cst_105 {dimension_numbers = #tpu.dot_dimension_numbers<[1], [0], [0], [1], [0, 0, 1, 1], [], []>} : vector<16x32xbf16>, vector<32x512xbf16>, vector<16x512xf32> -> vector<16x512xf32>
    %144 = arith.addf %142, %143 : vector<16x512xf32>
    %cst_106 = arith.constant dense<0.000000e+00> : vector<16x512xf32>
    %145 = tpu.matmul %135, %2, %cst_106 {dimension_numbers = #tpu.dot_dimension_numbers<[1], [0], [0], [1], [0, 0, 1, 1], [], []>} : vector<16x32xbf16>, vector<32x512xbf16>, vector<16x512xf32> -> vector<16x512xf32>
    %cst_107 = arith.constant dense<0.000000e+00> : vector<16x512xf32>
    %146 = tpu.matmul %137, %4, %cst_107 {dimension_numbers = #tpu.dot_dimension_numbers<[1], [0], [0], [1], [0, 0, 1, 1], [], []>} : vector<16x32xbf16>, vector<32x512xbf16>, vector<16x512xf32> -> vector<16x512xf32>
    %147 = arith.addf %145, %146 : vector<16x512xf32>
    %cst_108 = arith.constant dense<0.000000e+00> : vector<16x512xf32>
    %148 = tpu.matmul %139, %6, %cst_108 {dimension_numbers = #tpu.dot_dimension_numbers<[1], [0], [0], [1], [0, 0, 1, 1], [], []>} : vector<16x32xbf16>, vector<32x512xbf16>, vector<16x512xf32> -> vector<16x512xf32>
    %149 = arith.addf %147, %148 : vector<16x512xf32>
    %150 = arith.maximumf %144, %149 : vector<16x512xf32>
    %151 = vector.extract_strided_slice %150 {offsets = [0, 0], sizes = [16, 256], strides = [1, 1]} : vector<16x512xf32> to vector<16x256xf32>
    %152 = vector.extract_strided_slice %150 {offsets = [0, 256], sizes = [16, 256], strides = [1, 1]} : vector<16x512xf32> to vector<16x256xf32>
    %153 = arith.maximumf %151, %152 : vector<16x256xf32>
    %154 = vector.broadcast %0 : vector<1x256xf32> to vector<16x256xf32>
    %155 = arith.addf %153, %154 : vector<16x256xf32>
    %cst_109 = arith.constant 0.000000e+00 : f32
    %156 = vector.broadcast %cst_109 : f32 to vector<16x256xf32>
    %157 = arith.maximumf %155, %156 : vector<16x256xf32>
    %158 = arith.truncf %157 : vector<16x256xf32> to vector<16x256xbf16>
    %c4_110 = arith.constant 4 : index
    %c0_111 = arith.constant 0 : index
    %c0_112 = arith.constant 0 : index
    %159 = vector.load %arg4[%c4_110, %c0_111, %c0_112] : memref<13x256x64xbf16, #tpu.memory_space<vmem>>, vector<1x256x64xbf16>
    %160 = vector.shape_cast %159 : vector<1x256x64xbf16> to vector<256x64xbf16>
    %cst_113 = arith.constant dense<0.000000e+00> : vector<16x64xf32>
    %161 = tpu.matmul %158, %160, %cst_113 {dimension_numbers = #tpu.dot_dimension_numbers<[1], [0], [0], [1], [0, 0, 1, 1], [], []>} : vector<16x256xbf16>, vector<256x64xbf16>, vector<16x64xf32> -> vector<16x64xf32>
    %162 = arith.addf %131, %161 : vector<16x64xf32>
    %c10_114 = arith.constant 10 : index
    %c0_115 = arith.constant 0 : index
    %c0_116 = arith.constant 0 : index
    %163 = vector.load %arg1[%c10_114, %c0_115, %c0_116] : memref<28x16x32xbf16, #tpu.memory_space<vmem>>, vector<1x16x32xbf16>
    %164 = vector.shape_cast %163 : vector<1x16x32xbf16> to vector<16x32xbf16>
    %c11_117 = arith.constant 11 : index
    %c0_118 = arith.constant 0 : index
    %c0_119 = arith.constant 0 : index
    %165 = vector.load %arg1[%c11_117, %c0_118, %c0_119] : memref<28x16x32xbf16, #tpu.memory_space<vmem>>, vector<1x16x32xbf16>
    %166 = vector.shape_cast %165 : vector<1x16x32xbf16> to vector<16x32xbf16>
    %c12 = arith.constant 12 : index
    %c0_120 = arith.constant 0 : index
    %c0_121 = arith.constant 0 : index
    %167 = vector.load %arg1[%c12, %c0_120, %c0_121] : memref<28x16x32xbf16, #tpu.memory_space<vmem>>, vector<1x16x32xbf16>
    %168 = vector.shape_cast %167 : vector<1x16x32xbf16> to vector<16x32xbf16>
    %c13 = arith.constant 13 : index
    %c0_122 = arith.constant 0 : index
    %c0_123 = arith.constant 0 : index
    %169 = vector.load %arg1[%c13, %c0_122, %c0_123] : memref<28x16x32xbf16, #tpu.memory_space<vmem>>, vector<1x16x32xbf16>
    %170 = vector.shape_cast %169 : vector<1x16x32xbf16> to vector<16x32xbf16>
    %cst_124 = arith.constant dense<0.000000e+00> : vector<16x512xf32>
    %171 = tpu.matmul %164, %2, %cst_124 {dimension_numbers = #tpu.dot_dimension_numbers<[1], [0], [0], [1], [0, 0, 1, 1], [], []>} : vector<16x32xbf16>, vector<32x512xbf16>, vector<16x512xf32> -> vector<16x512xf32>
    %cst_125 = arith.constant dense<0.000000e+00> : vector<16x512xf32>
    %172 = tpu.matmul %166, %4, %cst_125 {dimension_numbers = #tpu.dot_dimension_numbers<[1], [0], [0], [1], [0, 0, 1, 1], [], []>} : vector<16x32xbf16>, vector<32x512xbf16>, vector<16x512xf32> -> vector<16x512xf32>
    %173 = arith.addf %171, %172 : vector<16x512xf32>
    %cst_126 = arith.constant dense<0.000000e+00> : vector<16x512xf32>
    %174 = tpu.matmul %168, %6, %cst_126 {dimension_numbers = #tpu.dot_dimension_numbers<[1], [0], [0], [1], [0, 0, 1, 1], [], []>} : vector<16x32xbf16>, vector<32x512xbf16>, vector<16x512xf32> -> vector<16x512xf32>
    %175 = arith.addf %173, %174 : vector<16x512xf32>
    %cst_127 = arith.constant dense<0.000000e+00> : vector<16x512xf32>
    %176 = tpu.matmul %166, %2, %cst_127 {dimension_numbers = #tpu.dot_dimension_numbers<[1], [0], [0], [1], [0, 0, 1, 1], [], []>} : vector<16x32xbf16>, vector<32x512xbf16>, vector<16x512xf32> -> vector<16x512xf32>
    %cst_128 = arith.constant dense<0.000000e+00> : vector<16x512xf32>
    %177 = tpu.matmul %168, %4, %cst_128 {dimension_numbers = #tpu.dot_dimension_numbers<[1], [0], [0], [1], [0, 0, 1, 1], [], []>} : vector<16x32xbf16>, vector<32x512xbf16>, vector<16x512xf32> -> vector<16x512xf32>
    %178 = arith.addf %176, %177 : vector<16x512xf32>
    %cst_129 = arith.constant dense<0.000000e+00> : vector<16x512xf32>
    %179 = tpu.matmul %170, %6, %cst_129 {dimension_numbers = #tpu.dot_dimension_numbers<[1], [0], [0], [1], [0, 0, 1, 1], [], []>} : vector<16x32xbf16>, vector<32x512xbf16>, vector<16x512xf32> -> vector<16x512xf32>
    %180 = arith.addf %178, %179 : vector<16x512xf32>
    %181 = arith.maximumf %175, %180 : vector<16x512xf32>
    %182 = vector.extract_strided_slice %181 {offsets = [0, 0], sizes = [16, 256], strides = [1, 1]} : vector<16x512xf32> to vector<16x256xf32>
    %183 = vector.extract_strided_slice %181 {offsets = [0, 256], sizes = [16, 256], strides = [1, 1]} : vector<16x512xf32> to vector<16x256xf32>
    %184 = arith.maximumf %182, %183 : vector<16x256xf32>
    %185 = vector.broadcast %0 : vector<1x256xf32> to vector<16x256xf32>
    %186 = arith.addf %184, %185 : vector<16x256xf32>
    %cst_130 = arith.constant 0.000000e+00 : f32
    %187 = vector.broadcast %cst_130 : f32 to vector<16x256xf32>
    %188 = arith.maximumf %186, %187 : vector<16x256xf32>
    %189 = arith.truncf %188 : vector<16x256xf32> to vector<16x256xbf16>
    %c5_131 = arith.constant 5 : index
    %c0_132 = arith.constant 0 : index
    %c0_133 = arith.constant 0 : index
    %190 = vector.load %arg4[%c5_131, %c0_132, %c0_133] : memref<13x256x64xbf16, #tpu.memory_space<vmem>>, vector<1x256x64xbf16>
    %191 = vector.shape_cast %190 : vector<1x256x64xbf16> to vector<256x64xbf16>
    %cst_134 = arith.constant dense<0.000000e+00> : vector<16x64xf32>
    %192 = tpu.matmul %189, %191, %cst_134 {dimension_numbers = #tpu.dot_dimension_numbers<[1], [0], [0], [1], [0, 0, 1, 1], [], []>} : vector<16x256xbf16>, vector<256x64xbf16>, vector<16x64xf32> -> vector<16x64xf32>
    %193 = arith.addf %162, %192 : vector<16x64xf32>
    %c12_135 = arith.constant 12 : index
    %c0_136 = arith.constant 0 : index
    %c0_137 = arith.constant 0 : index
    %194 = vector.load %arg1[%c12_135, %c0_136, %c0_137] : memref<28x16x32xbf16, #tpu.memory_space<vmem>>, vector<1x16x32xbf16>
    %195 = vector.shape_cast %194 : vector<1x16x32xbf16> to vector<16x32xbf16>
    %c13_138 = arith.constant 13 : index
    %c0_139 = arith.constant 0 : index
    %c0_140 = arith.constant 0 : index
    %196 = vector.load %arg1[%c13_138, %c0_139, %c0_140] : memref<28x16x32xbf16, #tpu.memory_space<vmem>>, vector<1x16x32xbf16>
    %197 = vector.shape_cast %196 : vector<1x16x32xbf16> to vector<16x32xbf16>
    %c14 = arith.constant 14 : index
    %c0_141 = arith.constant 0 : index
    %c0_142 = arith.constant 0 : index
    %198 = vector.load %arg1[%c14, %c0_141, %c0_142] : memref<28x16x32xbf16, #tpu.memory_space<vmem>>, vector<1x16x32xbf16>
    %199 = vector.shape_cast %198 : vector<1x16x32xbf16> to vector<16x32xbf16>
    %c15 = arith.constant 15 : index
    %c0_143 = arith.constant 0 : index
    %c0_144 = arith.constant 0 : index
    %200 = vector.load %arg1[%c15, %c0_143, %c0_144] : memref<28x16x32xbf16, #tpu.memory_space<vmem>>, vector<1x16x32xbf16>
    %201 = vector.shape_cast %200 : vector<1x16x32xbf16> to vector<16x32xbf16>
    %cst_145 = arith.constant dense<0.000000e+00> : vector<16x512xf32>
    %202 = tpu.matmul %195, %2, %cst_145 {dimension_numbers = #tpu.dot_dimension_numbers<[1], [0], [0], [1], [0, 0, 1, 1], [], []>} : vector<16x32xbf16>, vector<32x512xbf16>, vector<16x512xf32> -> vector<16x512xf32>
    %cst_146 = arith.constant dense<0.000000e+00> : vector<16x512xf32>
    %203 = tpu.matmul %197, %4, %cst_146 {dimension_numbers = #tpu.dot_dimension_numbers<[1], [0], [0], [1], [0, 0, 1, 1], [], []>} : vector<16x32xbf16>, vector<32x512xbf16>, vector<16x512xf32> -> vector<16x512xf32>
    %204 = arith.addf %202, %203 : vector<16x512xf32>
    %cst_147 = arith.constant dense<0.000000e+00> : vector<16x512xf32>
    %205 = tpu.matmul %199, %6, %cst_147 {dimension_numbers = #tpu.dot_dimension_numbers<[1], [0], [0], [1], [0, 0, 1, 1], [], []>} : vector<16x32xbf16>, vector<32x512xbf16>, vector<16x512xf32> -> vector<16x512xf32>
    %206 = arith.addf %204, %205 : vector<16x512xf32>
    %cst_148 = arith.constant dense<0.000000e+00> : vector<16x512xf32>
    %207 = tpu.matmul %197, %2, %cst_148 {dimension_numbers = #tpu.dot_dimension_numbers<[1], [0], [0], [1], [0, 0, 1, 1], [], []>} : vector<16x32xbf16>, vector<32x512xbf16>, vector<16x512xf32> -> vector<16x512xf32>
    %cst_149 = arith.constant dense<0.000000e+00> : vector<16x512xf32>
    %208 = tpu.matmul %199, %4, %cst_149 {dimension_numbers = #tpu.dot_dimension_numbers<[1], [0], [0], [1], [0, 0, 1, 1], [], []>} : vector<16x32xbf16>, vector<32x512xbf16>, vector<16x512xf32> -> vector<16x512xf32>
    %209 = arith.addf %207, %208 : vector<16x512xf32>
    %cst_150 = arith.constant dense<0.000000e+00> : vector<16x512xf32>
    %210 = tpu.matmul %201, %6, %cst_150 {dimension_numbers = #tpu.dot_dimension_numbers<[1], [0], [0], [1], [0, 0, 1, 1], [], []>} : vector<16x32xbf16>, vector<32x512xbf16>, vector<16x512xf32> -> vector<16x512xf32>
    %211 = arith.addf %209, %210 : vector<16x512xf32>
    %212 = arith.maximumf %206, %211 : vector<16x512xf32>
    %213 = vector.extract_strided_slice %212 {offsets = [0, 0], sizes = [16, 256], strides = [1, 1]} : vector<16x512xf32> to vector<16x256xf32>
    %214 = vector.extract_strided_slice %212 {offsets = [0, 256], sizes = [16, 256], strides = [1, 1]} : vector<16x512xf32> to vector<16x256xf32>
    %215 = arith.maximumf %213, %214 : vector<16x256xf32>
    %216 = vector.broadcast %0 : vector<1x256xf32> to vector<16x256xf32>
    %217 = arith.addf %215, %216 : vector<16x256xf32>
    %cst_151 = arith.constant 0.000000e+00 : f32
    %218 = vector.broadcast %cst_151 : f32 to vector<16x256xf32>
    %219 = arith.maximumf %217, %218 : vector<16x256xf32>
    %220 = arith.truncf %219 : vector<16x256xf32> to vector<16x256xbf16>
    %c6_152 = arith.constant 6 : index
    %c0_153 = arith.constant 0 : index
    %c0_154 = arith.constant 0 : index
    %221 = vector.load %arg4[%c6_152, %c0_153, %c0_154] : memref<13x256x64xbf16, #tpu.memory_space<vmem>>, vector<1x256x64xbf16>
    %222 = vector.shape_cast %221 : vector<1x256x64xbf16> to vector<256x64xbf16>
    %cst_155 = arith.constant dense<0.000000e+00> : vector<16x64xf32>
    %223 = tpu.matmul %220, %222, %cst_155 {dimension_numbers = #tpu.dot_dimension_numbers<[1], [0], [0], [1], [0, 0, 1, 1], [], []>} : vector<16x256xbf16>, vector<256x64xbf16>, vector<16x64xf32> -> vector<16x64xf32>
    %224 = arith.addf %193, %223 : vector<16x64xf32>
    %c14_156 = arith.constant 14 : index
    %c0_157 = arith.constant 0 : index
    %c0_158 = arith.constant 0 : index
    %225 = vector.load %arg1[%c14_156, %c0_157, %c0_158] : memref<28x16x32xbf16, #tpu.memory_space<vmem>>, vector<1x16x32xbf16>
    %226 = vector.shape_cast %225 : vector<1x16x32xbf16> to vector<16x32xbf16>
    %c15_159 = arith.constant 15 : index
    %c0_160 = arith.constant 0 : index
    %c0_161 = arith.constant 0 : index
    %227 = vector.load %arg1[%c15_159, %c0_160, %c0_161] : memref<28x16x32xbf16, #tpu.memory_space<vmem>>, vector<1x16x32xbf16>
    %228 = vector.shape_cast %227 : vector<1x16x32xbf16> to vector<16x32xbf16>
    %c16 = arith.constant 16 : index
    %c0_162 = arith.constant 0 : index
    %c0_163 = arith.constant 0 : index
    %229 = vector.load %arg1[%c16, %c0_162, %c0_163] : memref<28x16x32xbf16, #tpu.memory_space<vmem>>, vector<1x16x32xbf16>
    %230 = vector.shape_cast %229 : vector<1x16x32xbf16> to vector<16x32xbf16>
    %c17 = arith.constant 17 : index
    %c0_164 = arith.constant 0 : index
    %c0_165 = arith.constant 0 : index
    %231 = vector.load %arg1[%c17, %c0_164, %c0_165] : memref<28x16x32xbf16, #tpu.memory_space<vmem>>, vector<1x16x32xbf16>
    %232 = vector.shape_cast %231 : vector<1x16x32xbf16> to vector<16x32xbf16>
    %cst_166 = arith.constant dense<0.000000e+00> : vector<16x512xf32>
    %233 = tpu.matmul %226, %2, %cst_166 {dimension_numbers = #tpu.dot_dimension_numbers<[1], [0], [0], [1], [0, 0, 1, 1], [], []>} : vector<16x32xbf16>, vector<32x512xbf16>, vector<16x512xf32> -> vector<16x512xf32>
    %cst_167 = arith.constant dense<0.000000e+00> : vector<16x512xf32>
    %234 = tpu.matmul %228, %4, %cst_167 {dimension_numbers = #tpu.dot_dimension_numbers<[1], [0], [0], [1], [0, 0, 1, 1], [], []>} : vector<16x32xbf16>, vector<32x512xbf16>, vector<16x512xf32> -> vector<16x512xf32>
    %235 = arith.addf %233, %234 : vector<16x512xf32>
    %cst_168 = arith.constant dense<0.000000e+00> : vector<16x512xf32>
    %236 = tpu.matmul %230, %6, %cst_168 {dimension_numbers = #tpu.dot_dimension_numbers<[1], [0], [0], [1], [0, 0, 1, 1], [], []>} : vector<16x32xbf16>, vector<32x512xbf16>, vector<16x512xf32> -> vector<16x512xf32>
    %237 = arith.addf %235, %236 : vector<16x512xf32>
    %cst_169 = arith.constant dense<0.000000e+00> : vector<16x512xf32>
    %238 = tpu.matmul %228, %2, %cst_169 {dimension_numbers = #tpu.dot_dimension_numbers<[1], [0], [0], [1], [0, 0, 1, 1], [], []>} : vector<16x32xbf16>, vector<32x512xbf16>, vector<16x512xf32> -> vector<16x512xf32>
    %cst_170 = arith.constant dense<0.000000e+00> : vector<16x512xf32>
    %239 = tpu.matmul %230, %4, %cst_170 {dimension_numbers = #tpu.dot_dimension_numbers<[1], [0], [0], [1], [0, 0, 1, 1], [], []>} : vector<16x32xbf16>, vector<32x512xbf16>, vector<16x512xf32> -> vector<16x512xf32>
    %240 = arith.addf %238, %239 : vector<16x512xf32>
    %cst_171 = arith.constant dense<0.000000e+00> : vector<16x512xf32>
    %241 = tpu.matmul %232, %6, %cst_171 {dimension_numbers = #tpu.dot_dimension_numbers<[1], [0], [0], [1], [0, 0, 1, 1], [], []>} : vector<16x32xbf16>, vector<32x512xbf16>, vector<16x512xf32> -> vector<16x512xf32>
    %242 = arith.addf %240, %241 : vector<16x512xf32>
    %243 = arith.maximumf %237, %242 : vector<16x512xf32>
    %244 = vector.extract_strided_slice %243 {offsets = [0, 0], sizes = [16, 256], strides = [1, 1]} : vector<16x512xf32> to vector<16x256xf32>
    %245 = vector.extract_strided_slice %243 {offsets = [0, 256], sizes = [16, 256], strides = [1, 1]} : vector<16x512xf32> to vector<16x256xf32>
    %246 = arith.maximumf %244, %245 : vector<16x256xf32>
    %247 = vector.broadcast %0 : vector<1x256xf32> to vector<16x256xf32>
    %248 = arith.addf %246, %247 : vector<16x256xf32>
    %cst_172 = arith.constant 0.000000e+00 : f32
    %249 = vector.broadcast %cst_172 : f32 to vector<16x256xf32>
    %250 = arith.maximumf %248, %249 : vector<16x256xf32>
    %251 = arith.truncf %250 : vector<16x256xf32> to vector<16x256xbf16>
    %c7_173 = arith.constant 7 : index
    %c0_174 = arith.constant 0 : index
    %c0_175 = arith.constant 0 : index
    %252 = vector.load %arg4[%c7_173, %c0_174, %c0_175] : memref<13x256x64xbf16, #tpu.memory_space<vmem>>, vector<1x256x64xbf16>
    %253 = vector.shape_cast %252 : vector<1x256x64xbf16> to vector<256x64xbf16>
    %cst_176 = arith.constant dense<0.000000e+00> : vector<16x64xf32>
    %254 = tpu.matmul %251, %253, %cst_176 {dimension_numbers = #tpu.dot_dimension_numbers<[1], [0], [0], [1], [0, 0, 1, 1], [], []>} : vector<16x256xbf16>, vector<256x64xbf16>, vector<16x64xf32> -> vector<16x64xf32>
    %255 = arith.addf %224, %254 : vector<16x64xf32>
    %c16_177 = arith.constant 16 : index
    %c0_178 = arith.constant 0 : index
    %c0_179 = arith.constant 0 : index
    %256 = vector.load %arg1[%c16_177, %c0_178, %c0_179] : memref<28x16x32xbf16, #tpu.memory_space<vmem>>, vector<1x16x32xbf16>
    %257 = vector.shape_cast %256 : vector<1x16x32xbf16> to vector<16x32xbf16>
    %c17_180 = arith.constant 17 : index
    %c0_181 = arith.constant 0 : index
    %c0_182 = arith.constant 0 : index
    %258 = vector.load %arg1[%c17_180, %c0_181, %c0_182] : memref<28x16x32xbf16, #tpu.memory_space<vmem>>, vector<1x16x32xbf16>
    %259 = vector.shape_cast %258 : vector<1x16x32xbf16> to vector<16x32xbf16>
    %c18 = arith.constant 18 : index
    %c0_183 = arith.constant 0 : index
    %c0_184 = arith.constant 0 : index
    %260 = vector.load %arg1[%c18, %c0_183, %c0_184] : memref<28x16x32xbf16, #tpu.memory_space<vmem>>, vector<1x16x32xbf16>
    %261 = vector.shape_cast %260 : vector<1x16x32xbf16> to vector<16x32xbf16>
    %c19 = arith.constant 19 : index
    %c0_185 = arith.constant 0 : index
    %c0_186 = arith.constant 0 : index
    %262 = vector.load %arg1[%c19, %c0_185, %c0_186] : memref<28x16x32xbf16, #tpu.memory_space<vmem>>, vector<1x16x32xbf16>
    %263 = vector.shape_cast %262 : vector<1x16x32xbf16> to vector<16x32xbf16>
    %cst_187 = arith.constant dense<0.000000e+00> : vector<16x512xf32>
    %264 = tpu.matmul %257, %2, %cst_187 {dimension_numbers = #tpu.dot_dimension_numbers<[1], [0], [0], [1], [0, 0, 1, 1], [], []>} : vector<16x32xbf16>, vector<32x512xbf16>, vector<16x512xf32> -> vector<16x512xf32>
    %cst_188 = arith.constant dense<0.000000e+00> : vector<16x512xf32>
    %265 = tpu.matmul %259, %4, %cst_188 {dimension_numbers = #tpu.dot_dimension_numbers<[1], [0], [0], [1], [0, 0, 1, 1], [], []>} : vector<16x32xbf16>, vector<32x512xbf16>, vector<16x512xf32> -> vector<16x512xf32>
    %266 = arith.addf %264, %265 : vector<16x512xf32>
    %cst_189 = arith.constant dense<0.000000e+00> : vector<16x512xf32>
    %267 = tpu.matmul %261, %6, %cst_189 {dimension_numbers = #tpu.dot_dimension_numbers<[1], [0], [0], [1], [0, 0, 1, 1], [], []>} : vector<16x32xbf16>, vector<32x512xbf16>, vector<16x512xf32> -> vector<16x512xf32>
    %268 = arith.addf %266, %267 : vector<16x512xf32>
    %cst_190 = arith.constant dense<0.000000e+00> : vector<16x512xf32>
    %269 = tpu.matmul %259, %2, %cst_190 {dimension_numbers = #tpu.dot_dimension_numbers<[1], [0], [0], [1], [0, 0, 1, 1], [], []>} : vector<16x32xbf16>, vector<32x512xbf16>, vector<16x512xf32> -> vector<16x512xf32>
    %cst_191 = arith.constant dense<0.000000e+00> : vector<16x512xf32>
    %270 = tpu.matmul %261, %4, %cst_191 {dimension_numbers = #tpu.dot_dimension_numbers<[1], [0], [0], [1], [0, 0, 1, 1], [], []>} : vector<16x32xbf16>, vector<32x512xbf16>, vector<16x512xf32> -> vector<16x512xf32>
    %271 = arith.addf %269, %270 : vector<16x512xf32>
    %cst_192 = arith.constant dense<0.000000e+00> : vector<16x512xf32>
    %272 = tpu.matmul %263, %6, %cst_192 {dimension_numbers = #tpu.dot_dimension_numbers<[1], [0], [0], [1], [0, 0, 1, 1], [], []>} : vector<16x32xbf16>, vector<32x512xbf16>, vector<16x512xf32> -> vector<16x512xf32>
    %273 = arith.addf %271, %272 : vector<16x512xf32>
    %274 = arith.maximumf %268, %273 : vector<16x512xf32>
    %275 = vector.extract_strided_slice %274 {offsets = [0, 0], sizes = [16, 256], strides = [1, 1]} : vector<16x512xf32> to vector<16x256xf32>
    %276 = vector.extract_strided_slice %274 {offsets = [0, 256], sizes = [16, 256], strides = [1, 1]} : vector<16x512xf32> to vector<16x256xf32>
    %277 = arith.maximumf %275, %276 : vector<16x256xf32>
    %278 = vector.broadcast %0 : vector<1x256xf32> to vector<16x256xf32>
    %279 = arith.addf %277, %278 : vector<16x256xf32>
    %cst_193 = arith.constant 0.000000e+00 : f32
    %280 = vector.broadcast %cst_193 : f32 to vector<16x256xf32>
    %281 = arith.maximumf %279, %280 : vector<16x256xf32>
    %282 = arith.truncf %281 : vector<16x256xf32> to vector<16x256xbf16>
    %c8_194 = arith.constant 8 : index
    %c0_195 = arith.constant 0 : index
    %c0_196 = arith.constant 0 : index
    %283 = vector.load %arg4[%c8_194, %c0_195, %c0_196] : memref<13x256x64xbf16, #tpu.memory_space<vmem>>, vector<1x256x64xbf16>
    %284 = vector.shape_cast %283 : vector<1x256x64xbf16> to vector<256x64xbf16>
    %cst_197 = arith.constant dense<0.000000e+00> : vector<16x64xf32>
    %285 = tpu.matmul %282, %284, %cst_197 {dimension_numbers = #tpu.dot_dimension_numbers<[1], [0], [0], [1], [0, 0, 1, 1], [], []>} : vector<16x256xbf16>, vector<256x64xbf16>, vector<16x64xf32> -> vector<16x64xf32>
    %286 = arith.addf %255, %285 : vector<16x64xf32>
    %c18_198 = arith.constant 18 : index
    %c0_199 = arith.constant 0 : index
    %c0_200 = arith.constant 0 : index
    %287 = vector.load %arg1[%c18_198, %c0_199, %c0_200] : memref<28x16x32xbf16, #tpu.memory_space<vmem>>, vector<1x16x32xbf16>
    %288 = vector.shape_cast %287 : vector<1x16x32xbf16> to vector<16x32xbf16>
    %c19_201 = arith.constant 19 : index
    %c0_202 = arith.constant 0 : index
    %c0_203 = arith.constant 0 : index
    %289 = vector.load %arg1[%c19_201, %c0_202, %c0_203] : memref<28x16x32xbf16, #tpu.memory_space<vmem>>, vector<1x16x32xbf16>
    %290 = vector.shape_cast %289 : vector<1x16x32xbf16> to vector<16x32xbf16>
    %c20 = arith.constant 20 : index
    %c0_204 = arith.constant 0 : index
    %c0_205 = arith.constant 0 : index
    %291 = vector.load %arg1[%c20, %c0_204, %c0_205] : memref<28x16x32xbf16, #tpu.memory_space<vmem>>, vector<1x16x32xbf16>
    %292 = vector.shape_cast %291 : vector<1x16x32xbf16> to vector<16x32xbf16>
    %c21 = arith.constant 21 : index
    %c0_206 = arith.constant 0 : index
    %c0_207 = arith.constant 0 : index
    %293 = vector.load %arg1[%c21, %c0_206, %c0_207] : memref<28x16x32xbf16, #tpu.memory_space<vmem>>, vector<1x16x32xbf16>
    %294 = vector.shape_cast %293 : vector<1x16x32xbf16> to vector<16x32xbf16>
    %cst_208 = arith.constant dense<0.000000e+00> : vector<16x512xf32>
    %295 = tpu.matmul %288, %2, %cst_208 {dimension_numbers = #tpu.dot_dimension_numbers<[1], [0], [0], [1], [0, 0, 1, 1], [], []>} : vector<16x32xbf16>, vector<32x512xbf16>, vector<16x512xf32> -> vector<16x512xf32>
    %cst_209 = arith.constant dense<0.000000e+00> : vector<16x512xf32>
    %296 = tpu.matmul %290, %4, %cst_209 {dimension_numbers = #tpu.dot_dimension_numbers<[1], [0], [0], [1], [0, 0, 1, 1], [], []>} : vector<16x32xbf16>, vector<32x512xbf16>, vector<16x512xf32> -> vector<16x512xf32>
    %297 = arith.addf %295, %296 : vector<16x512xf32>
    %cst_210 = arith.constant dense<0.000000e+00> : vector<16x512xf32>
    %298 = tpu.matmul %292, %6, %cst_210 {dimension_numbers = #tpu.dot_dimension_numbers<[1], [0], [0], [1], [0, 0, 1, 1], [], []>} : vector<16x32xbf16>, vector<32x512xbf16>, vector<16x512xf32> -> vector<16x512xf32>
    %299 = arith.addf %297, %298 : vector<16x512xf32>
    %cst_211 = arith.constant dense<0.000000e+00> : vector<16x512xf32>
    %300 = tpu.matmul %290, %2, %cst_211 {dimension_numbers = #tpu.dot_dimension_numbers<[1], [0], [0], [1], [0, 0, 1, 1], [], []>} : vector<16x32xbf16>, vector<32x512xbf16>, vector<16x512xf32> -> vector<16x512xf32>
    %cst_212 = arith.constant dense<0.000000e+00> : vector<16x512xf32>
    %301 = tpu.matmul %292, %4, %cst_212 {dimension_numbers = #tpu.dot_dimension_numbers<[1], [0], [0], [1], [0, 0, 1, 1], [], []>} : vector<16x32xbf16>, vector<32x512xbf16>, vector<16x512xf32> -> vector<16x512xf32>
    %302 = arith.addf %300, %301 : vector<16x512xf32>
    %cst_213 = arith.constant dense<0.000000e+00> : vector<16x512xf32>
    %303 = tpu.matmul %294, %6, %cst_213 {dimension_numbers = #tpu.dot_dimension_numbers<[1], [0], [0], [1], [0, 0, 1, 1], [], []>} : vector<16x32xbf16>, vector<32x512xbf16>, vector<16x512xf32> -> vector<16x512xf32>
    %304 = arith.addf %302, %303 : vector<16x512xf32>
    %305 = arith.maximumf %299, %304 : vector<16x512xf32>
    %306 = vector.extract_strided_slice %305 {offsets = [0, 0], sizes = [16, 256], strides = [1, 1]} : vector<16x512xf32> to vector<16x256xf32>
    %307 = vector.extract_strided_slice %305 {offsets = [0, 256], sizes = [16, 256], strides = [1, 1]} : vector<16x512xf32> to vector<16x256xf32>
    %308 = arith.maximumf %306, %307 : vector<16x256xf32>
    %309 = vector.broadcast %0 : vector<1x256xf32> to vector<16x256xf32>
    %310 = arith.addf %308, %309 : vector<16x256xf32>
    %cst_214 = arith.constant 0.000000e+00 : f32
    %311 = vector.broadcast %cst_214 : f32 to vector<16x256xf32>
    %312 = arith.maximumf %310, %311 : vector<16x256xf32>
    %313 = arith.truncf %312 : vector<16x256xf32> to vector<16x256xbf16>
    %c9_215 = arith.constant 9 : index
    %c0_216 = arith.constant 0 : index
    %c0_217 = arith.constant 0 : index
    %314 = vector.load %arg4[%c9_215, %c0_216, %c0_217] : memref<13x256x64xbf16, #tpu.memory_space<vmem>>, vector<1x256x64xbf16>
    %315 = vector.shape_cast %314 : vector<1x256x64xbf16> to vector<256x64xbf16>
    %cst_218 = arith.constant dense<0.000000e+00> : vector<16x64xf32>
    %316 = tpu.matmul %313, %315, %cst_218 {dimension_numbers = #tpu.dot_dimension_numbers<[1], [0], [0], [1], [0, 0, 1, 1], [], []>} : vector<16x256xbf16>, vector<256x64xbf16>, vector<16x64xf32> -> vector<16x64xf32>
    %317 = arith.addf %286, %316 : vector<16x64xf32>
    %c20_219 = arith.constant 20 : index
    %c0_220 = arith.constant 0 : index
    %c0_221 = arith.constant 0 : index
    %318 = vector.load %arg1[%c20_219, %c0_220, %c0_221] : memref<28x16x32xbf16, #tpu.memory_space<vmem>>, vector<1x16x32xbf16>
    %319 = vector.shape_cast %318 : vector<1x16x32xbf16> to vector<16x32xbf16>
    %c21_222 = arith.constant 21 : index
    %c0_223 = arith.constant 0 : index
    %c0_224 = arith.constant 0 : index
    %320 = vector.load %arg1[%c21_222, %c0_223, %c0_224] : memref<28x16x32xbf16, #tpu.memory_space<vmem>>, vector<1x16x32xbf16>
    %321 = vector.shape_cast %320 : vector<1x16x32xbf16> to vector<16x32xbf16>
    %c22 = arith.constant 22 : index
    %c0_225 = arith.constant 0 : index
    %c0_226 = arith.constant 0 : index
    %322 = vector.load %arg1[%c22, %c0_225, %c0_226] : memref<28x16x32xbf16, #tpu.memory_space<vmem>>, vector<1x16x32xbf16>
    %323 = vector.shape_cast %322 : vector<1x16x32xbf16> to vector<16x32xbf16>
    %c23 = arith.constant 23 : index
    %c0_227 = arith.constant 0 : index
    %c0_228 = arith.constant 0 : index
    %324 = vector.load %arg1[%c23, %c0_227, %c0_228] : memref<28x16x32xbf16, #tpu.memory_space<vmem>>, vector<1x16x32xbf16>
    %325 = vector.shape_cast %324 : vector<1x16x32xbf16> to vector<16x32xbf16>
    %cst_229 = arith.constant dense<0.000000e+00> : vector<16x512xf32>
    %326 = tpu.matmul %319, %2, %cst_229 {dimension_numbers = #tpu.dot_dimension_numbers<[1], [0], [0], [1], [0, 0, 1, 1], [], []>} : vector<16x32xbf16>, vector<32x512xbf16>, vector<16x512xf32> -> vector<16x512xf32>
    %cst_230 = arith.constant dense<0.000000e+00> : vector<16x512xf32>
    %327 = tpu.matmul %321, %4, %cst_230 {dimension_numbers = #tpu.dot_dimension_numbers<[1], [0], [0], [1], [0, 0, 1, 1], [], []>} : vector<16x32xbf16>, vector<32x512xbf16>, vector<16x512xf32> -> vector<16x512xf32>
    %328 = arith.addf %326, %327 : vector<16x512xf32>
    %cst_231 = arith.constant dense<0.000000e+00> : vector<16x512xf32>
    %329 = tpu.matmul %323, %6, %cst_231 {dimension_numbers = #tpu.dot_dimension_numbers<[1], [0], [0], [1], [0, 0, 1, 1], [], []>} : vector<16x32xbf16>, vector<32x512xbf16>, vector<16x512xf32> -> vector<16x512xf32>
    %330 = arith.addf %328, %329 : vector<16x512xf32>
    %cst_232 = arith.constant dense<0.000000e+00> : vector<16x512xf32>
    %331 = tpu.matmul %321, %2, %cst_232 {dimension_numbers = #tpu.dot_dimension_numbers<[1], [0], [0], [1], [0, 0, 1, 1], [], []>} : vector<16x32xbf16>, vector<32x512xbf16>, vector<16x512xf32> -> vector<16x512xf32>
    %cst_233 = arith.constant dense<0.000000e+00> : vector<16x512xf32>
    %332 = tpu.matmul %323, %4, %cst_233 {dimension_numbers = #tpu.dot_dimension_numbers<[1], [0], [0], [1], [0, 0, 1, 1], [], []>} : vector<16x32xbf16>, vector<32x512xbf16>, vector<16x512xf32> -> vector<16x512xf32>
    %333 = arith.addf %331, %332 : vector<16x512xf32>
    %cst_234 = arith.constant dense<0.000000e+00> : vector<16x512xf32>
    %334 = tpu.matmul %325, %6, %cst_234 {dimension_numbers = #tpu.dot_dimension_numbers<[1], [0], [0], [1], [0, 0, 1, 1], [], []>} : vector<16x32xbf16>, vector<32x512xbf16>, vector<16x512xf32> -> vector<16x512xf32>
    %335 = arith.addf %333, %334 : vector<16x512xf32>
    %336 = arith.maximumf %330, %335 : vector<16x512xf32>
    %337 = vector.extract_strided_slice %336 {offsets = [0, 0], sizes = [16, 256], strides = [1, 1]} : vector<16x512xf32> to vector<16x256xf32>
    %338 = vector.extract_strided_slice %336 {offsets = [0, 256], sizes = [16, 256], strides = [1, 1]} : vector<16x512xf32> to vector<16x256xf32>
    %339 = arith.maximumf %337, %338 : vector<16x256xf32>
    %340 = vector.broadcast %0 : vector<1x256xf32> to vector<16x256xf32>
    %341 = arith.addf %339, %340 : vector<16x256xf32>
    %cst_235 = arith.constant 0.000000e+00 : f32
    %342 = vector.broadcast %cst_235 : f32 to vector<16x256xf32>
    %343 = arith.maximumf %341, %342 : vector<16x256xf32>
    %344 = arith.truncf %343 : vector<16x256xf32> to vector<16x256xbf16>
    %c10_236 = arith.constant 10 : index
    %c0_237 = arith.constant 0 : index
    %c0_238 = arith.constant 0 : index
    %345 = vector.load %arg4[%c10_236, %c0_237, %c0_238] : memref<13x256x64xbf16, #tpu.memory_space<vmem>>, vector<1x256x64xbf16>
    %346 = vector.shape_cast %345 : vector<1x256x64xbf16> to vector<256x64xbf16>
    %cst_239 = arith.constant dense<0.000000e+00> : vector<16x64xf32>
    %347 = tpu.matmul %344, %346, %cst_239 {dimension_numbers = #tpu.dot_dimension_numbers<[1], [0], [0], [1], [0, 0, 1, 1], [], []>} : vector<16x256xbf16>, vector<256x64xbf16>, vector<16x64xf32> -> vector<16x64xf32>
    %348 = arith.addf %317, %347 : vector<16x64xf32>
    %c22_240 = arith.constant 22 : index
    %c0_241 = arith.constant 0 : index
    %c0_242 = arith.constant 0 : index
    %349 = vector.load %arg1[%c22_240, %c0_241, %c0_242] : memref<28x16x32xbf16, #tpu.memory_space<vmem>>, vector<1x16x32xbf16>
    %350 = vector.shape_cast %349 : vector<1x16x32xbf16> to vector<16x32xbf16>
    %c23_243 = arith.constant 23 : index
    %c0_244 = arith.constant 0 : index
    %c0_245 = arith.constant 0 : index
    %351 = vector.load %arg1[%c23_243, %c0_244, %c0_245] : memref<28x16x32xbf16, #tpu.memory_space<vmem>>, vector<1x16x32xbf16>
    %352 = vector.shape_cast %351 : vector<1x16x32xbf16> to vector<16x32xbf16>
    %c24 = arith.constant 24 : index
    %c0_246 = arith.constant 0 : index
    %c0_247 = arith.constant 0 : index
    %353 = vector.load %arg1[%c24, %c0_246, %c0_247] : memref<28x16x32xbf16, #tpu.memory_space<vmem>>, vector<1x16x32xbf16>
    %354 = vector.shape_cast %353 : vector<1x16x32xbf16> to vector<16x32xbf16>
    %c25 = arith.constant 25 : index
    %c0_248 = arith.constant 0 : index
    %c0_249 = arith.constant 0 : index
    %355 = vector.load %arg1[%c25, %c0_248, %c0_249] : memref<28x16x32xbf16, #tpu.memory_space<vmem>>, vector<1x16x32xbf16>
    %356 = vector.shape_cast %355 : vector<1x16x32xbf16> to vector<16x32xbf16>
    %cst_250 = arith.constant dense<0.000000e+00> : vector<16x512xf32>
    %357 = tpu.matmul %350, %2, %cst_250 {dimension_numbers = #tpu.dot_dimension_numbers<[1], [0], [0], [1], [0, 0, 1, 1], [], []>} : vector<16x32xbf16>, vector<32x512xbf16>, vector<16x512xf32> -> vector<16x512xf32>
    %cst_251 = arith.constant dense<0.000000e+00> : vector<16x512xf32>
    %358 = tpu.matmul %352, %4, %cst_251 {dimension_numbers = #tpu.dot_dimension_numbers<[1], [0], [0], [1], [0, 0, 1, 1], [], []>} : vector<16x32xbf16>, vector<32x512xbf16>, vector<16x512xf32> -> vector<16x512xf32>
    %359 = arith.addf %357, %358 : vector<16x512xf32>
    %cst_252 = arith.constant dense<0.000000e+00> : vector<16x512xf32>
    %360 = tpu.matmul %354, %6, %cst_252 {dimension_numbers = #tpu.dot_dimension_numbers<[1], [0], [0], [1], [0, 0, 1, 1], [], []>} : vector<16x32xbf16>, vector<32x512xbf16>, vector<16x512xf32> -> vector<16x512xf32>
    %361 = arith.addf %359, %360 : vector<16x512xf32>
    %cst_253 = arith.constant dense<0.000000e+00> : vector<16x512xf32>
    %362 = tpu.matmul %352, %2, %cst_253 {dimension_numbers = #tpu.dot_dimension_numbers<[1], [0], [0], [1], [0, 0, 1, 1], [], []>} : vector<16x32xbf16>, vector<32x512xbf16>, vector<16x512xf32> -> vector<16x512xf32>
    %cst_254 = arith.constant dense<0.000000e+00> : vector<16x512xf32>
    %363 = tpu.matmul %354, %4, %cst_254 {dimension_numbers = #tpu.dot_dimension_numbers<[1], [0], [0], [1], [0, 0, 1, 1], [], []>} : vector<16x32xbf16>, vector<32x512xbf16>, vector<16x512xf32> -> vector<16x512xf32>
    %364 = arith.addf %362, %363 : vector<16x512xf32>
    %cst_255 = arith.constant dense<0.000000e+00> : vector<16x512xf32>
    %365 = tpu.matmul %356, %6, %cst_255 {dimension_numbers = #tpu.dot_dimension_numbers<[1], [0], [0], [1], [0, 0, 1, 1], [], []>} : vector<16x32xbf16>, vector<32x512xbf16>, vector<16x512xf32> -> vector<16x512xf32>
    %366 = arith.addf %364, %365 : vector<16x512xf32>
    %367 = arith.maximumf %361, %366 : vector<16x512xf32>
    %368 = vector.extract_strided_slice %367 {offsets = [0, 0], sizes = [16, 256], strides = [1, 1]} : vector<16x512xf32> to vector<16x256xf32>
    %369 = vector.extract_strided_slice %367 {offsets = [0, 256], sizes = [16, 256], strides = [1, 1]} : vector<16x512xf32> to vector<16x256xf32>
    %370 = arith.maximumf %368, %369 : vector<16x256xf32>
    %371 = vector.broadcast %0 : vector<1x256xf32> to vector<16x256xf32>
    %372 = arith.addf %370, %371 : vector<16x256xf32>
    %cst_256 = arith.constant 0.000000e+00 : f32
    %373 = vector.broadcast %cst_256 : f32 to vector<16x256xf32>
    %374 = arith.maximumf %372, %373 : vector<16x256xf32>
    %375 = arith.truncf %374 : vector<16x256xf32> to vector<16x256xbf16>
    %c11_257 = arith.constant 11 : index
    %c0_258 = arith.constant 0 : index
    %c0_259 = arith.constant 0 : index
    %376 = vector.load %arg4[%c11_257, %c0_258, %c0_259] : memref<13x256x64xbf16, #tpu.memory_space<vmem>>, vector<1x256x64xbf16>
    %377 = vector.shape_cast %376 : vector<1x256x64xbf16> to vector<256x64xbf16>
    %cst_260 = arith.constant dense<0.000000e+00> : vector<16x64xf32>
    %378 = tpu.matmul %375, %377, %cst_260 {dimension_numbers = #tpu.dot_dimension_numbers<[1], [0], [0], [1], [0, 0, 1, 1], [], []>} : vector<16x256xbf16>, vector<256x64xbf16>, vector<16x64xf32> -> vector<16x64xf32>
    %379 = arith.addf %348, %378 : vector<16x64xf32>
    %c24_261 = arith.constant 24 : index
    %c0_262 = arith.constant 0 : index
    %c0_263 = arith.constant 0 : index
    %380 = vector.load %arg1[%c24_261, %c0_262, %c0_263] : memref<28x16x32xbf16, #tpu.memory_space<vmem>>, vector<1x16x32xbf16>
    %381 = vector.shape_cast %380 : vector<1x16x32xbf16> to vector<16x32xbf16>
    %c25_264 = arith.constant 25 : index
    %c0_265 = arith.constant 0 : index
    %c0_266 = arith.constant 0 : index
    %382 = vector.load %arg1[%c25_264, %c0_265, %c0_266] : memref<28x16x32xbf16, #tpu.memory_space<vmem>>, vector<1x16x32xbf16>
    %383 = vector.shape_cast %382 : vector<1x16x32xbf16> to vector<16x32xbf16>
    %c26 = arith.constant 26 : index
    %c0_267 = arith.constant 0 : index
    %c0_268 = arith.constant 0 : index
    %384 = vector.load %arg1[%c26, %c0_267, %c0_268] : memref<28x16x32xbf16, #tpu.memory_space<vmem>>, vector<1x16x32xbf16>
    %385 = vector.shape_cast %384 : vector<1x16x32xbf16> to vector<16x32xbf16>
    %c27 = arith.constant 27 : index
    %c0_269 = arith.constant 0 : index
    %c0_270 = arith.constant 0 : index
    %386 = vector.load %arg1[%c27, %c0_269, %c0_270] : memref<28x16x32xbf16, #tpu.memory_space<vmem>>, vector<1x16x32xbf16>
    %387 = vector.shape_cast %386 : vector<1x16x32xbf16> to vector<16x32xbf16>
    %cst_271 = arith.constant dense<0.000000e+00> : vector<16x512xf32>
    %388 = tpu.matmul %381, %2, %cst_271 {dimension_numbers = #tpu.dot_dimension_numbers<[1], [0], [0], [1], [0, 0, 1, 1], [], []>} : vector<16x32xbf16>, vector<32x512xbf16>, vector<16x512xf32> -> vector<16x512xf32>
    %cst_272 = arith.constant dense<0.000000e+00> : vector<16x512xf32>
    %389 = tpu.matmul %383, %4, %cst_272 {dimension_numbers = #tpu.dot_dimension_numbers<[1], [0], [0], [1], [0, 0, 1, 1], [], []>} : vector<16x32xbf16>, vector<32x512xbf16>, vector<16x512xf32> -> vector<16x512xf32>
    %390 = arith.addf %388, %389 : vector<16x512xf32>
    %cst_273 = arith.constant dense<0.000000e+00> : vector<16x512xf32>
    %391 = tpu.matmul %385, %6, %cst_273 {dimension_numbers = #tpu.dot_dimension_numbers<[1], [0], [0], [1], [0, 0, 1, 1], [], []>} : vector<16x32xbf16>, vector<32x512xbf16>, vector<16x512xf32> -> vector<16x512xf32>
    %392 = arith.addf %390, %391 : vector<16x512xf32>
    %cst_274 = arith.constant dense<0.000000e+00> : vector<16x512xf32>
    %393 = tpu.matmul %383, %2, %cst_274 {dimension_numbers = #tpu.dot_dimension_numbers<[1], [0], [0], [1], [0, 0, 1, 1], [], []>} : vector<16x32xbf16>, vector<32x512xbf16>, vector<16x512xf32> -> vector<16x512xf32>
    %cst_275 = arith.constant dense<0.000000e+00> : vector<16x512xf32>
    %394 = tpu.matmul %385, %4, %cst_275 {dimension_numbers = #tpu.dot_dimension_numbers<[1], [0], [0], [1], [0, 0, 1, 1], [], []>} : vector<16x32xbf16>, vector<32x512xbf16>, vector<16x512xf32> -> vector<16x512xf32>
    %395 = arith.addf %393, %394 : vector<16x512xf32>
    %cst_276 = arith.constant dense<0.000000e+00> : vector<16x512xf32>
    %396 = tpu.matmul %387, %6, %cst_276 {dimension_numbers = #tpu.dot_dimension_numbers<[1], [0], [0], [1], [0, 0, 1, 1], [], []>} : vector<16x32xbf16>, vector<32x512xbf16>, vector<16x512xf32> -> vector<16x512xf32>
    %397 = arith.addf %395, %396 : vector<16x512xf32>
    %398 = arith.maximumf %392, %397 : vector<16x512xf32>
    %399 = vector.extract_strided_slice %398 {offsets = [0, 0], sizes = [16, 256], strides = [1, 1]} : vector<16x512xf32> to vector<16x256xf32>
    %400 = vector.extract_strided_slice %398 {offsets = [0, 256], sizes = [16, 256], strides = [1, 1]} : vector<16x512xf32> to vector<16x256xf32>
    %401 = arith.maximumf %399, %400 : vector<16x256xf32>
    %402 = vector.broadcast %0 : vector<1x256xf32> to vector<16x256xf32>
    %403 = arith.addf %401, %402 : vector<16x256xf32>
    %cst_277 = arith.constant 0.000000e+00 : f32
    %404 = vector.broadcast %cst_277 : f32 to vector<16x256xf32>
    %405 = arith.maximumf %403, %404 : vector<16x256xf32>
    %406 = arith.truncf %405 : vector<16x256xf32> to vector<16x256xbf16>
    %c12_278 = arith.constant 12 : index
    %c0_279 = arith.constant 0 : index
    %c0_280 = arith.constant 0 : index
    %407 = vector.load %arg4[%c12_278, %c0_279, %c0_280] : memref<13x256x64xbf16, #tpu.memory_space<vmem>>, vector<1x256x64xbf16>
    %408 = vector.shape_cast %407 : vector<1x256x64xbf16> to vector<256x64xbf16>
    %cst_281 = arith.constant dense<0.000000e+00> : vector<16x64xf32>
    %409 = tpu.matmul %406, %408, %cst_281 {dimension_numbers = #tpu.dot_dimension_numbers<[1], [0], [0], [1], [0, 0, 1, 1], [], []>} : vector<16x256xbf16>, vector<256x64xbf16>, vector<16x64xf32> -> vector<16x64xf32>
    %410 = arith.addf %379, %409 : vector<16x64xf32>
    %c0_282 = arith.constant 0 : index
    %c0_283 = arith.constant 0 : index
    %411 = vector.load %arg5[%c0_282, %c0_283] : memref<1x64xf32, #tpu.memory_space<vmem>>, vector<1x64xf32>
    %412 = vector.broadcast %411 : vector<1x64xf32> to vector<16x64xf32>
    %413 = arith.addf %410, %412 : vector<16x64xf32>
    %cst_284 = arith.constant 0.000000e+00 : f32
    %414 = vector.broadcast %cst_284 : f32 to vector<16x64xf32>
    %415 = arith.maximumf %413, %414 : vector<16x64xf32>
    %416 = arith.truncf %415 : vector<16x64xf32> to vector<16x64xbf16>
    %c0_285 = arith.constant 0 : index
    %c0_286 = arith.constant 0 : index
    %417 = vector.load %arg6[%c0_285, %c0_286] : memref<64x128xbf16, #tpu.memory_space<vmem>>, vector<64x128xbf16>
    %cst_287 = arith.constant dense<0.000000e+00> : vector<16x128xf32>
    %418 = tpu.matmul %416, %417, %cst_287 {dimension_numbers = #tpu.dot_dimension_numbers<[1], [0], [0], [1], [0, 0, 1, 1], [], []>} : vector<16x64xbf16>, vector<64x128xbf16>, vector<16x128xf32> -> vector<16x128xf32>
    %c0_288 = arith.constant 0 : index
    %c0_289 = arith.constant 0 : index
    %419 = vector.load %arg7[%c0_288, %c0_289] : memref<1x128xf32, #tpu.memory_space<vmem>>, vector<1x128xf32>
    %420 = vector.broadcast %419 : vector<1x128xf32> to vector<16x128xf32>
    %421 = arith.addf %418, %420 : vector<16x128xf32>
    %c0_290 = arith.constant 0 : index
    %c0_291 = arith.constant 0 : index
    %422 = vector.load %arg8[%c0_290, %c0_291] : memref<16x128xf32, #tpu.memory_space<vmem>>, vector<16x128xf32>
    tpu.vector_store %arg8[%c0_290, %c0_291], %421 {strides = array<i32>} : memref<16x128xf32, #tpu.memory_space<vmem>>, vector<16x128xf32>,
    return
  }
  func.func @transform_0(%arg0: i32) -> (i32, i32, i32) {
    %c0_i32 = arith.constant 0 : i32
    %c0_i32_0 = arith.constant 0 : i32
    %c0_i32_1 = arith.constant 0 : i32
    return %c0_i32, %arg0, %c0_i32_0 : i32, i32, i32
  }
  func.func @transform_1(%arg0: i32) -> (i32, i32, i32) {
    %c0_i32 = arith.constant 0 : i32
    %c0_i32_0 = arith.constant 0 : i32
    %c0_i32_1 = arith.constant 0 : i32
    %c0_i32_2 = arith.constant 0 : i32
    return %c0_i32, %c0_i32_0, %c0_i32_1 : i32, i32, i32
  }
  func.func @transform_2(%arg0: i32) -> (i32, i32) {
    %c0_i32 = arith.constant 0 : i32
    %c0_i32_0 = arith.constant 0 : i32
    %c0_i32_1 = arith.constant 0 : i32
    return %c0_i32, %c0_i32_0 : i32, i32
  }
  func.func @transform_3(%arg0: i32) -> (i32, i32, i32) {
    %c0_i32 = arith.constant 0 : i32
    %c0_i32_0 = arith.constant 0 : i32
    %c0_i32_1 = arith.constant 0 : i32
    %c0_i32_2 = arith.constant 0 : i32
    return %c0_i32, %c0_i32_0, %c0_i32_1 : i32, i32, i32
  }
  func.func @transform_4(%arg0: i32) -> (i32, i32) {
    %c0_i32 = arith.constant 0 : i32
    %c0_i32_0 = arith.constant 0 : i32
    %c0_i32_1 = arith.constant 0 : i32
    return %c0_i32, %c0_i32_0 : i32, i32
  }
  func.func @transform_5(%arg0: i32) -> (i32, i32) {
    %c0_i32 = arith.constant 0 : i32
    %c0_i32_0 = arith.constant 0 : i32
    %c0_i32_1 = arith.constant 0 : i32
    return %c0_i32, %c0_i32_0 : i32, i32
  }
  func.func @transform_6(%arg0: i32) -> (i32, i32) {
    %c0_i32 = arith.constant 0 : i32
    %c0_i32_0 = arith.constant 0 : i32
    %c0_i32_1 = arith.constant 0 : i32
    return %c0_i32, %c0_i32_0 : i32, i32
  }
  func.func @transform_7(%arg0: i32) -> (i32, i32) {
    %c0_i32 = arith.constant 0 : i32
    %c0_i32_0 = arith.constant 0 : i32
    return %arg0, %c0_i32 : i32, i32
  }
}

</mosaic_0001>

<bundles_post_ra>
// kernel: cnn_forward.1
= control target key start
LH: loop header
LB: loop body
LE: loop exit
PB: predicated region body
PF: predicated region fallthrough
CT: control target
= control target key end

     0   :  { %s12273_s24 = smov 0   ;;  %s12275_s25 = smov 0   ;;  %s15175_s0 = inlined_call_operand.vmem [shape: bf16[28,32,32], index: 0, kind: input, shape index: {}]   ;;  %s15176_s1 = inlined_call_operand.vmem [shape: bf16[3,32,512], index: 1, kind: input, shape index: {}]   ;;  %s15177_s2 = inlined_call_operand.vmem [shape: f32[1,256], index: 2, kind: input, shape index: {}]   ;;  %s15178_s3 = inlined_call_operand.vmem [shape: bf16[13,256,64], index: 3, kind: input, shape index: {}]   ;;  %s15179_s4 = inlined_call_operand.vmem [shape: f32[1,64], index: 4, kind: input, shape index: {}]   ;;  %s15180_s5 = inlined_call_operand.vmem [shape: bf16[64,128], index: 5, kind: input, shape index: {}]   ;;  %s15181_s6 = inlined_call_operand.vmem [shape: f32[1,128], index: 6, kind: input, shape index: {}]   ;;  %s15182_s7 = inlined_call_operand.vmem [shape: f32[32,128], index: 7, kind: output, shape index: {}]  }
   0x1   :  { %s12277_s26 = smov 0  }
   0x2 LB: > { %s10605_s27 = sadd.s32 4294967295, %s12228_s26   ;;  %s12290_s28 = sadd.s32 1, %s12228_s26   ;;  %s12228_s26 = sphi %s12277_s26, %s15727_s26   ;;  %s12224_s25 = sphi %s12275_s25, %s15726_s25   ;;  %s12220_s24 = sphi %s12273_s24, %s15725_s24  }
   0x3   : > { %s21_s29 = ssub.s32 %s12228_s26, %s12290_s28  ;;  %s24_s30 = sadd.s32 1, %s12224_s25 }
   0x4   : > { %p22_p0 = scmp.eq.s32.totalorder %s21_s29, 0  ;;  %p31_p1 = scmp.ne.s32.totalorder %s12224_s25, %s12220_s24 }
   0x5   : > { %p32_p2 = scmp.eq.s32.totalorder %s12228_s26, 0  ;;  %p10608_p4 = scmp.ge.s32.totalorder %s12228_s26, 2 }
   0x6   : > { %s12299_s8 = scalar_select %p22_p0, %s12224_s25, %s24_s30  }
   0x7   : > { %p33_p3 = por %p32_p2, %p31_p1  ;;  %227 = sbr.rel (%p10608_p4) target bundleno = 30 (0x1e), region = 40 }
   0xc   : > { %230 = sbr.rel (!%p33_p3) target bundleno = 30 (0x1e), region = 44  ;;  %s232_s9 = sand.u32 (%p33_p3), 1, %s12224_s25  }
   0xd   : > { %s11493_s10 = sshll.u32 (%p33_p3), %s12228_s26, 3  ;;  %s11797_s11 = smul.u32 (%p33_p3), 224, %s232_s9 }
   0xe   : > { %s12307_s14 = scalar_lea.vmem (%p33_p3), %s15175_s0, %s11493_s10 }
   0xf   : > { %v254_v0 = vld [vmem:[%s12307_s14] sm:$0xff] (%p33_p3)   ;;  %v258_v1 = vld [vmem:[%s12307_s14 + $0x10] sm:$0xff] (%p33_p3)   ;;  %s12315_s15 = scalar_lea.vmem (%p33_p3), [#allocation2], %s11797_s11 }
  0x10   : > { %v262_v2 = vld [vmem:[%s12307_s14 + $0x20] sm:$0xff] (%p33_p3)   ;;  %v266_v3 = vld [vmem:[%s12307_s14 + $0x30] sm:$0xff] (%p33_p3)   ;;  %255 = vst [vmem:[%s12315_s15] sm:$0xff] (%p33_p3), %v254_v0   ;;  %259 = vst [vmem:[%s12315_s15 + $0x8] sm:$0xff] (%p33_p3), %v258_v1  }
  0x11   : > { %v270_v4 = vld [vmem:[%s12307_s14 + $0x40] sm:$0xff]   ;;  %v274_v5 = vld [vmem:[%s12307_s14 + $0x50] sm:$0xff]   ;;  %263 = vst [vmem:[%s12315_s15 + $0x10] sm:$0xff] %v262_v2   ;;  %267 = vst [vmem:[%s12315_s15 + $0x18] sm:$0xff] %v266_v3  }
  0x12   : > { %271 = vst [vmem:[%s12315_s15 + $0x20] sm:$0xff] %v270_v4   ;;  %275 = vst [vmem:[%s12315_s15 + $0x28] sm:$0xff] %v274_v5   ;;  %v278_v6 = vld [vmem:[%s12307_s14 + $0x60] sm:$0xff]   ;;  %v282_v7 = vld [vmem:[%s12307_s14 + $0x70] sm:$0xff]  }
  0x13   : > { %v286_v8 = vld [vmem:[%s12307_s14 + $0x80] sm:$0xff]   ;;  %279 = vst [vmem:[%s12315_s15 + $0x30] sm:$0xff] %v278_v6   ;;  %283 = vst [vmem:[%s12315_s15 + $0x38] sm:$0xff] %v282_v7   ;;  %v290_v9 = vld [vmem:[%s12307_s14 + $0x90] sm:$0xff]  }
  0x14   : > { %287 = vst [vmem:[%s12315_s15 + $0x40] sm:$0xff] %v286_v8   ;;  %v294_v10 = vld [vmem:[%s12307_s14 + $0xa0] sm:$0xff]   ;;  %v298_v11 = vld [vmem:[%s12307_s14 + $0xb0] sm:$0xff]   ;;  %291 = vst [vmem:[%s12315_s15 + $0x48] sm:$0xff] %v290_v9  }
  0x15   : > { %295 = vst [vmem:[%s12315_s15 + $0x50] sm:$0xff] %v294_v10   ;;  %299 = vst [vmem:[%s12315_s15 + $0x58] sm:$0xff] %v298_v11   ;;  %v302_v12 = vld [vmem:[%s12307_s14 + $0xc0] sm:$0xff]   ;;  %v306_v13 = vld [vmem:[%s12307_s14 + $0xd0] sm:$0xff]  }
  0x16   : > { %v310_v14 = vld [vmem:[%s12307_s14 + $0xe0] sm:$0xff]   ;;  %303 = vst [vmem:[%s12315_s15 + $0x60] sm:$0xff] %v302_v12   ;;  %307 = vst [vmem:[%s12315_s15 + $0x68] sm:$0xff] %v306_v13   ;;  %v314_v15 = vld [vmem:[%s12307_s14 + $0xf0] sm:$0xff]  }
  0x17   : > { %311 = vst [vmem:[%s12315_s15 + $0x70] sm:$0xff] %v310_v14   ;;  %v318_v16 = vld [vmem:[%s12307_s14 + $0x100] sm:$0xff]   ;;  %v322_v17 = vld [vmem:[%s12307_s14 + $0x110] sm:$0xff]   ;;  %315 = vst [vmem:[%s12315_s15 + $0x78] sm:$0xff] %v314_v15  }
  0x18   : > { %319 = vst [vmem:[%s12315_s15 + $0x80] sm:$0xff] %v318_v16   ;;  %323 = vst [vmem:[%s12315_s15 + $0x88] sm:$0xff] %v322_v17   ;;  %v326_v18 = vld [vmem:[%s12307_s14 + $0x120] sm:$0xff]   ;;  %v330_v19 = vld [vmem:[%s12307_s14 + $0x130] sm:$0xff]  }
  0x19   : > { %v334_v20 = vld [vmem:[%s12307_s14 + $0x140] sm:$0xff]   ;;  %327 = vst [vmem:[%s12315_s15 + $0x90] sm:$0xff] %v326_v18   ;;  %331 = vst [vmem:[%s12315_s15 + $0x98] sm:$0xff] %v330_v19   ;;  %v338_v21 = vld [vmem:[%s12307_s14 + $0x150] sm:$0xff]  }
  0x1a   : > { %335 = vst [vmem:[%s12315_s15 + $0xa0] sm:$0xff] %v334_v20   ;;  %v342_v22 = vld [vmem:[%s12307_s14 + $0x160] sm:$0xff]   ;;  %v346_v23 = vld [vmem:[%s12307_s14 + $0x170] sm:$0xff]   ;;  %339 = vst [vmem:[%s12315_s15 + $0xa8] sm:$0xff] %v338_v21  }
  0x1b   : > { %343 = vst [vmem:[%s12315_s15 + $0xb0] sm:$0xff] %v342_v22   ;;  %347 = vst [vmem:[%s12315_s15 + $0xb8] sm:$0xff] %v346_v23   ;;  %v350_v24 = vld [vmem:[%s12307_s14 + $0x180] sm:$0xff]   ;;  %v354_v25 = vld [vmem:[%s12307_s14 + $0x190] sm:$0xff]  }
  0x1c   : > { %v358_v26 = vld [vmem:[%s12307_s14 + $0x1a0] sm:$0xff]   ;;  %351 = vst [vmem:[%s12315_s15 + $0xc0] sm:$0xff] %v350_v24   ;;  %355 = vst [vmem:[%s12315_s15 + $0xc8] sm:$0xff] %v354_v25   ;;  %v362_v27 = vld [vmem:[%s12307_s14 + $0x1b0] sm:$0xff]  }
  0x1d   : > { %359 = vst [vmem:[%s12315_s15 + $0xd0] sm:$0xff] %v358_v26   ;;  %363 = vst [vmem:[%s12315_s15 + $0xd8] sm:$0xff] %v362_v27  }
  0x1e PF: > { %p10611_p5 = scmp.ge.s32.totalorder %s12228_s26, 1  ;;  %p500_p6 = scmp.lt.s32.totalorder %s12228_s26, 3 }
  0x20   : > { %p501_p7 = pnand %p10611_p5, %p500_p6 }
  0x22   : > { %504 = sbr.rel (%p501_p7) target bundleno = 3466 (0xd8a), region = 85 }
  0x27   : > { %v12372_v28 = vld [vmem:[%s15176_s1 + $0x64] ss:$16 sps:$4 sm:$0xff]   ;;  %s507_s18 = sand.u32 1, %s12220_s24   ;;  %v15183_v30 = vmov 0   ;;  %v12386_v31 = vld [vmem:[%s15176_s1 + $0x60] ss:$16 sps:$4 sm:$0xff]  }
  0x28   : > { %v12378_v29 = vld [vmem:[%s15176_s1 + $0x24] ss:$16 sps:$4 sm:$0xff]   ;;  %665 = vmatprep.mubr.bf16.mxu1 %v15183_v30  ;;  %799 = vmatprep.mubr.bf16.mxu0 %v15183_v30  ;;  %s11798_s21 = smul.u32 224, %s507_s18  ;;  %v12391_v32 = vld [vmem:[%s15176_s1 + $0x20] ss:$16 sps:$4 sm:$0xff]   ;;  %vm629_vm0 = vcmask 261120  }
  0x29   : > { %645 = vmatprep.subr.bf16.mxu1 %v12372_v28  ;;  %779 = vmatprep.subr.bf16.mxu0 %v12378_v29  ;;  %v12397_v33 = vld [vmem:[%s15176_s1 + $0x44] ss:$16 sps:$4 sm:$0xff]   ;;  %v12409_v35 = vld [vmem:[%s15176_s1 + $0x40] ss:$16 sps:$4 sm:$0xff]   ;;  %v12426_v38 = vld [vmem:[%s15176_s1 + $0x6c] ss:$16 sps:$4 sm:$0xff]  }
  0x2a   : > { %646 = vmatpush1.bf16.msra.mxu1 %v12386_v31  ;;  %780 = vmatpush1.bf16.msra.mxu0 %v12391_v32  ;;  %v12404_v34 = vld [vmem:[%s15176_s1 + $0x4] ss:$16 sps:$4 sm:$0xff]   ;;  %v12415_v36 = vld [vmem:[%s15176_s1] ss:$16 sps:$4 sm:$0xff]   ;;  %s12417_s16 = scalar_lea.vmem [#allocation2], %s11798_s21  ;;  %v11868_v59 = vld [vmem:[%s15178_s3 + $0x78] sm:$0xff]  }
  0x2b   : > { %647 = vmatprep.subr.bf16.mxu1 %v12397_v33  ;;  %781 = vmatprep.subr.bf16.mxu0 %v12404_v34  ;;  %v12421_v37 = vld [vmem:[%s12417_s16 + $0x8] sm:$0xff]   ;;  %v11841_v39 = vld [vmem:[%s12417_s16] sm:$0xff]   ;;  %v12483_v48 = vld [vmem:[%s12417_s16 + $0x10] sm:$0xff]   ;;  %vm12232_vm1 = vmmov 0   ;;  %vm10496_vm2 = vcmask 523264   ;;  %s10612_s13 = sshll.u32 %s10605_s27, 1 }
  0x2c   : > { %v12435_v40 = vld [vmem:[%s15176_s1 + $0xa4] ss:$16 sps:$4 sm:$0xff]   ;;  %v12440_v41 = vld [vmem:[%s15176_s1 + $0x68] ss:$16 sps:$4 sm:$0xff]   ;;  %v12445_v42 = vld [vmem:[%s15176_s1 + $0xa0] ss:$16 sps:$4 sm:$0xff]  }
  0x2d   : > { %v12450_v43 = vld [vmem:[%s15176_s1 + $0x4c] ss:$16 sps:$4 sm:$0xff]   ;;  %v12458_v44 = vld [vmem:[%s15176_s1 + $0x84] ss:$16 sps:$4 sm:$0xff]   ;;  %v12465_v45 = vld [vmem:[%s15176_s1 + $0x48] ss:$16 sps:$4 sm:$0xff]  }
  0x2e   : > { %648 = vmatpush1.bf16.msra.mxu1 %v12409_v35  ;;  %782 = vmatpush1.bf16.msra.mxu0 %v12415_v36  ;;  %v12470_v46 = vld [vmem:[%s15176_s1 + $0x80] ss:$16 sps:$4 sm:$0xff]   ;;  %v12477_v47 = vld [vmem:[%s15176_s1 + $0x2c] ss:$16 sps:$4 sm:$0xff]   ;;  %v12489_v49 = vld [vmem:[%s15176_s1 + $0x28] ss:$16 sps:$4 sm:$0xff]  }
  0x2f   : > { %688 = vmatprep.subr.bf16.mxu1 %v12426_v38  ;;  %913 = vmatprep.subr.bf16.mxu0 %v12435_v40  ;;  %v12496_v50 = vld [vmem:[%s15176_s1 + $0xc] ss:$16 sps:$4 sm:$0xff]   ;;  %v12507_v51 = vld [vmem:[%s15176_s1 + $0x8] ss:$16 sps:$4 sm:$0xff]   ;;  %v11866_v57 = vld [vmem:[%s12417_s16 + $0x20] sm:$0xff]   ;;  %p540_p8 = scmp.lt.s32.totalorder %s10612_s13, 3 }
  0x30   : > { %v12514_v52 = vld [vmem:[%s15176_s1 + $0xac] ss:$16 sps:$4 sm:$0xff]   ;;  %v12521_v53 = vld [vmem:[%s15176_s1 + $0xa8] ss:$16 sps:$4 sm:$0xff]   ;;  %v11870_v61 = vld [vmem:[%s15178_s3 + $0x70] sm:$0xff]  }
  0x31   : > { %10645 = vmatmul.mubr.msk.bf16.vlgmr.msra.gmra.mxu1 %vm629_vm0, %v12421_v37  ;;  %10656 = vmatmul.mubr.msk.bf16.vlgmr.msra.gmra.mxu0 %vm629_vm0, %v11841_v39  ;;  %v12527_v54 = vld [vmem:[%s15176_s1 + $0x8c] ss:$16 sps:$4 sm:$0xff]   ;;  %v12536_v55 = vld [vmem:[%s15176_s1 + $0x88] ss:$16 sps:$4 sm:$0xff]   ;;  %v11871_v62 = vld [vmem:[%s15178_s3 + $0x30] sm:$0xff]   ;;  %s15729_s13 = smov (!%p540_p8, %s10612_s13), 3 }
  0x32   : > { %689 = vmatpush1.bf16.msra.mxu1 %v12440_v41  ;;  %914 = vmatpush1.bf16.msra.mxu0 %v12445_v42  ;;  %v12561_v56 = vld [vmem:[%s12417_s16 + $0x18] sm:$0xff]   ;;  %v12646_v58 = vld [vmem:[%s12417_s16 + $0x28] sm:$0xff]   ;;  %v11874_v1 = vld [vmem:[%s15178_s3 + $0x60] sm:$0xff]   ;;  %s10613_s14 = sshll.u32 %s15729_s13, 3 }
  0x33   : > { %690 = vmatprep.subr.bf16.mxu1 %v12450_v43  ;;  %915 = vmatprep.subr.bf16.mxu0 %v12458_v44  ;;  %v11869_v60 = vld [vmem:[%s15178_s3 + $0x38] sm:$0xff]   ;;  %v11872_v63 = vld [vmem:[%s15178_s3 + $0x68] sm:$0xff]   ;;  %v11875_v2 = vld [vmem:[%s15178_s3 + $0x20] sm:$0xff]  }
  0x34   : > { %708 = vmatprep.mubr.bf16.mxu1 %v15183_v30  ;;  %933 = vmatprep.mubr.bf16.mxu0 %v15183_v30  ;;  %v11873_v0 = vld [vmem:[%s15178_s3 + $0x28] sm:$0xff]   ;;  %v11876_v3 = vld [vmem:[%s15178_s3 + $0x58] sm:$0xff]   ;;  %v11878_v5 = vld [vmem:[%s15178_s3 + $0x50] sm:$0xff]  }
  0x35   : > { %v11877_v4 = vld [vmem:[%s15178_s3 + $0x18] sm:$0xff]   ;;  %v11879_v6 = vld [vmem:[%s15178_s3 + $0x10] sm:$0xff]   ;;  %v11880_v7 = vld [vmem:[%s15178_s3 + $0x48] sm:$0xff]  }
  0x36   : > { %691 = vmatpush1.bf16.msra.mxu1 %v12465_v45  ;;  %916 = vmatpush1.bf16.msra.mxu0 %v12470_v46  ;;  %v11881_v8 = vld [vmem:[%s15178_s3 + $0x8] sm:$0xff]   ;;  %v11882_v9 = vld [vmem:[%s15178_s3 + $0x40] sm:$0xff]   ;;  %v11884_v12 = vld [vmem:[%s15178_s3 + $0xf8] sm:$0xff]  }
  0x37   : > { %822 = vmatprep.subr.bf16.mxu1 %v12477_v47  ;;  %1007 = vmatprep.subr.bf16.mxu0 %v12372_v28  ;;  %v11883_v10 = vld [vmem:[%s15178_s3] sm:$0xff]   ;;  %v12719_v11 = vld [vmem:[%s15176_s1 + $0x6c] ss:$16 sps:$4 sm:$0xff]   ;;  %v11886_v14 = vld [vmem:[%s15178_s3 + $0xf0] sm:$0xff]  }
  0x38   : > { %v11885_v13 = vld [vmem:[%s15178_s3 + $0xb8] sm:$0xff]   ;;  %v11887_v15 = vld [vmem:[%s15178_s3 + $0xb0] sm:$0xff]   ;;  %v11888_v16 = vld [vmem:[%s15178_s3 + $0xe8] sm:$0xff]  }
  0x39   : > { %10646 = vmatmul.mubr.msk.bf16.vlgmr.msra.gmra.mxu1 %vm629_vm0, %v12421_v37  ;;  %10667 = vmatmul.mubr.msk.bf16.vlgmr.msra.gmra.mxu0 %vm629_vm0, %v12483_v48  ;;  %v11889_v17 = vld [vmem:[%s15178_s3 + $0xa8] sm:$0xff]   ;;  %v11890_v18 = vld [vmem:[%s15178_s3 + $0xe0] sm:$0xff]   ;;  %v11893_v20 = vld [vmem:[%s15178_s3 + $0xd8] sm:$0xff]  }
  0x3a   : > { %823 = vmatpush1.bf16.msra.mxu1 %v12489_v49  ;;  %1008 = vmatpush1.bf16.msra.mxu0 %v12386_v31  ;;  %v11891_v19 = vld [vmem:[%s15178_s3 + $0xa0] sm:$0xff]   ;;  %v11894_v21 = vld [vmem:[%s15178_s3 + $0x98] sm:$0xff]   ;;  %v11895_v22 = vld [vmem:[%s15178_s3 + $0xd0] sm:$0xff]  }
  0x3b   : > { %824 = vmatprep.subr.bf16.mxu1 %v12496_v50  ;;  %1009 = vmatprep.subr.bf16.mxu0 %v12397_v33  ;;  %v11896_v23 = vld [vmem:[%s15178_s3 + $0x90] sm:$0xff]   ;;  %v11897_v24 = vld [vmem:[%s15178_s3 + $0xc8] sm:$0xff]   ;;  %v11899_v26 = vld [vmem:[%s15178_s3 + $0xc0] sm:$0xff]  }
  0x3c   : > { %842 = vmatprep.mubr.bf16.mxu1 %v15183_v30  ;;  %1027 = vmatprep.mubr.bf16.mxu0 %v15183_v30  ;;  %v11898_v25 = vld [vmem:[%s15178_s3 + $0x88] sm:$0xff]   ;;  %v11900_v27 = vld [vmem:[%s15178_s3 + $0x80] sm:$0xff]  }
  0x3e   : > { %825 = vmatpush1.bf16.msra.mxu1 %v12507_v51  ;;  %1010 = vmatpush1.bf16.msra.mxu0 %v12409_v35 }
  0x3f   : > { %956 = vmatprep.subr.bf16.mxu1 %v12514_v52  ;;  %1093 = vmatprep.subr.bf16.mxu0 %v12378_v29 }
  0x41   : > { %10657 = vmatmul.mubr.msk.bf16.vlgmr.msra.gmra.mxu1 %vm629_vm0, %v11841_v39  ;;  %10669 = vmatmul.mubr.msk.bf16.vlgmr.msra.gmra.mxu0 %vm629_vm0, %v12483_v48 }
  0x42   : > { %957 = vmatpush1.bf16.msra.mxu1 %v12521_v53  ;;  %1094 = vmatpush1.bf16.msra.mxu0 %v12391_v32 }
  0x43   : > { %958 = vmatprep.subr.bf16.mxu1 %v12527_v54  ;;  %1095 = vmatprep.subr.bf16.mxu0 %v12404_v34 }
  0x44   : > { %976 = vmatprep.mubr.bf16.mxu1 %v15183_v30  ;;  %1113 = vmatprep.mubr.bf16.mxu0 %v15183_v30 }
  0x46   : > { %959 = vmatpush1.bf16.msra.mxu1 %v12536_v55  ;;  %1096 = vmatpush1.bf16.msra.mxu0 %v12415_v36 }
  0x47   : > { %1050 = vmatprep.subr.bf16.mxu1 %v12426_v38  ;;  %1187 = vmatprep.subr.bf16.mxu0 %v12435_v40 }
  0x49   : > { %10668 = vmatmul.mubr.msk.bf16.vlgmr.msra.gmra.mxu1 %vm629_vm0, %v12483_v48  ;;  %10671 = vmatmul.mubr.msk.bf16.vlgmr.msra.gmra.mxu0 %vm629_vm0, %v12421_v37 }
  0x4a   : > { %1051 = vmatpush1.bf16.msra.mxu1 %v12440_v41  ;;  %1188 = vmatpush1.bf16.msra.mxu0 %v12445_v42 }
  0x4b   : > { %1052 = vmatprep.subr.bf16.mxu1 %v12450_v43  ;;  %1189 = vmatprep.subr.bf16.mxu0 %v12458_v44 }
  0x4c   : > { %1070 = vmatprep.mubr.bf16.mxu1 %v15183_v30  ;;  %1207 = vmatprep.mubr.bf16.mxu0 %v15183_v30 }
  0x4e   : > { %1053 = vmatpush1.bf16.msra.mxu1 %v12465_v45  ;;  %1190 = vmatpush1.bf16.msra.mxu0 %v12470_v46 }
  0x4f   : > { %1136 = vmatprep.subr.bf16.mxu1 %v12477_v47  ;;  %1352 = vmatprep.subr.bf16.mxu0 %v12372_v28 }
  0x51   : > { %10670 = vmatmul.mubr.msk.bf16.vlgmr.msra.gmra.mxu1 %vm629_vm0, %v12483_v48  ;;  %10674 = vmatmul.mubr.msk.bf16.vlgmr.msra.gmra.mxu0 %vm629_vm0, %v12561_v56 }
  0x52   : > { %1137 = vmatpush1.bf16.msra.mxu1 %v12489_v49  ;;  %1353 = vmatpush1.bf16.msra.mxu0 %v12386_v31 }
  0x53   : > { %1138 = vmatprep.subr.bf16.mxu1 %v12496_v50  ;;  %1354 = vmatprep.subr.bf16.mxu0 %v12397_v33 }
  0x54   : > { %1156 = vmatprep.mubr.bf16.mxu1 %v15183_v30  ;;  %1372 = vmatprep.mubr.bf16.mxu0 %v15183_v30 }
  0x56   : > { %1139 = vmatpush1.bf16.msra.mxu1 %v12507_v51  ;;  %1355 = vmatpush1.bf16.msra.mxu0 %v12409_v35 }
  0x57   : > { %1230 = vmatprep.subr.bf16.mxu1 %v12514_v52  ;;  %1438 = vmatprep.subr.bf16.mxu0 %v12378_v29 }
  0x59   : > { %10672 = vmatmul.mubr.msk.bf16.vlgmr.msra.gmra.mxu1 %vm629_vm0, %v12421_v37  ;;  %10680 = vmatmul.mubr.msk.bf16.vlgmr.msra.gmra.mxu0 %vm629_vm0, %v12561_v56 }
  0x5a   : > { %1231 = vmatpush1.bf16.msra.mxu1 %v12521_v53  ;;  %1439 = vmatpush1.bf16.msra.mxu0 %v12391_v32 }
  0x5b   : > { %1232 = vmatprep.subr.bf16.mxu1 %v12527_v54  ;;  %1440 = vmatprep.subr.bf16.mxu0 %v12404_v34 }
  0x5c   : > { %1250 = vmatprep.mubr.bf16.mxu1 %v15183_v30  ;;  %1458 = vmatprep.mubr.bf16.mxu0 %v15183_v30 }
  0x5e   : > { %1233 = vmatpush1.bf16.msra.mxu1 %v12536_v55  ;;  %1441 = vmatpush1.bf16.msra.mxu0 %v12415_v36 }
  0x5f   : > { %1395 = vmatprep.subr.bf16.mxu1 %v12426_v38  ;;  %1532 = vmatprep.subr.bf16.mxu0 %v12435_v40 }
  0x61   : > { %10675 = vmatmul.mubr.msk.bf16.vlgmr.msra.gmra.mxu1 %vm629_vm0, %v12561_v56  ;;  %10682 = vmatmul.mubr.msk.bf16.vlgmr.msra.gmra.mxu0 %vm629_vm0, %v12483_v48 }
  0x62   : > { %1396 = vmatpush1.bf16.msra.mxu1 %v12440_v41  ;;  %1533 = vmatpush1.bf16.msra.mxu0 %v12445_v42 }
  0x63   : > { %1397 = vmatprep.subr.bf16.mxu1 %v12450_v43  ;;  %1534 = vmatprep.subr.bf16.mxu0 %v12458_v44 }
  0x64   : > { %1415 = vmatprep.mubr.bf16.mxu1 %v15183_v30  ;;  %1552 = vmatprep.mubr.bf16.mxu0 %v15183_v30 }
  0x66   : > { %1398 = vmatpush1.bf16.msra.mxu1 %v12465_v45  ;;  %1535 = vmatpush1.bf16.msra.mxu0 %v12470_v46 }
  0x67   : > { %1481 = vmatprep.subr.bf16.mxu1 %v12477_v47  ;;  %1626 = vmatprep.subr.bf16.mxu0 %v12372_v28  ;;  %v12773_v28 = vld [vmem:[%s15176_s1 + $0x64] ss:$16 sps:$4 sm:$0xff]  }
  0x68   : > { %15424 = vst [vmem:[#allocation3_spill] sm:$0xff] %v12773_v28 }
  0x69   : > { %10681 = vmatmul.mubr.msk.bf16.vlgmr.msra.gmra.mxu1 %vm629_vm0, %v12561_v56  ;;  %10685 = vmatmul.mubr.msk.bf16.vlgmr.msra.gmra.mxu0 %vm629_vm0, %v11866_v57 }
  0x6a   : > { %1482 = vmatpush1.bf16.msra.mxu1 %v12489_v49  ;;  %1627 = vmatpush1.bf16.msra.mxu0 %v12386_v31 }
  0x6b   : > { %1483 = vmatprep.subr.bf16.mxu1 %v12496_v50  ;;  %1628 = vmatprep.subr.bf16.mxu0 %v12397_v33 }
  0x6c   : > { %1501 = vmatprep.mubr.bf16.mxu1 %v15183_v30  ;;  %1646 = vmatprep.mubr.bf16.mxu0 %v15183_v30 }
  0x6e   : > { %1484 = vmatpush1.bf16.msra.mxu1 %v12507_v51  ;;  %1629 = vmatpush1.bf16.msra.mxu0 %v12409_v35 }
  0x6f   : > { %1575 = vmatprep.subr.bf16.mxu1 %v12514_v52  ;;  %1712 = vmatprep.subr.bf16.mxu0 %v12378_v29 }
  0x71   : > { %10683 = vmatmul.mubr.msk.bf16.vlgmr.msra.gmra.mxu1 %vm629_vm0, %v12483_v48  ;;  %10687 = vmatmul.mubr.msk.bf16.vlgmr.msra.gmra.mxu0 %vm629_vm0, %v11866_v57 }
  0x72   : > { %1576 = vmatpush1.bf16.msra.mxu1 %v12521_v53  ;;  %1713 = vmatpush1.bf16.msra.mxu0 %v12391_v32 }
  0x73   : > { %1577 = vmatprep.subr.bf16.mxu1 %v12527_v54  ;;  %1714 = vmatprep.subr.bf16.mxu0 %v12404_v34 }
  0x74   : > { %1595 = vmatprep.mubr.bf16.mxu1 %v15183_v30  ;;  %1732 = vmatprep.mubr.bf16.mxu0 %v15183_v30 }
  0x76   : > { %1578 = vmatpush1.bf16.msra.mxu1 %v12536_v55  ;;  %1715 = vmatpush1.bf16.msra.mxu0 %v12415_v36 }
  0x77   : > { %1669 = vmatprep.subr.bf16.mxu1 %v12426_v38  ;;  %1806 = vmatprep.subr.bf16.mxu0 %v12435_v40 }
  0x79   : > { %10686 = vmatmul.mubr.msk.bf16.vlgmr.msra.gmra.mxu1 %vm629_vm0, %v11866_v57  ;;  %10689 = vmatmul.mubr.msk.bf16.vlgmr.msra.gmra.mxu0 %vm629_vm0, %v12561_v56 }
  0x7a   : > { %1670 = vmatpush1.bf16.msra.mxu1 %v12440_v41  ;;  %1807 = vmatpush1.bf16.msra.mxu0 %v12445_v42 }
  0x7b   : > { %1671 = vmatprep.subr.bf16.mxu1 %v12450_v43  ;;  %1808 = vmatprep.subr.bf16.mxu0 %v12458_v44 }
  0x7c   : > { %1689 = vmatprep.mubr.bf16.mxu1 %v15183_v30  ;;  %1826 = vmatprep.mubr.bf16.mxu0 %v15183_v30 }
  0x7e   : > { %1672 = vmatpush1.bf16.msra.mxu1 %v12465_v45  ;;  %1809 = vmatpush1.bf16.msra.mxu0 %v12470_v46 }
  0x7f   : > { %1755 = vmatprep.subr.bf16.mxu1 %v12477_v47  ;;  %11494 = vmatprep.subr.bf16.mxu0 %v11884_v12 }
  0x81   : > { %10688 = vmatmul.mubr.msk.bf16.vlgmr.msra.gmra.mxu1 %vm629_vm0, %v11866_v57  ;;  %10692 = vmatmul.mubr.msk.bf16.vlgmr.msra.gmra.mxu0 %vm629_vm0, %v12646_v58 }
  0x82   : > { %1756 = vmatpush1.bf16.msra.mxu1 %v12489_v49  ;;  %1775 = vmatprep.mubr.bf16.mxu1 %v15183_v30 }
  0x83   : > { %1757 = vmatprep.subr.bf16.mxu1 %v12496_v50  ;;  %11495 = vmatpush3.bf16.msra.mxu0 %v11885_v13 }
  0x84   : > { %11496 = vmatprep.subr.bf16.mxu0 %v11886_v14 }
  0x86   : > { %1758 = vmatpush1.bf16.msra.mxu1 %v12507_v51 }
  0x87   : > { %1849 = vmatprep.subr.bf16.mxu1 %v12514_v52  ;;  %11497 = vmatpush3.bf16.msra.mxu0 %v11887_v15 }
  0x88   : > { %11498 = vmatprep.subr.bf16.mxu0 %v11888_v16 }
  0x89   : > { %10690 = vmatmul.mubr.msk.bf16.vlgmr.msra.gmra.mxu1 %vm629_vm0, %v12561_v56 }
  0x8a   : > { %1850 = vmatpush1.bf16.msra.mxu1 %v12521_v53  ;;  %1869 = vmatprep.mubr.bf16.mxu1 %v15183_v30 }
  0x8b   : > { %1851 = vmatprep.subr.bf16.mxu1 %v12527_v54  ;;  %11499 = vmatpush3.bf16.msra.mxu0 %v11889_v17 }
  0x8c   : > { %11500 = vmatprep.subr.bf16.mxu0 %v11890_v18 }
  0x8e   : > { %1852 = vmatpush1.bf16.msra.mxu1 %v12536_v55 }
  0x8f   : > { %11516 = vmatprep.subr.bf16.mxu1 %v11868_v59  ;;  %11501 = vmatpush3.bf16.msra.mxu0 %v11891_v19 }
  0x90   : > { %11502 = vmatprep.subr.bf16.mxu0 %v11893_v20 }
  0x91   : > { %10693 = vmatmul.mubr.msk.bf16.vlgmr.msra.gmra.mxu1 %vm629_vm0, %v12646_v58 }
  0x92   : > { %11517 = vmatpush3.bf16.msra.mxu1 %v11869_v60 }
  0x93   : > { %11518 = vmatprep.subr.bf16.mxu1 %v11870_v61  ;;  %11503 = vmatpush3.bf16.msra.mxu0 %v11894_v21 }
  0x94   : > { %11504 = vmatprep.subr.bf16.mxu0 %v11895_v22 }
  0x96   : > { %11519 = vmatpush3.bf16.msra.mxu1 %v11871_v62 }
  0x97   : > { %11520 = vmatprep.subr.bf16.mxu1 %v11872_v63  ;;  %11505 = vmatpush3.bf16.msra.mxu0 %v11896_v23 }
  0x98   : > { %11506 = vmatprep.subr.bf16.mxu0 %v11897_v24 }
  0x9a   : > { %11521 = vmatpush3.bf16.msra.mxu1 %v11873_v0 }
  0x9b   : > { %11522 = vmatprep.subr.bf16.mxu1 %v11874_v1  ;;  %11507 = vmatpush3.bf16.msra.mxu0 %v11898_v25 }
  0x9c   : > { %11508 = vmatprep.subr.bf16.mxu0 %v11899_v26 }
  0x9e   : > { %11523 = vmatpush3.bf16.msra.mxu1 %v11875_v2 }
  0x9f   : > { %11524 = vmatprep.subr.bf16.mxu1 %v11876_v3  ;;  %11509 = vmatpush3.bf16.msra.mxu0 %v11900_v27 }
  0xa0   : > { %2235 = vmatprep.subr.bf16.mxu0 %v12773_v28 }
  0xa2   : > { %11525 = vmatpush3.bf16.msra.mxu1 %v11877_v4 }
  0xa3   : > { %11526 = vmatprep.subr.bf16.mxu1 %v11878_v5 }
  0xa6   : > { %11527 = vmatpush3.bf16.msra.mxu1 %v11879_v6  ;;  %v1282_v6 = vlaneseq }
  0xa7   : > { %11528 = vmatprep.subr.bf16.mxu1 %v11880_v7 }
  0xa8   : > { %v1283_v12 = vshrl.u32 %v1282_v6, 7 }
  0xaa   : > { %11529 = vmatpush3.bf16.msra.mxu1 %v11881_v8  ;;  %v1284_v21 = vsub.s32 0, %v1283_v12  ;;  %v1288_v22 = vsub.s32 1, %v1283_v12 }
  0xab   : > { %11530 = vmatprep.subr.bf16.mxu1 %v11882_v9 }
  0xae   : > { %11531 = vmatpush3.bf16.msra.mxu1 %v11883_v10 }
  0xaf   : > { %2278 = vmatprep.subr.bf16.mxu1 %v12719_v11 }
  0xf1   : > { %v667_v29 = vpop.f32.mrf.mxu1  ;;  %v801_v31 = vpop.f32.mrf.mxu0 }
  0xf2   : > { %v802_v16 = vadd.f32 %v801_v31, %v667_v29 }
  0xf3   : > { %v669_v32 = vpop.f32.mrf.mxu1  ;;  %v803_v33 = vpop.f32.mrf.mxu0 }
  0xf4   : > { %v804_v18 = vadd.f32 %v803_v33, %v669_v32 }
  0xf5   : > { %v671_v34 = vpop.f32.mrf.mxu1  ;;  %v805_v35 = vpop.f32.mrf.mxu0 }
  0xf6   : > { %v806_v23 = vadd.f32 %v805_v35, %v671_v34 }
  0xf7   : > { %v673_v36 = vpop.f32.mrf.mxu1  ;;  %v807_v37 = vpop.f32.mrf.mxu0 }
  0xf8   : > { %v808_v24 = vadd.f32 %v807_v37, %v673_v36 }
  0xf9   : > { %v710_v38 = vpop.f32.mrf.mxu1  ;;  %v935_v39 = vpop.f32.mrf.mxu0 }
  0xfa   : > { %v987_v25 = vadd.f32 %v935_v39, %v802_v16 }
  0xfb   : > { %v712_v40 = vpop.f32.mrf.mxu1  ;;  %v937_v41 = vpop.f32.mrf.mxu0 }
  0xfc   : > { %v988_v30 = vadd.f32 %v937_v41, %v804_v18 }
  0xfd   : > { %v714_v42 = vpop.f32.mrf.mxu1  ;;  %v939_v43 = vpop.f32.mrf.mxu0 }
  0xff   : > { %v12776_v44 = vpop.f32.mrf.mxu1  ;;  %v12778_v45 = vpop.f32.mrf.mxu0 }
 0x101   : > { %v844_v46 = vpop.f32.mrf.mxu1  ;;  %v1029_v47 = vpop.f32.mrf.mxu0 }
 0x102   : > { %v845_v6 = vadd.f32 %v844_v46, %v710_v38 }
 0x103   : > { %v846_v48 = vpop.f32.mrf.mxu1  ;;  %v1031_v49 = vpop.f32.mrf.mxu0 }
 0x104   : > { %v847_v28 = vadd.f32 %v846_v48, %v712_v40 }
 0x105   : > { %v848_v50 = vpop.f32.mrf.mxu1  ;;  %v1033_v51 = vpop.f32.mrf.mxu0 }
 0x106   : > { %v849_v33 = vadd.f32 %v848_v50, %v714_v42 }
 0x107   : > { %v850_v52 = vpop.f32.mrf.mxu1  ;;  %v1035_v53 = vpop.f32.mrf.mxu0 }
 0x108   : > { %v851_v38 = vadd.f32 %v850_v52, %v12776_v44 }
 0x109   : > { %v978_v54 = vpop.f32.mrf.mxu1  ;;  %v1115_v55 = vpop.f32.mrf.mxu0 }
 0x10a   : > { %v1116_v19 = vadd.f32 %v1115_v55, %v1029_v47  ;;  %v989_v47 = vadd.f32 %v978_v54, %v845_v6  ;;  %v992_v54 = vadd.f32 %v12778_v45, %v808_v24 }
 0x10b   : > { %v980_v56 = vpop.f32.mrf.mxu1  ;;  %v1117_v57 = vpop.f32.mrf.mxu0 }
 0x10c   : > { %v1118_v14 = vadd.f32 %v1117_v57, %v1031_v49  ;;  %v991_v57 = vadd.f32 %v939_v43, %v806_v23  ;;  %v990_v55 = vadd.f32 %v980_v56, %v847_v28  ;;  %v546_v28 = vld [vmem:[%s15177_s2] sm:$0x3] }
 0x10d   : > { %v982_v59 = vpop.f32.mrf.mxu1  ;;  %v1119_v60 = vpop.f32.mrf.mxu0  ;;  %v12799_v44 = vrot.slane %v546_v28, %v1288_v22 }
 0x10e   : > { %v1120_v29 = vadd.f32 %v1119_v60, %v1033_v51  ;;  %v993_v40 = vadd.f32 %v982_v59, %v849_v33 }
 0x10f   : > { %v984_v61 = vpop.f32.mrf.mxu1  ;;  %v1121_v62 = vpop.f32.mrf.mxu0 }
 0x110   : > { %v1122_v36 = vadd.f32 %v1121_v62, %v1035_v53  ;;  %v994_v56 = vadd.f32 %v984_v61, %v851_v38  ;;  %v12857_v38 = vld [vmem:[%s15176_s1 + $0x48] ss:$16 sps:$4 sm:$0xff]  }
 0x111   : > { %v1072_v63 = vpop.f32.mrf.mxu1  ;;  %v1209_v0 = vpop.f32.mrf.mxu0  ;;  %15430 = vst [vmem:[#allocation8_spill] sm:$0xff] %v12857_v38 }
 0x112   : > { %v1261_v34 = vadd.f32 %v1209_v0, %v1116_v19 }
 0x113   : > { %v1074_v1 = vpop.f32.mrf.mxu1  ;;  %v1211_v2 = vpop.f32.mrf.mxu0 }
 0x114   : > { %v1269_v62 = vmax.f32 %v987_v25, %v1261_v34  ;;  %v15428_v34 = vmov 0  }
 0x115   : > { %v1076_v3 = vpop.f32.mrf.mxu1  ;;  %v1213_v4 = vpop.f32.mrf.mxu0 }
 0x116   : > { %v1265_v37 = vadd.f32 %v1213_v4, %v1120_v29  ;;  %v12803_v4 = vrot.slane %v546_v28, %v1284_v21 }
 0x117   : > { %v1078_v5 = vpop.f32.mrf.mxu1  ;;  %v1215_v7 = vpop.f32.mrf.mxu0 }
 0x118   : > { %v1266_v51 = vadd.f32 %v1215_v7, %v1122_v36  ;;  %v12847_v36 = vld [vmem:[%s15176_s1 + $0x4c] ss:$16 sps:$4 sm:$0xff]  }
 0x119   : > { %v1158_v8 = vpop.f32.mrf.mxu1  ;;  %v12780_v9 = vpop.f32.mrf.mxu0  ;;  %15429 = vst [vmem:[#allocation7_spill] sm:$0xff] %v12847_v36 }
 0x11a   : > { %v1159_v26 = vadd.f32 %v1158_v8, %v1072_v63  ;;  %v1274_v7 = vmax.f32 %v992_v54, %v1266_v51  ;;  %v12890_v54 = vld [vmem:[%s15176_s1 + $0x8] ss:$16 sps:$4 sm:$0xff]  }
 0x11b   : > { %v1160_v10 = vpop.f32.mrf.mxu1  ;;  %v12782_v13 = vpop.f32.mrf.mxu0  ;;  %15434 = vst [vmem:[#allocation12_spill] sm:$0xff] %v12890_v54 }
 0x11c   : > { %15425 = vst [vmem:[#allocation4_spill] sm:$0xff] %v12782_v13  ;;  %v1262_v13 = vadd.f32 %v1211_v2, %v1118_v14  ;;  %v1161_v31 = vadd.f32 %v1160_v10, %v1074_v1 }
 0x11d   : > { %v1162_v15 = vpop.f32.mrf.mxu1  ;;  %v12784_v17 = vpop.f32.mrf.mxu0 }
 0x11e   : > { %15426 = vst [vmem:[#allocation5_spill] sm:$0xff] %v12784_v17  ;;  %v1163_v39 = vadd.f32 %v1162_v15, %v1076_v3  ;;  %v1270_v43 = vmax.f32 %v988_v30, %v1262_v13  ;;  %v1273_v30 = vmax.f32 %v991_v57, %v1265_v37 }
 0x11f   : > { %v1164_v20 = vpop.f32.mrf.mxu1  ;;  %v12786_v27 = vpop.f32.mrf.mxu0 }
 0x120   : > { %v1165_v60 = vadd.f32 %v1164_v20, %v1078_v5 }
 0x121   : > { %v1252_v49 = vpop.f32.mrf.mxu1  ;;  %v12788_v32 = vpop.f32.mrf.mxu0 }
 0x122   : > { %v1263_v17 = vadd.f32 %v1252_v49, %v1159_v26 }
 0x123   : > { %v1254_v35 = vpop.f32.mrf.mxu1  ;;  %v12790_v41 = vpop.f32.mrf.mxu0 }
 0x124   : > { %v1264_v63 = vadd.f32 %v1254_v35, %v1161_v31  ;;  %v1271_v46 = vmax.f32 %v989_v47, %v1263_v17 }
 0x125   : > { %v1256_v48 = vpop.f32.mrf.mxu1  ;;  %v12796_v53 = vpop.f32.mrf.mxu0 }
 0x126   : > { %v1272_v42 = vmax.f32 %v990_v55, %v1264_v63  ;;  %v1267_v50 = vadd.f32 %v1256_v48, %v1163_v39  ;;  %v1277_v3 = vmax.f32 %v1269_v62, %v1271_v46  ;;  %v12838_v55 = vld [vmem:[%s15176_s1 + $0x68] ss:$16 sps:$4 sm:$0xff]   ;;  %v12896_v62 = vld [vmem:[%s15176_s1 + $0xac] ss:$16 sps:$4 sm:$0xff]  }
 0x127   : > { %v1258_v0 = vpop.f32.mrf.mxu1  ;;  %v12801_v2 = vpop.f32.mrf.mxu0  ;;  %15427 = vst [vmem:[#allocation6_spill] sm:$0xff] %v12838_v55  ;;  %15435 = vst [vmem:[#allocation13_spill] sm:$0xff] %v12896_v62 }
 0x128   : > { %v1278_v52 = vmax.f32 %v1270_v43, %v1272_v42  ;;  %v1275_v59 = vmax.f32 %v993_v40, %v1267_v50  ;;  %v1268_v1 = vadd.f32 %v1258_v0, %v1165_v60  ;;  %v1292_v16 = vadd.f32 %v12803_v4, %v1277_v3  ;;  %v12865_v43 = vld [vmem:[%s15176_s1 + $0x2c] ss:$16 sps:$4 sm:$0xff]   ;;  %v12875_v60 = vld [vmem:[%s15176_s1 + $0x28] ss:$16 sps:$4 sm:$0xff]  }
 0x129   : > { %v12805_v5 = vpop.f32.mrf.mxu1  ;;  %v12807_v45 = vpop.f32.mrf.mxu0  ;;  %15431 = vst [vmem:[#allocation9_spill] sm:$0xff] %v12865_v43  ;;  %15432 = vst [vmem:[#allocation10_spill] sm:$0xff] %v12875_v60  ;;  %v12884_v42 = vld [vmem:[%s15176_s1 + $0xc] ss:$16 sps:$4 sm:$0xff]  }
 0x12a   : > { %v1279_v8 = vmax.f32 %v1273_v30, %v1275_v59  ;;  %v1276_v10 = vmax.f32 %v994_v56, %v1268_v1  ;;  %v1293_v15 = vadd.f32 %v12799_v44, %v1278_v52  ;;  %v1296_v25 = vmax.f32 %v1292_v16, 0.0  ;;  %15433 = vst [vmem:[#allocation11_spill] sm:$0xff] %v12884_v42  ;;  %v12900_v30 = vld [vmem:[%s12417_s16 + $0x20] sm:$0xff]   ;;  %v12907_v59 = vld [vmem:[%s15176_s1 + $0xa8] ss:$16 sps:$4 sm:$0xff]  }
 0x12b   : > { %v12809_v61 = vpop.f32.mrf.mxu1  ;;  %v12812_v14 = vpop.f32.mrf.mxu0  ;;  %15436 = vst [vmem:[#allocation14_spill] sm:$0xff] %v12900_v30  ;;  %15437 = vst [vmem:[#allocation15_spill] sm:$0xff] %v12907_v59  ;;  %v12914_v3 = vld [vmem:[%s15176_s1 + $0x8c] ss:$16 sps:$4 sm:$0xff]  }
 0x12c   : > { %v1294_v12 = vadd.f32 %v12803_v4, %v1279_v8  ;;  %v1280_v13 = vmax.f32 %v1274_v7, %v1276_v10  ;;  %v1297_v23 = vmax.f32 %v1293_v15, 0.0  ;;  %15438 = vst [vmem:[#allocation16_spill] sm:$0xff] %v12914_v3  ;;  %v12918_v8 = vld [vmem:[%s12417_s16 + $0x30] sm:$0xff]   ;;  %v1461_v15 = vadd.f32 %v12788_v32, %v12780_v9  ;;  %v15440_v16 = vld [vmem:[#allocation4_spill] sm:$0xff] }
 0x12d   : > { %v12816_v17 = vpop.f32.mrf.mxu1  ;;  %v12818_v18 = vpop.f32.mrf.mxu0  ;;  %v1467_v9 = vadd.f32 %v12801_v2, %v12786_v27 }
 0x12e   : > { %v1295_v19 = vadd.f32 %v12799_v44, %v1280_v13  ;;  %v1298_v20 = vmax.f32 %v1294_v12, 0.0  ;;  %v12923_v12 = vld [vmem:[%s15176_s1 + $0x88] ss:$16 sps:$4 sm:$0xff]   ;;  %v1606_v32 = vadd.f32 %v12807_v45, %v1461_v15 }
 0x12f   : > { %v12821_v21 = vpop.f32.mrf.mxu1  ;;  %v12823_v22 = vpop.f32.mrf.mxu0  ;;  %15439 = vst [vmem:[#allocation17_spill] sm:$0xff] %v12923_v12 }
 0x130   : > { %v1299_v24 = vmax.f32 %v1295_v19, 0.0  ;;  %v1300_v29 = vpack.c.bf16 %v1298_v20, %v1296_v25  ;;  %v1463_v19 = vadd.f32 %v12790_v41, %v15440_v16  ;;  %v15441_v25 = vld [vmem:[#allocation5_spill] sm:$0xff] }
 0x131   : > { %v12825_v26 = vpop.f32.mrf.mxu1  ;;  %v12827_v6 = vpop.f32.mrf.mxu0 }
 0x132   : > { %v1301_v49 = vpack.c.bf16 %v1299_v24, %v1297_v23  ;;  %v1607_v41 = vadd.f32 %v12812_v14, %v1463_v19  ;;  %v1504_v16 = vadd.f32 %v12825_v26, %v12805_v5 }
 0x133   : > { %v12829_v57 = vpop.f32.mrf.mxu1  ;;  %v1650_v31 = vpop.f32.mrf.mxu0 }
 0x134   : > { %2208 = vmatprep.mubr.bf16.mxu1 %v1301_v49  ;;  %v1465_v49 = vadd.f32 %v12796_v53, %v15441_v25  ;;  %v1506_v53 = vadd.f32 %v12829_v57, %v12809_v61 }
 0x135   : > { %v12831_v33 = vpop.f32.mrf.mxu1  ;;  %2209 = vmatmul.mubr.bf16.vlgmr.msra.gmra.mxu1 %v1300_v29  ;;  %v12833_v47 = vpop.f32.mrf.mxu0 }
 0x136   : > { %2279 = vmatpush1.bf16.msra.mxu1 %v12838_v55  ;;  %2298 = vmatprep.mubr.bf16.mxu1 %v15428_v34  ;;  %v1508_v25 = vadd.f32 %v12831_v33, %v12816_v17 }
 0x137   : > { %v12842_v35 = vpop.f32.mrf.mxu1  ;;  %2280 = vmatprep.subr.bf16.mxu1 %v12847_v36  ;;  %v12850_v37 = vpop.f32.mrf.mxu0 }
 0x138   : > { %v1510_v14 = vadd.f32 %v12842_v35, %v12821_v21 }
 0x139   : > { %v12852_v39 = vpop.f32.mrf.mxu1  ;;  %v1734_v63 = vpop.f32.mrf.mxu0 }
 0x13a   : > { %2281 = vmatpush1.bf16.msra.mxu1 %v12857_v38  ;;  %v1735_v29 = vadd.f32 %v1734_v63, %v12827_v6  ;;  %v1608_v5 = vadd.f32 %v12852_v39, %v1504_v16  ;;  %v1611_v39 = vadd.f32 %v12823_v22, %v1467_v9  ;;  %v12981_v16 = vld [vmem:[%s12417_s16 + $0x38] sm:$0xff]  }
 0x13b   : > { %v12860_v40 = vpop.f32.mrf.mxu1  ;;  %2364 = vmatprep.subr.bf16.mxu1 %v12865_v43  ;;  %v1736_v46 = vpop.f32.mrf.mxu0  ;;  %15442 = vst [vmem:[#allocation4_spill] sm:$0xff] %v12981_v16 }
 0x13c   : > { %v1737_v20 = vadd.f32 %v1736_v46, %v1650_v31  ;;  %v1610_v46 = vadd.f32 %v12818_v18, %v1465_v49  ;;  %v1609_v17 = vadd.f32 %v12860_v40, %v1506_v53 }
 0x13d   : > { %v12868_v48 = vpop.f32.mrf.mxu1  ;;  %10763 = vmatmul.mubr.msk.bf16.vlgmr.msra.gmra.mxu1 %vm629_vm0, %v12646_v58  ;;  %v1738_v51 = vpop.f32.mrf.mxu0 }
 0x13e   : > { %2365 = vmatpush1.bf16.msra.mxu1 %v12875_v60  ;;  %2384 = vmatprep.mubr.bf16.mxu1 %v15428_v34  ;;  %v1739_v27 = vadd.f32 %v1738_v51, %v12833_v47  ;;  %v1612_v51 = vadd.f32 %v12868_v48, %v1508_v25  ;;  %v12990_v25 = vld [vmem:[%s15176_s1 + $0x60] ss:$16 sps:$4 sm:$0xff]  }
 0x13f   : > { %v12879_v28 = vpop.f32.mrf.mxu1  ;;  %2366 = vmatprep.subr.bf16.mxu1 %v12884_v42  ;;  %v1740_v50 = vpop.f32.mrf.mxu0  ;;  %15444 = vst [vmem:[#allocation5_spill] sm:$0xff] %v12990_v25 }
 0x140   : > { %v1741_v18 = vadd.f32 %v1740_v50, %v12850_v37  ;;  %v1613_v40 = vadd.f32 %v12879_v28, %v1510_v14  ;;  %v13029_v14 = vld [vmem:[%s15176_s1 + $0x4] ss:$16 sps:$4 sm:$0xff]  }
 0x141   : > { %v1691_v58 = vpop.f32.mrf.mxu1  ;;  %v1828_v52 = vpop.f32.mrf.mxu0  ;;  %15449 = vst [vmem:[#allocation21_spill] sm:$0xff] %v13029_v14 }
 0x142   : > { %2367 = vmatpush1.bf16.msra.mxu1 %v12890_v54  ;;  %v1880_v61 = vadd.f32 %v1828_v52, %v1735_v29  ;;  %v12972_v29 = vld [vmem:[%s12417_s16 + $0x28] sm:$0xff]  }
 0x143   : > { %v1693_v56 = vpop.f32.mrf.mxu1  ;;  %2458 = vmatprep.subr.bf16.mxu1 %v12896_v62  ;;  %v1830_v10 = vpop.f32.mrf.mxu0 }
 0x144   : > { %v1881_v6 = vadd.f32 %v1830_v10, %v1737_v20  ;;  %v1888_v50 = vmax.f32 %v1606_v32, %v1880_v61  ;;  %v15452_v61 = vld [vmem:[#allocation14_spill] sm:$0xff] }
 0x145   : > { %v1695_v0 = vpop.f32.mrf.mxu1  ;;  %10765 = vmatmul.mubr.msk.bf16.vlgmr.msra.gmra.mxu1 %vm629_vm0, %v12900_v30  ;;  %v1832_v24 = vpop.f32.mrf.mxu0 }
 0x146   : > { %2459 = vmatpush1.bf16.msra.mxu1 %v12907_v59  ;;  %2478 = vmatprep.mubr.bf16.mxu1 %v15428_v34  ;;  %v1884_v57 = vadd.f32 %v1832_v24, %v1739_v27  ;;  %v12997_v27 = vld [vmem:[%s15176_s1 + $0x44] ss:$16 sps:$4 sm:$0xff]  }
 0x147   : > { %v1697_v1 = vpop.f32.mrf.mxu1  ;;  %2460 = vmatprep.subr.bf16.mxu1 %v12914_v3  ;;  %v1834_v2 = vpop.f32.mrf.mxu0 }
 0x149   : > { %v1777_v7 = vpop.f32.mrf.mxu1 }
 0x14a   : > { %2461 = vmatpush1.bf16.msra.mxu1 %v12923_v12  ;;  %v1778_v31 = vadd.f32 %v1777_v7, %v1691_v58  ;;  %v1889_v58 = vmax.f32 %v1607_v41, %v1881_v6 }
 0x14b   : > { %v1779_v13 = vpop.f32.mrf.mxu1  ;;  %2552 = vmatprep.subr.bf16.mxu1 %v12719_v11 }
 0x14c   : > { %v1780_v45 = vadd.f32 %v1779_v13, %v1693_v56  ;;  %v1885_v56 = vadd.f32 %v1834_v2, %v1741_v18  ;;  %v13006_v2 = vld [vmem:[%s15176_s1 + $0x40] ss:$16 sps:$4 sm:$0xff]   ;;  %v13046_v18 = vld [vmem:[%s15176_s1 + $0xa4] ss:$16 sps:$4 sm:$0xff]  }
 0x14d   : > { %v1781_v23 = vpop.f32.mrf.mxu1  ;;  %10768 = vmatmul.mubr.msk.bf16.vlgmr.msra.gmra.mxu1 %vm629_vm0, %v12918_v8  ;;  %15446 = vst [vmem:[#allocation18_spill] sm:$0xff] %v13006_v2  ;;  %15451 = vst [vmem:[#allocation23_spill] sm:$0xff] %v13046_v18 }
 0x14e   : > { %2553 = vmatpush1.bf16.msra.mxu1 %v12838_v55  ;;  %2572 = vmatprep.mubr.bf16.mxu1 %v15428_v34  ;;  %v1782_v33 = vadd.f32 %v1781_v23, %v1695_v0  ;;  %v1892_v0 = vmax.f32 %v1610_v46, %v1884_v57  ;;  %v13074_v57 = vld [vmem:[%s15176_s1 + $0x80] ss:$16 sps:$4 sm:$0xff]  }
 0x14f   : > { %v1783_v30 = vpop.f32.mrf.mxu1  ;;  %2554 = vmatprep.subr.bf16.mxu1 %v12847_v36  ;;  %15454 = vst [vmem:[#allocation24_spill] sm:$0xff] %v13074_v57 }
 0x150   : > { %v1784_v21 = vadd.f32 %v1783_v30, %v1697_v1  ;;  %v1893_v1 = vmax.f32 %v1611_v39, %v1885_v56  ;;  %v11908_v56 = vld [vmem:[%s15178_s3 + $0x128] sm:$0xff]   ;;  %v11914_v39 = vld [vmem:[%s15178_s3 + $0x150] sm:$0xff]  }
 0x151   : > { %v1871_v63 = vpop.f32.mrf.mxu1 }
 0x152   : > { %v1882_v15 = vadd.f32 %v1871_v63, %v1778_v31  ;;  %2555 = vmatpush1.bf16.msra.mxu1 %v12857_v38  ;;  %v15443_v63 = vld [vmem:[#allocation3_spill] sm:$0xff] }
 0x153   : > { %v1873_v26 = vpop.f32.mrf.mxu1  ;;  %2638 = vmatprep.subr.bf16.mxu1 %v12865_v43  ;;  %15445 = vst [vmem:[#allocation3_spill] sm:$0xff] %v12997_v27 }
 0x154   : > { %v1883_v47 = vadd.f32 %v1873_v26, %v1780_v45  ;;  %v1890_v7 = vmax.f32 %v1608_v5, %v1882_v15  ;;  %v13012_v45 = vld [vmem:[%s15176_s1 + $0x24] ss:$16 sps:$4 sm:$0xff]   ;;  %v13022_v15 = vld [vmem:[%s15176_s1 + $0x20] ss:$16 sps:$4 sm:$0xff]  }
 0x155   : > { %v1875_v10 = vpop.f32.mrf.mxu1  ;;  %10770 = vmatmul.mubr.msk.bf16.vlgmr.msra.gmra.mxu1 %vm629_vm0, %v12918_v8  ;;  %15447 = vst [vmem:[#allocation19_spill] sm:$0xff] %v13012_v45  ;;  %15448 = vst [vmem:[#allocation20_spill] sm:$0xff] %v13022_v15  ;;  %v13040_v5 = vld [vmem:[%s15176_s1] ss:$16 sps:$4 sm:$0xff]  }
 0x156   : > { %v1891_v35 = vmax.f32 %v1609_v17, %v1883_v47  ;;  %v1886_v37 = vadd.f32 %v1875_v10, %v1782_v33  ;;  %2639 = vmatpush1.bf16.msra.mxu1 %v12875_v60  ;;  %2658 = vmatprep.mubr.bf16.mxu1 %v15428_v34  ;;  %v1896_v30 = vmax.f32 %v1888_v50, %v1890_v7  ;;  %v13056_v26 = vld [vmem:[%s15176_s1 + $0xa0] ss:$16 sps:$4 sm:$0xff]   ;;  %v13063_v17 = vld [vmem:[%s15176_s1 + $0x84] ss:$16 sps:$4 sm:$0xff]   ;;  %v11904_v33 = vld [vmem:[%s15178_s3 + $0x138] sm:$0xff]  }
 0x157   : > { %v1877_v48 = vpop.f32.mrf.mxu1  ;;  %2640 = vmatprep.subr.bf16.mxu1 %v12884_v42  ;;  %15450 = vst [vmem:[#allocation22_spill] sm:$0xff] %v13040_v5  ;;  %15453 = vst [vmem:[#allocation14_spill] sm:$0xff] %v13063_v17  ;;  %v11905_v47 = vld [vmem:[%s15178_s3 + $0x170] sm:$0xff]   ;;  %v11909_v7 = vld [vmem:[%s15178_s3 + $0x160] sm:$0xff]  }
 0x158   : > { %v1897_v52 = vmax.f32 %v1889_v58, %v1891_v35  ;;  %v1894_v13 = vmax.f32 %v1612_v51, %v1886_v37  ;;  %v1887_v19 = vadd.f32 %v1877_v48, %v1784_v21  ;;  %v1900_v49 = vadd.f32 %v1896_v30, %v12803_v4  ;;  %v11906_v51 = vld [vmem:[%s15178_s3 + $0x130] sm:$0xff]   ;;  %v11907_v58 = vld [vmem:[%s15178_s3 + $0x168] sm:$0xff]   ;;  %v11910_v21 = vld [vmem:[%s15178_s3 + $0x120] sm:$0xff]  }
 0x159   : > { %v13161_v10 = vld [vmem:[%s12417_s16 + $0x48] sm:$0xff]   ;;  %v11912_v35 = vld [vmem:[%s15178_s3 + $0x158] sm:$0xff]   ;;  %v11915_v50 = vld [vmem:[%s15178_s3 + $0x110] sm:$0xff]  }
 0x15a   : > { %v1898_v20 = vmax.f32 %v1892_v0, %v1894_v13  ;;  %v1895_v23 = vmax.f32 %v1613_v40, %v1887_v19  ;;  %2641 = vmatpush1.bf16.msra.mxu1 %v12890_v54  ;;  %v1901_v24 = vadd.f32 %v1897_v52, %v12799_v44  ;;  %v1904_v46 = vmax.f32 %v1900_v49, 0.0  ;;  %15456 = vst [vmem:[#allocation26_spill] sm:$0xff] %v13161_v10  ;;  %v11913_v37 = vld [vmem:[%s15178_s3 + $0x118] sm:$0xff]   ;;  %v11916_v48 = vld [vmem:[%s15178_s3 + $0x148] sm:$0xff]   ;;  %v11918_v52 = vld [vmem:[%s15178_s3 + $0x140] sm:$0xff]  }
 0x15b   : > { %2732 = vmatprep.subr.bf16.mxu1 %v12896_v62  ;;  %v13185_v40 = vld [vmem:[%s15176_s1 + $0x6c] ss:$16 sps:$4 sm:$0xff]   ;;  %v11919_v13 = vld [vmem:[%s15178_s3 + $0x100] sm:$0xff]  }
 0x15c   : > { %v1902_v22 = vadd.f32 %v1898_v20, %v12803_v4  ;;  %v1899_v28 = vmax.f32 %v1893_v1, %v1895_v23  ;;  %v1905_v41 = vmax.f32 %v1901_v24, 0.0  ;;  %15457 = vst [vmem:[#allocation27_spill] sm:$0xff] %v13185_v40  ;;  %v11917_v0 = vld [vmem:[%s15178_s3 + $0x108] sm:$0xff]  }
 0x15d   : > { %10772 = vmatmul.mubr.msk.bf16.vlgmr.msra.gmra.mxu1 %vm629_vm0, %v12972_v29 }
 0x15e   : > { %2733 = vmatpush1.bf16.msra.mxu1 %v12907_v59  ;;  %v1903_v9 = vadd.f32 %v1899_v28, %v12799_v44  ;;  %2752 = vmatprep.mubr.bf16.mxu1 %v15428_v34  ;;  %v1906_v32 = vmax.f32 %v1902_v22, 0.0 }
 0x15f   : > { %2734 = vmatprep.subr.bf16.mxu1 %v12914_v3 }
 0x160   : > { %v1907_v31 = vmax.f32 %v1903_v9, 0.0  ;;  %v1908_v6 = vpack.c.bf16 %v1906_v32, %v1904_v46 }
 0x162   : > { %v1909_v53 = vpack.c.bf16 %v1907_v31, %v1905_v41  ;;  %2735 = vmatpush1.bf16.msra.mxu1 %v12923_v12 }
 0x163   : > { %2983 = vmatprep.subr.bf16.mxu1 %v15443_v63 }
 0x164   : > { %2071 = vmatprep.mubr.bf16.mxu0 %v1909_v53 }
 0x165   : > { %2072 = vmatmul.mubr.bf16.vlgmr.msra.gmra.mxu0 %v1908_v6  ;;  %10775 = vmatmul.mubr.msk.bf16.vlgmr.msra.gmra.mxu1 %vm629_vm0, %v12981_v16 }
 0x166   : > { %2236 = vmatpush1.bf16.msra.mxu0 %v12990_v25  ;;  %2255 = vmatprep.mubr.bf16.mxu0 %v15428_v34 }
 0x167   : > { %2237 = vmatprep.subr.bf16.mxu0 %v12997_v27  ;;  %2984 = vmatpush1.bf16.msra.mxu1 %v12990_v25 }
 0x168   : > { %2985 = vmatprep.subr.bf16.mxu1 %v12997_v27  ;;  %3003 = vmatprep.mubr.bf16.mxu1 %v15428_v34 }
 0x16a   : > { %2238 = vmatpush1.bf16.msra.mxu0 %v13006_v2 }
 0x16b   : > { %2321 = vmatprep.subr.bf16.mxu0 %v13012_v45  ;;  %2986 = vmatpush1.bf16.msra.mxu1 %v13006_v2 }
 0x16c   : > { %3026 = vmatprep.subr.bf16.mxu1 %v12719_v11 }
 0x16d   : > { %10762 = vmatmul.mubr.msk.bf16.vlgmr.msra.gmra.mxu0 %vm629_vm0, %v12972_v29 }
 0x16e   : > { %2322 = vmatpush1.bf16.msra.mxu0 %v13022_v15  ;;  %2341 = vmatprep.mubr.bf16.mxu0 %v15428_v34 }
 0x16f   : > { %2323 = vmatprep.subr.bf16.mxu0 %v13029_v14  ;;  %10828 = vmatmul.mubr.msk.bf16.vlgmr.msra.gmra.mxu1 %vm629_vm0, %v12981_v16 }
 0x170   : > { %3027 = vmatpush1.bf16.msra.mxu1 %v12838_v55  ;;  %3046 = vmatprep.mubr.bf16.mxu1 %v15428_v34 }
 0x171   : > { %3028 = vmatprep.subr.bf16.mxu1 %v12847_v36 }
 0x172   : > { %2324 = vmatpush1.bf16.msra.mxu0 %v13040_v5 }
 0x173   : > { %2415 = vmatprep.subr.bf16.mxu0 %v13046_v18 }
 0x174   : > { %3029 = vmatpush1.bf16.msra.mxu1 %v12857_v38 }
 0x175   : > { %10764 = vmatmul.mubr.msk.bf16.vlgmr.msra.gmra.mxu0 %vm629_vm0, %v15452_v61  ;;  %3069 = vmatprep.subr.bf16.mxu1 %v13012_v45 }
 0x176   : > { %2416 = vmatpush1.bf16.msra.mxu0 %v13056_v26  ;;  %2435 = vmatprep.mubr.bf16.mxu0 %v15428_v34 }
 0x177   : > { %2417 = vmatprep.subr.bf16.mxu0 %v13063_v17  ;;  %10829 = vmatmul.mubr.msk.bf16.vlgmr.msra.gmra.mxu1 %vm629_vm0, %v12981_v16 }
 0x178   : > { %3070 = vmatpush1.bf16.msra.mxu1 %v13022_v15  ;;  %3089 = vmatprep.mubr.bf16.mxu1 %v15428_v34 }
 0x179   : > { %3071 = vmatprep.subr.bf16.mxu1 %v13029_v14 }
 0x17a   : > { %2418 = vmatpush1.bf16.msra.mxu0 %v13074_v57 }
 0x17b   : > { %2509 = vmatprep.subr.bf16.mxu0 %v15443_v63 }
 0x17c   : > { %3072 = vmatpush1.bf16.msra.mxu1 %v13040_v5 }
 0x17d   : > { %10767 = vmatmul.mubr.msk.bf16.vlgmr.msra.gmra.mxu0 %vm629_vm0, %v12918_v8  ;;  %3112 = vmatprep.subr.bf16.mxu1 %v12865_v43 }
 0x17e   : > { %2510 = vmatpush1.bf16.msra.mxu0 %v12990_v25  ;;  %2529 = vmatprep.mubr.bf16.mxu0 %v15428_v34 }
 0x17f   : > { %2511 = vmatprep.subr.bf16.mxu0 %v12997_v27  ;;  %10830 = vmatmul.mubr.msk.bf16.vlgmr.msra.gmra.mxu1 %vm629_vm0, %v12918_v8 }
 0x180   : > { %3113 = vmatpush1.bf16.msra.mxu1 %v12875_v60  ;;  %3132 = vmatprep.mubr.bf16.mxu1 %v15428_v34 }
 0x181   : > { %3114 = vmatprep.subr.bf16.mxu1 %v12884_v42 }
 0x182   : > { %2512 = vmatpush1.bf16.msra.mxu0 %v13006_v2 }
 0x183   : > { %2595 = vmatprep.subr.bf16.mxu0 %v13012_v45 }
 0x184   : > { %3115 = vmatpush1.bf16.msra.mxu1 %v12890_v54 }
 0x185   : > { %10769 = vmatmul.mubr.msk.bf16.vlgmr.msra.gmra.mxu0 %vm629_vm0, %v12918_v8  ;;  %3206 = vmatprep.subr.bf16.mxu1 %v12896_v62 }
 0x186   : > { %2596 = vmatpush1.bf16.msra.mxu0 %v13022_v15  ;;  %2615 = vmatprep.mubr.bf16.mxu0 %v15428_v34 }
 0x187   : > { %2597 = vmatprep.subr.bf16.mxu0 %v13029_v14  ;;  %10831 = vmatmul.mubr.msk.bf16.vlgmr.msra.gmra.mxu1 %vm629_vm0, %v12918_v8  ;;  %v13117_v8 = vld [vmem:[%s12417_s16 + $0x40] sm:$0xff]  }
 0x188   : > { %3207 = vmatpush1.bf16.msra.mxu1 %v12907_v59  ;;  %3226 = vmatprep.mubr.bf16.mxu1 %v15428_v34  ;;  %15455 = vst [vmem:[#allocation25_spill] sm:$0xff] %v13117_v8 }
 0x189   : > { %3208 = vmatprep.subr.bf16.mxu1 %v12914_v3 }
 0x18a   : > { %2598 = vmatpush1.bf16.msra.mxu0 %v13040_v5 }
 0x18b   : > { %2689 = vmatprep.subr.bf16.mxu0 %v13046_v18 }
 0x18c   : > { %3209 = vmatpush1.bf16.msra.mxu1 %v12923_v12 }
 0x18d   : > { %10771 = vmatmul.mubr.msk.bf16.vlgmr.msra.gmra.mxu0 %vm629_vm0, %v12972_v29  ;;  %3300 = vmatprep.subr.bf16.mxu1 %v12719_v11  ;;  %v11903_v11 = vld [vmem:[%s15178_s3 + $0x178] sm:$0xff]  }
 0x18e   : > { %2690 = vmatpush1.bf16.msra.mxu0 %v13056_v26  ;;  %2709 = vmatprep.mubr.bf16.mxu0 %v15428_v34 }
 0x18f   : > { %2691 = vmatprep.subr.bf16.mxu0 %v13063_v17  ;;  %10834 = vmatmul.mubr.msk.bf16.vlgmr.msra.gmra.mxu1 %vm629_vm0, %v13117_v8 }
 0x190   : > { %3301 = vmatpush1.bf16.msra.mxu1 %v12838_v55  ;;  %3320 = vmatprep.mubr.bf16.mxu1 %v15428_v34 }
 0x191   : > { %3302 = vmatprep.subr.bf16.mxu1 %v12847_v36 }
 0x192   : > { %2692 = vmatpush1.bf16.msra.mxu0 %v13074_v57 }
 0x193   : > { %11538 = vmatprep.subr.bf16.mxu0 %v11903_v11 }
 0x194   : > { %3303 = vmatpush1.bf16.msra.mxu1 %v12857_v38 }
 0x195   : > { %10774 = vmatmul.mubr.msk.bf16.vlgmr.msra.gmra.mxu0 %vm629_vm0, %v12981_v16  ;;  %3386 = vmatprep.subr.bf16.mxu1 %v12865_v43 }
 0x196   : > { %11539 = vmatpush3.bf16.msra.mxu0 %v11904_v33 }
 0x197   : > { %10836 = vmatmul.mubr.msk.bf16.vlgmr.msra.gmra.mxu1 %vm629_vm0, %v13117_v8  ;;  %11540 = vmatprep.subr.bf16.mxu0 %v11905_v47 }
 0x198   : > { %3387 = vmatpush1.bf16.msra.mxu1 %v12875_v60  ;;  %3406 = vmatprep.mubr.bf16.mxu1 %v15428_v34 }
 0x199   : > { %3388 = vmatprep.subr.bf16.mxu1 %v12884_v42 }
 0x19a   : > { %11541 = vmatpush3.bf16.msra.mxu0 %v11906_v51 }
 0x19b   : > { %11542 = vmatprep.subr.bf16.mxu0 %v11907_v58 }
 0x19c   : > { %3389 = vmatpush1.bf16.msra.mxu1 %v12890_v54 }
 0x19d   : > { %3480 = vmatprep.subr.bf16.mxu1 %v12896_v62 }
 0x19e   : > { %11543 = vmatpush3.bf16.msra.mxu0 %v11908_v56 }
 0x19f   : > { %10838 = vmatmul.mubr.msk.bf16.vlgmr.msra.gmra.mxu1 %vm629_vm0, %v12981_v16  ;;  %11544 = vmatprep.subr.bf16.mxu0 %v11909_v7 }
 0x1a0   : > { %3481 = vmatpush1.bf16.msra.mxu1 %v12907_v59  ;;  %3500 = vmatprep.mubr.bf16.mxu1 %v15428_v34 }
 0x1a1   : > { %3482 = vmatprep.subr.bf16.mxu1 %v12914_v3 }
 0x1a2   : > { %11545 = vmatpush3.bf16.msra.mxu0 %v11910_v21 }
 0x1a3   : > { %11546 = vmatprep.subr.bf16.mxu0 %v11912_v35 }
 0x1a4   : > { %3483 = vmatpush1.bf16.msra.mxu1 %v12923_v12 }
 0x1a5   : > { %3731 = vmatprep.subr.bf16.mxu1 %v15443_v63 }
 0x1a6   : > { %11547 = vmatpush3.bf16.msra.mxu0 %v11913_v37 }
 0x1a7   : > { %10841 = vmatmul.mubr.msk.bf16.vlgmr.msra.gmra.mxu1 %vm629_vm0, %v13161_v10  ;;  %11548 = vmatprep.subr.bf16.mxu0 %v11914_v39 }
 0x1a8   : > { %3732 = vmatpush1.bf16.msra.mxu1 %v12990_v25  ;;  %3751 = vmatprep.mubr.bf16.mxu1 %v15428_v34 }
 0x1a9   : > { %3733 = vmatprep.subr.bf16.mxu1 %v12997_v27 }
 0x1aa   : > { %11549 = vmatpush3.bf16.msra.mxu0 %v11915_v50 }
 0x1ab   : > { %11550 = vmatprep.subr.bf16.mxu0 %v11916_v48 }
 0x1ac   : > { %3734 = vmatpush1.bf16.msra.mxu1 %v13006_v2 }
 0x1ad   : > { %3774 = vmatprep.subr.bf16.mxu1 %v13185_v40 }
 0x1ae   : > { %11551 = vmatpush3.bf16.msra.mxu0 %v11917_v0 }
 0x1af   : > { %10894 = vmatmul.mubr.msk.bf16.vlgmr.msra.gmra.mxu1 %vm629_vm0, %v13161_v10  ;;  %11552 = vmatprep.subr.bf16.mxu0 %v11918_v52 }
 0x1b0   : > { %3775 = vmatpush1.bf16.msra.mxu1 %v12838_v55  ;;  %3794 = vmatprep.mubr.bf16.mxu1 %v15428_v34 }
 0x1b1   : > { %3776 = vmatprep.subr.bf16.mxu1 %v12847_v36 }
 0x1b2   : > { %11553 = vmatpush3.bf16.msra.mxu0 %v11919_v13 }
 0x1b3   : > { %3163 = vmatprep.subr.bf16.mxu0 %v13046_v18 }
 0x1b4   : > { %3777 = vmatpush1.bf16.msra.mxu1 %v12857_v38 }
 0x1b5   : > { %3817 = vmatprep.subr.bf16.mxu1 %v13012_v45 }
 0x1b7   : > { %10895 = vmatmul.mubr.msk.bf16.vlgmr.msra.gmra.mxu1 %vm629_vm0, %v13161_v10 }
 0x1b8   : > { %3818 = vmatpush1.bf16.msra.mxu1 %v13022_v15  ;;  %3837 = vmatprep.mubr.bf16.mxu1 %v15428_v34 }
 0x1b9   : > { %3819 = vmatprep.subr.bf16.mxu1 %v13029_v14 }
 0x1bc   : > { %3820 = vmatpush1.bf16.msra.mxu1 %v13040_v5 }
 0x1bd   : > { %3860 = vmatprep.subr.bf16.mxu1 %v12865_v43 }
 0x1bf   : > { %10896 = vmatmul.mubr.msk.bf16.vlgmr.msra.gmra.mxu1 %vm629_vm0, %v13117_v8 }
 0x1c0   : > { %3861 = vmatpush1.bf16.msra.mxu1 %v12875_v60  ;;  %3880 = vmatprep.mubr.bf16.mxu1 %v15428_v34 }
 0x1c1   : > { %3862 = vmatprep.subr.bf16.mxu1 %v12884_v42 }
 0x1c4   : > { %3863 = vmatpush1.bf16.msra.mxu1 %v12890_v54 }
 0x1c5   : > { %3954 = vmatprep.subr.bf16.mxu1 %v12896_v62 }
 0x1c7   : > { %10897 = vmatmul.mubr.msk.bf16.vlgmr.msra.gmra.mxu1 %vm629_vm0, %v13117_v8 }
 0x1c8   : > { %3955 = vmatpush1.bf16.msra.mxu1 %v12907_v59  ;;  %3974 = vmatprep.mubr.bf16.mxu1 %v15428_v34 }
 0x1c9   : > { %3956 = vmatprep.subr.bf16.mxu1 %v12914_v3 }
 0x1cc   : > { %3957 = vmatpush1.bf16.msra.mxu1 %v12923_v12 }
 0x1cd   : > { %4048 = vmatprep.subr.bf16.mxu1 %v13185_v40 }
 0x1f5   : > { %v11532_v19 = vpop.f32.mrf.mxu1 }
 0x1f7   : > { %v11533_v30 = vpop.f32.mrf.mxu1 }
 0x1f8   : > { %v11534_v1 = vadd.f32 %v11533_v30, %v11532_v19 }
 0x1f9   : > { %v11535_v20 = vpop.f32.mrf.mxu1 }
 0x1fb   : > { %v11536_v23 = vpop.f32.mrf.mxu1 }
 0x1fc   : > { %v11537_v56 = vadd.f32 %v11536_v23, %v11535_v20 }
 0x1fd   : > { %v2300_v22 = vpop.f32.mrf.mxu1 }
 0x1ff   : > { %v2302_v28 = vpop.f32.mrf.mxu1 }
 0x201   : > { %v2304_v24 = vpop.f32.mrf.mxu1 }
 0x203   : > { %v2306_v49 = vpop.f32.mrf.mxu1 }
 0x205   : > { %v2386_v29 = vpop.f32.mrf.mxu1 }
 0x206   : > { %v2387_v54 = vadd.f32 %v2386_v29, %v2300_v22 }
 0x207   : > { %v2388_v9 = vpop.f32.mrf.mxu1 }
 0x208   : > { %v2389_v42 = vadd.f32 %v2388_v9, %v2302_v28 }
 0x209   : > { %v2390_v32 = vpop.f32.mrf.mxu1 }
 0x20a   : > { %v2391_v38 = vadd.f32 %v2390_v32, %v2304_v24 }
 0x20b   : > { %v2392_v41 = vpop.f32.mrf.mxu1 }
 0x20c   : > { %v2393_v55 = vadd.f32 %v2392_v41, %v2306_v49 }
 0x20d   : > { %v2480_v31 = vpop.f32.mrf.mxu1 }
 0x20e   : > { %v2491_v5 = vadd.f32 %v2480_v31, %v2387_v54 }
 0x20f   : > { %v2482_v46 = vpop.f32.mrf.mxu1 }
 0x210   : > { %v2492_v15 = vadd.f32 %v2482_v46, %v2389_v42 }
 0x211   : > { %v2484_v53 = vpop.f32.mrf.mxu1 }
 0x212   : > { %v2495_v8 = vadd.f32 %v2484_v53, %v2391_v38 }
 0x213   : > { %v2486_v63 = vpop.f32.mrf.mxu1 }
 0x214   : > { %v2496_v29 = vadd.f32 %v2486_v63, %v2393_v55 }
 0x215   : > { %v2574_v47 = vpop.f32.mrf.mxu1 }
 0x217   : > { %v2576_v35 = vpop.f32.mrf.mxu1 }
 0x219   : > { %v2578_v48 = vpop.f32.mrf.mxu1 }
 0x21b   : > { %v2580_v13 = vpop.f32.mrf.mxu1 }
 0x225   : > { %v11510_v6 = vpop.f32.mrf.mxu0 }
 0x227   : > { %v11511_v61 = vpop.f32.mrf.mxu0 }
 0x228   : > { %v11512_v11 = vadd.f32 %v11511_v61, %v11510_v6  ;;  %v2660_v6 = vpop.f32.mrf.mxu1 }
 0x229   : > { %v11513_v33 = vpop.f32.mrf.mxu0  ;;  %v2661_v10 = vadd.f32 %v2660_v6, %v2574_v47  ;;  %v15467_v6 = vld [vmem:[#allocation20_spill] sm:$0xff] }
 0x22a   : > { %v13232_v51 = vadd.f32 %v11534_v1, %v11512_v11  ;;  %v2662_v1 = vpop.f32.mrf.mxu1 }
 0x22b   : > { %v11514_v58 = vpop.f32.mrf.mxu0  ;;  %v2663_v60 = vadd.f32 %v2662_v1, %v2576_v35  ;;  %v15469_v1 = vld [vmem:[#allocation22_spill] sm:$0xff] }
 0x22c   : > { %15458 = vst [vmem:[#allocation28_spill] sm:$0xff] %v13232_v51  ;;  %v11515_v7 = vadd.f32 %v11514_v58, %v11513_v33  ;;  %v2664_v20 = vpop.f32.mrf.mxu1 }
 0x22d   : > { %v2257_v21 = vpop.f32.mrf.mxu0  ;;  %v2665_v16 = vadd.f32 %v2664_v20, %v2578_v48  ;;  %v13247_v48 = vld [vmem:[%s15176_s1 + $0x64] ss:$16 sps:$4 sm:$0xff]   ;;  %v15471_v20 = vld [vmem:[#allocation4_spill] sm:$0xff] }
 0x22e   : > { %v13234_v37 = vadd.f32 %v11537_v56, %v11515_v7  ;;  %v2666_v58 = vpop.f32.mrf.mxu1 }
 0x22f   : > { %v2259_v39 = vpop.f32.mrf.mxu0  ;;  %v2667_v45 = vadd.f32 %v2666_v58, %v2580_v13  ;;  %v15464_v13 = vld [vmem:[#allocation3_spill] sm:$0xff]  ;;  %v15474_v58 = vld [vmem:[#allocation6_spill] sm:$0xff] }
 0x230   : > { %15459 = vst [vmem:[#allocation29_spill] sm:$0xff] %v13234_v37  ;;  %v2754_v37 = vpop.f32.mrf.mxu1 }
 0x231   : > { %v2261_v50 = vpop.f32.mrf.mxu0  ;;  %v2765_v9 = vadd.f32 %v2754_v37, %v2661_v10 }
 0x232   : > { %v2756_v59 = vpop.f32.mrf.mxu1 }
 0x233   : > { %v2263_v0 = vpop.f32.mrf.mxu0  ;;  %v2766_v2 = vadd.f32 %v2756_v59, %v2663_v60 }
 0x234   : > { %v2758_v36 = vpop.f32.mrf.mxu1 }
 0x235   : > { %v2343_v52 = vpop.f32.mrf.mxu0  ;;  %v2769_v24 = vadd.f32 %v2758_v36, %v2665_v16 }
 0x236   : > { %v2344_v27 = vadd.f32 %v2343_v52, %v2257_v21  ;;  %v2760_v57 = vpop.f32.mrf.mxu1  ;;  %v15463_v52 = vld [vmem:[#allocation5_spill] sm:$0xff] }
 0x237   : > { %v2345_v19 = vpop.f32.mrf.mxu0  ;;  %v2770_v42 = vadd.f32 %v2760_v57, %v2667_v45 }
 0x238   : > { %v2346_v17 = vadd.f32 %v2345_v19, %v2259_v39  ;;  %v15460_v39 = vld [vmem:[#allocation14_spill] sm:$0xff] }
 0x239   : > { %v2347_v30 = vpop.f32.mrf.mxu0  ;;  %v15465_v19 = vld [vmem:[#allocation18_spill] sm:$0xff] }
 0x23a   : > { %v2348_v41 = vadd.f32 %v2347_v30, %v2261_v50  ;;  %v15461_v50 = vld [vmem:[#allocation24_spill] sm:$0xff]  ;;  %v15466_v30 = vld [vmem:[#allocation19_spill] sm:$0xff] }
 0x23b   : > { %v2349_v61 = vpop.f32.mrf.mxu0 }
 0x23c   : > { %v2350_v31 = vadd.f32 %v2349_v61, %v2263_v0  ;;  %v15462_v0 = vld [vmem:[#allocation25_spill] sm:$0xff] }
 0x23d   : > { %v2437_v40 = vpop.f32.mrf.mxu0  ;;  %v15468_v61 = vld [vmem:[#allocation21_spill] sm:$0xff] }
 0x23e   : > { %v2489_v32 = vadd.f32 %v2437_v40, %v2344_v27 }
 0x23f   : > { %v2439_v11 = vpop.f32.mrf.mxu0 }
 0x240   : > { %v2490_v47 = vadd.f32 %v2439_v11, %v2346_v17  ;;  %v2778_v17 = vmax.f32 %v2496_v29, %v2770_v42  ;;  %v15470_v11 = vld [vmem:[#allocation23_spill] sm:$0xff]  ;;  %v11921_v29 = vld [vmem:[%s15178_s3 + $0x1f8] sm:$0xff]   ;;  %v11926_v42 = vld [vmem:[%s15178_s3 + $0x1a8] sm:$0xff]  }
 0x241   : > { %v2441_v51 = vpop.f32.mrf.mxu0 }
 0x242   : > { %v2493_v46 = vadd.f32 %v2441_v51, %v2348_v41  ;;  %v15481_v41 = vld [vmem:[#allocation13_spill] sm:$0xff] }
 0x243   : > { %v2443_v23 = vpop.f32.mrf.mxu0 }
 0x245   : > { %v2531_v33 = vpop.f32.mrf.mxu0 }
 0x247   : > { %v2533_v56 = vpop.f32.mrf.mxu0 }
 0x249   : > { %v2535_v7 = vpop.f32.mrf.mxu0 }
 0x24b   : > { %v2537_v12 = vpop.f32.mrf.mxu0 }
 0x24d   : > { %v2617_v3 = vpop.f32.mrf.mxu0 }
 0x24e   : > { %v2618_v14 = vadd.f32 %v2617_v3, %v2531_v33  ;;  %v2774_v3 = vmax.f32 %v2492_v15, %v2766_v2  ;;  %v13273_v33 = vld [vmem:[%s12417_s16 + $0x50] sm:$0xff]  }
 0x24f   : > { %v2619_v62 = vpop.f32.mrf.mxu0  ;;  %15473 = vst [vmem:[#allocation14_spill] sm:$0xff] %v13273_v33  ;;  %10900 = vmatmul.mubr.msk.bf16.vlgmr.msra.gmra.mxu1 %vm629_vm0, %v13273_v33 }
 0x250   : > { %v2620_v22 = vadd.f32 %v2619_v62, %v2533_v56  ;;  %v2773_v62 = vmax.f32 %v2491_v5, %v2765_v9  ;;  %4049 = vmatpush1.bf16.msra.mxu1 %v15474_v58  ;;  %4068 = vmatprep.mubr.bf16.mxu1 %v15428_v34  ;;  %v15475_v56 = vld [vmem:[#allocation7_spill] sm:$0xff] }
 0x251   : > { %v2621_v43 = vpop.f32.mrf.mxu0  ;;  %4050 = vmatprep.subr.bf16.mxu1 %v15475_v56  ;;  %v15479_v9 = vld [vmem:[#allocation11_spill] sm:$0xff] }
 0x252   : > { %v2622_v35 = vadd.f32 %v2621_v43, %v2535_v7  ;;  %v15476_v7 = vld [vmem:[#allocation8_spill] sm:$0xff] }
 0x253   : > { %v2623_v18 = vpop.f32.mrf.mxu0 }
 0x254   : > { %v2624_v38 = vadd.f32 %v2623_v18, %v2537_v12  ;;  %4051 = vmatpush1.bf16.msra.mxu1 %v15476_v7 }
 0x255   : > { %v2711_v25 = vpop.f32.mrf.mxu0 }
 0x256   : > { %v2763_v28 = vadd.f32 %v2711_v25, %v2618_v14  ;;  %v2777_v25 = vmax.f32 %v2495_v8, %v2769_v24  ;;  %v2494_v14 = vadd.f32 %v2443_v23, %v2350_v31  ;;  %v15472_v23 = vld [vmem:[#allocation26_spill] sm:$0xff]  ;;  %v15484_v31 = vld [vmem:[#allocation17_spill] sm:$0xff] }
 0x257   : > { %v2713_v49 = vpop.f32.mrf.mxu0  ;;  %10902 = vmatmul.mubr.msk.bf16.vlgmr.msra.gmra.mxu1 %vm629_vm0, %v13273_v33  ;;  %v11922_v24 = vld [vmem:[%s15178_s3 + $0x1b8] sm:$0xff]  }
 0x258   : > { %v2764_v54 = vadd.f32 %v2713_v49, %v2620_v22  ;;  %v2771_v60 = vmax.f32 %v2489_v32, %v2763_v28  ;;  %v15477_v22 = vld [vmem:[#allocation9_spill] sm:$0xff]  ;;  %v15478_v28 = vld [vmem:[#allocation10_spill] sm:$0xff]  ;;  %4154 = vmatprep.mubr.bf16.mxu1 %v15428_v34  ;;  %v15480_v32 = vld [vmem:[#allocation12_spill] sm:$0xff] }
 0x259   : > { %v2715_v59 = vpop.f32.mrf.mxu0  ;;  %4134 = vmatprep.subr.bf16.mxu1 %v15477_v22  ;;  %v11923_v49 = vld [vmem:[%s15178_s3 + $0x1f0] sm:$0xff]  }
 0x25a   : > { %v2772_v53 = vmax.f32 %v2490_v47, %v2764_v54  ;;  %v2767_v21 = vadd.f32 %v2715_v59, %v2622_v35  ;;  %v2779_v10 = vmax.f32 %v2771_v60, %v2773_v62  ;;  %4135 = vmatpush1.bf16.msra.mxu1 %v15478_v28  ;;  %v11924_v47 = vld [vmem:[%s15178_s3 + $0x1b0] sm:$0xff]   ;;  %v15482_v35 = vld [vmem:[#allocation15_spill] sm:$0xff]  ;;  %v11925_v54 = vld [vmem:[%s15178_s3 + $0x1e8] sm:$0xff]  }
 0x25b   : > { %v2717_v55 = vpop.f32.mrf.mxu0  ;;  %4136 = vmatprep.subr.bf16.mxu1 %v15479_v9  ;;  %v11927_v60 = vld [vmem:[%s15178_s3 + $0x1e0] sm:$0xff]   ;;  %v13317_v59 = vld [vmem:[%s12417_s16 + $0x58] sm:$0xff]   ;;  %v11932_v62 = vld [vmem:[%s15178_s3 + $0x1d0] sm:$0xff]  }
 0x25c   : > { %v2780_v36 = vmax.f32 %v2772_v53, %v2774_v3  ;;  %v2775_v16 = vmax.f32 %v2493_v46, %v2767_v21  ;;  %v2768_v27 = vadd.f32 %v2717_v55, %v2624_v38  ;;  %v2783_v12 = vadd.f32 %v2779_v10, %v12803_v4  ;;  %v15483_v3 = vld [vmem:[#allocation16_spill] sm:$0xff]  ;;  %15485 = vst [vmem:[#allocation24_spill] sm:$0xff] %v13317_v59  ;;  %v11928_v46 = vld [vmem:[%s15178_s3 + $0x1a0] sm:$0xff]   ;;  %v11930_v38 = vld [vmem:[%s15178_s3 + $0x1d8] sm:$0xff]   ;;  %v13334_v21 = vpop.f32.mrf.mxu1 }
 0x25d   : > { %v11931_v53 = vld [vmem:[%s15178_s3 + $0x198] sm:$0xff]   ;;  %v11933_v55 = vld [vmem:[%s15178_s3 + $0x190] sm:$0xff]   ;;  %v11936_v10 = vld [vmem:[%s15178_s3 + $0x1c0] sm:$0xff]  }
 0x25e   : > { %v2781_v43 = vmax.f32 %v2775_v16, %v2777_v25  ;;  %v2776_v40 = vmax.f32 %v2494_v14, %v2768_v27  ;;  %v2784_v15 = vadd.f32 %v2780_v36, %v12799_v44  ;;  %v2787_v63 = vmax.f32 %v2783_v12, 0.0  ;;  %4137 = vmatpush1.bf16.msra.mxu1 %v15480_v32  ;;  %v15486_v25 = vld [vmem:[#allocation27_spill] sm:$0xff]  ;;  %v13344_v14 = vpop.f32.mrf.mxu1  ;;  %v11934_v36 = vld [vmem:[%s15178_s3 + $0x1c8] sm:$0xff]  }
 0x25f   : > { %4228 = vmatprep.subr.bf16.mxu1 %v15481_v41  ;;  %v11935_v16 = vld [vmem:[%s15178_s3 + $0x188] sm:$0xff]  }
 0x260   : > { %v2785_v2 = vadd.f32 %v2781_v43, %v12803_v4  ;;  %v2782_v45 = vmax.f32 %v2776_v40, %v2778_v17  ;;  %v2788_v57 = vmax.f32 %v2784_v15, 0.0  ;;  %v13357_v27 = vpop.f32.mrf.mxu1  ;;  %v11937_v17 = vld [vmem:[%s15178_s3 + $0x180] sm:$0xff]  }
 0x261   : > { %10904 = vmatmul.mubr.msk.bf16.vlgmr.msra.gmra.mxu1 %vm629_vm0, %v15472_v23 }
 0x262   : > { %v2786_v18 = vadd.f32 %v2782_v45, %v12799_v44  ;;  %v2789_v5 = vmax.f32 %v2785_v2, 0.0  ;;  %4229 = vmatpush1.bf16.msra.mxu1 %v15482_v35  ;;  %4248 = vmatprep.mubr.bf16.mxu1 %v15428_v34  ;;  %v13367_v43 = vpop.f32.mrf.mxu1 }
 0x263   : > { %4230 = vmatprep.subr.bf16.mxu1 %v15483_v3 }
 0x264   : > { %v2790_v8 = vmax.f32 %v2786_v18, 0.0  ;;  %v2791_v37 = vpack.c.bf16 %v2789_v5, %v2787_v63  ;;  %v3048_v40 = vpop.f32.mrf.mxu1 }
 0x266   : > { %v2792_v51 = vpack.c.bf16 %v2790_v8, %v2788_v57  ;;  %4231 = vmatpush1.bf16.msra.mxu1 %v15484_v31  ;;  %v3050_v2 = vpop.f32.mrf.mxu1 }
 0x267   : > { %4479 = vmatprep.subr.bf16.mxu1 %v13247_v48 }
 0x268   : > { %2954 = vmatprep.mubr.bf16.mxu0 %v2792_v51  ;;  %v3052_v45 = vpop.f32.mrf.mxu1 }
 0x269   : > { %2955 = vmatmul.mubr.bf16.vlgmr.msra.gmra.mxu0 %v2791_v37  ;;  %10907 = vmatmul.mubr.msk.bf16.vlgmr.msra.gmra.mxu1 %vm629_vm0, %v13317_v59 }
 0x26a   : > { %3164 = vmatpush1.bf16.msra.mxu0 %v13056_v26  ;;  %3183 = vmatprep.mubr.bf16.mxu0 %v15428_v34  ;;  %v3054_v15 = vpop.f32.mrf.mxu1 }
 0x26b   : > { %3165 = vmatprep.subr.bf16.mxu0 %v15460_v39  ;;  %4480 = vmatpush1.bf16.msra.mxu1 %v15463_v52 }
 0x26c   : > { %4481 = vmatprep.subr.bf16.mxu1 %v15464_v13  ;;  %4499 = vmatprep.mubr.bf16.mxu1 %v15428_v34  ;;  %v3091_v12 = vpop.f32.mrf.mxu1 }
 0x26e   : > { %3166 = vmatpush1.bf16.msra.mxu0 %v15461_v50  ;;  %v3093_v18 = vpop.f32.mrf.mxu1 }
 0x26f   : > { %3257 = vmatprep.subr.bf16.mxu0 %v13247_v48  ;;  %4482 = vmatpush1.bf16.msra.mxu1 %v15465_v19 }
 0x270   : > { %4522 = vmatprep.subr.bf16.mxu1 %v15486_v25  ;;  %v3095_v5 = vpop.f32.mrf.mxu1 }
 0x271   : > { %10833 = vmatmul.mubr.msk.bf16.vlgmr.msra.gmra.mxu0 %vm629_vm0, %v15462_v0 }
 0x272   : > { %3258 = vmatpush1.bf16.msra.mxu0 %v15463_v52  ;;  %3277 = vmatprep.mubr.bf16.mxu0 %v15428_v34  ;;  %v13391_v57 = vpop.f32.mrf.mxu1 }
 0x273   : > { %3259 = vmatprep.subr.bf16.mxu0 %v15464_v13  ;;  %10960 = vmatmul.mubr.msk.bf16.vlgmr.msra.gmra.mxu1 %vm629_vm0, %v13317_v59 }
 0x274   : > { %4523 = vmatpush1.bf16.msra.mxu1 %v15474_v58  ;;  %4542 = vmatprep.mubr.bf16.mxu1 %v15428_v34  ;;  %v3134_v8 = vpop.f32.mrf.mxu1 }
 0x275   : > { %4524 = vmatprep.subr.bf16.mxu1 %v15475_v56 }
 0x276   : > { %3260 = vmatpush1.bf16.msra.mxu0 %v15465_v19  ;;  %v3136_v63 = vpop.f32.mrf.mxu1 }
 0x277   : > { %3343 = vmatprep.subr.bf16.mxu0 %v15466_v30 }
 0x278   : > { %4525 = vmatpush1.bf16.msra.mxu1 %v15476_v7  ;;  %v3138_v51 = vpop.f32.mrf.mxu1 }
 0x279   : > { %10835 = vmatmul.mubr.msk.bf16.vlgmr.msra.gmra.mxu0 %vm629_vm0, %v15462_v0  ;;  %4565 = vmatprep.subr.bf16.mxu1 %v15466_v30 }
 0x27a   : > { %3344 = vmatpush1.bf16.msra.mxu0 %v15467_v6  ;;  %3363 = vmatprep.mubr.bf16.mxu0 %v15428_v34  ;;  %v3140_v37 = vpop.f32.mrf.mxu1 }
 0x27b   : > { %3345 = vmatprep.subr.bf16.mxu0 %v15468_v61  ;;  %10961 = vmatmul.mubr.msk.bf16.vlgmr.msra.gmra.mxu1 %vm629_vm0, %v13317_v59  ;;  %v3135_v59 = vadd.f32 %v3134_v8, %v3048_v40  ;;  %v3141_v30 = vadd.f32 %v3140_v37, %v3054_v15 }
 0x27c   : > { %4566 = vmatpush1.bf16.msra.mxu1 %v15467_v6  ;;  %4585 = vmatprep.mubr.bf16.mxu1 %v15428_v34  ;;  %v3228_v0 = vpop.f32.mrf.mxu1 }
 0x27d   : > { %4567 = vmatprep.subr.bf16.mxu1 %v15468_v61  ;;  %v3094_v61 = vadd.f32 %v3093_v18, %v13344_v14 }
 0x27e   : > { %3346 = vmatpush1.bf16.msra.mxu0 %v15469_v1 }
 0x27f   : > { %3437 = vmatprep.subr.bf16.mxu0 %v15470_v11 }
 0x280   : > { %4568 = vmatpush1.bf16.msra.mxu1 %v15469_v1  ;;  %v3092_v1 = vadd.f32 %v3091_v12, %v13334_v21  ;;  %v3098_v21 = vadd.f32 %v13391_v57, %v13367_v43 }
 0x281   : > { %10837 = vmatmul.mubr.msk.bf16.vlgmr.msra.gmra.mxu0 %vm629_vm0, %v15471_v20  ;;  %4608 = vmatprep.subr.bf16.mxu1 %v15477_v22  ;;  %v3230_v20 = vpop.f32.mrf.mxu1 }
 0x282   : > { %3438 = vmatpush1.bf16.msra.mxu0 %v13056_v26  ;;  %3457 = vmatprep.mubr.bf16.mxu0 %v15428_v34 }
 0x283   : > { %3439 = vmatprep.subr.bf16.mxu0 %v15460_v39  ;;  %10962 = vmatmul.mubr.msk.bf16.vlgmr.msra.gmra.mxu1 %vm629_vm0, %v13273_v33  ;;  %v3232_v58 = vpop.f32.mrf.mxu1 }
 0x284   : > { %4609 = vmatpush1.bf16.msra.mxu1 %v15478_v28  ;;  %4628 = vmatprep.mubr.bf16.mxu1 %v15428_v34 }
 0x285   : > { %4610 = vmatprep.subr.bf16.mxu1 %v15479_v9  ;;  %v3234_v56 = vpop.f32.mrf.mxu1 }
 0x286   : > { %3440 = vmatpush1.bf16.msra.mxu0 %v15461_v50  ;;  %v3244_v12 = vadd.f32 %v3234_v56, %v3141_v30 }
 0x287   : > { %11560 = vmatprep.subr.bf16.mxu0 %v11921_v29  ;;  %v3322_v7 = vpop.f32.mrf.mxu1 }
 0x288   : > { %4611 = vmatpush1.bf16.msra.mxu1 %v15480_v32 }
 0x289   : > { %10840 = vmatmul.mubr.msk.bf16.vlgmr.msra.gmra.mxu0 %vm629_vm0, %v15472_v23  ;;  %4702 = vmatprep.subr.bf16.mxu1 %v15481_v41  ;;  %v3324_v22 = vpop.f32.mrf.mxu1 }
 0x28a   : > { %11561 = vmatpush3.bf16.msra.mxu0 %v11922_v24 }
 0x28b   : > { %11562 = vmatprep.subr.bf16.mxu0 %v11923_v49  ;;  %10963 = vmatmul.mubr.msk.bf16.vlgmr.msra.gmra.mxu1 %vm629_vm0, %v13273_v33  ;;  %v3326_v28 = vpop.f32.mrf.mxu1 }
 0x28c   : > { %4703 = vmatpush1.bf16.msra.mxu1 %v15482_v35  ;;  %4722 = vmatprep.mubr.bf16.mxu1 %v15428_v34 }
 0x28d   : > { %4704 = vmatprep.subr.bf16.mxu1 %v15483_v3  ;;  %v3328_v9 = vpop.f32.mrf.mxu1 }
 0x28e   : > { %11563 = vmatpush3.bf16.msra.mxu0 %v11924_v47  ;;  %v15487_v47 = vld [vmem:[#allocation28_spill] sm:$0xff] }
 0x28f   : > { %11564 = vmatprep.subr.bf16.mxu0 %v11925_v54  ;;  %v3408_v41 = vpop.f32.mrf.mxu1 }
 0x290   : > { %4705 = vmatpush1.bf16.msra.mxu1 %v15484_v31 }
 0x291   : > { %4796 = vmatprep.subr.bf16.mxu1 %v15486_v25  ;;  %v3410_v31 = vpop.f32.mrf.mxu1 }
 0x292   : > { %11565 = vmatpush3.bf16.msra.mxu0 %v11926_v42 }
 0x293   : > { %11566 = vmatprep.subr.bf16.mxu0 %v11927_v60  ;;  %v15489_v60 = vld [vmem:[#allocation29_spill] sm:$0xff] }
 0x296   : > { %11567 = vmatpush3.bf16.msra.mxu0 %v11928_v46 }
 0x297   : > { %11568 = vmatprep.subr.bf16.mxu0 %v11930_v38 }
 0x29a   : > { %11569 = vmatpush3.bf16.msra.mxu0 %v11931_v53 }
 0x29b   : > { %11570 = vmatprep.subr.bf16.mxu0 %v11932_v62  ;;  %v3412_v62 = vpop.f32.mrf.mxu1 }
 0x29e   : > { %11571 = vmatpush3.bf16.msra.mxu0 %v11933_v55 }
 0x29f   : > { %11572 = vmatprep.subr.bf16.mxu0 %v11934_v36 }
 0x2a2   : > { %11573 = vmatpush3.bf16.msra.mxu0 %v11935_v16  ;;  %v3414_v16 = vpop.f32.mrf.mxu1 }
 0x2a3   : > { %11574 = vmatprep.subr.bf16.mxu0 %v11936_v10  ;;  %v3415_v13 = vadd.f32 %v3414_v16, %v3328_v9  ;;  %v15492_v16 = vld [vmem:[#allocation5_spill] sm:$0xff] }
 0x2a6   : > { %11575 = vmatpush3.bf16.msra.mxu0 %v11937_v17 }
 0x2a7   : > { %3911 = vmatprep.subr.bf16.mxu0 %v15470_v11 }
 0x329   : > { %v11554_v29 = vpop.f32.mrf.mxu0 }
 0x32b   : > { %v11555_v24 = vpop.f32.mrf.mxu0 }
 0x32c   : > { %v11556_v32 = vadd.f32 %v11555_v24, %v11554_v29  ;;  %v3502_v29 = vpop.f32.mrf.mxu1 }
 0x32d   : > { %v11557_v49 = vpop.f32.mrf.mxu0 }
 0x32e   : > { %v13394_v35 = vadd.f32 %v11556_v32, %v15487_v47  ;;  %v3504_v32 = vpop.f32.mrf.mxu1 }
 0x32f   : > { %v11558_v54 = vpop.f32.mrf.mxu0 }
 0x330   : > { %15488 = vst [vmem:[#allocation25_spill] sm:$0xff] %v13394_v35  ;;  %v11559_v3 = vadd.f32 %v11558_v54, %v11557_v49  ;;  %v3137_v35 = vadd.f32 %v3136_v63, %v3050_v2  ;;  %v3411_v49 = vadd.f32 %v3410_v31, %v3324_v22  ;;  %v3506_v23 = vpop.f32.mrf.mxu1  ;;  %v3096_v2 = vadd.f32 %v3095_v5, %v13357_v27 }
 0x331   : > { %v3185_v42 = vpop.f32.mrf.mxu0  ;;  %v3239_v63 = vadd.f32 %v3228_v0, %v3135_v59 }
 0x332   : > { %v13397_v46 = vadd.f32 %v11559_v3, %v15489_v60  ;;  %v3139_v3 = vadd.f32 %v3138_v51, %v3052_v45  ;;  %v3409_v60 = vadd.f32 %v3408_v41, %v3322_v7  ;;  %v3240_v19 = vadd.f32 %v3230_v20, %v3137_v35  ;;  %v3508_v22 = vpop.f32.mrf.mxu1 }
 0x333   : > { %v3187_v38 = vpop.f32.mrf.mxu0  ;;  %v3514_v52 = vadd.f32 %v3504_v32, %v3411_v49  ;;  %v3518_v37 = vadd.f32 %v3508_v22, %v3415_v13  ;;  %v15497_v32 = vld [vmem:[#allocation21_spill] sm:$0xff]  ;;  %v15499_v49 = vld [vmem:[#allocation23_spill] sm:$0xff]  ;;  %v11939_v22 = vld [vmem:[%s15178_s3 + $0x278] sm:$0xff]  }
 0x334   : > { %15490 = vst [vmem:[#allocation4_spill] sm:$0xff] %v13397_v46  ;;  %v3413_v46 = vadd.f32 %v3412_v62, %v3326_v28  ;;  %v3243_v45 = vadd.f32 %v3232_v58, %v3139_v3  ;;  %v3513_v51 = vadd.f32 %v3502_v29, %v3409_v60  ;;  %v3237_v28 = vadd.f32 %v3185_v42, %v3092_v1  ;;  %v15495_v29 = vld [vmem:[#allocation19_spill] sm:$0xff]  ;;  %v15501_v3 = vld [vmem:[#allocation24_spill] sm:$0xff] }
 0x335   : > { %v3189_v53 = vpop.f32.mrf.mxu0  ;;  %v3522_v18 = vmax.f32 %v3240_v19, %v3514_v52  ;;  %v13436_v60 = vld [vmem:[%s12417_s16 + $0x60] sm:$0xff]  }
 0x336   : > { %v3517_v7 = vadd.f32 %v3506_v23, %v3413_v46  ;;  %v3241_v59 = vadd.f32 %v3189_v53, %v3096_v2  ;;  %10966 = vmatmul.mubr.msk.bf16.vlgmr.msra.gmra.mxu1 %vm629_vm0, %v13436_v60  ;;  %v13443_v2 = vld [vmem:[%s15176_s1 + $0x68] ss:$16 sps:$4 sm:$0xff]  }
 0x337   : > { %v3191_v55 = vpop.f32.mrf.mxu0  ;;  %15502 = vst [vmem:[#allocation6_spill] sm:$0xff] %v13443_v2  ;;  %4797 = vmatpush1.bf16.msra.mxu1 %v13443_v2  ;;  %4816 = vmatprep.mubr.bf16.mxu1 %v15428_v34 }
 0x338   : > { %v3525_v58 = vmax.f32 %v3243_v45, %v3517_v7  ;;  %v3242_v1 = vadd.f32 %v3191_v55, %v3098_v21  ;;  %v13489_v45 = vld [vmem:[%s15176_s1 + $0x8] ss:$16 sps:$4 sm:$0xff]   ;;  %v13498_v7 = vld [vmem:[%s15176_s1 + $0xac] ss:$16 sps:$4 sm:$0xff]  }
 0x339   : > { %v3279_v36 = vpop.f32.mrf.mxu0  ;;  %15508 = vst [vmem:[#allocation12_spill] sm:$0xff] %v13489_v45  ;;  %15509 = vst [vmem:[#allocation13_spill] sm:$0xff] %v13498_v7  ;;  %v11943_v21 = vld [vmem:[%s15178_s3 + $0x268] sm:$0xff]  }
 0x33b   : > { %v3281_v10 = vpop.f32.mrf.mxu0 }
 0x33d   : > { %v3283_v17 = vpop.f32.mrf.mxu0 }
 0x33f   : > { %v3285_v24 = vpop.f32.mrf.mxu0 }
 0x341   : > { %v3365_v25 = vpop.f32.mrf.mxu0 }
 0x342   : > { %v3366_v6 = vadd.f32 %v3365_v25, %v3279_v36  ;;  %v3238_v25 = vadd.f32 %v3187_v38, %v3094_v61  ;;  %v3526_v61 = vmax.f32 %v3244_v12, %v3518_v37  ;;  %v15491_v36 = vld [vmem:[#allocation14_spill] sm:$0xff]  ;;  %v11945_v12 = vld [vmem:[%s15178_s3 + $0x260] sm:$0xff]  }
 0x343   : > { %v3367_v47 = vpop.f32.mrf.mxu0  ;;  %v11946_v37 = vld [vmem:[%s15178_s3 + $0x220] sm:$0xff]  }
 0x344   : > { %v3368_v40 = vadd.f32 %v3367_v47, %v3281_v10  ;;  %v15493_v10 = vld [vmem:[#allocation3_spill] sm:$0xff]  ;;  %v15498_v47 = vld [vmem:[#allocation22_spill] sm:$0xff] }
 0x345   : > { %v3369_v54 = vpop.f32.mrf.mxu0 }
 0x346   : > { %v3370_v14 = vadd.f32 %v3369_v54, %v3283_v17  ;;  %v15494_v17 = vld [vmem:[#allocation18_spill] sm:$0xff] }
 0x347   : > { %v3371_v11 = vpop.f32.mrf.mxu0  ;;  %v15500_v54 = vld [vmem:[#allocation26_spill] sm:$0xff] }
 0x348   : > { %v3372_v5 = vadd.f32 %v3371_v11, %v3285_v24  ;;  %v15496_v24 = vld [vmem:[#allocation20_spill] sm:$0xff] }
 0x349   : > { %v3459_v33 = vpop.f32.mrf.mxu0 }
 0x34a   : > { %v3511_v8 = vadd.f32 %v3459_v33, %v3366_v6  ;;  %v3521_v33 = vmax.f32 %v3239_v63, %v3513_v51  ;;  %v13470_v63 = vld [vmem:[%s15176_s1 + $0x28] ss:$16 sps:$4 sm:$0xff]   ;;  %v11941_v51 = vld [vmem:[%s15178_s3 + $0x270] sm:$0xff]  }
 0x34b   : > { %v3461_v41 = vpop.f32.mrf.mxu0  ;;  %15506 = vst [vmem:[#allocation10_spill] sm:$0xff] %v13470_v63 }
 0x34c   : > { %v3512_v15 = vadd.f32 %v3461_v41, %v3368_v40  ;;  %v3519_v20 = vmax.f32 %v3237_v28, %v3511_v8  ;;  %v13480_v40 = vld [vmem:[%s15176_s1 + $0xc] ss:$16 sps:$4 sm:$0xff]   ;;  %v11942_v28 = vld [vmem:[%s15178_s3 + $0x230] sm:$0xff]   ;;  %v13509_v41 = vld [vmem:[%s15176_s1 + $0xa8] ss:$16 sps:$4 sm:$0xff]  }
 0x34d   : > { %v3463_v27 = vpop.f32.mrf.mxu0  ;;  %15507 = vst [vmem:[#allocation11_spill] sm:$0xff] %v13480_v40  ;;  %v11940_v8 = vld [vmem:[%s15178_s3 + $0x238] sm:$0xff]   ;;  %15510 = vst [vmem:[#allocation15_spill] sm:$0xff] %v13509_v41 }
 0x34e   : > { %v3520_v0 = vmax.f32 %v3238_v25, %v3512_v15  ;;  %v3515_v6 = vadd.f32 %v3463_v27, %v3370_v14  ;;  %v3527_v43 = vmax.f32 %v3519_v20, %v3521_v33  ;;  %v13518_v25 = vld [vmem:[%s15176_s1 + $0x8c] ss:$16 sps:$4 sm:$0xff]   ;;  %v13528_v15 = vld [vmem:[%s15176_s1 + $0x88] ss:$16 sps:$4 sm:$0xff]   ;;  %v13546_v20 = vld [vmem:[%s15176_s1 + $0x60] ss:$16 sps:$4 sm:$0xff]  }
 0x34f   : > { %v3465_v23 = vpop.f32.mrf.mxu0  ;;  %15511 = vst [vmem:[#allocation16_spill] sm:$0xff] %v13518_v25  ;;  %v11944_v14 = vld [vmem:[%s15178_s3 + $0x228] sm:$0xff]   ;;  %15512 = vst [vmem:[#allocation17_spill] sm:$0xff] %v13528_v15  ;;  %v11948_v27 = vld [vmem:[%s15178_s3 + $0x258] sm:$0xff]  }
 0x350   : > { %v3528_v9 = vmax.f32 %v3520_v0, %v3522_v18  ;;  %v3523_v35 = vmax.f32 %v3241_v59, %v3515_v6  ;;  %v3516_v42 = vadd.f32 %v3465_v23, %v3372_v5  ;;  %v3531_v30 = vadd.f32 %v3527_v43, %v12803_v4  ;;  %v13535_v18 = vld [vmem:[%s12417_s16 + $0x68] sm:$0xff]   ;;  %15514 = vst [vmem:[#allocation29_spill] sm:$0xff] %v13546_v20  ;;  %v13555_v59 = vld [vmem:[%s15176_s1 + $0x44] ss:$16 sps:$4 sm:$0xff]   ;;  %v11949_v5 = vld [vmem:[%s15178_s3 + $0x218] sm:$0xff]   ;;  %v13562_v0 = vpop.f32.mrf.mxu1 }
 0x351   : > { %15513 = vst [vmem:[#allocation28_spill] sm:$0xff] %v13535_v18  ;;  %15515 = vst [vmem:[#allocation14_spill] sm:$0xff] %v13555_v59  ;;  %v13567_v6 = vld [vmem:[%s15176_s1 + $0x40] ss:$16 sps:$4 sm:$0xff]  }
 0x352   : > { %v3529_v57 = vmax.f32 %v3523_v35, %v3525_v58  ;;  %v3524_v31 = vmax.f32 %v3242_v1, %v3516_v42  ;;  %v3532_v19 = vadd.f32 %v3528_v9, %v12799_v44  ;;  %v3535_v53 = vmax.f32 %v3531_v30, 0.0  ;;  %15516 = vst [vmem:[#allocation5_spill] sm:$0xff] %v13567_v6  ;;  %v11950_v33 = vld [vmem:[%s15178_s3 + $0x250] sm:$0xff]   ;;  %v15517_v58 = vld [vmem:[#allocation27_spill] sm:$0xff]  ;;  %v13577_v1 = vpop.f32.mrf.mxu1  ;;  %v11952_v9 = vld [vmem:[%s15178_s3 + $0x248] sm:$0xff]  }
 0x353   : > { %v11951_v23 = vld [vmem:[%s15178_s3 + $0x210] sm:$0xff]   ;;  %v11953_v35 = vld [vmem:[%s15178_s3 + $0x208] sm:$0xff]   ;;  %v11954_v43 = vld [vmem:[%s15178_s3 + $0x240] sm:$0xff]  }
 0x354   : > { %v3533_v52 = vadd.f32 %v3529_v57, %v12803_v4  ;;  %v3530_v13 = vmax.f32 %v3524_v31, %v3526_v61  ;;  %v3536_v46 = vmax.f32 %v3532_v19, 0.0  ;;  %v13590_v42 = vpop.f32.mrf.mxu1  ;;  %v11955_v61 = vld [vmem:[%s15178_s3 + $0x200] sm:$0xff]  }
 0x355   : > { %v13602_v57 = vld [vmem:[%s15176_s1 + $0x24] ss:$16 sps:$4 sm:$0xff]  }
 0x356   : > { %v3534_v11 = vadd.f32 %v3530_v13, %v12799_v44  ;;  %v3537_v56 = vmax.f32 %v3533_v52, 0.0  ;;  %15518 = vst [vmem:[#allocation3_spill] sm:$0xff] %v13602_v57  ;;  %v13605_v31 = vpop.f32.mrf.mxu1  ;;  %v13612_v52 = vld [vmem:[%s15176_s1 + $0x20] ss:$16 sps:$4 sm:$0xff]   ;;  %v13618_v13 = vld [vmem:[%s15176_s1 + $0xa4] ss:$16 sps:$4 sm:$0xff]  }
 0x357   : > { %15519 = vst [vmem:[#allocation18_spill] sm:$0xff] %v13612_v52  ;;  %15520 = vst [vmem:[#allocation19_spill] sm:$0xff] %v13618_v13  ;;  %v13624_v19 = vld [vmem:[%s15176_s1 + $0x4] ss:$16 sps:$4 sm:$0xff]  }
 0x358   : > { %v3538_v38 = vmax.f32 %v3534_v11, 0.0  ;;  %v3539_v55 = vpack.c.bf16 %v3537_v56, %v3535_v53  ;;  %15521 = vst [vmem:[#allocation20_spill] sm:$0xff] %v13624_v19  ;;  %v3796_v30 = vpop.f32.mrf.mxu1  ;;  %v13631_v11 = vld [vmem:[%s15176_s1] ss:$16 sps:$4 sm:$0xff]  }
 0x359   : > { %15522 = vst [vmem:[#allocation21_spill] sm:$0xff] %v13631_v11 }
 0x35a   : > { %v3540_v62 = vpack.c.bf16 %v3538_v38, %v3536_v46  ;;  %v3798_v56 = vpop.f32.mrf.mxu1 }
 0x35c   : > { %3702 = vmatprep.mubr.bf16.mxu0 %v3540_v62  ;;  %v3800_v46 = vpop.f32.mrf.mxu1 }
 0x35d   : > { %3703 = vmatmul.mubr.bf16.vlgmr.msra.gmra.mxu0 %v3539_v55 }
 0x35e   : > { %3912 = vmatpush1.bf16.msra.mxu0 %v13056_v26  ;;  %3931 = vmatprep.mubr.bf16.mxu0 %v15428_v34  ;;  %v3802_v38 = vpop.f32.mrf.mxu1 }
 0x35f   : > { %3913 = vmatprep.subr.bf16.mxu0 %v15460_v39 }
 0x360   : > { %v3839_v53 = vpop.f32.mrf.mxu1 }
 0x362   : > { %3914 = vmatpush1.bf16.msra.mxu0 %v15461_v50  ;;  %v3841_v62 = vpop.f32.mrf.mxu1 }
 0x363   : > { %4005 = vmatprep.subr.bf16.mxu0 %v13247_v48 }
 0x364   : > { %v3843_v55 = vpop.f32.mrf.mxu1 }
 0x365   : > { %10899 = vmatmul.mubr.msk.bf16.vlgmr.msra.gmra.mxu0 %vm629_vm0, %v15491_v36 }
 0x366   : > { %4006 = vmatpush1.bf16.msra.mxu0 %v15492_v16  ;;  %4025 = vmatprep.mubr.bf16.mxu0 %v15428_v34 }
 0x367   : > { %4007 = vmatprep.subr.bf16.mxu0 %v15493_v10 }
 0x36a   : > { %4008 = vmatpush1.bf16.msra.mxu0 %v15494_v17 }
 0x36b   : > { %4091 = vmatprep.subr.bf16.mxu0 %v15495_v29 }
 0x36d   : > { %10901 = vmatmul.mubr.msk.bf16.vlgmr.msra.gmra.mxu0 %vm629_vm0, %v15491_v36  ;;  %v13649_v36 = vpop.f32.mrf.mxu1 }
 0x36e   : > { %4092 = vmatpush1.bf16.msra.mxu0 %v15496_v24  ;;  %4111 = vmatprep.mubr.bf16.mxu0 %v15428_v34 }
 0x36f   : > { %4093 = vmatprep.subr.bf16.mxu0 %v15497_v32  ;;  %v3882_v16 = vpop.f32.mrf.mxu1 }
 0x371   : > { %v3884_v10 = vpop.f32.mrf.mxu1 }
 0x372   : > { %4094 = vmatpush1.bf16.msra.mxu0 %v15498_v47 }
 0x373   : > { %4185 = vmatprep.subr.bf16.mxu0 %v15499_v49  ;;  %v3886_v17 = vpop.f32.mrf.mxu1 }
 0x375   : > { %10903 = vmatmul.mubr.msk.bf16.vlgmr.msra.gmra.mxu0 %vm629_vm0, %v15500_v54  ;;  %v3888_v29 = vpop.f32.mrf.mxu1 }
 0x376   : > { %4186 = vmatpush1.bf16.msra.mxu0 %v13056_v26  ;;  %4205 = vmatprep.mubr.bf16.mxu0 %v15428_v34  ;;  %v13450_v26 = vld [vmem:[%s15176_s1 + $0x4c] ss:$16 sps:$4 sm:$0xff]  }
 0x377   : > { %4187 = vmatprep.subr.bf16.mxu0 %v15460_v39  ;;  %15503 = vst [vmem:[#allocation7_spill] sm:$0xff] %v13450_v26  ;;  %4798 = vmatprep.subr.bf16.mxu1 %v13450_v26  ;;  %v13456_v39 = vld [vmem:[%s15176_s1 + $0x48] ss:$16 sps:$4 sm:$0xff]   ;;  %v3976_v24 = vpop.f32.mrf.mxu1 }
 0x378   : > { %15504 = vst [vmem:[#allocation8_spill] sm:$0xff] %v13456_v39  ;;  %4799 = vmatpush1.bf16.msra.mxu1 %v13456_v39 }
 0x379   : > { %v3978_v32 = vpop.f32.mrf.mxu1 }
 0x37a   : > { %4188 = vmatpush1.bf16.msra.mxu0 %v15461_v50  ;;  %v13462_v50 = vld [vmem:[%s15176_s1 + $0x2c] ss:$16 sps:$4 sm:$0xff]  }
 0x37b   : > { %15505 = vst [vmem:[#allocation9_spill] sm:$0xff] %v13462_v50  ;;  %4882 = vmatprep.subr.bf16.mxu1 %v13462_v50  ;;  %10968 = vmatmul.mubr.msk.bf16.vlgmr.msra.gmra.mxu1 %vm629_vm0, %v13436_v60  ;;  %v3980_v47 = vpop.f32.mrf.mxu1 }
 0x37c   : > { %4883 = vmatpush1.bf16.msra.mxu1 %v13470_v63  ;;  %4902 = vmatprep.mubr.bf16.mxu1 %v15428_v34 }
 0x37d   : > { %10906 = vmatmul.mubr.msk.bf16.vlgmr.msra.gmra.mxu0 %vm629_vm0, %v15501_v3  ;;  %4884 = vmatprep.subr.bf16.mxu1 %v13480_v40  ;;  %v3982_v49 = vpop.f32.mrf.mxu1 }
 0x37e   : > { %11582 = vmatprep.subr.bf16.mxu0 %v11939_v22 }
 0x37f   : > { %11583 = vmatpush3.bf16.msra.mxu0 %v11940_v8  ;;  %v4070_v54 = vpop.f32.mrf.mxu1 }
 0x380   : > { %4885 = vmatpush1.bf16.msra.mxu1 %v13489_v45  ;;  %11584 = vmatprep.subr.bf16.mxu0 %v11941_v51 }
 0x381   : > { %4976 = vmatprep.subr.bf16.mxu1 %v13498_v7  ;;  %v4072_v22 = vpop.f32.mrf.mxu1 }
 0x383   : > { %10970 = vmatmul.mubr.msk.bf16.vlgmr.msra.gmra.mxu1 %vm629_vm0, %v15501_v3  ;;  %11585 = vmatpush3.bf16.msra.mxu0 %v11942_v28  ;;  %v4074_v8 = vpop.f32.mrf.mxu1  ;;  %v3842_v3 = vadd.f32 %v3841_v62, %v13577_v1 }
 0x384   : > { %4977 = vmatpush1.bf16.msra.mxu1 %v13509_v41  ;;  %4996 = vmatprep.mubr.bf16.mxu1 %v15428_v34 }
 0x385   : > { %4978 = vmatprep.subr.bf16.mxu1 %v13518_v25  ;;  %11586 = vmatprep.subr.bf16.mxu0 %v11943_v21  ;;  %v4076_v28 = vpop.f32.mrf.mxu1 }
 0x387   : > { %11587 = vmatpush3.bf16.msra.mxu0 %v11944_v14 }
 0x388   : > { %4979 = vmatpush1.bf16.msra.mxu1 %v13528_v15  ;;  %11588 = vmatprep.subr.bf16.mxu0 %v11945_v12 }
 0x389   : > { %5227 = vmatprep.subr.bf16.mxu1 %v13247_v48 }
 0x38b   : > { %10973 = vmatmul.mubr.msk.bf16.vlgmr.msra.gmra.mxu1 %vm629_vm0, %v13535_v18  ;;  %11589 = vmatpush3.bf16.msra.mxu0 %v11946_v37  ;;  %v4156_v37 = vpop.f32.mrf.mxu1 }
 0x38c   : > { %5228 = vmatpush1.bf16.msra.mxu1 %v13546_v20  ;;  %5247 = vmatprep.mubr.bf16.mxu1 %v15428_v34 }
 0x38d   : > { %5229 = vmatprep.subr.bf16.mxu1 %v13555_v59  ;;  %11590 = vmatprep.subr.bf16.mxu0 %v11948_v27  ;;  %v15523_v27 = vld [vmem:[#allocation25_spill] sm:$0xff] }
 0x38f   : > { %11591 = vmatpush3.bf16.msra.mxu0 %v11949_v5 }
 0x390   : > { %5230 = vmatpush1.bf16.msra.mxu1 %v13567_v6  ;;  %11592 = vmatprep.subr.bf16.mxu0 %v11950_v33 }
 0x391   : > { %5270 = vmatprep.subr.bf16.mxu1 %v15517_v58 }
 0x393   : > { %11026 = vmatmul.mubr.msk.bf16.vlgmr.msra.gmra.mxu1 %vm629_vm0, %v13535_v18  ;;  %11593 = vmatpush3.bf16.msra.mxu0 %v11951_v23 }
 0x394   : > { %5271 = vmatpush1.bf16.msra.mxu1 %v13443_v2  ;;  %5290 = vmatprep.mubr.bf16.mxu1 %v15428_v34 }
 0x395   : > { %5272 = vmatprep.subr.bf16.mxu1 %v13450_v26  ;;  %11594 = vmatprep.subr.bf16.mxu0 %v11952_v9  ;;  %v4158_v9 = vpop.f32.mrf.mxu1 }
 0x397   : > { %11595 = vmatpush3.bf16.msra.mxu0 %v11953_v35  ;;  %v15525_v35 = vld [vmem:[#allocation4_spill] sm:$0xff] }
 0x398   : > { %5273 = vmatpush1.bf16.msra.mxu1 %v13456_v39  ;;  %11596 = vmatprep.subr.bf16.mxu0 %v11954_v43  ;;  %v3883_v39 = vadd.f32 %v3882_v16, %v3796_v30 }
 0x399   : > { %5313 = vmatprep.subr.bf16.mxu1 %v13602_v57 }
 0x39b   : > { %11027 = vmatmul.mubr.msk.bf16.vlgmr.msra.gmra.mxu1 %vm629_vm0, %v13535_v18  ;;  %11597 = vmatpush3.bf16.msra.mxu0 %v11955_v61  ;;  %v3840_v18 = vadd.f32 %v3839_v53, %v13562_v0  ;;  %v3846_v0 = vadd.f32 %v13649_v36, %v13605_v31 }
 0x39c   : > { %5314 = vmatpush1.bf16.msra.mxu1 %v13612_v52  ;;  %4659 = vmatprep.subr.bf16.mxu0 %v13618_v13 }
 0x39d   : > { %5315 = vmatprep.subr.bf16.mxu1 %v13624_v19  ;;  %5333 = vmatprep.mubr.bf16.mxu1 %v15428_v34 }
 0x3a0   : > { %5316 = vmatpush1.bf16.msra.mxu1 %v13631_v11  ;;  %v3889_v11 = vadd.f32 %v3888_v29, %v3802_v38 }
 0x3a1   : > { %5356 = vmatprep.subr.bf16.mxu1 %v13462_v50 }
 0x3a3   : > { %11028 = vmatmul.mubr.msk.bf16.vlgmr.msra.gmra.mxu1 %vm629_vm0, %v13436_v60 }
 0x3a4   : > { %5357 = vmatpush1.bf16.msra.mxu1 %v13470_v63  ;;  %5376 = vmatprep.mubr.bf16.mxu1 %v15428_v34 }
 0x3a5   : > { %5358 = vmatprep.subr.bf16.mxu1 %v13480_v40 }
 0x3a8   : > { %5359 = vmatpush1.bf16.msra.mxu1 %v13489_v45 }
 0x3a9   : > { %5450 = vmatprep.subr.bf16.mxu1 %v13498_v7 }
 0x3ab   : > { %11029 = vmatmul.mubr.msk.bf16.vlgmr.msra.gmra.mxu1 %vm629_vm0, %v13436_v60 }
 0x3ac   : > { %5451 = vmatpush1.bf16.msra.mxu1 %v13509_v41  ;;  %5470 = vmatprep.mubr.bf16.mxu1 %v15428_v34 }
 0x3ad   : > { %5452 = vmatprep.subr.bf16.mxu1 %v13518_v25  ;;  %v4160_v25 = vpop.f32.mrf.mxu1 }
 0x3af   : > { %v4162_v45 = vpop.f32.mrf.mxu1 }
 0x3b0   : > { %5453 = vmatpush1.bf16.msra.mxu1 %v13528_v15  ;;  %v4163_v52 = vadd.f32 %v4162_v45, %v4076_v28  ;;  %v3992_v45 = vadd.f32 %v3982_v49, %v3889_v11 }
 0x3b1   : > { %5544 = vmatprep.subr.bf16.mxu1 %v15517_v58 }
 0x41d   : > { %v11576_v51 = vpop.f32.mrf.mxu0 }
 0x41f   : > { %v11577_v21 = vpop.f32.mrf.mxu0 }
 0x420   : > { %v11578_v14 = vadd.f32 %v11577_v21, %v11576_v51  ;;  %v4250_v21 = vpop.f32.mrf.mxu1 }
 0x421   : > { %v11579_v12 = vpop.f32.mrf.mxu0 }
 0x422   : > { %v13652_v5 = vadd.f32 %v11578_v14, %v15523_v27  ;;  %v4252_v14 = vpop.f32.mrf.mxu1 }
 0x423   : > { %v11580_v33 = vpop.f32.mrf.mxu0 }
 0x424   : > { %15524 = vst [vmem:[#allocation22_spill] sm:$0xff] %v13652_v5  ;;  %v11581_v58 = vadd.f32 %v11580_v33, %v11579_v12  ;;  %v3885_v5 = vadd.f32 %v3884_v10, %v3798_v56  ;;  %v4159_v12 = vadd.f32 %v4158_v9, %v4072_v22  ;;  %v4254_v26 = vpop.f32.mrf.mxu1  ;;  %v3844_v56 = vadd.f32 %v3843_v55, %v13590_v42  ;;  %v13676_v9 = vld [vmem:[%s15176_s1 + $0x84] ss:$16 sps:$4 sm:$0xff]  }
 0x425   : > { %v3933_v23 = vpop.f32.mrf.mxu0  ;;  %v3987_v10 = vadd.f32 %v3976_v24, %v3883_v39 }
 0x426   : > { %v13655_v43 = vadd.f32 %v11581_v58, %v15525_v35  ;;  %v3887_v58 = vadd.f32 %v3886_v17, %v3800_v46  ;;  %v4157_v35 = vadd.f32 %v4156_v37, %v4070_v54  ;;  %v3988_v19 = vadd.f32 %v3978_v32, %v3885_v5  ;;  %v4256_v22 = vpop.f32.mrf.mxu1 }
 0x427   : > { %v3935_v61 = vpop.f32.mrf.mxu0  ;;  %v4262_v57 = vadd.f32 %v4252_v14, %v4159_v12  ;;  %v3985_v54 = vadd.f32 %v3933_v23, %v3840_v18  ;;  %v4266_v53 = vadd.f32 %v4256_v22, %v4163_v52  ;;  %v13669_v23 = vld [vmem:[%s15176_s1 + $0xa0] ss:$16 sps:$4 sm:$0xff]   ;;  %v15530_v14 = vld [vmem:[#allocation20_spill] sm:$0xff] }
 0x428   : > { %15526 = vst [vmem:[#allocation23_spill] sm:$0xff] %v13655_v43  ;;  %v4161_v43 = vadd.f32 %v4160_v25, %v4074_v8  ;;  %v3991_v46 = vadd.f32 %v3980_v47, %v3887_v58  ;;  %v4261_v17 = vadd.f32 %v4250_v21, %v4157_v35  ;;  %v15529_v21 = vld [vmem:[#allocation18_spill] sm:$0xff]  ;;  %v15532_v12 = vld [vmem:[#allocation19_spill] sm:$0xff]  ;;  %v13709_v58 = vld [vmem:[%s12417_s16 + $0x70] sm:$0xff]  }
 0x429   : > { %v3937_v15 = vpop.f32.mrf.mxu0  ;;  %v4270_v38 = vmax.f32 %v3988_v19, %v4262_v57  ;;  %11032 = vmatmul.mubr.msk.bf16.vlgmr.msra.gmra.mxu1 %vm629_vm0, %v13709_v58  ;;  %v15535_v35 = vld [vmem:[#allocation6_spill] sm:$0xff]  ;;  %v15538_v22 = vld [vmem:[#allocation9_spill] sm:$0xff] }
 0x42a   : > { %v4265_v25 = vadd.f32 %v4254_v26, %v4161_v43  ;;  %v3989_v39 = vadd.f32 %v3937_v15, %v3844_v56  ;;  %v13682_v43 = vld [vmem:[%s15176_s1 + $0x80] ss:$16 sps:$4 sm:$0xff]   ;;  %5545 = vmatpush1.bf16.msra.mxu1 %v15535_v35  ;;  %5564 = vmatprep.mubr.bf16.mxu1 %v15428_v34 }
 0x42b   : > { %v3939_v41 = vpop.f32.mrf.mxu0  ;;  %v15536_v56 = vld [vmem:[#allocation7_spill] sm:$0xff] }
 0x42c   : > { %v4273_v29 = vmax.f32 %v3991_v46, %v4265_v25  ;;  %v3990_v18 = vadd.f32 %v3939_v41, %v3846_v0  ;;  %5546 = vmatprep.subr.bf16.mxu1 %v15536_v56  ;;  %v15540_v46 = vld [vmem:[#allocation11_spill] sm:$0xff]  ;;  %v15541_v25 = vld [vmem:[#allocation12_spill] sm:$0xff]  ;;  %v11960_v0 = vld [vmem:[%s15178_s3 + $0x2b0] sm:$0xff]  }
 0x42d   : > { %v4027_v7 = vpop.f32.mrf.mxu0 }
 0x42f   : > { %v4029_v40 = vpop.f32.mrf.mxu0 }
 0x431   : > { %v4031_v51 = vpop.f32.mrf.mxu0 }
 0x433   : > { %v4033_v63 = vpop.f32.mrf.mxu0 }
 0x435   : > { %v4113_v50 = vpop.f32.mrf.mxu0 }
 0x436   : > { %v4114_v13 = vadd.f32 %v4113_v50, %v4027_v7  ;;  %v3986_v50 = vadd.f32 %v3935_v61, %v3842_v3  ;;  %v4274_v3 = vmax.f32 %v3992_v45, %v4266_v53  ;;  %v15527_v61 = vld [vmem:[#allocation5_spill] sm:$0xff]  ;;  %v11962_v45 = vld [vmem:[%s15178_s3 + $0x2a8] sm:$0xff]   ;;  %v11963_v53 = vld [vmem:[%s15178_s3 + $0x2e0] sm:$0xff]  }
 0x437   : > { %v4115_v27 = vpop.f32.mrf.mxu0 }
 0x438   : > { %v4116_v30 = vadd.f32 %v4115_v27, %v4029_v40  ;;  %v15531_v27 = vld [vmem:[#allocation21_spill] sm:$0xff] }
 0x439   : > { %v4117_v33 = vpop.f32.mrf.mxu0 }
 0x43a   : > { %v4118_v7 = vadd.f32 %v4117_v33, %v4031_v51  ;;  %v15528_v51 = vld [vmem:[#allocation3_spill] sm:$0xff]  ;;  %v15533_v33 = vld [vmem:[#allocation24_spill] sm:$0xff] }
 0x43b   : > { %v4119_v2 = vpop.f32.mrf.mxu0 }
 0x43c   : > { %v4120_v55 = vadd.f32 %v4119_v2, %v4033_v63 }
 0x43d   : > { %v4207_v6 = vpop.f32.mrf.mxu0 }
 0x43e   : > { %v4259_v16 = vadd.f32 %v4207_v6, %v4114_v13  ;;  %v4269_v13 = vmax.f32 %v3987_v10, %v4261_v17  ;;  %v15537_v10 = vld [vmem:[#allocation8_spill] sm:$0xff]  ;;  %v11958_v17 = vld [vmem:[%s15178_s3 + $0x2b8] sm:$0xff]  }
 0x43f   : > { %v4209_v8 = vpop.f32.mrf.mxu0  ;;  %5547 = vmatpush1.bf16.msra.mxu1 %v15537_v10 }
 0x440   : > { %v4260_v1 = vadd.f32 %v4209_v8, %v4116_v30  ;;  %v4267_v62 = vmax.f32 %v3985_v54, %v4259_v16  ;;  %5630 = vmatprep.subr.bf16.mxu1 %v15538_v22  ;;  %v15539_v30 = vld [vmem:[#allocation10_spill] sm:$0xff]  ;;  %v11959_v54 = vld [vmem:[%s15178_s3 + $0x2f0] sm:$0xff]  }
 0x441   : > { %v4211_v42 = vpop.f32.mrf.mxu0  ;;  %v11957_v16 = vld [vmem:[%s15178_s3 + $0x2f8] sm:$0xff]   ;;  %v15542_v8 = vld [vmem:[#allocation13_spill] sm:$0xff] }
 0x442   : > { %v4268_v40 = vmax.f32 %v3986_v50, %v4260_v1  ;;  %v4263_v6 = vadd.f32 %v4211_v42, %v4118_v7  ;;  %v4275_v31 = vmax.f32 %v4267_v62, %v4269_v13  ;;  %11034 = vmatmul.mubr.msk.bf16.vlgmr.msra.gmra.mxu1 %vm629_vm0, %v13709_v58  ;;  %v15543_v50 = vld [vmem:[#allocation15_spill] sm:$0xff]  ;;  %v11961_v7 = vld [vmem:[%s15178_s3 + $0x2e8] sm:$0xff]   ;;  %v13753_v62 = vld [vmem:[%s12417_s16 + $0x78] sm:$0xff]  }
 0x443   : > { %v4213_v26 = vpop.f32.mrf.mxu0  ;;  %5631 = vmatpush1.bf16.msra.mxu1 %v15539_v30  ;;  %5650 = vmatprep.mubr.bf16.mxu1 %v15428_v34  ;;  %v15544_v1 = vld [vmem:[#allocation16_spill] sm:$0xff]  ;;  %15546 = vst [vmem:[#allocation26_spill] sm:$0xff] %v13753_v62  ;;  %v11964_v42 = vld [vmem:[%s15178_s3 + $0x2a0] sm:$0xff]   ;;  %v11969_v13 = vld [vmem:[%s15178_s3 + $0x290] sm:$0xff]  }
 0x444   : > { %v4276_v24 = vmax.f32 %v4268_v40, %v4270_v38  ;;  %v4271_v32 = vmax.f32 %v3989_v39, %v4263_v6  ;;  %v4264_v47 = vadd.f32 %v4213_v26, %v4120_v55  ;;  %v4279_v2 = vadd.f32 %v4275_v31, %v12803_v4  ;;  %5632 = vmatprep.subr.bf16.mxu1 %v15540_v46  ;;  %v15545_v38 = vld [vmem:[#allocation17_spill] sm:$0xff]  ;;  %v11966_v39 = vld [vmem:[%s15178_s3 + $0x2d8] sm:$0xff]   ;;  %v13770_v55 = vpop.f32.mrf.mxu1  ;;  %v11970_v26 = vld [vmem:[%s15178_s3 + $0x2c8] sm:$0xff]  }
 0x445   : > { %v11968_v40 = vld [vmem:[%s15178_s3 + $0x2d0] sm:$0xff]   ;;  %v13779_v6 = vld [vmem:[%s15176_s1 + $0x6c] ss:$16 sps:$4 sm:$0xff]  }
 0x446   : > { %v4277_v36 = vmax.f32 %v4271_v32, %v4273_v29  ;;  %v4272_v28 = vmax.f32 %v3990_v18, %v4264_v47  ;;  %v4280_v19 = vadd.f32 %v4276_v24, %v12799_v44  ;;  %v4283_v41 = vmax.f32 %v4279_v2, 0.0  ;;  %15547 = vst [vmem:[#allocation27_spill] sm:$0xff] %v13779_v6  ;;  %v13785_v29 = vpop.f32.mrf.mxu1  ;;  %v11971_v18 = vld [vmem:[%s15178_s3 + $0x288] sm:$0xff]   ;;  %v11972_v32 = vld [vmem:[%s15178_s3 + $0x2c0] sm:$0xff]  }
 0x447   : > { %5633 = vmatpush1.bf16.msra.mxu1 %v15541_v25  ;;  %v11973_v47 = vld [vmem:[%s15178_s3 + $0x280] sm:$0xff]  }
 0x448   : > { %v4281_v57 = vadd.f32 %v4277_v36, %v12803_v4  ;;  %v4278_v52 = vmax.f32 %v4272_v28, %v4274_v3  ;;  %v4284_v11 = vmax.f32 %v4280_v19, 0.0  ;;  %5724 = vmatprep.subr.bf16.mxu1 %v15542_v8  ;;  %v13798_v24 = vpop.f32.mrf.mxu1 }
 0x44a   : > { %v4282_v63 = vadd.f32 %v4278_v52, %v12799_v44  ;;  %v4285_v15 = vmax.f32 %v4281_v57, 0.0  ;;  %v13808_v31 = vpop.f32.mrf.mxu1 }
 0x44c   : > { %v4286_v49 = vmax.f32 %v4282_v63, 0.0  ;;  %v4287_v5 = vpack.c.bf16 %v4285_v15, %v4283_v41  ;;  %v4544_v3 = vpop.f32.mrf.mxu1 }
 0x44e   : > { %v4288_v37 = vpack.c.bf16 %v4286_v49, %v4284_v11  ;;  %v4546_v36 = vpop.f32.mrf.mxu1 }
 0x450   : > { %4450 = vmatprep.mubr.bf16.mxu0 %v4288_v37  ;;  %v4548_v28 = vpop.f32.mrf.mxu1 }
 0x451   : > { %4451 = vmatmul.mubr.bf16.vlgmr.msra.gmra.mxu0 %v4287_v5 }
 0x452   : > { %4660 = vmatpush1.bf16.msra.mxu0 %v13669_v23  ;;  %4679 = vmatprep.mubr.bf16.mxu0 %v15428_v34  ;;  %v4550_v57 = vpop.f32.mrf.mxu1 }
 0x453   : > { %4661 = vmatprep.subr.bf16.mxu0 %v13676_v9 }
 0x454   : > { %v4587_v52 = vpop.f32.mrf.mxu1 }
 0x456   : > { %4662 = vmatpush1.bf16.msra.mxu0 %v13682_v43  ;;  %v4589_v19 = vpop.f32.mrf.mxu1 }
 0x457   : > { %4753 = vmatprep.subr.bf16.mxu0 %v13247_v48 }
 0x458   : > { %v4591_v2 = vpop.f32.mrf.mxu1 }
 0x459   : > { %10965 = vmatmul.mubr.msk.bf16.vlgmr.msra.gmra.mxu0 %vm629_vm0, %v13436_v60 }
 0x45a   : > { %4754 = vmatpush1.bf16.msra.mxu0 %v13546_v20  ;;  %4773 = vmatprep.mubr.bf16.mxu0 %v15428_v34  ;;  %v13832_v63 = vpop.f32.mrf.mxu1 }
 0x45b   : > { %4755 = vmatprep.subr.bf16.mxu0 %v13555_v59 }
 0x45c   : > { %v4630_v15 = vpop.f32.mrf.mxu1 }
 0x45e   : > { %4756 = vmatpush1.bf16.msra.mxu0 %v15527_v61  ;;  %v4632_v11 = vpop.f32.mrf.mxu1 }
 0x45f   : > { %4839 = vmatprep.subr.bf16.mxu0 %v15528_v51 }
 0x460   : > { %v4634_v49 = vpop.f32.mrf.mxu1 }
 0x461   : > { %10967 = vmatmul.mubr.msk.bf16.vlgmr.msra.gmra.mxu0 %vm629_vm0, %v13436_v60  ;;  %v15534_v60 = vld [vmem:[#allocation28_spill] sm:$0xff] }
 0x462   : > { %4840 = vmatpush1.bf16.msra.mxu0 %v15529_v21  ;;  %4859 = vmatprep.mubr.bf16.mxu0 %v15428_v34  ;;  %v4636_v41 = vpop.f32.mrf.mxu1 }
 0x463   : > { %4841 = vmatprep.subr.bf16.mxu0 %v15530_v14  ;;  %11036 = vmatmul.mubr.msk.bf16.vlgmr.msra.gmra.mxu1 %vm629_vm0, %v15534_v60 }
 0x464   : > { %5725 = vmatpush1.bf16.msra.mxu1 %v15543_v50  ;;  %5744 = vmatprep.mubr.bf16.mxu1 %v15428_v34  ;;  %v4724_v37 = vpop.f32.mrf.mxu1 }
 0x465   : > { %5726 = vmatprep.subr.bf16.mxu1 %v15544_v1 }
 0x466   : > { %4842 = vmatpush1.bf16.msra.mxu0 %v15531_v27  ;;  %v4726_v5 = vpop.f32.mrf.mxu1 }
 0x467   : > { %4933 = vmatprep.subr.bf16.mxu0 %v15532_v12 }
 0x468   : > { %5727 = vmatpush1.bf16.msra.mxu1 %v15545_v38 }
 0x469   : > { %10969 = vmatmul.mubr.msk.bf16.vlgmr.msra.gmra.mxu0 %vm629_vm0, %v15533_v33  ;;  %5975 = vmatprep.subr.bf16.mxu1 %v13247_v48  ;;  %v11967_v48 = vld [vmem:[%s15178_s3 + $0x298] sm:$0xff]   ;;  %v4728_v33 = vpop.f32.mrf.mxu1 }
 0x46a   : > { %4934 = vmatpush1.bf16.msra.mxu0 %v13669_v23  ;;  %4953 = vmatprep.mubr.bf16.mxu0 %v15428_v34 }
 0x46b   : > { %4935 = vmatprep.subr.bf16.mxu0 %v13676_v9  ;;  %11039 = vmatmul.mubr.msk.bf16.vlgmr.msra.gmra.mxu1 %vm629_vm0, %v13753_v62 }
 0x46c   : > { %5976 = vmatpush1.bf16.msra.mxu1 %v13546_v20  ;;  %5995 = vmatprep.mubr.bf16.mxu1 %v15428_v34 }
 0x46d   : > { %5977 = vmatprep.subr.bf16.mxu1 %v13555_v59 }
 0x46e   : > { %4936 = vmatpush1.bf16.msra.mxu0 %v13682_v43 }
 0x46f   : > { %11604 = vmatprep.subr.bf16.mxu0 %v11957_v16  ;;  %v4730_v16 = vpop.f32.mrf.mxu1 }
 0x470   : > { %5978 = vmatpush1.bf16.msra.mxu1 %v15527_v61 }
 0x471   : > { %10972 = vmatmul.mubr.msk.bf16.vlgmr.msra.gmra.mxu0 %vm629_vm0, %v15534_v60  ;;  %6018 = vmatprep.subr.bf16.mxu1 %v13779_v6 }
 0x472   : > { %11605 = vmatpush3.bf16.msra.mxu0 %v11958_v17  ;;  %v4818_v17 = vpop.f32.mrf.mxu1 }
 0x473   : > { %11606 = vmatprep.subr.bf16.mxu0 %v11959_v54  ;;  %11092 = vmatmul.mubr.msk.bf16.vlgmr.msra.gmra.mxu1 %vm629_vm0, %v13753_v62 }
 0x474   : > { %6019 = vmatpush1.bf16.msra.mxu1 %v15535_v35  ;;  %6038 = vmatprep.mubr.bf16.mxu1 %v15428_v34  ;;  %v4820_v54 = vpop.f32.mrf.mxu1  ;;  %v4631_v35 = vadd.f32 %v4630_v15, %v4544_v3 }
 0x475   : > { %6020 = vmatprep.subr.bf16.mxu1 %v15536_v56 }
 0x476   : > { %11607 = vmatpush3.bf16.msra.mxu0 %v11960_v0  ;;  %v4822_v0 = vpop.f32.mrf.mxu1 }
 0x477   : > { %11608 = vmatprep.subr.bf16.mxu0 %v11961_v7 }
 0x478   : > { %6021 = vmatpush1.bf16.msra.mxu1 %v15537_v10 }
 0x479   : > { %6061 = vmatprep.subr.bf16.mxu1 %v15528_v51 }
 0x47a   : > { %11609 = vmatpush3.bf16.msra.mxu0 %v11962_v45  ;;  %v4824_v45 = vpop.f32.mrf.mxu1 }
 0x47b   : > { %11610 = vmatprep.subr.bf16.mxu0 %v11963_v53  ;;  %11093 = vmatmul.mubr.msk.bf16.vlgmr.msra.gmra.mxu1 %vm629_vm0, %v13753_v62 }
 0x47c   : > { %6062 = vmatpush1.bf16.msra.mxu1 %v15529_v21  ;;  %6081 = vmatprep.mubr.bf16.mxu1 %v15428_v34  ;;  %v4637_v21 = vadd.f32 %v4636_v41, %v4550_v57 }
 0x47d   : > { %6063 = vmatprep.subr.bf16.mxu1 %v15530_v14 }
 0x47e   : > { %11611 = vmatpush3.bf16.msra.mxu0 %v11964_v42 }
 0x47f   : > { %11612 = vmatprep.subr.bf16.mxu0 %v11966_v39 }
 0x480   : > { %6064 = vmatpush1.bf16.msra.mxu1 %v15531_v27  ;;  %v4590_v27 = vadd.f32 %v4589_v19, %v13785_v29 }
 0x481   : > { %6104 = vmatprep.subr.bf16.mxu1 %v15538_v22 }
 0x482   : > { %11613 = vmatpush3.bf16.msra.mxu0 %v11967_v48  ;;  %v4904_v48 = vpop.f32.mrf.mxu1 }
 0x483   : > { %11614 = vmatprep.subr.bf16.mxu0 %v11968_v40  ;;  %11094 = vmatmul.mubr.msk.bf16.vlgmr.msra.gmra.mxu1 %vm629_vm0, %v13709_v58  ;;  %v15548_v40 = vld [vmem:[#allocation22_spill] sm:$0xff] }
 0x484   : > { %6105 = vmatpush1.bf16.msra.mxu1 %v15539_v30  ;;  %6124 = vmatprep.mubr.bf16.mxu1 %v15428_v34 }
 0x485   : > { %6106 = vmatprep.subr.bf16.mxu1 %v15540_v46 }
 0x486   : > { %11615 = vmatpush3.bf16.msra.mxu0 %v11969_v13 }
 0x487   : > { %11616 = vmatprep.subr.bf16.mxu0 %v11970_v26 }
 0x488   : > { %6107 = vmatpush1.bf16.msra.mxu1 %v15541_v25 }
 0x489   : > { %6198 = vmatprep.subr.bf16.mxu1 %v15542_v8 }
 0x48a   : > { %11617 = vmatpush3.bf16.msra.mxu0 %v11971_v18 }
 0x48b   : > { %11618 = vmatprep.subr.bf16.mxu0 %v11972_v32  ;;  %11095 = vmatmul.mubr.msk.bf16.vlgmr.msra.gmra.mxu1 %vm629_vm0, %v13709_v58 }
 0x48c   : > { %6199 = vmatpush1.bf16.msra.mxu1 %v15543_v50  ;;  %6218 = vmatprep.mubr.bf16.mxu1 %v15428_v34 }
 0x48d   : > { %6200 = vmatprep.subr.bf16.mxu1 %v15544_v1 }
 0x48e   : > { %11619 = vmatpush3.bf16.msra.mxu0 %v11973_v47  ;;  %v4906_v47 = vpop.f32.mrf.mxu1 }
 0x48f   : > { %5407 = vmatprep.subr.bf16.mxu0 %v15532_v12  ;;  %v4588_v12 = vadd.f32 %v4587_v52, %v13770_v55  ;;  %v4594_v55 = vadd.f32 %v13832_v63, %v13808_v31 }
 0x490   : > { %6201 = vmatpush1.bf16.msra.mxu1 %v15545_v38  ;;  %v4908_v8 = vpop.f32.mrf.mxu1 }
 0x491   : > { %6292 = vmatprep.subr.bf16.mxu1 %v13779_v6  ;;  %v15550_v6 = vld [vmem:[#allocation23_spill] sm:$0xff] }
 0x492   : > { %v4910_v30 = vpop.f32.mrf.mxu1 }
 0x493   : > { %v4911_v61 = vadd.f32 %v4910_v30, %v4824_v45  ;;  %v4740_v30 = vadd.f32 %v4730_v16, %v4637_v21 }
 0x511   : > { %v11598_v7 = vpop.f32.mrf.mxu0 }
 0x513   : > { %v11599_v53 = vpop.f32.mrf.mxu0 }
 0x514   : > { %v11600_v42 = vadd.f32 %v11599_v53, %v11598_v7  ;;  %v4998_v53 = vpop.f32.mrf.mxu1 }
 0x515   : > { %v11601_v39 = vpop.f32.mrf.mxu0 }
 0x516   : > { %v13835_v13 = vadd.f32 %v11600_v42, %v15548_v40  ;;  %v5000_v42 = vpop.f32.mrf.mxu1 }
 0x517   : > { %v11602_v26 = vpop.f32.mrf.mxu0 }
 0x518   : > { %15549 = vst [vmem:[#allocation25_spill] sm:$0xff] %v13835_v13  ;;  %v11603_v18 = vadd.f32 %v11602_v26, %v11601_v39  ;;  %v4633_v13 = vadd.f32 %v4632_v11, %v4546_v36  ;;  %v4907_v39 = vadd.f32 %v4906_v47, %v4820_v54  ;;  %v5002_v62 = vpop.f32.mrf.mxu1  ;;  %v4592_v36 = vadd.f32 %v4591_v2, %v13798_v24  ;;  %v15554_v47 = vld [vmem:[#allocation5_spill] sm:$0xff] }
 0x519   : > { %v4681_v32 = vpop.f32.mrf.mxu0  ;;  %v4735_v11 = vadd.f32 %v4724_v37, %v4631_v35 }
 0x51a   : > { %v13838_v38 = vadd.f32 %v11603_v18, %v15550_v6  ;;  %v4635_v6 = vadd.f32 %v4634_v49, %v4548_v28  ;;  %v4905_v18 = vadd.f32 %v4904_v48, %v4818_v17  ;;  %v4736_v51 = vadd.f32 %v4726_v5, %v4633_v13  ;;  %v5004_v54 = vpop.f32.mrf.mxu1  ;;  %v13856_v48 = vld [vmem:[%s15176_s1 + $0x64] ss:$16 sps:$4 sm:$0xff]  }
 0x51b   : > { %v4683_v1 = vpop.f32.mrf.mxu0  ;;  %v5010_v59 = vadd.f32 %v5000_v42, %v4907_v39  ;;  %v4733_v17 = vadd.f32 %v4681_v32, %v4588_v12  ;;  %v5014_v52 = vadd.f32 %v5004_v54, %v4911_v61  ;;  %v15552_v13 = vld [vmem:[#allocation29_spill] sm:$0xff]  ;;  %v15553_v32 = vld [vmem:[#allocation14_spill] sm:$0xff]  ;;  %v15557_v42 = vld [vmem:[#allocation20_spill] sm:$0xff] }
 0x51c   : > { %15551 = vst [vmem:[#allocation4_spill] sm:$0xff] %v13838_v38  ;;  %v4909_v38 = vadd.f32 %v4908_v8, %v4822_v0  ;;  %v4739_v28 = vadd.f32 %v4728_v33, %v4635_v6  ;;  %v5009_v49 = vadd.f32 %v4998_v53, %v4905_v18  ;;  %v15556_v53 = vld [vmem:[#allocation18_spill] sm:$0xff]  ;;  %v15559_v39 = vld [vmem:[#allocation19_spill] sm:$0xff]  ;;  %v15566_v54 = vld [vmem:[#allocation9_spill] sm:$0xff] }
 0x51d   : > { %v4685_v50 = vpop.f32.mrf.mxu0  ;;  %v5018_v57 = vmax.f32 %v4736_v51, %v5010_v59  ;;  %v13882_v6 = vld [vmem:[%s12417_s16 + $0x80] sm:$0xff]   ;;  %v15563_v18 = vld [vmem:[#allocation6_spill] sm:$0xff] }
 0x51e   : > { %v5013_v8 = vadd.f32 %v5002_v62, %v4909_v38  ;;  %v4737_v35 = vadd.f32 %v4685_v50, %v4592_v36  ;;  %15562 = vst [vmem:[#allocation24_spill] sm:$0xff] %v13882_v6  ;;  %11098 = vmatmul.mubr.msk.bf16.vlgmr.msra.gmra.mxu1 %vm629_vm0, %v13882_v6  ;;  %v15564_v36 = vld [vmem:[#allocation7_spill] sm:$0xff] }
 0x51f   : > { %v4687_v25 = vpop.f32.mrf.mxu0  ;;  %6293 = vmatpush1.bf16.msra.mxu1 %v15563_v18  ;;  %6312 = vmatprep.mubr.bf16.mxu1 %v15428_v34 }
 0x520   : > { %v5021_v41 = vmax.f32 %v4739_v28, %v5013_v8  ;;  %v4738_v12 = vadd.f32 %v4687_v25, %v4594_v55  ;;  %6294 = vmatprep.subr.bf16.mxu1 %v15564_v36  ;;  %v15568_v28 = vld [vmem:[#allocation11_spill] sm:$0xff]  ;;  %v15569_v8 = vld [vmem:[#allocation12_spill] sm:$0xff]  ;;  %v11978_v55 = vld [vmem:[%s15178_s3 + $0x330] sm:$0xff]  }
 0x521   : > { %v4775_v46 = vpop.f32.mrf.mxu0 }
 0x523   : > { %v4777_v22 = vpop.f32.mrf.mxu0 }
 0x525   : > { %v4779_v7 = vpop.f32.mrf.mxu0 }
 0x527   : > { %v4781_v10 = vpop.f32.mrf.mxu0 }
 0x529   : > { %v4861_v56 = vpop.f32.mrf.mxu0 }
 0x52a   : > { %v4862_v14 = vadd.f32 %v4861_v56, %v4775_v46  ;;  %v4734_v56 = vadd.f32 %v4683_v1, %v4590_v27  ;;  %v5022_v27 = vmax.f32 %v4740_v30, %v5014_v52  ;;  %v11980_v30 = vld [vmem:[%s15178_s3 + $0x328] sm:$0xff]   ;;  %v11981_v52 = vld [vmem:[%s15178_s3 + $0x360] sm:$0xff]  }
 0x52b   : > { %v4863_v40 = vpop.f32.mrf.mxu0 }
 0x52c   : > { %v4864_v3 = vadd.f32 %v4863_v40, %v4777_v22  ;;  %v15558_v40 = vld [vmem:[#allocation21_spill] sm:$0xff] }
 0x52d   : > { %v4865_v26 = vpop.f32.mrf.mxu0 }
 0x52e   : > { %v4866_v46 = vadd.f32 %v4865_v26, %v4779_v7  ;;  %v15555_v7 = vld [vmem:[#allocation3_spill] sm:$0xff]  ;;  %v15560_v26 = vld [vmem:[#allocation28_spill] sm:$0xff] }
 0x52f   : > { %v4867_v60 = vpop.f32.mrf.mxu0 }
 0x530   : > { %v4868_v2 = vadd.f32 %v4867_v60, %v4781_v10 }
 0x531   : > { %v4955_v20 = vpop.f32.mrf.mxu0 }
 0x532   : > { %v5007_v15 = vadd.f32 %v4955_v20, %v4862_v14  ;;  %v5017_v14 = vmax.f32 %v4735_v11, %v5009_v49  ;;  %v15565_v11 = vld [vmem:[#allocation8_spill] sm:$0xff]  ;;  %v11976_v49 = vld [vmem:[%s15178_s3 + $0x338] sm:$0xff]  }
 0x533   : > { %v4957_v0 = vpop.f32.mrf.mxu0  ;;  %6295 = vmatpush1.bf16.msra.mxu1 %v15565_v11 }
 0x534   : > { %v5008_v29 = vadd.f32 %v4957_v0, %v4864_v3  ;;  %v5015_v19 = vmax.f32 %v4733_v17, %v5007_v15  ;;  %6378 = vmatprep.subr.bf16.mxu1 %v15566_v54  ;;  %v15567_v3 = vld [vmem:[#allocation10_spill] sm:$0xff]  ;;  %v11977_v17 = vld [vmem:[%s15178_s3 + $0x370] sm:$0xff]  }
 0x535   : > { %v4959_v24 = vpop.f32.mrf.mxu0  ;;  %v11975_v15 = vld [vmem:[%s15178_s3 + $0x378] sm:$0xff]   ;;  %v15570_v0 = vld [vmem:[#allocation13_spill] sm:$0xff] }
 0x536   : > { %v5016_v22 = vmax.f32 %v4734_v56, %v5008_v29  ;;  %v5011_v20 = vadd.f32 %v4959_v24, %v4866_v46  ;;  %v5023_v31 = vmax.f32 %v5015_v19, %v5017_v14  ;;  %11100 = vmatmul.mubr.msk.bf16.vlgmr.msra.gmra.mxu1 %vm629_vm0, %v13882_v6  ;;  %v15571_v56 = vld [vmem:[#allocation15_spill] sm:$0xff]  ;;  %v11979_v46 = vld [vmem:[%s15178_s3 + $0x368] sm:$0xff]  }
 0x537   : > { %v4961_v38 = vpop.f32.mrf.mxu0  ;;  %6379 = vmatpush1.bf16.msra.mxu1 %v15567_v3  ;;  %6398 = vmatprep.mubr.bf16.mxu1 %v15428_v34  ;;  %v15572_v29 = vld [vmem:[#allocation16_spill] sm:$0xff]  ;;  %v11982_v24 = vld [vmem:[%s15178_s3 + $0x320] sm:$0xff]  }
 0x538   : > { %v5024_v62 = vmax.f32 %v5016_v22, %v5018_v57  ;;  %v5019_v37 = vmax.f32 %v4737_v35, %v5011_v20  ;;  %v5012_v5 = vadd.f32 %v4961_v38, %v4868_v2  ;;  %v5027_v21 = vadd.f32 %v5023_v31, %v12803_v4  ;;  %6380 = vmatprep.subr.bf16.mxu1 %v15568_v28  ;;  %v15573_v57 = vld [vmem:[#allocation17_spill] sm:$0xff]  ;;  %v13926_v19 = vld [vmem:[%s12417_s16 + $0x88] sm:$0xff]   ;;  %v11984_v35 = vld [vmem:[%s15178_s3 + $0x358] sm:$0xff]   ;;  %v13943_v22 = vpop.f32.mrf.mxu1 }
 0x539   : > { %15574 = vst [vmem:[#allocation22_spill] sm:$0xff] %v13926_v19  ;;  %v11985_v2 = vld [vmem:[%s15178_s3 + $0x318] sm:$0xff]   ;;  %v11986_v20 = vld [vmem:[%s15178_s3 + $0x350] sm:$0xff]   ;;  %v15575_v14 = vld [vmem:[#allocation27_spill] sm:$0xff] }
 0x53a   : > { %v5025_v1 = vmax.f32 %v5019_v37, %v5021_v41  ;;  %v5020_v63 = vmax.f32 %v4738_v12, %v5012_v5  ;;  %v5028_v51 = vadd.f32 %v5024_v62, %v12799_v44  ;;  %v5031_v25 = vmax.f32 %v5027_v21, 0.0  ;;  %v11987_v41 = vld [vmem:[%s15178_s3 + $0x310] sm:$0xff]   ;;  %v13953_v38 = vpop.f32.mrf.mxu1  ;;  %v11988_v12 = vld [vmem:[%s15178_s3 + $0x348] sm:$0xff]   ;;  %v11990_v5 = vld [vmem:[%s15178_s3 + $0x340] sm:$0xff]  }
 0x53b   : > { %6381 = vmatpush1.bf16.msra.mxu1 %v15569_v8  ;;  %v11989_v62 = vld [vmem:[%s15178_s3 + $0x308] sm:$0xff]   ;;  %v11991_v31 = vld [vmem:[%s15178_s3 + $0x300] sm:$0xff]  }
 0x53c   : > { %v5029_v59 = vadd.f32 %v5025_v1, %v12803_v4  ;;  %v5026_v61 = vmax.f32 %v5020_v63, %v5022_v27  ;;  %v5032_v50 = vmax.f32 %v5028_v51, 0.0  ;;  %6472 = vmatprep.subr.bf16.mxu1 %v15570_v0  ;;  %v13966_v37 = vpop.f32.mrf.mxu1 }
 0x53e   : > { %v5030_v60 = vadd.f32 %v5026_v61, %v12799_v44  ;;  %v5033_v10 = vmax.f32 %v5029_v59, 0.0  ;;  %v13976_v27 = vpop.f32.mrf.mxu1 }
 0x540   : > { %v5034_v33 = vmax.f32 %v5030_v60, 0.0  ;;  %v5035_v45 = vpack.c.bf16 %v5033_v10, %v5031_v25  ;;  %v5292_v1 = vpop.f32.mrf.mxu1 }
 0x542   : > { %v5036_v16 = vpack.c.bf16 %v5034_v33, %v5032_v50  ;;  %v5294_v63 = vpop.f32.mrf.mxu1 }
 0x544   : > { %5198 = vmatprep.mubr.bf16.mxu0 %v5036_v16  ;;  %v5296_v59 = vpop.f32.mrf.mxu1 }
 0x545   : > { %5199 = vmatmul.mubr.bf16.vlgmr.msra.gmra.mxu0 %v5035_v45 }
 0x546   : > { %5408 = vmatpush1.bf16.msra.mxu0 %v13669_v23  ;;  %5427 = vmatprep.mubr.bf16.mxu0 %v15428_v34  ;;  %v5298_v61 = vpop.f32.mrf.mxu1 }
 0x547   : > { %5409 = vmatprep.subr.bf16.mxu0 %v13676_v9 }
 0x548   : > { %v5335_v51 = vpop.f32.mrf.mxu1 }
 0x54a   : > { %5410 = vmatpush1.bf16.msra.mxu0 %v13682_v43  ;;  %v5337_v21 = vpop.f32.mrf.mxu1 }
 0x54b   : > { %5501 = vmatprep.subr.bf16.mxu0 %v13856_v48 }
 0x54c   : > { %v5339_v60 = vpop.f32.mrf.mxu1 }
 0x54d   : > { %11031 = vmatmul.mubr.msk.bf16.vlgmr.msra.gmra.mxu0 %vm629_vm0, %v13709_v58 }
 0x54e   : > { %5502 = vmatpush1.bf16.msra.mxu0 %v15552_v13  ;;  %5521 = vmatprep.mubr.bf16.mxu0 %v15428_v34  ;;  %v14000_v10 = vpop.f32.mrf.mxu1 }
 0x54f   : > { %5503 = vmatprep.subr.bf16.mxu0 %v15553_v32 }
 0x550   : > { %v5378_v50 = vpop.f32.mrf.mxu1 }
 0x552   : > { %5504 = vmatpush1.bf16.msra.mxu0 %v15554_v47  ;;  %v5380_v33 = vpop.f32.mrf.mxu1 }
 0x553   : > { %5587 = vmatprep.subr.bf16.mxu0 %v15555_v7 }
 0x554   : > { %v5382_v25 = vpop.f32.mrf.mxu1 }
 0x555   : > { %11033 = vmatmul.mubr.msk.bf16.vlgmr.msra.gmra.mxu0 %vm629_vm0, %v13709_v58  ;;  %v15561_v58 = vld [vmem:[#allocation26_spill] sm:$0xff] }
 0x556   : > { %5588 = vmatpush1.bf16.msra.mxu0 %v15556_v53  ;;  %5607 = vmatprep.mubr.bf16.mxu0 %v15428_v34  ;;  %v5384_v16 = vpop.f32.mrf.mxu1 }
 0x557   : > { %5589 = vmatprep.subr.bf16.mxu0 %v15557_v42  ;;  %11102 = vmatmul.mubr.msk.bf16.vlgmr.msra.gmra.mxu1 %vm629_vm0, %v15561_v58 }
 0x558   : > { %6473 = vmatpush1.bf16.msra.mxu1 %v15571_v56  ;;  %6492 = vmatprep.mubr.bf16.mxu1 %v15428_v34  ;;  %v5472_v45 = vpop.f32.mrf.mxu1 }
 0x559   : > { %6474 = vmatprep.subr.bf16.mxu1 %v15572_v29 }
 0x55a   : > { %5590 = vmatpush1.bf16.msra.mxu0 %v15558_v40 }
 0x55b   : > { %5681 = vmatprep.subr.bf16.mxu0 %v15559_v39 }
 0x55c   : > { %6475 = vmatpush1.bf16.msra.mxu1 %v15573_v57 }
 0x55d   : > { %11035 = vmatmul.mubr.msk.bf16.vlgmr.msra.gmra.mxu0 %vm629_vm0, %v15560_v26  ;;  %6723 = vmatprep.subr.bf16.mxu1 %v13856_v48 }
 0x55e   : > { %5682 = vmatpush1.bf16.msra.mxu0 %v13669_v23  ;;  %5701 = vmatprep.mubr.bf16.mxu0 %v15428_v34 }
 0x55f   : > { %5683 = vmatprep.subr.bf16.mxu0 %v13676_v9  ;;  %11105 = vmatmul.mubr.msk.bf16.vlgmr.msra.gmra.mxu1 %vm629_vm0, %v13926_v19 }
 0x560   : > { %6724 = vmatpush1.bf16.msra.mxu1 %v15552_v13  ;;  %6743 = vmatprep.mubr.bf16.mxu1 %v15428_v34  ;;  %v5474_v13 = vpop.f32.mrf.mxu1 }
 0x561   : > { %6725 = vmatprep.subr.bf16.mxu1 %v15553_v32 }
 0x562   : > { %5684 = vmatpush1.bf16.msra.mxu0 %v13682_v43  ;;  %v5476_v32 = vpop.f32.mrf.mxu1 }
 0x563   : > { %11626 = vmatprep.subr.bf16.mxu0 %v11975_v15 }
 0x564   : > { %6726 = vmatpush1.bf16.msra.mxu1 %v15554_v47  ;;  %v5478_v47 = vpop.f32.mrf.mxu1 }
 0x565   : > { %11038 = vmatmul.mubr.msk.bf16.vlgmr.msra.gmra.mxu0 %vm629_vm0, %v15561_v58  ;;  %6766 = vmatprep.subr.bf16.mxu1 %v15575_v14 }
 0x566   : > { %11627 = vmatpush3.bf16.msra.mxu0 %v11976_v49 }
 0x567   : > { %11628 = vmatprep.subr.bf16.mxu0 %v11977_v17  ;;  %11158 = vmatmul.mubr.msk.bf16.vlgmr.msra.gmra.mxu1 %vm629_vm0, %v13926_v19  ;;  %v15578_v17 = vld [vmem:[#allocation4_spill] sm:$0xff] }
 0x568   : > { %6767 = vmatpush1.bf16.msra.mxu1 %v15563_v18  ;;  %6786 = vmatprep.mubr.bf16.mxu1 %v15428_v34 }
 0x569   : > { %6768 = vmatprep.subr.bf16.mxu1 %v15564_v36 }
 0x56a   : > { %11629 = vmatpush3.bf16.msra.mxu0 %v11978_v55 }
 0x56b   : > { %11630 = vmatprep.subr.bf16.mxu0 %v11979_v46 }
 0x56c   : > { %6769 = vmatpush1.bf16.msra.mxu1 %v15565_v11 }
 0x56d   : > { %6809 = vmatprep.subr.bf16.mxu1 %v15555_v7  ;;  %v5566_v7 = vpop.f32.mrf.mxu1 }
 0x56e   : > { %11631 = vmatpush3.bf16.msra.mxu0 %v11980_v30 }
 0x56f   : > { %11632 = vmatprep.subr.bf16.mxu0 %v11981_v52  ;;  %11159 = vmatmul.mubr.msk.bf16.vlgmr.msra.gmra.mxu1 %vm629_vm0, %v13926_v19 }
 0x570   : > { %6810 = vmatpush1.bf16.msra.mxu1 %v15556_v53  ;;  %6829 = vmatprep.mubr.bf16.mxu1 %v15428_v34  ;;  %v5568_v53 = vpop.f32.mrf.mxu1 }
 0x571   : > { %6811 = vmatprep.subr.bf16.mxu1 %v15557_v42 }
 0x572   : > { %11633 = vmatpush3.bf16.msra.mxu0 %v11982_v24  ;;  %v5570_v42 = vpop.f32.mrf.mxu1 }
 0x573   : > { %11634 = vmatprep.subr.bf16.mxu0 %v11984_v35 }
 0x574   : > { %6812 = vmatpush1.bf16.msra.mxu1 %v15558_v40 }
 0x575   : > { %6852 = vmatprep.subr.bf16.mxu1 %v15566_v54  ;;  %v15576_v54 = vld [vmem:[#allocation25_spill] sm:$0xff] }
 0x576   : > { %11635 = vmatpush3.bf16.msra.mxu0 %v11985_v2 }
 0x577   : > { %11636 = vmatprep.subr.bf16.mxu0 %v11986_v20  ;;  %11160 = vmatmul.mubr.msk.bf16.vlgmr.msra.gmra.mxu1 %vm629_vm0, %v13882_v6 }
 0x578   : > { %6853 = vmatpush1.bf16.msra.mxu1 %v15567_v3  ;;  %6872 = vmatprep.mubr.bf16.mxu1 %v15428_v34 }
 0x579   : > { %6854 = vmatprep.subr.bf16.mxu1 %v15568_v28 }
 0x57a   : > { %11637 = vmatpush3.bf16.msra.mxu0 %v11987_v41 }
 0x57b   : > { %11638 = vmatprep.subr.bf16.mxu0 %v11988_v12 }
 0x57c   : > { %6855 = vmatpush1.bf16.msra.mxu1 %v15569_v8 }
 0x57d   : > { %6946 = vmatprep.subr.bf16.mxu1 %v15570_v0 }
 0x57e   : > { %11639 = vmatpush3.bf16.msra.mxu0 %v11989_v62  ;;  %v5381_v62 = vadd.f32 %v5380_v33, %v5294_v63  ;;  %v5340_v63 = vadd.f32 %v5339_v60, %v13966_v37 }
 0x57f   : > { %11640 = vmatprep.subr.bf16.mxu0 %v11990_v5  ;;  %11161 = vmatmul.mubr.msk.bf16.vlgmr.msra.gmra.mxu1 %vm629_vm0, %v13882_v6 }
 0x580   : > { %6947 = vmatpush1.bf16.msra.mxu1 %v15571_v56  ;;  %6966 = vmatprep.mubr.bf16.mxu1 %v15428_v34 }
 0x581   : > { %6948 = vmatprep.subr.bf16.mxu1 %v15572_v29 }
 0x582   : > { %11641 = vmatpush3.bf16.msra.mxu0 %v11991_v31 }
 0x583   : > { %6155 = vmatprep.subr.bf16.mxu0 %v15559_v39  ;;  %v5572_v39 = vpop.f32.mrf.mxu1 }
 0x584   : > { %6949 = vmatpush1.bf16.msra.mxu1 %v15573_v57 }
 0x585   : > { %7040 = vmatprep.subr.bf16.mxu1 %v15575_v14  ;;  %v5652_v11 = vpop.f32.mrf.mxu1  ;;  %v5484_v14 = vadd.f32 %v5474_v13, %v5381_v62  ;;  %v14027_v62 = vld [vmem:[%s15176_s1 + $0x60] ss:$16 sps:$4 sm:$0xff]  }
 0x586   : > { %15581 = vst [vmem:[#allocation14_spill] sm:$0xff] %v14027_v62 }
 0x587   : > { %v5654_v8 = vpop.f32.mrf.mxu1 }
 0x588   : > { %v5655_v5 = vadd.f32 %v5654_v8, %v5568_v53 }
 0x589   : > { %v5656_v46 = vpop.f32.mrf.mxu1 }
 0x58b   : > { %v5658_v57 = vpop.f32.mrf.mxu1 }
 0x58c   : > { %v5659_v19 = vadd.f32 %v5658_v57, %v5572_v39 }
 0x58d   : > { %v5746_v35 = vpop.f32.mrf.mxu1 }
 0x58f   : > { %v5748_v41 = vpop.f32.mrf.mxu1 }
 0x590   : > { %v5758_v58 = vadd.f32 %v5748_v41, %v5655_v5  ;;  %v14034_v5 = vld [vmem:[%s15176_s1 + $0x44] ss:$16 sps:$4 sm:$0xff]  }
 0x591   : > { %15582 = vst [vmem:[#allocation5_spill] sm:$0xff] %v14034_v5 }
 0x605   : > { %v11620_v40 = vpop.f32.mrf.mxu0 }
 0x607   : > { %v11621_v26 = vpop.f32.mrf.mxu0 }
 0x608   : > { %v11622_v18 = vadd.f32 %v11621_v26, %v11620_v40  ;;  %v5379_v40 = vadd.f32 %v5378_v50, %v5292_v1  ;;  %v5750_v26 = vpop.f32.mrf.mxu1 }
 0x609   : > { %v11623_v36 = vpop.f32.mrf.mxu0 }
 0x60a   : > { %v14003_v3 = vadd.f32 %v11622_v18, %v15576_v54  ;;  %v5383_v18 = vadd.f32 %v5382_v25, %v5296_v59  ;;  %v5657_v54 = vadd.f32 %v5656_v46, %v5570_v42  ;;  %v5483_v33 = vadd.f32 %v5472_v45, %v5379_v40  ;;  %v5752_v53 = vpop.f32.mrf.mxu1  ;;  %v14046_v40 = vld [vmem:[%s15176_s1 + $0x24] ss:$16 sps:$4 sm:$0xff]  }
 0x60b   : > { %v11624_v15 = vpop.f32.mrf.mxu0  ;;  %v5762_v13 = vadd.f32 %v5752_v53, %v5659_v19  ;;  %15584 = vst [vmem:[#allocation18_spill] sm:$0xff] %v14046_v40  ;;  %v11993_v53 = vld [vmem:[%s15178_s3 + $0x3f8] sm:$0xff]  }
 0x60c   : > { %15577 = vst [vmem:[#allocation23_spill] sm:$0xff] %v14003_v3  ;;  %v11625_v28 = vadd.f32 %v11624_v15, %v11623_v36  ;;  %v5653_v36 = vadd.f32 %v5652_v11, %v5566_v7  ;;  %v5385_v3 = vadd.f32 %v5384_v16, %v5298_v61  ;;  %v5487_v59 = vadd.f32 %v5476_v32, %v5383_v18  ;;  %v14061_v18 = vld [vmem:[%s15176_s1 + $0x4] ss:$16 sps:$4 sm:$0xff]  }
 0x60d   : > { %v5429_v49 = vpop.f32.mrf.mxu0  ;;  %v5761_v7 = vadd.f32 %v5750_v26, %v5657_v54  ;;  %v5766_v16 = vmax.f32 %v5484_v14, %v5758_v58  ;;  %v14054_v26 = vld [vmem:[%s15176_s1 + $0x20] ss:$16 sps:$4 sm:$0xff]   ;;  %15586 = vst [vmem:[#allocation21_spill] sm:$0xff] %v14061_v18  ;;  %v14073_v54 = vld [vmem:[%s15176_s1 + $0xa4] ss:$16 sps:$4 sm:$0xff]  }
 0x60e   : > { %v14006_v0 = vadd.f32 %v11625_v28, %v15578_v17  ;;  %v5336_v28 = vadd.f32 %v5335_v51, %v13943_v22  ;;  %v5338_v17 = vadd.f32 %v5337_v21, %v13953_v38  ;;  %v5757_v25 = vadd.f32 %v5746_v35, %v5653_v36  ;;  %15585 = vst [vmem:[#allocation20_spill] sm:$0xff] %v14054_v26  ;;  %v14067_v36 = vld [vmem:[%s15176_s1] ss:$16 sps:$4 sm:$0xff]  }
 0x60f   : > { %v5431_v55 = vpop.f32.mrf.mxu0  ;;  %v5342_v22 = vadd.f32 %v14000_v10, %v13976_v27  ;;  %v5488_v21 = vadd.f32 %v5478_v47, %v5385_v3  ;;  %15587 = vst [vmem:[#allocation19_spill] sm:$0xff] %v14067_v36  ;;  %15588 = vst [vmem:[#allocation28_spill] sm:$0xff] %v14073_v54 }
 0x610   : > { %15579 = vst [vmem:[#allocation29_spill] sm:$0xff] %v14006_v0  ;;  %v5481_v42 = vadd.f32 %v5429_v49, %v5336_v28  ;;  %v5482_v38 = vadd.f32 %v5431_v55, %v5338_v17  ;;  %v5765_v32 = vmax.f32 %v5483_v33, %v5757_v25  ;;  %v15590_v28 = vld [vmem:[#allocation22_spill] sm:$0xff]  ;;  %v14085_v17 = vld [vmem:[%s12417_s16 + $0x90] sm:$0xff]  }
 0x611   : > { %v5433_v56 = vpop.f32.mrf.mxu0  ;;  %v5770_v10 = vmax.f32 %v5488_v21, %v5762_v13  ;;  %11164 = vmatmul.mubr.msk.bf16.vlgmr.msra.gmra.mxu1 %vm629_vm0, %v14085_v17  ;;  %v14119_v33 = vld [vmem:[%s15176_s1 + $0x28] ss:$16 sps:$4 sm:$0xff]   ;;  %v11995_v25 = vld [vmem:[%s15178_s3 + $0x3f0] sm:$0xff]   ;;  %v11999_v21 = vld [vmem:[%s15178_s3 + $0x3e0] sm:$0xff]  }
 0x612   : > { %v5485_v60 = vadd.f32 %v5433_v56, %v5340_v63  ;;  %v14092_v63 = vld [vmem:[%s15176_s1 + $0x68] ss:$16 sps:$4 sm:$0xff]   ;;  %7060 = vmatprep.mubr.bf16.mxu1 %v15428_v34  ;;  %15595 = vst [vmem:[#allocation10_spill] sm:$0xff] %v14119_v33  ;;  %v12000_v13 = vld [vmem:[%s15178_s3 + $0x3a0] sm:$0xff]  }
 0x613   : > { %v5435_v29 = vpop.f32.mrf.mxu0  ;;  %15591 = vst [vmem:[#allocation6_spill] sm:$0xff] %v14092_v63  ;;  %7041 = vmatpush1.bf16.msra.mxu1 %v14092_v63 }
 0x614   : > { %v5486_v49 = vadd.f32 %v5435_v29, %v5342_v22  ;;  %v11997_v22 = vld [vmem:[%s15178_s3 + $0x3e8] sm:$0xff]  }
 0x615   : > { %v5523_v30 = vpop.f32.mrf.mxu0 }
 0x617   : > { %v5525_v52 = vpop.f32.mrf.mxu0 }
 0x619   : > { %v5527_v24 = vpop.f32.mrf.mxu0 }
 0x61b   : > { %v5529_v2 = vpop.f32.mrf.mxu0 }
 0x61d   : > { %v5609_v20 = vpop.f32.mrf.mxu0 }
 0x61e   : > { %v5610_v0 = vadd.f32 %v5609_v20, %v5523_v30 }
 0x61f   : > { %v5611_v12 = vpop.f32.mrf.mxu0 }
 0x620   : > { %v5612_v1 = vadd.f32 %v5611_v12, %v5525_v52  ;;  %v15580_v12 = vld [vmem:[#allocation24_spill] sm:$0xff] }
 0x621   : > { %v5613_v31 = vpop.f32.mrf.mxu0 }
 0x622   : > { %v5614_v61 = vadd.f32 %v5613_v31, %v5527_v24  ;;  %v14040_v31 = vld [vmem:[%s15176_s1 + $0x40] ss:$16 sps:$4 sm:$0xff]  }
 0x623   : > { %v5615_v15 = vpop.f32.mrf.mxu0  ;;  %15583 = vst [vmem:[#allocation3_spill] sm:$0xff] %v14040_v31 }
 0x624   : > { %v5616_v45 = vadd.f32 %v5615_v15, %v5529_v2  ;;  %v15589_v15 = vld [vmem:[#allocation26_spill] sm:$0xff] }
 0x625   : > { %v5703_v6 = vpop.f32.mrf.mxu0 }
 0x626   : > { %v5755_v50 = vadd.f32 %v5703_v6, %v5610_v0  ;;  %v5769_v0 = vmax.f32 %v5487_v59, %v5761_v7  ;;  %v14138_v59 = vld [vmem:[%s15176_s1 + $0x8] ss:$16 sps:$4 sm:$0xff]   ;;  %v14147_v7 = vld [vmem:[%s15176_s1 + $0xac] ss:$16 sps:$4 sm:$0xff]  }
 0x627   : > { %v5705_v11 = vpop.f32.mrf.mxu0  ;;  %15597 = vst [vmem:[#allocation12_spill] sm:$0xff] %v14138_v59  ;;  %15598 = vst [vmem:[#allocation13_spill] sm:$0xff] %v14147_v7 }
 0x628   : > { %v5756_v51 = vadd.f32 %v5705_v11, %v5612_v1  ;;  %v5763_v39 = vmax.f32 %v5481_v42, %v5755_v50  ;;  %v14129_v1 = vld [vmem:[%s15176_s1 + $0xc] ss:$16 sps:$4 sm:$0xff]   ;;  %v11996_v42 = vld [vmem:[%s15178_s3 + $0x3b0] sm:$0xff]   ;;  %v14158_v11 = vld [vmem:[%s15176_s1 + $0xa8] ss:$16 sps:$4 sm:$0xff]  }
 0x629   : > { %v5707_v37 = vpop.f32.mrf.mxu0  ;;  %15596 = vst [vmem:[#allocation11_spill] sm:$0xff] %v14129_v1  ;;  %v11994_v50 = vld [vmem:[%s15178_s3 + $0x3b8] sm:$0xff]   ;;  %15599 = vst [vmem:[#allocation15_spill] sm:$0xff] %v14158_v11 }
 0x62a   : > { %v5764_v8 = vmax.f32 %v5482_v38, %v5756_v51  ;;  %v5759_v6 = vadd.f32 %v5707_v37, %v5614_v61  ;;  %v5771_v27 = vmax.f32 %v5763_v39, %v5765_v32  ;;  %v14167_v38 = vld [vmem:[%s15176_s1 + $0x8c] ss:$16 sps:$4 sm:$0xff]   ;;  %v14177_v51 = vld [vmem:[%s15176_s1 + $0x88] ss:$16 sps:$4 sm:$0xff]  }
 0x62b   : > { %v5709_v46 = vpop.f32.mrf.mxu0  ;;  %15600 = vst [vmem:[#allocation16_spill] sm:$0xff] %v14167_v38  ;;  %v11998_v61 = vld [vmem:[%s15178_s3 + $0x3a8] sm:$0xff]   ;;  %15601 = vst [vmem:[#allocation17_spill] sm:$0xff] %v14177_v51  ;;  %v12002_v39 = vld [vmem:[%s15178_s3 + $0x3d8] sm:$0xff]  }
 0x62c   : > { %v5772_v30 = vmax.f32 %v5764_v8, %v5766_v16  ;;  %v5767_v57 = vmax.f32 %v5485_v60, %v5759_v6  ;;  %v5760_v52 = vadd.f32 %v5709_v46, %v5616_v45  ;;  %v5775_v47 = vadd.f32 %v5771_v27, %v12803_v4  ;;  %v14184_v16 = vld [vmem:[%s12417_s16 + $0x98] sm:$0xff]   ;;  %v14201_v60 = vpop.f32.mrf.mxu1  ;;  %v12004_v45 = vld [vmem:[%s15178_s3 + $0x3d0] sm:$0xff]   ;;  %v15603_v8 = vld [vmem:[#allocation27_spill] sm:$0xff] }
 0x62d   : > { %15602 = vst [vmem:[#allocation25_spill] sm:$0xff] %v14184_v16  ;;  %v12003_v37 = vld [vmem:[%s15178_s3 + $0x398] sm:$0xff]   ;;  %v12005_v6 = vld [vmem:[%s15178_s3 + $0x390] sm:$0xff]   ;;  %v12007_v46 = vld [vmem:[%s15178_s3 + $0x388] sm:$0xff]  }
 0x62e   : > { %v5773_v55 = vmax.f32 %v5767_v57, %v5769_v0  ;;  %v5768_v24 = vmax.f32 %v5486_v49, %v5760_v52  ;;  %v5776_v14 = vadd.f32 %v5772_v30, %v12799_v44  ;;  %v5779_v29 = vmax.f32 %v5775_v47, 0.0  ;;  %v14211_v32 = vpop.f32.mrf.mxu1  ;;  %v12006_v0 = vld [vmem:[%s15178_s3 + $0x3c8] sm:$0xff]   ;;  %v12008_v30 = vld [vmem:[%s15178_s3 + $0x3c0] sm:$0xff]  }
 0x62f   : > { %v12009_v57 = vld [vmem:[%s15178_s3 + $0x380] sm:$0xff]  }
 0x630   : > { %v5777_v58 = vadd.f32 %v5773_v55, %v12803_v4  ;;  %v5774_v19 = vmax.f32 %v5768_v24, %v5770_v10  ;;  %v5780_v35 = vmax.f32 %v5776_v14, 0.0  ;;  %v14224_v49 = vpop.f32.mrf.mxu1 }
 0x632   : > { %v5778_v3 = vadd.f32 %v5774_v19, %v12799_v44  ;;  %v5781_v56 = vmax.f32 %v5777_v58, 0.0  ;;  %v14234_v52 = vpop.f32.mrf.mxu1 }
 0x634   : > { %v5782_v2 = vmax.f32 %v5778_v3, 0.0  ;;  %v5783_v41 = vpack.c.bf16 %v5781_v56, %v5779_v29  ;;  %v6040_v27 = vpop.f32.mrf.mxu1 }
 0x636   : > { %v5784_v20 = vpack.c.bf16 %v5782_v2, %v5780_v35  ;;  %v6042_v10 = vpop.f32.mrf.mxu1 }
 0x638   : > { %5946 = vmatprep.mubr.bf16.mxu0 %v5784_v20  ;;  %v6044_v55 = vpop.f32.mrf.mxu1 }
 0x639   : > { %5947 = vmatmul.mubr.bf16.vlgmr.msra.gmra.mxu0 %v5783_v41 }
 0x63a   : > { %6156 = vmatpush1.bf16.msra.mxu0 %v13669_v23  ;;  %6175 = vmatprep.mubr.bf16.mxu0 %v15428_v34  ;;  %v6046_v24 = vpop.f32.mrf.mxu1 }
 0x63b   : > { %6157 = vmatprep.subr.bf16.mxu0 %v13676_v9 }
 0x63c   : > { %v6083_v58 = vpop.f32.mrf.mxu1 }
 0x63e   : > { %6158 = vmatpush1.bf16.msra.mxu0 %v13682_v43  ;;  %v6085_v19 = vpop.f32.mrf.mxu1 }
 0x63f   : > { %6249 = vmatprep.subr.bf16.mxu0 %v13856_v48 }
 0x640   : > { %v6087_v14 = vpop.f32.mrf.mxu1 }
 0x641   : > { %11097 = vmatmul.mubr.msk.bf16.vlgmr.msra.gmra.mxu0 %vm629_vm0, %v15580_v12 }
 0x642   : > { %6250 = vmatpush1.bf16.msra.mxu0 %v14027_v62  ;;  %6269 = vmatprep.mubr.bf16.mxu0 %v15428_v34  ;;  %v14258_v47 = vpop.f32.mrf.mxu1 }
 0x643   : > { %6251 = vmatprep.subr.bf16.mxu0 %v14034_v5 }
 0x644   : > { %v6126_v3 = vpop.f32.mrf.mxu1 }
 0x646   : > { %6252 = vmatpush1.bf16.msra.mxu0 %v14040_v31  ;;  %v6128_v56 = vpop.f32.mrf.mxu1 }
 0x647   : > { %6335 = vmatprep.subr.bf16.mxu0 %v14046_v40 }
 0x648   : > { %v6130_v35 = vpop.f32.mrf.mxu1 }
 0x649   : > { %11099 = vmatmul.mubr.msk.bf16.vlgmr.msra.gmra.mxu0 %vm629_vm0, %v15580_v12 }
 0x64a   : > { %6336 = vmatpush1.bf16.msra.mxu0 %v14054_v26  ;;  %6355 = vmatprep.mubr.bf16.mxu0 %v15428_v34  ;;  %v6132_v2 = vpop.f32.mrf.mxu1 }
 0x64b   : > { %6337 = vmatprep.subr.bf16.mxu0 %v14061_v18 }
 0x64c   : > { %v6220_v29 = vpop.f32.mrf.mxu1 }
 0x64e   : > { %6338 = vmatpush1.bf16.msra.mxu0 %v14067_v36  ;;  %v6222_v20 = vpop.f32.mrf.mxu1 }
 0x64f   : > { %6429 = vmatprep.subr.bf16.mxu0 %v14073_v54 }
 0x650   : > { %v6224_v41 = vpop.f32.mrf.mxu1 }
 0x651   : > { %11101 = vmatmul.mubr.msk.bf16.vlgmr.msra.gmra.mxu0 %vm629_vm0, %v15589_v15 }
 0x652   : > { %6430 = vmatpush1.bf16.msra.mxu0 %v13669_v23  ;;  %6449 = vmatprep.mubr.bf16.mxu0 %v15428_v34  ;;  %v14099_v23 = vld [vmem:[%s15176_s1 + $0x4c] ss:$16 sps:$4 sm:$0xff]   ;;  %v6226_v12 = vpop.f32.mrf.mxu1 }
 0x653   : > { %6431 = vmatprep.subr.bf16.mxu0 %v13676_v9  ;;  %15592 = vst [vmem:[#allocation7_spill] sm:$0xff] %v14099_v23  ;;  %7042 = vmatprep.subr.bf16.mxu1 %v14099_v23  ;;  %v14105_v9 = vld [vmem:[%s15176_s1 + $0x48] ss:$16 sps:$4 sm:$0xff]  }
 0x654   : > { %15593 = vst [vmem:[#allocation8_spill] sm:$0xff] %v14105_v9  ;;  %7043 = vmatpush1.bf16.msra.mxu1 %v14105_v9  ;;  %v6314_v15 = vpop.f32.mrf.mxu1 }
 0x656   : > { %6432 = vmatpush1.bf16.msra.mxu0 %v13682_v43  ;;  %v14111_v43 = vld [vmem:[%s15176_s1 + $0x2c] ss:$16 sps:$4 sm:$0xff]  }
 0x657   : > { %15594 = vst [vmem:[#allocation9_spill] sm:$0xff] %v14111_v43  ;;  %7126 = vmatprep.subr.bf16.mxu1 %v14111_v43  ;;  %11166 = vmatmul.mubr.msk.bf16.vlgmr.msra.gmra.mxu1 %vm629_vm0, %v14085_v17 }
 0x658   : > { %7127 = vmatpush1.bf16.msra.mxu1 %v14119_v33  ;;  %7146 = vmatprep.mubr.bf16.mxu1 %v15428_v34 }
 0x659   : > { %11104 = vmatmul.mubr.msk.bf16.vlgmr.msra.gmra.mxu0 %vm629_vm0, %v15590_v28  ;;  %7128 = vmatprep.subr.bf16.mxu1 %v14129_v1 }
 0x65a   : > { %11648 = vmatprep.subr.bf16.mxu0 %v11993_v53  ;;  %v6316_v53 = vpop.f32.mrf.mxu1 }
 0x65b   : > { %11649 = vmatpush3.bf16.msra.mxu0 %v11994_v50 }
 0x65c   : > { %7129 = vmatpush1.bf16.msra.mxu1 %v14138_v59  ;;  %11650 = vmatprep.subr.bf16.mxu0 %v11995_v25  ;;  %v6318_v50 = vpop.f32.mrf.mxu1 }
 0x65d   : > { %7220 = vmatprep.subr.bf16.mxu1 %v14147_v7 }
 0x65f   : > { %11168 = vmatmul.mubr.msk.bf16.vlgmr.msra.gmra.mxu1 %vm629_vm0, %v15590_v28  ;;  %11651 = vmatpush3.bf16.msra.mxu0 %v11996_v42  ;;  %v6320_v42 = vpop.f32.mrf.mxu1  ;;  %v6086_v28 = vadd.f32 %v6085_v19, %v14211_v32 }
 0x660   : > { %7221 = vmatpush1.bf16.msra.mxu1 %v14158_v11  ;;  %7240 = vmatprep.mubr.bf16.mxu1 %v15428_v34 }
 0x661   : > { %7222 = vmatprep.subr.bf16.mxu1 %v14167_v38  ;;  %11652 = vmatprep.subr.bf16.mxu0 %v11997_v22 }
 0x663   : > { %11653 = vmatpush3.bf16.msra.mxu0 %v11998_v61 }
 0x664   : > { %7223 = vmatpush1.bf16.msra.mxu1 %v14177_v51  ;;  %11654 = vmatprep.subr.bf16.mxu0 %v11999_v21 }
 0x665   : > { %7471 = vmatprep.subr.bf16.mxu1 %v13856_v48 }
 0x667   : > { %11171 = vmatmul.mubr.msk.bf16.vlgmr.msra.gmra.mxu1 %vm629_vm0, %v14184_v16  ;;  %11655 = vmatpush3.bf16.msra.mxu0 %v12000_v13  ;;  %v6400_v13 = vpop.f32.mrf.mxu1 }
 0x668   : > { %7472 = vmatpush1.bf16.msra.mxu1 %v14027_v62  ;;  %7491 = vmatprep.mubr.bf16.mxu1 %v15428_v34 }
 0x669   : > { %7473 = vmatprep.subr.bf16.mxu1 %v14034_v5  ;;  %11656 = vmatprep.subr.bf16.mxu0 %v12002_v39  ;;  %v15604_v39 = vld [vmem:[#allocation23_spill] sm:$0xff] }
 0x66b   : > { %11657 = vmatpush3.bf16.msra.mxu0 %v12003_v37 }
 0x66c   : > { %7474 = vmatpush1.bf16.msra.mxu1 %v14040_v31  ;;  %11658 = vmatprep.subr.bf16.mxu0 %v12004_v45 }
 0x66d   : > { %7514 = vmatprep.subr.bf16.mxu1 %v15603_v8 }
 0x66f   : > { %11224 = vmatmul.mubr.msk.bf16.vlgmr.msra.gmra.mxu1 %vm629_vm0, %v14184_v16  ;;  %11659 = vmatpush3.bf16.msra.mxu0 %v12005_v6 }
 0x670   : > { %7515 = vmatpush1.bf16.msra.mxu1 %v14092_v63  ;;  %7534 = vmatprep.mubr.bf16.mxu1 %v15428_v34 }
 0x671   : > { %7516 = vmatprep.subr.bf16.mxu1 %v14099_v23  ;;  %11660 = vmatprep.subr.bf16.mxu0 %v12006_v0  ;;  %v6402_v0 = vpop.f32.mrf.mxu1 }
 0x673   : > { %11661 = vmatpush3.bf16.msra.mxu0 %v12007_v46  ;;  %v15606_v46 = vld [vmem:[#allocation29_spill] sm:$0xff] }
 0x674   : > { %7517 = vmatpush1.bf16.msra.mxu1 %v14105_v9  ;;  %11662 = vmatprep.subr.bf16.mxu0 %v12008_v30  ;;  %v6127_v9 = vadd.f32 %v6126_v3, %v6040_v27 }
 0x675   : > { %7557 = vmatprep.subr.bf16.mxu1 %v14046_v40 }
 0x677   : > { %11225 = vmatmul.mubr.msk.bf16.vlgmr.msra.gmra.mxu1 %vm629_vm0, %v14184_v16  ;;  %11663 = vmatpush3.bf16.msra.mxu0 %v12009_v57  ;;  %v6084_v16 = vadd.f32 %v6083_v58, %v14201_v60  ;;  %v6090_v60 = vadd.f32 %v14258_v47, %v14234_v52 }
 0x678   : > { %7558 = vmatpush1.bf16.msra.mxu1 %v14054_v26  ;;  %6903 = vmatprep.subr.bf16.mxu0 %v14073_v54 }
 0x679   : > { %7559 = vmatprep.subr.bf16.mxu1 %v14061_v18  ;;  %7577 = vmatprep.mubr.bf16.mxu1 %v15428_v34 }
 0x67c   : > { %7560 = vmatpush1.bf16.msra.mxu1 %v14067_v36  ;;  %v6133_v36 = vadd.f32 %v6132_v2, %v6046_v24 }
 0x67d   : > { %7600 = vmatprep.subr.bf16.mxu1 %v14111_v43 }
 0x67f   : > { %11226 = vmatmul.mubr.msk.bf16.vlgmr.msra.gmra.mxu1 %vm629_vm0, %v14085_v17 }
 0x680   : > { %7601 = vmatpush1.bf16.msra.mxu1 %v14119_v33  ;;  %7620 = vmatprep.mubr.bf16.mxu1 %v15428_v34 }
 0x681   : > { %7602 = vmatprep.subr.bf16.mxu1 %v14129_v1 }
 0x684   : > { %7603 = vmatpush1.bf16.msra.mxu1 %v14138_v59 }
 0x685   : > { %7694 = vmatprep.subr.bf16.mxu1 %v14147_v7 }
 0x687   : > { %11227 = vmatmul.mubr.msk.bf16.vlgmr.msra.gmra.mxu1 %vm629_vm0, %v14085_v17 }
 0x688   : > { %7695 = vmatpush1.bf16.msra.mxu1 %v14158_v11  ;;  %7714 = vmatprep.mubr.bf16.mxu1 %v15428_v34 }
 0x689   : > { %7696 = vmatprep.subr.bf16.mxu1 %v14167_v38  ;;  %v6404_v38 = vpop.f32.mrf.mxu1 }
 0x68b   : > { %v6406_v59 = vpop.f32.mrf.mxu1 }
 0x68c   : > { %7697 = vmatpush1.bf16.msra.mxu1 %v14177_v51  ;;  %v6407_v26 = vadd.f32 %v6406_v59, %v6320_v42  ;;  %v6236_v59 = vadd.f32 %v6226_v12, %v6133_v36 }
 0x68d   : > { %7788 = vmatprep.subr.bf16.mxu1 %v15603_v8 }
 0x6f9   : > { %v11642_v25 = vpop.f32.mrf.mxu0 }
 0x6fb   : > { %v11643_v22 = vpop.f32.mrf.mxu0 }
 0x6fc   : > { %v11644_v61 = vadd.f32 %v11643_v22, %v11642_v25  ;;  %v6494_v22 = vpop.f32.mrf.mxu1 }
 0x6fd   : > { %v11645_v21 = vpop.f32.mrf.mxu0 }
 0x6fe   : > { %v14261_v37 = vadd.f32 %v11644_v61, %v15604_v39  ;;  %v6496_v61 = vpop.f32.mrf.mxu1 }
 0x6ff   : > { %v11646_v45 = vpop.f32.mrf.mxu0 }
 0x700   : > { %15605 = vst [vmem:[#allocation4_spill] sm:$0xff] %v14261_v37  ;;  %v11647_v8 = vadd.f32 %v11646_v45, %v11645_v21  ;;  %v6129_v37 = vadd.f32 %v6128_v56, %v6042_v10  ;;  %v6403_v21 = vadd.f32 %v6402_v0, %v6316_v53  ;;  %v6498_v23 = vpop.f32.mrf.mxu1  ;;  %v6088_v10 = vadd.f32 %v6087_v14, %v14224_v49  ;;  %v14285_v0 = vld [vmem:[%s15176_s1 + $0x84] ss:$16 sps:$4 sm:$0xff]  }
 0x701   : > { %v6177_v6 = vpop.f32.mrf.mxu0  ;;  %v6231_v56 = vadd.f32 %v6220_v29, %v6127_v9 }
 0x702   : > { %v14264_v30 = vadd.f32 %v11647_v8, %v15606_v46  ;;  %v6131_v8 = vadd.f32 %v6130_v35, %v6044_v55  ;;  %v6401_v46 = vadd.f32 %v6400_v13, %v6314_v15  ;;  %v6232_v18 = vadd.f32 %v6222_v20, %v6129_v37  ;;  %v6500_v53 = vpop.f32.mrf.mxu1 }
 0x703   : > { %v6179_v57 = vpop.f32.mrf.mxu0  ;;  %v6506_v40 = vadd.f32 %v6496_v61, %v6403_v21  ;;  %v6229_v15 = vadd.f32 %v6177_v6, %v6084_v16  ;;  %v6510_v58 = vadd.f32 %v6500_v53, %v6407_v26  ;;  %v14278_v6 = vld [vmem:[%s15176_s1 + $0xa0] ss:$16 sps:$4 sm:$0xff]   ;;  %v15613_v21 = vld [vmem:[#allocation28_spill] sm:$0xff] }
 0x704   : > { %15607 = vst [vmem:[#allocation24_spill] sm:$0xff] %v14264_v30  ;;  %v6405_v30 = vadd.f32 %v6404_v38, %v6318_v50  ;;  %v6235_v55 = vadd.f32 %v6224_v41, %v6131_v8  ;;  %v6505_v35 = vadd.f32 %v6494_v22, %v6401_v46  ;;  %v15610_v22 = vld [vmem:[#allocation20_spill] sm:$0xff]  ;;  %v15611_v61 = vld [vmem:[#allocation21_spill] sm:$0xff]  ;;  %v14318_v8 = vld [vmem:[%s12417_s16 + $0xa0] sm:$0xff]  }
 0x705   : > { %v6181_v51 = vpop.f32.mrf.mxu0  ;;  %v6514_v24 = vmax.f32 %v6232_v18, %v6506_v40  ;;  %11230 = vmatmul.mubr.msk.bf16.vlgmr.msra.gmra.mxu1 %vm629_vm0, %v14318_v8  ;;  %v15616_v46 = vld [vmem:[#allocation6_spill] sm:$0xff]  ;;  %v15619_v53 = vld [vmem:[#allocation9_spill] sm:$0xff] }
 0x706   : > { %v6509_v38 = vadd.f32 %v6498_v23, %v6405_v30  ;;  %v6233_v9 = vadd.f32 %v6181_v51, %v6088_v10  ;;  %v14291_v30 = vld [vmem:[%s15176_s1 + $0x80] ss:$16 sps:$4 sm:$0xff]   ;;  %7789 = vmatpush1.bf16.msra.mxu1 %v15616_v46  ;;  %7808 = vmatprep.mubr.bf16.mxu1 %v15428_v34 }
 0x707   : > { %v6183_v11 = vpop.f32.mrf.mxu0  ;;  %v15617_v10 = vld [vmem:[#allocation7_spill] sm:$0xff] }
 0x708   : > { %v6517_v2 = vmax.f32 %v6235_v55, %v6509_v38  ;;  %v6234_v16 = vadd.f32 %v6183_v11, %v6090_v60  ;;  %7790 = vmatprep.subr.bf16.mxu1 %v15617_v10  ;;  %v15621_v55 = vld [vmem:[#allocation11_spill] sm:$0xff]  ;;  %v15622_v38 = vld [vmem:[#allocation12_spill] sm:$0xff]  ;;  %v12014_v60 = vld [vmem:[%s15178_s3 + $0x430] sm:$0xff]  }
 0x709   : > { %v6271_v7 = vpop.f32.mrf.mxu0 }
 0x70b   : > { %v6273_v1 = vpop.f32.mrf.mxu0 }
 0x70d   : > { %v6275_v25 = vpop.f32.mrf.mxu0 }
 0x70f   : > { %v6277_v33 = vpop.f32.mrf.mxu0 }
 0x711   : > { %v6357_v43 = vpop.f32.mrf.mxu0 }
 0x712   : > { %v6358_v54 = vadd.f32 %v6357_v43, %v6271_v7  ;;  %v6230_v43 = vadd.f32 %v6179_v57, %v6086_v28  ;;  %v6518_v28 = vmax.f32 %v6236_v59, %v6510_v58  ;;  %v15608_v57 = vld [vmem:[#allocation3_spill] sm:$0xff]  ;;  %v12016_v59 = vld [vmem:[%s15178_s3 + $0x428] sm:$0xff]  }
 0x713   : > { %v6359_v39 = vpop.f32.mrf.mxu0  ;;  %v12017_v58 = vld [vmem:[%s15178_s3 + $0x460] sm:$0xff]  }
 0x714   : > { %v6360_v27 = vadd.f32 %v6359_v39, %v6273_v1  ;;  %v15612_v39 = vld [vmem:[#allocation19_spill] sm:$0xff] }
 0x715   : > { %v6361_v45 = vpop.f32.mrf.mxu0 }
 0x716   : > { %v6362_v7 = vadd.f32 %v6361_v45, %v6275_v25  ;;  %v15609_v25 = vld [vmem:[#allocation18_spill] sm:$0xff] }
 0x717   : > { %v6363_v63 = vpop.f32.mrf.mxu0  ;;  %v15614_v45 = vld [vmem:[#allocation22_spill] sm:$0xff] }
 0x718   : > { %v6364_v14 = vadd.f32 %v6363_v63, %v6277_v33 }
 0x719   : > { %v6451_v31 = vpop.f32.mrf.mxu0 }
 0x71a   : > { %v6503_v3 = vadd.f32 %v6451_v31, %v6358_v54  ;;  %v6513_v54 = vmax.f32 %v6231_v56, %v6505_v35  ;;  %v15618_v56 = vld [vmem:[#allocation8_spill] sm:$0xff]  ;;  %v12012_v35 = vld [vmem:[%s15178_s3 + $0x438] sm:$0xff]  }
 0x71b   : > { %v6453_v50 = vpop.f32.mrf.mxu0  ;;  %7791 = vmatpush1.bf16.msra.mxu1 %v15618_v56 }
 0x71c   : > { %v6504_v32 = vadd.f32 %v6453_v50, %v6360_v27  ;;  %v6511_v19 = vmax.f32 %v6229_v15, %v6503_v3  ;;  %7874 = vmatprep.subr.bf16.mxu1 %v15619_v53  ;;  %v15620_v27 = vld [vmem:[#allocation10_spill] sm:$0xff]  ;;  %v12013_v15 = vld [vmem:[%s15178_s3 + $0x470] sm:$0xff]  }
 0x71d   : > { %v6455_v49 = vpop.f32.mrf.mxu0  ;;  %v12011_v3 = vld [vmem:[%s15178_s3 + $0x478] sm:$0xff]   ;;  %v15623_v50 = vld [vmem:[#allocation13_spill] sm:$0xff] }
 0x71e   : > { %v6512_v1 = vmax.f32 %v6230_v43, %v6504_v32  ;;  %v6507_v31 = vadd.f32 %v6455_v49, %v6362_v7  ;;  %v6519_v52 = vmax.f32 %v6511_v19, %v6513_v54  ;;  %11232 = vmatmul.mubr.msk.bf16.vlgmr.msra.gmra.mxu1 %vm629_vm0, %v14318_v8  ;;  %v15624_v43 = vld [vmem:[#allocation15_spill] sm:$0xff]  ;;  %v12015_v7 = vld [vmem:[%s15178_s3 + $0x468] sm:$0xff]   ;;  %v12023_v54 = vld [vmem:[%s15178_s3 + $0x410] sm:$0xff]  }
 0x71f   : > { %v6457_v23 = vpop.f32.mrf.mxu0  ;;  %7875 = vmatpush1.bf16.msra.mxu1 %v15620_v27  ;;  %7894 = vmatprep.mubr.bf16.mxu1 %v15428_v34  ;;  %v15625_v32 = vld [vmem:[#allocation16_spill] sm:$0xff]  ;;  %v12018_v49 = vld [vmem:[%s15178_s3 + $0x420] sm:$0xff]  }
 0x720   : > { %v6520_v29 = vmax.f32 %v6512_v1, %v6514_v24  ;;  %v6515_v20 = vmax.f32 %v6233_v9, %v6507_v31  ;;  %v6508_v41 = vadd.f32 %v6457_v23, %v6364_v14  ;;  %v6523_v36 = vadd.f32 %v6519_v52, %v12803_v4  ;;  %7876 = vmatprep.subr.bf16.mxu1 %v15621_v55  ;;  %v15626_v24 = vld [vmem:[#allocation17_spill] sm:$0xff]  ;;  %v14362_v19 = vld [vmem:[%s12417_s16 + $0xa8] sm:$0xff]   ;;  %v12020_v9 = vld [vmem:[%s15178_s3 + $0x458] sm:$0xff]   ;;  %v14379_v14 = vpop.f32.mrf.mxu1 }
 0x721   : > { %15627 = vst [vmem:[#allocation26_spill] sm:$0xff] %v14362_v19  ;;  %v12022_v1 = vld [vmem:[%s15178_s3 + $0x450] sm:$0xff]   ;;  %v14388_v31 = vld [vmem:[%s15176_s1 + $0x6c] ss:$16 sps:$4 sm:$0xff]  }
 0x722   : > { %v6521_v47 = vmax.f32 %v6515_v20, %v6517_v2  ;;  %v6516_v42 = vmax.f32 %v6234_v16, %v6508_v41  ;;  %v6524_v18 = vadd.f32 %v6520_v29, %v12799_v44  ;;  %v6527_v11 = vmax.f32 %v6523_v36, 0.0  ;;  %15628 = vst [vmem:[#allocation27_spill] sm:$0xff] %v14388_v31  ;;  %v14394_v2 = vpop.f32.mrf.mxu1  ;;  %v12024_v23 = vld [vmem:[%s15178_s3 + $0x448] sm:$0xff]   ;;  %v12026_v20 = vld [vmem:[%s15178_s3 + $0x440] sm:$0xff]  }
 0x723   : > { %7877 = vmatpush1.bf16.msra.mxu1 %v15622_v38  ;;  %v12025_v16 = vld [vmem:[%s15178_s3 + $0x408] sm:$0xff]   ;;  %v12027_v41 = vld [vmem:[%s15178_s3 + $0x400] sm:$0xff]  }
 0x724   : > { %v6525_v40 = vadd.f32 %v6521_v47, %v12803_v4  ;;  %v6522_v26 = vmax.f32 %v6516_v42, %v6518_v28  ;;  %v6528_v51 = vmax.f32 %v6524_v18, 0.0  ;;  %7968 = vmatprep.subr.bf16.mxu1 %v15623_v50  ;;  %v14407_v29 = vpop.f32.mrf.mxu1 }
 0x726   : > { %v6526_v63 = vadd.f32 %v6522_v26, %v12799_v44  ;;  %v6529_v33 = vmax.f32 %v6525_v40, 0.0  ;;  %v14417_v52 = vpop.f32.mrf.mxu1 }
 0x728   : > { %v6530_v12 = vmax.f32 %v6526_v63, 0.0  ;;  %v6531_v37 = vpack.c.bf16 %v6529_v33, %v6527_v11  ;;  %v6788_v28 = vpop.f32.mrf.mxu1 }
 0x72a   : > { %v6532_v13 = vpack.c.bf16 %v6530_v12, %v6528_v51  ;;  %v6790_v47 = vpop.f32.mrf.mxu1 }
 0x72c   : > { %6694 = vmatprep.mubr.bf16.mxu0 %v6532_v13  ;;  %v6792_v42 = vpop.f32.mrf.mxu1 }
 0x72d   : > { %6695 = vmatmul.mubr.bf16.vlgmr.msra.gmra.mxu0 %v6531_v37 }
 0x72e   : > { %6904 = vmatpush1.bf16.msra.mxu0 %v14278_v6  ;;  %6923 = vmatprep.mubr.bf16.mxu0 %v15428_v34  ;;  %v6794_v40 = vpop.f32.mrf.mxu1 }
 0x72f   : > { %6905 = vmatprep.subr.bf16.mxu0 %v14285_v0 }
 0x730   : > { %v6831_v26 = vpop.f32.mrf.mxu1 }
 0x732   : > { %6906 = vmatpush1.bf16.msra.mxu0 %v14291_v30  ;;  %v6833_v18 = vpop.f32.mrf.mxu1 }
 0x733   : > { %6997 = vmatprep.subr.bf16.mxu0 %v13856_v48 }
 0x734   : > { %v6835_v36 = vpop.f32.mrf.mxu1 }
 0x735   : > { %11163 = vmatmul.mubr.msk.bf16.vlgmr.msra.gmra.mxu0 %vm629_vm0, %v14085_v17 }
 0x736   : > { %6998 = vmatpush1.bf16.msra.mxu0 %v14027_v62  ;;  %7017 = vmatprep.mubr.bf16.mxu0 %v15428_v34  ;;  %v14441_v63 = vpop.f32.mrf.mxu1 }
 0x737   : > { %6999 = vmatprep.subr.bf16.mxu0 %v14034_v5 }
 0x738   : > { %v6874_v33 = vpop.f32.mrf.mxu1 }
 0x73a   : > { %7000 = vmatpush1.bf16.msra.mxu0 %v15608_v57  ;;  %v6876_v51 = vpop.f32.mrf.mxu1 }
 0x73b   : > { %7083 = vmatprep.subr.bf16.mxu0 %v15609_v25 }
 0x73c   : > { %v6878_v12 = vpop.f32.mrf.mxu1 }
 0x73d   : > { %11165 = vmatmul.mubr.msk.bf16.vlgmr.msra.gmra.mxu0 %vm629_vm0, %v14085_v17  ;;  %v15615_v17 = vld [vmem:[#allocation25_spill] sm:$0xff] }
 0x73e   : > { %7084 = vmatpush1.bf16.msra.mxu0 %v15610_v22  ;;  %7103 = vmatprep.mubr.bf16.mxu0 %v15428_v34  ;;  %v6880_v11 = vpop.f32.mrf.mxu1 }
 0x73f   : > { %7085 = vmatprep.subr.bf16.mxu0 %v15611_v61  ;;  %11234 = vmatmul.mubr.msk.bf16.vlgmr.msra.gmra.mxu1 %vm629_vm0, %v15615_v17 }
 0x740   : > { %7969 = vmatpush1.bf16.msra.mxu1 %v15624_v43  ;;  %7988 = vmatprep.mubr.bf16.mxu1 %v15428_v34  ;;  %v6968_v13 = vpop.f32.mrf.mxu1 }
 0x741   : > { %7970 = vmatprep.subr.bf16.mxu1 %v15625_v32 }
 0x742   : > { %7086 = vmatpush1.bf16.msra.mxu0 %v15612_v39  ;;  %v6970_v37 = vpop.f32.mrf.mxu1 }
 0x743   : > { %7177 = vmatprep.subr.bf16.mxu0 %v15613_v21 }
 0x744   : > { %7971 = vmatpush1.bf16.msra.mxu1 %v15626_v24 }
 0x745   : > { %11167 = vmatmul.mubr.msk.bf16.vlgmr.msra.gmra.mxu0 %vm629_vm0, %v15614_v45  ;;  %8219 = vmatprep.subr.bf16.mxu1 %v13856_v48  ;;  %v12021_v48 = vld [vmem:[%s15178_s3 + $0x418] sm:$0xff]   ;;  %v6972_v45 = vpop.f32.mrf.mxu1 }
 0x746   : > { %7178 = vmatpush1.bf16.msra.mxu0 %v14278_v6  ;;  %7197 = vmatprep.mubr.bf16.mxu0 %v15428_v34 }
 0x747   : > { %7179 = vmatprep.subr.bf16.mxu0 %v14285_v0  ;;  %11237 = vmatmul.mubr.msk.bf16.vlgmr.msra.gmra.mxu1 %vm629_vm0, %v14362_v19 }
 0x748   : > { %8220 = vmatpush1.bf16.msra.mxu1 %v14027_v62  ;;  %8239 = vmatprep.mubr.bf16.mxu1 %v15428_v34 }
 0x749   : > { %8221 = vmatprep.subr.bf16.mxu1 %v14034_v5 }
 0x74a   : > { %7180 = vmatpush1.bf16.msra.mxu0 %v14291_v30 }
 0x74b   : > { %11670 = vmatprep.subr.bf16.mxu0 %v12011_v3  ;;  %v6974_v3 = vpop.f32.mrf.mxu1 }
 0x74c   : > { %8222 = vmatpush1.bf16.msra.mxu1 %v15608_v57 }
 0x74d   : > { %11170 = vmatmul.mubr.msk.bf16.vlgmr.msra.gmra.mxu0 %vm629_vm0, %v15615_v17  ;;  %8262 = vmatprep.subr.bf16.mxu1 %v14388_v31 }
 0x74e   : > { %11671 = vmatpush3.bf16.msra.mxu0 %v12012_v35  ;;  %v7062_v35 = vpop.f32.mrf.mxu1 }
 0x74f   : > { %11672 = vmatprep.subr.bf16.mxu0 %v12013_v15  ;;  %11290 = vmatmul.mubr.msk.bf16.vlgmr.msra.gmra.mxu1 %vm629_vm0, %v14362_v19 }
 0x750   : > { %8263 = vmatpush1.bf16.msra.mxu1 %v15616_v46  ;;  %8282 = vmatprep.mubr.bf16.mxu1 %v15428_v34  ;;  %v7064_v15 = vpop.f32.mrf.mxu1  ;;  %v6875_v46 = vadd.f32 %v6874_v33, %v6788_v28 }
 0x751   : > { %8264 = vmatprep.subr.bf16.mxu1 %v15617_v10 }
 0x752   : > { %11673 = vmatpush3.bf16.msra.mxu0 %v12014_v60  ;;  %v7066_v60 = vpop.f32.mrf.mxu1 }
 0x753   : > { %11674 = vmatprep.subr.bf16.mxu0 %v12015_v7 }
 0x754   : > { %8265 = vmatpush1.bf16.msra.mxu1 %v15618_v56 }
 0x755   : > { %8305 = vmatprep.subr.bf16.mxu1 %v15609_v25 }
 0x756   : > { %11675 = vmatpush3.bf16.msra.mxu0 %v12016_v59  ;;  %v7068_v59 = vpop.f32.mrf.mxu1 }
 0x757   : > { %11676 = vmatprep.subr.bf16.mxu0 %v12017_v58  ;;  %11291 = vmatmul.mubr.msk.bf16.vlgmr.msra.gmra.mxu1 %vm629_vm0, %v14362_v19 }
 0x758   : > { %8306 = vmatpush1.bf16.msra.mxu1 %v15610_v22  ;;  %8325 = vmatprep.mubr.bf16.mxu1 %v15428_v34  ;;  %v6881_v22 = vadd.f32 %v6880_v11, %v6794_v40 }
 0x759   : > { %8307 = vmatprep.subr.bf16.mxu1 %v15611_v61 }
 0x75a   : > { %11677 = vmatpush3.bf16.msra.mxu0 %v12018_v49 }
 0x75b   : > { %11678 = vmatprep.subr.bf16.mxu0 %v12020_v9 }
 0x75c   : > { %8308 = vmatpush1.bf16.msra.mxu1 %v15612_v39  ;;  %v6834_v39 = vadd.f32 %v6833_v18, %v14394_v2 }
 0x75d   : > { %8348 = vmatprep.subr.bf16.mxu1 %v15619_v53 }
 0x75e   : > { %11679 = vmatpush3.bf16.msra.mxu0 %v12021_v48  ;;  %v7148_v48 = vpop.f32.mrf.mxu1 }
 0x75f   : > { %11680 = vmatprep.subr.bf16.mxu0 %v12022_v1  ;;  %11292 = vmatmul.mubr.msk.bf16.vlgmr.msra.gmra.mxu1 %vm629_vm0, %v14318_v8  ;;  %v15629_v1 = vld [vmem:[#allocation4_spill] sm:$0xff] }
 0x760   : > { %8349 = vmatpush1.bf16.msra.mxu1 %v15620_v27  ;;  %8368 = vmatprep.mubr.bf16.mxu1 %v15428_v34 }
 0x761   : > { %8350 = vmatprep.subr.bf16.mxu1 %v15621_v55 }
 0x762   : > { %11681 = vmatpush3.bf16.msra.mxu0 %v12023_v54 }
 0x763   : > { %11682 = vmatprep.subr.bf16.mxu0 %v12024_v23 }
 0x764   : > { %8351 = vmatpush1.bf16.msra.mxu1 %v15622_v38 }
 0x765   : > { %8442 = vmatprep.subr.bf16.mxu1 %v15623_v50 }
 0x766   : > { %11683 = vmatpush3.bf16.msra.mxu0 %v12025_v16 }
 0x767   : > { %11684 = vmatprep.subr.bf16.mxu0 %v12026_v20  ;;  %11293 = vmatmul.mubr.msk.bf16.vlgmr.msra.gmra.mxu1 %vm629_vm0, %v14318_v8 }
 0x768   : > { %8443 = vmatpush1.bf16.msra.mxu1 %v15624_v43  ;;  %8462 = vmatprep.mubr.bf16.mxu1 %v15428_v34 }
 0x769   : > { %8444 = vmatprep.subr.bf16.mxu1 %v15625_v32 }
 0x76a   : > { %11685 = vmatpush3.bf16.msra.mxu0 %v12027_v41  ;;  %v7150_v41 = vpop.f32.mrf.mxu1 }
 0x76b   : > { %7651 = vmatprep.subr.bf16.mxu0 %v15613_v21  ;;  %v6832_v21 = vadd.f32 %v6831_v26, %v14379_v14  ;;  %v6838_v14 = vadd.f32 %v14441_v63, %v14417_v52 }
 0x76c   : > { %8445 = vmatpush1.bf16.msra.mxu1 %v15626_v24  ;;  %v7152_v50 = vpop.f32.mrf.mxu1 }
 0x76d   : > { %8536 = vmatprep.subr.bf16.mxu1 %v14388_v31  ;;  %v15631_v31 = vld [vmem:[#allocation24_spill] sm:$0xff] }
 0x76e   : > { %v7154_v27 = vpop.f32.mrf.mxu1 }
 0x76f   : > { %v7155_v57 = vadd.f32 %v7154_v27, %v7068_v59  ;;  %v6984_v27 = vadd.f32 %v6974_v3, %v6881_v22 }
 0x7ed   : > { %v11664_v7 = vpop.f32.mrf.mxu0 }
 0x7ef   : > { %v11665_v58 = vpop.f32.mrf.mxu0 }
 0x7f0   : > { %v11666_v49 = vadd.f32 %v11665_v58, %v11664_v7  ;;  %v7242_v58 = vpop.f32.mrf.mxu1 }
 0x7f1   : > { %v11667_v9 = vpop.f32.mrf.mxu0 }
 0x7f2   : > { %v14444_v54 = vadd.f32 %v11666_v49, %v15629_v1  ;;  %v7244_v49 = vpop.f32.mrf.mxu1 }
 0x7f3   : > { %v11668_v23 = vpop.f32.mrf.mxu0 }
 0x7f4   : > { %15630 = vst [vmem:[#allocation23_spill] sm:$0xff] %v14444_v54  ;;  %v11669_v16 = vadd.f32 %v11668_v23, %v11667_v9  ;;  %v6877_v54 = vadd.f32 %v6876_v51, %v6790_v47  ;;  %v7151_v9 = vadd.f32 %v7150_v41, %v7064_v15  ;;  %v7246_v19 = vpop.f32.mrf.mxu1  ;;  %v6836_v47 = vadd.f32 %v6835_v36, %v14407_v29  ;;  %v15635_v41 = vld [vmem:[#allocation3_spill] sm:$0xff] }
 0x7f5   : > { %v6925_v20 = vpop.f32.mrf.mxu0  ;;  %v6979_v51 = vadd.f32 %v6968_v13, %v6875_v46 }
 0x7f6   : > { %v14447_v24 = vadd.f32 %v11669_v16, %v15631_v31  ;;  %v6879_v31 = vadd.f32 %v6878_v12, %v6792_v42  ;;  %v7149_v16 = vadd.f32 %v7148_v48, %v7062_v35  ;;  %v6980_v25 = vadd.f32 %v6970_v37, %v6877_v54  ;;  %v7248_v15 = vpop.f32.mrf.mxu1  ;;  %v14465_v48 = vld [vmem:[%s15176_s1 + $0x64] ss:$16 sps:$4 sm:$0xff]   ;;  %v15633_v54 = vld [vmem:[#allocation14_spill] sm:$0xff] }
 0x7f7   : > { %v6927_v32 = vpop.f32.mrf.mxu0  ;;  %v7254_v5 = vadd.f32 %v7244_v49, %v7151_v9  ;;  %v6977_v35 = vadd.f32 %v6925_v20, %v6832_v21  ;;  %v7258_v26 = vadd.f32 %v7248_v15, %v7155_v57  ;;  %v15634_v20 = vld [vmem:[#allocation5_spill] sm:$0xff]  ;;  %v15640_v9 = vld [vmem:[#allocation28_spill] sm:$0xff] }
 0x7f8   : > { %15632 = vst [vmem:[#allocation29_spill] sm:$0xff] %v14447_v24  ;;  %v7153_v24 = vadd.f32 %v7152_v50, %v7066_v60  ;;  %v6983_v42 = vadd.f32 %v6972_v45, %v6879_v31  ;;  %v7253_v12 = vadd.f32 %v7242_v58, %v7149_v16  ;;  %v15637_v58 = vld [vmem:[#allocation20_spill] sm:$0xff]  ;;  %v15638_v49 = vld [vmem:[#allocation21_spill] sm:$0xff]  ;;  %v15644_v16 = vld [vmem:[#allocation6_spill] sm:$0xff] }
 0x7f9   : > { %v6929_v43 = vpop.f32.mrf.mxu0  ;;  %v7262_v40 = vmax.f32 %v6980_v25, %v7254_v5  ;;  %v14491_v31 = vld [vmem:[%s12417_s16 + $0xb0] sm:$0xff]  }
 0x7fa   : > { %v7257_v50 = vadd.f32 %v7246_v19, %v7153_v24  ;;  %v6981_v46 = vadd.f32 %v6929_v43, %v6836_v47  ;;  %15643 = vst [vmem:[#allocation22_spill] sm:$0xff] %v14491_v31  ;;  %11296 = vmatmul.mubr.msk.bf16.vlgmr.msra.gmra.mxu1 %vm629_vm0, %v14491_v31  ;;  %v15645_v47 = vld [vmem:[#allocation7_spill] sm:$0xff]  ;;  %v15647_v15 = vld [vmem:[#allocation9_spill] sm:$0xff] }
 0x7fb   : > { %v6931_v38 = vpop.f32.mrf.mxu0  ;;  %8537 = vmatpush1.bf16.msra.mxu1 %v15644_v16  ;;  %8556 = vmatprep.mubr.bf16.mxu1 %v15428_v34 }
 0x7fc   : > { %v7265_v11 = vmax.f32 %v6983_v42, %v7257_v50  ;;  %v6982_v21 = vadd.f32 %v6931_v38, %v6838_v14  ;;  %8538 = vmatprep.subr.bf16.mxu1 %v15645_v47  ;;  %v15649_v42 = vld [vmem:[#allocation11_spill] sm:$0xff]  ;;  %v15650_v50 = vld [vmem:[#allocation12_spill] sm:$0xff]  ;;  %v12032_v14 = vld [vmem:[%s15178_s3 + $0x4b0] sm:$0xff]  }
 0x7fd   : > { %v7019_v55 = vpop.f32.mrf.mxu0 }
 0x7ff   : > { %v7021_v53 = vpop.f32.mrf.mxu0 }
 0x801   : > { %v7023_v7 = vpop.f32.mrf.mxu0 }
 0x803   : > { %v7025_v56 = vpop.f32.mrf.mxu0 }
 0x805   : > { %v7105_v10 = vpop.f32.mrf.mxu0 }
 0x806   : > { %v7106_v61 = vadd.f32 %v7105_v10, %v7019_v55  ;;  %v6978_v10 = vadd.f32 %v6927_v32, %v6834_v39  ;;  %v7266_v39 = vmax.f32 %v6984_v27, %v7258_v26  ;;  %v12034_v27 = vld [vmem:[%s15178_s3 + $0x4a8] sm:$0xff]   ;;  %v12035_v26 = vld [vmem:[%s15178_s3 + $0x4e0] sm:$0xff]  }
 0x807   : > { %v7107_v1 = vpop.f32.mrf.mxu0 }
 0x808   : > { %v7108_v28 = vadd.f32 %v7107_v1, %v7021_v53  ;;  %v15639_v1 = vld [vmem:[#allocation19_spill] sm:$0xff] }
 0x809   : > { %v7109_v23 = vpop.f32.mrf.mxu0 }
 0x80a   : > { %v7110_v55 = vadd.f32 %v7109_v23, %v7023_v7  ;;  %v15636_v7 = vld [vmem:[#allocation18_spill] sm:$0xff]  ;;  %v15641_v23 = vld [vmem:[#allocation25_spill] sm:$0xff] }
 0x80b   : > { %v7111_v17 = vpop.f32.mrf.mxu0 }
 0x80c   : > { %v7112_v36 = vadd.f32 %v7111_v17, %v7025_v56 }
 0x80d   : > { %v7199_v62 = vpop.f32.mrf.mxu0 }
 0x80e   : > { %v7251_v33 = vadd.f32 %v7199_v62, %v7106_v61  ;;  %v7261_v61 = vmax.f32 %v6979_v51, %v7253_v12  ;;  %v15646_v51 = vld [vmem:[#allocation8_spill] sm:$0xff]  ;;  %v12030_v12 = vld [vmem:[%s15178_s3 + $0x4b8] sm:$0xff]  }
 0x80f   : > { %v7201_v60 = vpop.f32.mrf.mxu0  ;;  %8539 = vmatpush1.bf16.msra.mxu1 %v15646_v51 }
 0x810   : > { %v7252_v2 = vadd.f32 %v7201_v60, %v7108_v28  ;;  %v7259_v18 = vmax.f32 %v6977_v35, %v7251_v33  ;;  %8622 = vmatprep.subr.bf16.mxu1 %v15647_v15  ;;  %v15648_v28 = vld [vmem:[#allocation10_spill] sm:$0xff]  ;;  %v12031_v35 = vld [vmem:[%s15178_s3 + $0x4f0] sm:$0xff]  }
 0x811   : > { %v7203_v29 = vpop.f32.mrf.mxu0  ;;  %v12029_v33 = vld [vmem:[%s15178_s3 + $0x4f8] sm:$0xff]   ;;  %v15651_v60 = vld [vmem:[#allocation13_spill] sm:$0xff] }
 0x812   : > { %v7260_v53 = vmax.f32 %v6978_v10, %v7252_v2  ;;  %v7255_v62 = vadd.f32 %v7203_v29, %v7110_v55  ;;  %v7267_v52 = vmax.f32 %v7259_v18, %v7261_v61  ;;  %11298 = vmatmul.mubr.msk.bf16.vlgmr.msra.gmra.mxu1 %vm629_vm0, %v14491_v31  ;;  %v15652_v10 = vld [vmem:[#allocation15_spill] sm:$0xff]  ;;  %v12033_v55 = vld [vmem:[%s15178_s3 + $0x4e8] sm:$0xff]   ;;  %v14535_v18 = vld [vmem:[%s12417_s16 + $0xb8] sm:$0xff]  }
 0x813   : > { %v7205_v24 = vpop.f32.mrf.mxu0  ;;  %8623 = vmatpush1.bf16.msra.mxu1 %v15648_v28  ;;  %8642 = vmatprep.mubr.bf16.mxu1 %v15428_v34  ;;  %v15653_v2 = vld [vmem:[#allocation16_spill] sm:$0xff]  ;;  %15655 = vst [vmem:[#allocation4_spill] sm:$0xff] %v14535_v18  ;;  %v12036_v29 = vld [vmem:[%s15178_s3 + $0x4a0] sm:$0xff]  }
 0x814   : > { %v7268_v19 = vmax.f32 %v7260_v53, %v7262_v40  ;;  %v7263_v13 = vmax.f32 %v6981_v46, %v7255_v62  ;;  %v7256_v37 = vadd.f32 %v7205_v24, %v7112_v36  ;;  %v7271_v22 = vadd.f32 %v7267_v52, %v12803_v4  ;;  %8624 = vmatprep.subr.bf16.mxu1 %v15649_v42  ;;  %v15654_v40 = vld [vmem:[#allocation17_spill] sm:$0xff]  ;;  %v12038_v46 = vld [vmem:[%s15178_s3 + $0x4d8] sm:$0xff]   ;;  %v14552_v53 = vpop.f32.mrf.mxu1  ;;  %v15656_v61 = vld [vmem:[#allocation27_spill] sm:$0xff] }
 0x815   : > { %v12039_v36 = vld [vmem:[%s15178_s3 + $0x498] sm:$0xff]   ;;  %v12040_v62 = vld [vmem:[%s15178_s3 + $0x4d0] sm:$0xff]   ;;  %v12045_v52 = vld [vmem:[%s15178_s3 + $0x480] sm:$0xff]  }
 0x816   : > { %v7269_v32 = vmax.f32 %v7263_v13, %v7265_v11  ;;  %v7264_v63 = vmax.f32 %v6982_v21, %v7256_v37  ;;  %v7272_v25 = vadd.f32 %v7268_v19, %v12799_v44  ;;  %v7275_v38 = vmax.f32 %v7271_v22, 0.0  ;;  %v12041_v11 = vld [vmem:[%s15178_s3 + $0x490] sm:$0xff]   ;;  %v14562_v24 = vpop.f32.mrf.mxu1  ;;  %v12042_v21 = vld [vmem:[%s15178_s3 + $0x4c8] sm:$0xff]   ;;  %v12044_v37 = vld [vmem:[%s15178_s3 + $0x4c0] sm:$0xff]  }
 0x817   : > { %8625 = vmatpush1.bf16.msra.mxu1 %v15650_v50  ;;  %v12043_v19 = vld [vmem:[%s15178_s3 + $0x488] sm:$0xff]   ;;  %v14616_v22 = vld [vmem:[%s15176_s1] ss:$16 sps:$4 sm:$0xff]  }
 0x818   : > { %v7273_v5 = vadd.f32 %v7269_v32, %v12803_v4  ;;  %v7270_v57 = vmax.f32 %v7264_v63, %v7266_v39  ;;  %v7276_v43 = vmax.f32 %v7272_v25, 0.0  ;;  %8716 = vmatprep.subr.bf16.mxu1 %v15651_v60  ;;  %v14575_v13 = vpop.f32.mrf.mxu1  ;;  %v14587_v39 = vld [vmem:[%s15176_s1 + $0x24] ss:$16 sps:$4 sm:$0xff]   ;;  %v14597_v63 = vld [vmem:[%s15176_s1 + $0x20] ss:$16 sps:$4 sm:$0xff]   ;;  %15661 = vst [vmem:[#allocation18_spill] sm:$0xff] %v14616_v22 }
 0x819   : > { %15657 = vst [vmem:[#allocation24_spill] sm:$0xff] %v14587_v39  ;;  %15658 = vst [vmem:[#allocation14_spill] sm:$0xff] %v14597_v63 }
 0x81a   : > { %v7274_v17 = vadd.f32 %v7270_v57, %v12799_v44  ;;  %v7277_v56 = vmax.f32 %v7273_v5, 0.0  ;;  %v14590_v32 = vpop.f32.mrf.mxu1  ;;  %v14603_v5 = vld [vmem:[%s15176_s1 + $0xa4] ss:$16 sps:$4 sm:$0xff]  }
 0x81b   : > { %15659 = vst [vmem:[#allocation5_spill] sm:$0xff] %v14603_v5  ;;  %v14609_v57 = vld [vmem:[%s15176_s1 + $0x4] ss:$16 sps:$4 sm:$0xff]  }
 0x81c   : > { %v7278_v45 = vmax.f32 %v7274_v17, 0.0  ;;  %v7279_v59 = vpack.c.bf16 %v7277_v56, %v7275_v38  ;;  %15660 = vst [vmem:[#allocation3_spill] sm:$0xff] %v14609_v57  ;;  %v7536_v25 = vpop.f32.mrf.mxu1 }
 0x81e   : > { %v7280_v3 = vpack.c.bf16 %v7278_v45, %v7276_v43  ;;  %v7538_v17 = vpop.f32.mrf.mxu1 }
 0x820   : > { %7442 = vmatprep.mubr.bf16.mxu0 %v7280_v3  ;;  %v7540_v56 = vpop.f32.mrf.mxu1 }
 0x821   : > { %7443 = vmatmul.mubr.bf16.vlgmr.msra.gmra.mxu0 %v7279_v59 }
 0x822   : > { %7652 = vmatpush1.bf16.msra.mxu0 %v14278_v6  ;;  %7671 = vmatprep.mubr.bf16.mxu0 %v15428_v34  ;;  %v7542_v43 = vpop.f32.mrf.mxu1 }
 0x823   : > { %7653 = vmatprep.subr.bf16.mxu0 %v14285_v0 }
 0x824   : > { %v7579_v45 = vpop.f32.mrf.mxu1 }
 0x826   : > { %7654 = vmatpush1.bf16.msra.mxu0 %v14291_v30  ;;  %v7581_v38 = vpop.f32.mrf.mxu1 }
 0x827   : > { %7745 = vmatprep.subr.bf16.mxu0 %v14465_v48 }
 0x828   : > { %v7583_v3 = vpop.f32.mrf.mxu1 }
 0x829   : > { %11229 = vmatmul.mubr.msk.bf16.vlgmr.msra.gmra.mxu0 %vm629_vm0, %v14318_v8 }
 0x82a   : > { %7746 = vmatpush1.bf16.msra.mxu0 %v15633_v54  ;;  %7765 = vmatprep.mubr.bf16.mxu0 %v15428_v34  ;;  %v14634_v59 = vpop.f32.mrf.mxu1 }
 0x82b   : > { %7747 = vmatprep.subr.bf16.mxu0 %v15634_v20 }
 0x82e   : > { %7748 = vmatpush1.bf16.msra.mxu0 %v15635_v41 }
 0x82f   : > { %7831 = vmatprep.subr.bf16.mxu0 %v15636_v7 }
 0x831   : > { %11231 = vmatmul.mubr.msk.bf16.vlgmr.msra.gmra.mxu0 %vm629_vm0, %v14318_v8  ;;  %v15642_v8 = vld [vmem:[#allocation26_spill] sm:$0xff] }
 0x832   : > { %7832 = vmatpush1.bf16.msra.mxu0 %v15637_v58  ;;  %7851 = vmatprep.mubr.bf16.mxu0 %v15428_v34 }
 0x833   : > { %7833 = vmatprep.subr.bf16.mxu0 %v15638_v49  ;;  %11300 = vmatmul.mubr.msk.bf16.vlgmr.msra.gmra.mxu1 %vm629_vm0, %v15642_v8 }
 0x834   : > { %8717 = vmatpush1.bf16.msra.mxu1 %v15652_v10  ;;  %8736 = vmatprep.mubr.bf16.mxu1 %v15428_v34 }
 0x835   : > { %8718 = vmatprep.subr.bf16.mxu1 %v15653_v2 }
 0x836   : > { %7834 = vmatpush1.bf16.msra.mxu0 %v15639_v1 }
 0x837   : > { %7925 = vmatprep.subr.bf16.mxu0 %v15640_v9 }
 0x838   : > { %8719 = vmatpush1.bf16.msra.mxu1 %v15654_v40 }
 0x839   : > { %11233 = vmatmul.mubr.msk.bf16.vlgmr.msra.gmra.mxu0 %vm629_vm0, %v15641_v23  ;;  %8967 = vmatprep.subr.bf16.mxu1 %v14465_v48 }
 0x83a   : > { %7926 = vmatpush1.bf16.msra.mxu0 %v14278_v6  ;;  %7945 = vmatprep.mubr.bf16.mxu0 %v15428_v34 }
 0x83b   : > { %7927 = vmatprep.subr.bf16.mxu0 %v14285_v0  ;;  %11303 = vmatmul.mubr.msk.bf16.vlgmr.msra.gmra.mxu1 %vm629_vm0, %v14535_v18 }
 0x83c   : > { %8968 = vmatpush1.bf16.msra.mxu1 %v15633_v54  ;;  %8987 = vmatprep.mubr.bf16.mxu1 %v15428_v34  ;;  %v7622_v54 = vpop.f32.mrf.mxu1 }
 0x83d   : > { %8969 = vmatprep.subr.bf16.mxu1 %v15634_v20 }
 0x83e   : > { %7928 = vmatpush1.bf16.msra.mxu0 %v14291_v30  ;;  %v7624_v20 = vpop.f32.mrf.mxu1 }
 0x83f   : > { %11692 = vmatprep.subr.bf16.mxu0 %v12029_v33 }
 0x840   : > { %8970 = vmatpush1.bf16.msra.mxu1 %v15635_v41  ;;  %v7626_v41 = vpop.f32.mrf.mxu1 }
 0x841   : > { %11236 = vmatmul.mubr.msk.bf16.vlgmr.msra.gmra.mxu0 %vm629_vm0, %v15642_v8  ;;  %9010 = vmatprep.subr.bf16.mxu1 %v15656_v61  ;;  %v7582_v8 = vadd.f32 %v7581_v38, %v14562_v24 }
 0x842   : > { %11693 = vmatpush3.bf16.msra.mxu0 %v12030_v12  ;;  %v7628_v7 = vpop.f32.mrf.mxu1 }
 0x843   : > { %11694 = vmatprep.subr.bf16.mxu0 %v12031_v35  ;;  %11356 = vmatmul.mubr.msk.bf16.vlgmr.msra.gmra.mxu1 %vm629_vm0, %v14535_v18 }
 0x844   : > { %9011 = vmatpush1.bf16.msra.mxu1 %v15644_v16  ;;  %9030 = vmatprep.mubr.bf16.mxu1 %v15428_v34  ;;  %v7716_v58 = vpop.f32.mrf.mxu1 }
 0x845   : > { %9012 = vmatprep.subr.bf16.mxu1 %v15645_v47 }
 0x846   : > { %11695 = vmatpush3.bf16.msra.mxu0 %v12032_v14  ;;  %v7718_v49 = vpop.f32.mrf.mxu1 }
 0x847   : > { %11696 = vmatprep.subr.bf16.mxu0 %v12033_v55 }
 0x848   : > { %9013 = vmatpush1.bf16.msra.mxu1 %v15646_v51  ;;  %v7720_v1 = vpop.f32.mrf.mxu1 }
 0x849   : > { %9053 = vmatprep.subr.bf16.mxu1 %v14587_v39 }
 0x84a   : > { %11697 = vmatpush3.bf16.msra.mxu0 %v12034_v27  ;;  %v7722_v9 = vpop.f32.mrf.mxu1 }
 0x84b   : > { %11698 = vmatprep.subr.bf16.mxu0 %v12035_v26  ;;  %11357 = vmatmul.mubr.msk.bf16.vlgmr.msra.gmra.mxu1 %vm629_vm0, %v14535_v18  ;;  %v7580_v18 = vadd.f32 %v7579_v45, %v14552_v53  ;;  %v7586_v53 = vadd.f32 %v14634_v59, %v14590_v32 }
 0x84c   : > { %9054 = vmatpush1.bf16.msra.mxu1 %v14597_v63  ;;  %9073 = vmatprep.mubr.bf16.mxu1 %v15428_v34  ;;  %v7810_v23 = vpop.f32.mrf.mxu1 }
 0x84d   : > { %9055 = vmatprep.subr.bf16.mxu1 %v14609_v57 }
 0x84e   : > { %11699 = vmatpush3.bf16.msra.mxu0 %v12036_v29  ;;  %v7812_v16 = vpop.f32.mrf.mxu1 }
 0x84f   : > { %11700 = vmatprep.subr.bf16.mxu0 %v12038_v46 }
 0x850   : > { %9056 = vmatpush1.bf16.msra.mxu1 %v14616_v22  ;;  %v7814_v47 = vpop.f32.mrf.mxu1  ;;  %v7629_v22 = vadd.f32 %v7628_v7, %v7542_v43 }
 0x851   : > { %9096 = vmatprep.subr.bf16.mxu1 %v15647_v15 }
 0x852   : > { %11701 = vmatpush3.bf16.msra.mxu0 %v12039_v36  ;;  %v7816_v15 = vpop.f32.mrf.mxu1  ;;  %v7732_v38 = vadd.f32 %v7722_v9, %v7629_v22 }
 0x853   : > { %11702 = vmatprep.subr.bf16.mxu0 %v12040_v62  ;;  %11358 = vmatmul.mubr.msk.bf16.vlgmr.msra.gmra.mxu1 %vm629_vm0, %v14491_v31 }
 0x854   : > { %9097 = vmatpush1.bf16.msra.mxu1 %v15648_v28  ;;  %9116 = vmatprep.mubr.bf16.mxu1 %v15428_v34  ;;  %v7896_v12 = vpop.f32.mrf.mxu1 }
 0x855   : > { %9098 = vmatprep.subr.bf16.mxu1 %v15649_v42 }
 0x856   : > { %11703 = vmatpush3.bf16.msra.mxu0 %v12041_v11  ;;  %v7898_v55 = vpop.f32.mrf.mxu1 }
 0x857   : > { %11704 = vmatprep.subr.bf16.mxu0 %v12042_v21 }
 0x858   : > { %9099 = vmatpush1.bf16.msra.mxu1 %v15650_v50  ;;  %v15662_v50 = vld [vmem:[#allocation23_spill] sm:$0xff]  ;;  %v7900_v29 = vpop.f32.mrf.mxu1 }
 0x859   : > { %9190 = vmatprep.subr.bf16.mxu1 %v15651_v60 }
 0x85a   : > { %11705 = vmatpush3.bf16.msra.mxu0 %v12043_v19  ;;  %v7902_v62 = vpop.f32.mrf.mxu1 }
 0x85b   : > { %11706 = vmatprep.subr.bf16.mxu0 %v12044_v37  ;;  %11359 = vmatmul.mubr.msk.bf16.vlgmr.msra.gmra.mxu1 %vm629_vm0, %v14491_v31  ;;  %v7903_v63 = vadd.f32 %v7902_v62, %v7816_v15 }
 0x85c   : > { %9191 = vmatpush1.bf16.msra.mxu1 %v15652_v10  ;;  %9210 = vmatprep.mubr.bf16.mxu1 %v15428_v34  ;;  %v7990_v19 = vpop.f32.mrf.mxu1 }
 0x85d   : > { %9192 = vmatprep.subr.bf16.mxu1 %v15653_v2  ;;  %v15664_v2 = vld [vmem:[#allocation29_spill] sm:$0xff] }
 0x85e   : > { %11707 = vmatpush3.bf16.msra.mxu0 %v12045_v52 }
 0x85f   : > { %8399 = vmatprep.subr.bf16.mxu0 %v14603_v5 }
 0x860   : > { %9193 = vmatpush1.bf16.msra.mxu1 %v15654_v40 }
 0x861   : > { %9284 = vmatprep.subr.bf16.mxu1 %v15656_v61 }
 0x8e1   : > { %v11686_v51 = vpop.f32.mrf.mxu0 }
 0x8e3   : > { %v11687_v28 = vpop.f32.mrf.mxu0 }
 0x8e4   : > { %v11688_v33 = vadd.f32 %v11687_v28, %v11686_v51  ;;  %v7992_v51 = vpop.f32.mrf.mxu1 }
 0x8e5   : > { %v11689_v42 = vpop.f32.mrf.mxu0 }
 0x8e6   : > { %v14637_v35 = vadd.f32 %v11688_v33, %v15662_v50  ;;  %v7625_v33 = vadd.f32 %v7624_v20, %v7538_v17  ;;  %v7584_v17 = vadd.f32 %v7583_v3, %v14575_v13 }
 0x8e7   : > { %v11690_v60 = vpop.f32.mrf.mxu0 }
 0x8e8   : > { %15663 = vst [vmem:[#allocation20_spill] sm:$0xff] %v14637_v35  ;;  %v11691_v14 = vadd.f32 %v11690_v60, %v11689_v42  ;;  %v7899_v42 = vadd.f32 %v7898_v55, %v7812_v16  ;;  %v7623_v60 = vadd.f32 %v7622_v54, %v7536_v25  ;;  %v7994_v35 = vpop.f32.mrf.mxu1  ;;  %v7728_v57 = vadd.f32 %v7718_v49, %v7625_v33  ;;  %v15672_v33 = vld [vmem:[#allocation3_spill] sm:$0xff] }
 0x8e9   : > { %v7673_v10 = vpop.f32.mrf.mxu0 }
 0x8ea   : > { %v14640_v27 = vadd.f32 %v11691_v14, %v15664_v2  ;;  %v7627_v14 = vadd.f32 %v7626_v41, %v7540_v56  ;;  %v7897_v2 = vadd.f32 %v7896_v12, %v7810_v23  ;;  %v8002_v39 = vadd.f32 %v7992_v51, %v7899_v42  ;;  %v7996_v16 = vpop.f32.mrf.mxu1  ;;  %v15670_v51 = vld [vmem:[#allocation24_spill] sm:$0xff]  ;;  %v15673_v42 = vld [vmem:[#allocation18_spill] sm:$0xff] }
 0x8eb   : > { %v7675_v40 = vpop.f32.mrf.mxu0  ;;  %v7727_v20 = vadd.f32 %v7716_v58, %v7623_v60  ;;  %v8006_v49 = vadd.f32 %v7996_v16, %v7903_v63  ;;  %v15675_v60 = vld [vmem:[#allocation26_spill] sm:$0xff] }
 0x8ec   : > { %15665 = vst [vmem:[#allocation21_spill] sm:$0xff] %v14640_v27  ;;  %v7901_v27 = vadd.f32 %v7900_v29, %v7814_v47  ;;  %v7731_v56 = vadd.f32 %v7720_v1, %v7627_v14  ;;  %v8001_v41 = vadd.f32 %v7990_v19, %v7897_v2  ;;  %v7725_v47 = vadd.f32 %v7673_v10, %v7580_v18  ;;  %v14661_v19 = vld [vmem:[%s15176_s1 + $0x60] ss:$16 sps:$4 sm:$0xff]   ;;  %v15676_v14 = vld [vmem:[#allocation4_spill] sm:$0xff]  ;;  %v12047_v16 = vld [vmem:[%s15178_s3 + $0x578] sm:$0xff]  }
 0x8ed   : > { %v7677_v26 = vpop.f32.mrf.mxu0  ;;  %v7726_v24 = vadd.f32 %v7675_v40, %v7582_v8  ;;  %v8010_v7 = vmax.f32 %v7728_v57, %v8002_v39  ;;  %v8014_v8 = vmax.f32 %v7732_v38, %v8006_v49  ;;  %15667 = vst [vmem:[#allocation19_spill] sm:$0xff] %v14661_v19  ;;  %v14694_v2 = vld [vmem:[%s12417_s16 + $0xc0] sm:$0xff]  }
 0x8ee   : > { %v8005_v23 = vadd.f32 %v7994_v35, %v7901_v27  ;;  %v7729_v3 = vadd.f32 %v7677_v26, %v7584_v17  ;;  %11362 = vmatmul.mubr.msk.bf16.vlgmr.msra.gmra.mxu1 %vm629_vm0, %v14694_v2  ;;  %v14701_v17 = vld [vmem:[%s15176_s1 + $0x68] ss:$16 sps:$4 sm:$0xff]   ;;  %v12053_v38 = vld [vmem:[%s15178_s3 + $0x560] sm:$0xff]  }
 0x8ef   : > { %v7679_v46 = vpop.f32.mrf.mxu0  ;;  %15677 = vst [vmem:[#allocation6_spill] sm:$0xff] %v14701_v17  ;;  %9285 = vmatpush1.bf16.msra.mxu1 %v14701_v17  ;;  %9304 = vmatprep.mubr.bf16.mxu1 %v15428_v34  ;;  %v12054_v49 = vld [vmem:[%s15178_s3 + $0x520] sm:$0xff]  }
 0x8f0   : > { %v8013_v1 = vmax.f32 %v7731_v56, %v8005_v23  ;;  %v7730_v18 = vadd.f32 %v7679_v46, %v7586_v53  ;;  %v14747_v56 = vld [vmem:[%s15176_s1 + $0x8] ss:$16 sps:$4 sm:$0xff]   ;;  %v14756_v23 = vld [vmem:[%s15176_s1 + $0xac] ss:$16 sps:$4 sm:$0xff]  }
 0x8f1   : > { %v7767_v36 = vpop.f32.mrf.mxu0  ;;  %15683 = vst [vmem:[#allocation12_spill] sm:$0xff] %v14747_v56  ;;  %15684 = vst [vmem:[#allocation13_spill] sm:$0xff] %v14756_v23  ;;  %v12051_v53 = vld [vmem:[%s15178_s3 + $0x568] sm:$0xff]  }
 0x8f3   : > { %v7769_v11 = vpop.f32.mrf.mxu0 }
 0x8f5   : > { %v7771_v21 = vpop.f32.mrf.mxu0 }
 0x8f7   : > { %v7773_v37 = vpop.f32.mrf.mxu0 }
 0x8f9   : > { %v7853_v52 = vpop.f32.mrf.mxu0 }
 0x8fa   : > { %v7854_v5 = vadd.f32 %v7853_v52, %v7767_v36  ;;  %v14674_v52 = vld [vmem:[%s15176_s1 + $0x40] ss:$16 sps:$4 sm:$0xff]  }
 0x8fb   : > { %v7855_v28 = vpop.f32.mrf.mxu0  ;;  %15669 = vst [vmem:[#allocation25_spill] sm:$0xff] %v14674_v52 }
 0x8fc   : > { %v7856_v25 = vadd.f32 %v7855_v28, %v7769_v11  ;;  %v15671_v28 = vld [vmem:[#allocation14_spill] sm:$0xff] }
 0x8fd   : > { %v7857_v50 = vpop.f32.mrf.mxu0 }
 0x8fe   : > { %v7858_v43 = vadd.f32 %v7857_v50, %v7771_v21  ;;  %v15666_v21 = vld [vmem:[#allocation22_spill] sm:$0xff]  ;;  %v15674_v50 = vld [vmem:[#allocation5_spill] sm:$0xff] }
 0x8ff   : > { %v7859_v61 = vpop.f32.mrf.mxu0 }
 0x900   : > { %v7860_v58 = vadd.f32 %v7859_v61, %v7773_v37  ;;  %v14668_v37 = vld [vmem:[%s15176_s1 + $0x44] ss:$16 sps:$4 sm:$0xff]  }
 0x901   : > { %v7947_v31 = vpop.f32.mrf.mxu0  ;;  %15668 = vst [vmem:[#allocation28_spill] sm:$0xff] %v14668_v37 }
 0x902   : > { %v7999_v54 = vadd.f32 %v7947_v31, %v7854_v5  ;;  %v8009_v5 = vmax.f32 %v7727_v20, %v8001_v41  ;;  %v14728_v20 = vld [vmem:[%s15176_s1 + $0x28] ss:$16 sps:$4 sm:$0xff]   ;;  %v12049_v41 = vld [vmem:[%s15178_s3 + $0x570] sm:$0xff]  }
 0x903   : > { %v7949_v12 = vpop.f32.mrf.mxu0  ;;  %15681 = vst [vmem:[#allocation10_spill] sm:$0xff] %v14728_v20 }
 0x904   : > { %v8000_v45 = vadd.f32 %v7949_v12, %v7856_v25  ;;  %v8007_v15 = vmax.f32 %v7725_v47, %v7999_v54  ;;  %v14738_v25 = vld [vmem:[%s15176_s1 + $0xc] ss:$16 sps:$4 sm:$0xff]   ;;  %v12050_v47 = vld [vmem:[%s15178_s3 + $0x530] sm:$0xff]   ;;  %v14767_v12 = vld [vmem:[%s15176_s1 + $0xa8] ss:$16 sps:$4 sm:$0xff]  }
 0x905   : > { %v7951_v13 = vpop.f32.mrf.mxu0  ;;  %15682 = vst [vmem:[#allocation11_spill] sm:$0xff] %v14738_v25  ;;  %v12048_v54 = vld [vmem:[%s15178_s3 + $0x538] sm:$0xff]   ;;  %15685 = vst [vmem:[#allocation15_spill] sm:$0xff] %v14767_v12 }
 0x906   : > { %v8008_v55 = vmax.f32 %v7726_v24, %v8000_v45  ;;  %v8003_v31 = vadd.f32 %v7951_v13, %v7858_v43  ;;  %v8015_v32 = vmax.f32 %v8007_v15, %v8009_v5  ;;  %v14776_v24 = vld [vmem:[%s15176_s1 + $0x8c] ss:$16 sps:$4 sm:$0xff]   ;;  %v14786_v45 = vld [vmem:[%s15176_s1 + $0x88] ss:$16 sps:$4 sm:$0xff]  }
 0x907   : > { %v7953_v35 = vpop.f32.mrf.mxu0  ;;  %15686 = vst [vmem:[#allocation16_spill] sm:$0xff] %v14776_v24  ;;  %v12052_v43 = vld [vmem:[%s15178_s3 + $0x528] sm:$0xff]   ;;  %15687 = vst [vmem:[#allocation17_spill] sm:$0xff] %v14786_v45  ;;  %v12056_v15 = vld [vmem:[%s15178_s3 + $0x558] sm:$0xff]  }
 0x908   : > { %v8016_v10 = vmax.f32 %v8008_v55, %v8010_v7  ;;  %v8011_v27 = vmax.f32 %v7729_v3, %v8003_v31  ;;  %v8004_v29 = vadd.f32 %v7953_v35, %v7860_v58  ;;  %v8019_v61 = vadd.f32 %v8015_v32, %v12803_v4  ;;  %v14793_v7 = vld [vmem:[%s12417_s16 + $0xc8] sm:$0xff]   ;;  %v12057_v13 = vld [vmem:[%s15178_s3 + $0x518] sm:$0xff]   ;;  %v14810_v3 = vpop.f32.mrf.mxu1  ;;  %v12058_v58 = vld [vmem:[%s15178_s3 + $0x550] sm:$0xff]  }
 0x909   : > { %15688 = vst [vmem:[#allocation23_spill] sm:$0xff] %v14793_v7  ;;  %v15689_v55 = vld [vmem:[#allocation27_spill] sm:$0xff]  ;;  %v12059_v31 = vld [vmem:[%s15178_s3 + $0x510] sm:$0xff]   ;;  %v12061_v35 = vld [vmem:[%s15178_s3 + $0x508] sm:$0xff]  }
 0x90a   : > { %v8017_v59 = vmax.f32 %v8011_v27, %v8013_v1  ;;  %v8012_v40 = vmax.f32 %v7730_v18, %v8004_v29  ;;  %v8020_v57 = vadd.f32 %v8016_v10, %v12799_v44  ;;  %v8023_v46 = vmax.f32 %v8019_v61, 0.0  ;;  %v14820_v5 = vpop.f32.mrf.mxu1  ;;  %v12060_v1 = vld [vmem:[%s15178_s3 + $0x548] sm:$0xff]   ;;  %v12062_v10 = vld [vmem:[%s15178_s3 + $0x540] sm:$0xff]  }
 0x90b   : > { %v12063_v27 = vld [vmem:[%s15178_s3 + $0x500] sm:$0xff]  }
 0x90c   : > { %v8021_v39 = vadd.f32 %v8017_v59, %v12803_v4  ;;  %v8018_v63 = vmax.f32 %v8012_v40, %v8014_v8  ;;  %v8024_v26 = vmax.f32 %v8020_v57, 0.0  ;;  %v14833_v18 = vpop.f32.mrf.mxu1 }
 0x90e   : > { %v8022_v22 = vadd.f32 %v8018_v63, %v12799_v44  ;;  %v8025_v9 = vmax.f32 %v8021_v39, 0.0  ;;  %v14843_v29 = vpop.f32.mrf.mxu1 }
 0x910   : > { %v8026_v36 = vmax.f32 %v8022_v22, 0.0  ;;  %v8027_v11 = vpack.c.bf16 %v8025_v9, %v8023_v46  ;;  %v8284_v32 = vpop.f32.mrf.mxu1 }
 0x912   : > { %v8028_v62 = vpack.c.bf16 %v8026_v36, %v8024_v26  ;;  %v8286_v8 = vpop.f32.mrf.mxu1 }
 0x914   : > { %8190 = vmatprep.mubr.bf16.mxu0 %v8028_v62  ;;  %v8288_v59 = vpop.f32.mrf.mxu1 }
 0x915   : > { %8191 = vmatmul.mubr.bf16.vlgmr.msra.gmra.mxu0 %v8027_v11 }
 0x916   : > { %8400 = vmatpush1.bf16.msra.mxu0 %v14278_v6  ;;  %8419 = vmatprep.mubr.bf16.mxu0 %v15428_v34  ;;  %v8290_v40 = vpop.f32.mrf.mxu1 }
 0x917   : > { %8401 = vmatprep.subr.bf16.mxu0 %v14285_v0 }
 0x918   : > { %v8327_v39 = vpop.f32.mrf.mxu1 }
 0x91a   : > { %8402 = vmatpush1.bf16.msra.mxu0 %v14291_v30  ;;  %v8329_v63 = vpop.f32.mrf.mxu1 }
 0x91b   : > { %8493 = vmatprep.subr.bf16.mxu0 %v14465_v48 }
 0x91c   : > { %v8331_v57 = vpop.f32.mrf.mxu1 }
 0x91d   : > { %11295 = vmatmul.mubr.msk.bf16.vlgmr.msra.gmra.mxu0 %vm629_vm0, %v15666_v21 }
 0x91e   : > { %8494 = vmatpush1.bf16.msra.mxu0 %v14661_v19  ;;  %8513 = vmatprep.mubr.bf16.mxu0 %v15428_v34  ;;  %v14867_v61 = vpop.f32.mrf.mxu1 }
 0x91f   : > { %8495 = vmatprep.subr.bf16.mxu0 %v14668_v37 }
 0x920   : > { %v8370_v22 = vpop.f32.mrf.mxu1 }
 0x922   : > { %8496 = vmatpush1.bf16.msra.mxu0 %v14674_v52  ;;  %v8372_v9 = vpop.f32.mrf.mxu1 }
 0x923   : > { %8579 = vmatprep.subr.bf16.mxu0 %v15670_v51 }
 0x924   : > { %v8374_v26 = vpop.f32.mrf.mxu1 }
 0x925   : > { %11297 = vmatmul.mubr.msk.bf16.vlgmr.msra.gmra.mxu0 %vm629_vm0, %v15666_v21 }
 0x926   : > { %8580 = vmatpush1.bf16.msra.mxu0 %v15671_v28  ;;  %8599 = vmatprep.mubr.bf16.mxu0 %v15428_v34  ;;  %v8376_v36 = vpop.f32.mrf.mxu1 }
 0x927   : > { %8581 = vmatprep.subr.bf16.mxu0 %v15672_v33 }
 0x928   : > { %v8464_v46 = vpop.f32.mrf.mxu1 }
 0x92a   : > { %8582 = vmatpush1.bf16.msra.mxu0 %v15673_v42  ;;  %v8466_v62 = vpop.f32.mrf.mxu1 }
 0x92b   : > { %8673 = vmatprep.subr.bf16.mxu0 %v15674_v50 }
 0x92c   : > { %v8468_v11 = vpop.f32.mrf.mxu1 }
 0x92d   : > { %11299 = vmatmul.mubr.msk.bf16.vlgmr.msra.gmra.mxu0 %vm629_vm0, %v15675_v60 }
 0x92e   : > { %8674 = vmatpush1.bf16.msra.mxu0 %v14278_v6  ;;  %8693 = vmatprep.mubr.bf16.mxu0 %v15428_v34  ;;  %v14708_v6 = vld [vmem:[%s15176_s1 + $0x4c] ss:$16 sps:$4 sm:$0xff]   ;;  %v8470_v21 = vpop.f32.mrf.mxu1 }
 0x92f   : > { %8675 = vmatprep.subr.bf16.mxu0 %v14285_v0  ;;  %15678 = vst [vmem:[#allocation7_spill] sm:$0xff] %v14708_v6  ;;  %9286 = vmatprep.subr.bf16.mxu1 %v14708_v6  ;;  %v14714_v0 = vld [vmem:[%s15176_s1 + $0x48] ss:$16 sps:$4 sm:$0xff]  }
 0x930   : > { %15679 = vst [vmem:[#allocation8_spill] sm:$0xff] %v14714_v0  ;;  %9287 = vmatpush1.bf16.msra.mxu1 %v14714_v0  ;;  %v8558_v60 = vpop.f32.mrf.mxu1 }
 0x932   : > { %8676 = vmatpush1.bf16.msra.mxu0 %v14291_v30  ;;  %v14720_v30 = vld [vmem:[%s15176_s1 + $0x2c] ss:$16 sps:$4 sm:$0xff]  }
 0x933   : > { %15680 = vst [vmem:[#allocation9_spill] sm:$0xff] %v14720_v30  ;;  %9370 = vmatprep.subr.bf16.mxu1 %v14720_v30  ;;  %11364 = vmatmul.mubr.msk.bf16.vlgmr.msra.gmra.mxu1 %vm629_vm0, %v14694_v2 }
 0x934   : > { %9371 = vmatpush1.bf16.msra.mxu1 %v14728_v20  ;;  %9390 = vmatprep.mubr.bf16.mxu1 %v15428_v34 }
 0x935   : > { %11302 = vmatmul.mubr.msk.bf16.vlgmr.msra.gmra.mxu0 %vm629_vm0, %v15676_v14  ;;  %9372 = vmatprep.subr.bf16.mxu1 %v14738_v25 }
 0x936   : > { %11714 = vmatprep.subr.bf16.mxu0 %v12047_v16  ;;  %v8560_v16 = vpop.f32.mrf.mxu1 }
 0x937   : > { %11715 = vmatpush3.bf16.msra.mxu0 %v12048_v54 }
 0x938   : > { %9373 = vmatpush1.bf16.msra.mxu1 %v14747_v56  ;;  %11716 = vmatprep.subr.bf16.mxu0 %v12049_v41  ;;  %v8562_v54 = vpop.f32.mrf.mxu1 }
 0x939   : > { %9464 = vmatprep.subr.bf16.mxu1 %v14756_v23 }
 0x93b   : > { %11366 = vmatmul.mubr.msk.bf16.vlgmr.msra.gmra.mxu1 %vm629_vm0, %v15676_v14  ;;  %11717 = vmatpush3.bf16.msra.mxu0 %v12050_v47  ;;  %v8564_v47 = vpop.f32.mrf.mxu1  ;;  %v8330_v14 = vadd.f32 %v8329_v63, %v14820_v5 }
 0x93c   : > { %9465 = vmatpush1.bf16.msra.mxu1 %v14767_v12  ;;  %9484 = vmatprep.mubr.bf16.mxu1 %v15428_v34 }
 0x93d   : > { %9466 = vmatprep.subr.bf16.mxu1 %v14776_v24  ;;  %11718 = vmatprep.subr.bf16.mxu0 %v12051_v53 }
 0x93f   : > { %11719 = vmatpush3.bf16.msra.mxu0 %v12052_v43 }
 0x940   : > { %9467 = vmatpush1.bf16.msra.mxu1 %v14786_v45  ;;  %11720 = vmatprep.subr.bf16.mxu0 %v12053_v38 }
 0x941   : > { %9715 = vmatprep.subr.bf16.mxu1 %v14465_v48 }
 0x943   : > { %11369 = vmatmul.mubr.msk.bf16.vlgmr.msra.gmra.mxu1 %vm629_vm0, %v14793_v7  ;;  %11721 = vmatpush3.bf16.msra.mxu0 %v12054_v49  ;;  %v8644_v49 = vpop.f32.mrf.mxu1 }
 0x944   : > { %9716 = vmatpush1.bf16.msra.mxu1 %v14661_v19  ;;  %9735 = vmatprep.mubr.bf16.mxu1 %v15428_v34 }
 0x945   : > { %9717 = vmatprep.subr.bf16.mxu1 %v14668_v37  ;;  %11722 = vmatprep.subr.bf16.mxu0 %v12056_v15  ;;  %v15690_v15 = vld [vmem:[#allocation20_spill] sm:$0xff] }
 0x947   : > { %11723 = vmatpush3.bf16.msra.mxu0 %v12057_v13 }
 0x948   : > { %9718 = vmatpush1.bf16.msra.mxu1 %v14674_v52  ;;  %11724 = vmatprep.subr.bf16.mxu0 %v12058_v58 }
 0x949   : > { %9758 = vmatprep.subr.bf16.mxu1 %v15689_v55 }
 0x94b   : > { %11422 = vmatmul.mubr.msk.bf16.vlgmr.msra.gmra.mxu1 %vm629_vm0, %v14793_v7  ;;  %11725 = vmatpush3.bf16.msra.mxu0 %v12059_v31 }
 0x94c   : > { %9759 = vmatpush1.bf16.msra.mxu1 %v14701_v17  ;;  %9778 = vmatprep.mubr.bf16.mxu1 %v15428_v34 }
 0x94d   : > { %9760 = vmatprep.subr.bf16.mxu1 %v14708_v6  ;;  %11726 = vmatprep.subr.bf16.mxu0 %v12060_v1  ;;  %v8646_v1 = vpop.f32.mrf.mxu1 }
 0x94f   : > { %11727 = vmatpush3.bf16.msra.mxu0 %v12061_v35  ;;  %v15692_v35 = vld [vmem:[#allocation21_spill] sm:$0xff] }
 0x950   : > { %9761 = vmatpush1.bf16.msra.mxu1 %v14714_v0  ;;  %11728 = vmatprep.subr.bf16.mxu0 %v12062_v10  ;;  %v8371_v0 = vadd.f32 %v8370_v22, %v8284_v32 }
 0x951   : > { %9801 = vmatprep.subr.bf16.mxu1 %v15670_v51 }
 0x953   : > { %11423 = vmatmul.mubr.msk.bf16.vlgmr.msra.gmra.mxu1 %vm629_vm0, %v14793_v7  ;;  %11729 = vmatpush3.bf16.msra.mxu0 %v12063_v27  ;;  %v8328_v7 = vadd.f32 %v8327_v39, %v14810_v3  ;;  %v8334_v3 = vadd.f32 %v14867_v61, %v14843_v29 }
 0x954   : > { %9802 = vmatpush1.bf16.msra.mxu1 %v15671_v28  ;;  %9147 = vmatprep.subr.bf16.mxu0 %v15674_v50 }
 0x955   : > { %9803 = vmatprep.subr.bf16.mxu1 %v15672_v33  ;;  %9821 = vmatprep.mubr.bf16.mxu1 %v15428_v34 }
 0x958   : > { %9804 = vmatpush1.bf16.msra.mxu1 %v15673_v42  ;;  %v8377_v42 = vadd.f32 %v8376_v36, %v8290_v40 }
 0x959   : > { %9844 = vmatprep.subr.bf16.mxu1 %v14720_v30 }
 0x95b   : > { %11424 = vmatmul.mubr.msk.bf16.vlgmr.msra.gmra.mxu1 %vm629_vm0, %v14694_v2 }
 0x95c   : > { %9845 = vmatpush1.bf16.msra.mxu1 %v14728_v20  ;;  %9864 = vmatprep.mubr.bf16.mxu1 %v15428_v34 }
 0x95d   : > { %9846 = vmatprep.subr.bf16.mxu1 %v14738_v25 }
 0x960   : > { %9847 = vmatpush1.bf16.msra.mxu1 %v14747_v56 }
 0x961   : > { %9938 = vmatprep.subr.bf16.mxu1 %v14756_v23 }
 0x963   : > { %11425 = vmatmul.mubr.msk.bf16.vlgmr.msra.gmra.mxu1 %vm629_vm0, %v14694_v2 }
 0x964   : > { %9939 = vmatpush1.bf16.msra.mxu1 %v14767_v12  ;;  %9958 = vmatprep.mubr.bf16.mxu1 %v15428_v34 }
 0x965   : > { %9940 = vmatprep.subr.bf16.mxu1 %v14776_v24  ;;  %v8648_v24 = vpop.f32.mrf.mxu1 }
 0x967   : > { %v8650_v56 = vpop.f32.mrf.mxu1 }
 0x968   : > { %9941 = vmatpush1.bf16.msra.mxu1 %v14786_v45  ;;  %v8651_v28 = vadd.f32 %v8650_v56, %v8564_v47  ;;  %v8480_v56 = vadd.f32 %v8470_v21, %v8377_v42 }
 0x969   : > { %10032 = vmatprep.subr.bf16.mxu1 %v15689_v55 }
 0x9d5   : > { %v11708_v41 = vpop.f32.mrf.mxu0 }
 0x9d7   : > { %v11709_v53 = vpop.f32.mrf.mxu0 }
 0x9d8   : > { %v11710_v43 = vadd.f32 %v11709_v53, %v11708_v41  ;;  %v8738_v53 = vpop.f32.mrf.mxu1 }
 0x9d9   : > { %v11711_v38 = vpop.f32.mrf.mxu0 }
 0x9da   : > { %v14870_v13 = vadd.f32 %v11710_v43, %v15690_v15  ;;  %v8740_v43 = vpop.f32.mrf.mxu1 }
 0x9db   : > { %v11712_v58 = vpop.f32.mrf.mxu0 }
 0x9dc   : > { %15691 = vst [vmem:[#allocation29_spill] sm:$0xff] %v14870_v13  ;;  %v11713_v55 = vadd.f32 %v11712_v58, %v11711_v38  ;;  %v8373_v13 = vadd.f32 %v8372_v9, %v8286_v8  ;;  %v8647_v38 = vadd.f32 %v8646_v1, %v8560_v16  ;;  %v8742_v6 = vpop.f32.mrf.mxu1  ;;  %v8332_v8 = vadd.f32 %v8331_v57, %v14833_v18  ;;  %v14894_v1 = vld [vmem:[%s15176_s1 + $0x84] ss:$16 sps:$4 sm:$0xff]  }
 0x9dd   : > { %v8421_v31 = vpop.f32.mrf.mxu0  ;;  %v8475_v9 = vadd.f32 %v8464_v46, %v8371_v0 }
 0x9de   : > { %v14873_v10 = vadd.f32 %v11713_v55, %v15692_v35  ;;  %v8375_v55 = vadd.f32 %v8374_v26, %v8288_v59  ;;  %v8645_v35 = vadd.f32 %v8644_v49, %v8558_v60  ;;  %v8476_v33 = vadd.f32 %v8466_v62, %v8373_v13  ;;  %v8744_v16 = vpop.f32.mrf.mxu1 }
 0x9df   : > { %v8423_v27 = vpop.f32.mrf.mxu0  ;;  %v8750_v51 = vadd.f32 %v8740_v43, %v8647_v38  ;;  %v8473_v60 = vadd.f32 %v8421_v31, %v8328_v7  ;;  %v8754_v39 = vadd.f32 %v8744_v16, %v8651_v28  ;;  %v14887_v31 = vld [vmem:[%s15176_s1 + $0xa0] ss:$16 sps:$4 sm:$0xff]   ;;  %v15698_v43 = vld [vmem:[#allocation18_spill] sm:$0xff]  ;;  %v15700_v38 = vld [vmem:[#allocation4_spill] sm:$0xff] }
 0x9e0   : > { %15693 = vst [vmem:[#allocation22_spill] sm:$0xff] %v14873_v10  ;;  %v8649_v10 = vadd.f32 %v8648_v24, %v8562_v54  ;;  %v8479_v59 = vadd.f32 %v8468_v11, %v8375_v55  ;;  %v8749_v26 = vadd.f32 %v8738_v53, %v8645_v35  ;;  %v15696_v53 = vld [vmem:[#allocation14_spill] sm:$0xff]  ;;  %v15703_v35 = vld [vmem:[#allocation7_spill] sm:$0xff] }
 0x9e1   : > { %v8425_v45 = vpop.f32.mrf.mxu0  ;;  %v8758_v40 = vmax.f32 %v8476_v33, %v8750_v51  ;;  %v15702_v55 = vld [vmem:[#allocation6_spill] sm:$0xff] }
 0x9e2   : > { %v8753_v24 = vadd.f32 %v8742_v6, %v8649_v10  ;;  %v8477_v0 = vadd.f32 %v8425_v45, %v8332_v8  ;;  %v14900_v10 = vld [vmem:[%s15176_s1 + $0x80] ss:$16 sps:$4 sm:$0xff]   ;;  %v15704_v8 = vld [vmem:[#allocation8_spill] sm:$0xff]  ;;  %v15706_v16 = vld [vmem:[#allocation10_spill] sm:$0xff] }
 0x9e3   : > { %v8427_v12 = vpop.f32.mrf.mxu0 }
 0x9e4   : > { %v8761_v36 = vmax.f32 %v8479_v59, %v8753_v24  ;;  %v8478_v7 = vadd.f32 %v8427_v12, %v8334_v3  ;;  %v12066_v59 = vld [vmem:[%s15178_s3 + $0x5b8] sm:$0xff]   ;;  %v12067_v24 = vld [vmem:[%s15178_s3 + $0x5f0] sm:$0xff]   ;;  %v15710_v3 = vld [vmem:[#allocation15_spill] sm:$0xff] }
 0x9e5   : > { %v8515_v23 = vpop.f32.mrf.mxu0 }
 0x9e7   : > { %v8517_v25 = vpop.f32.mrf.mxu0 }
 0x9e9   : > { %v8519_v41 = vpop.f32.mrf.mxu0 }
 0x9eb   : > { %v8521_v20 = vpop.f32.mrf.mxu0 }
 0x9ed   : > { %v8601_v30 = vpop.f32.mrf.mxu0 }
 0x9ee   : > { %v8602_v50 = vadd.f32 %v8601_v30, %v8515_v23  ;;  %v8474_v30 = vadd.f32 %v8423_v27, %v8330_v14  ;;  %v8762_v14 = vmax.f32 %v8480_v56, %v8754_v39  ;;  %v15694_v27 = vld [vmem:[#allocation25_spill] sm:$0xff]  ;;  %v14971_v39 = vld [vmem:[%s12417_s16 + $0xd8] sm:$0xff]  }
 0x9ef   : > { %v8603_v15 = vpop.f32.mrf.mxu0  ;;  %v15712_v56 = vld [vmem:[#allocation17_spill] sm:$0xff]  ;;  %15713 = vst [vmem:[#allocation26_spill] sm:$0xff] %v14971_v39 }
 0x9f0   : > { %v8604_v32 = vadd.f32 %v8603_v15, %v8517_v25  ;;  %v15699_v15 = vld [vmem:[#allocation5_spill] sm:$0xff] }
 0x9f1   : > { %v8605_v58 = vpop.f32.mrf.mxu0 }
 0x9f2   : > { %v8606_v23 = vadd.f32 %v8605_v58, %v8519_v41  ;;  %v15695_v41 = vld [vmem:[#allocation24_spill] sm:$0xff]  ;;  %v14927_v58 = vld [vmem:[%s12417_s16 + $0xd0] sm:$0xff]   ;;  %s543_s16 = scalar_lea.vmem %s15182_s7, %s10613_s14 }
 0x9f3   : > { %v8607_v17 = vpop.f32.mrf.mxu0  ;;  %11428 = vmatmul.mubr.msk.bf16.vlgmr.msra.gmra.mxu1 %vm629_vm0, %v14927_v58 }
 0x9f4   : > { %v8608_v57 = vadd.f32 %v8607_v17, %v8521_v20  ;;  %10033 = vmatpush1.bf16.msra.mxu1 %v15702_v55  ;;  %10052 = vmatprep.mubr.bf16.mxu1 %v15428_v34 }
 0x9f5   : > { %v8695_v52 = vpop.f32.mrf.mxu0  ;;  %10034 = vmatprep.subr.bf16.mxu1 %v15703_v35 }
 0x9f6   : > { %v8747_v22 = vadd.f32 %v8695_v52, %v8602_v50  ;;  %v8757_v50 = vmax.f32 %v8475_v9, %v8749_v26  ;;  %v15705_v9 = vld [vmem:[#allocation9_spill] sm:$0xff]  ;;  %v15708_v26 = vld [vmem:[#allocation12_spill] sm:$0xff] }
 0x9f7   : > { %v8697_v54 = vpop.f32.mrf.mxu0 }
 0x9f8   : > { %v8748_v5 = vadd.f32 %v8697_v54, %v8604_v32  ;;  %v8755_v63 = vmax.f32 %v8473_v60, %v8747_v22  ;;  %10035 = vmatpush1.bf16.msra.mxu1 %v15704_v8  ;;  %v12065_v32 = vld [vmem:[%s15178_s3 + $0x5f8] sm:$0xff]   ;;  %v15707_v22 = vld [vmem:[#allocation11_spill] sm:$0xff]  ;;  %v15709_v60 = vld [vmem:[#allocation13_spill] sm:$0xff] }
 0x9f9   : > { %v8699_v18 = vpop.f32.mrf.mxu0  ;;  %10118 = vmatprep.subr.bf16.mxu1 %v15705_v9  ;;  %v12068_v54 = vld [vmem:[%s15178_s3 + $0x5b0] sm:$0xff]  }
 0x9fa   : > { %v8756_v25 = vmax.f32 %v8474_v30, %v8748_v5  ;;  %v8751_v52 = vadd.f32 %v8699_v18, %v8606_v23  ;;  %v8763_v29 = vmax.f32 %v8755_v63, %v8757_v50  ;;  %v12069_v30 = vld [vmem:[%s15178_s3 + $0x5e8] sm:$0xff]   ;;  %v12072_v63 = vld [vmem:[%s15178_s3 + $0x5a0] sm:$0xff]   ;;  %v12074_v18 = vld [vmem:[%s15178_s3 + $0x5d8] sm:$0xff]  }
 0x9fb   : > { %v8701_v6 = vpop.f32.mrf.mxu0  ;;  %11430 = vmatmul.mubr.msk.bf16.vlgmr.msra.gmra.mxu1 %vm629_vm0, %v14927_v58  ;;  %v15711_v23 = vld [vmem:[#allocation16_spill] sm:$0xff] }
 0x9fc   : > { %v8764_v46 = vmax.f32 %v8756_v25, %v8758_v40  ;;  %v8759_v62 = vmax.f32 %v8477_v0, %v8751_v52  ;;  %v8752_v11 = vadd.f32 %v8701_v6, %v8608_v57  ;;  %v8767_v42 = vadd.f32 %v8763_v29, %v12803_v4  ;;  %10119 = vmatpush1.bf16.msra.mxu1 %v15706_v16  ;;  %v12070_v5 = vld [vmem:[%s15178_s3 + $0x5a8] sm:$0xff]   ;;  %v12071_v40 = vld [vmem:[%s15178_s3 + $0x5e0] sm:$0xff]   ;;  %v12075_v0 = vld [vmem:[%s15178_s3 + $0x598] sm:$0xff]   ;;  %v14984_v57 = vpop.f32.mrf.mxu1 }
 0x9fd   : > { %10138 = vmatprep.mubr.bf16.mxu1 %v15428_v34  ;;  %10120 = vmatprep.subr.bf16.mxu1 %v15707_v22  ;;  %v12076_v25 = vld [vmem:[%s15178_s3 + $0x5d0] sm:$0xff]   ;;  %v12079_v6 = vld [vmem:[%s15178_s3 + $0x588] sm:$0xff]  }
 0x9fe   : > { %v8765_v61 = vmax.f32 %v8759_v62, %v8761_v36  ;;  %v8760_v47 = vmax.f32 %v8478_v7, %v8752_v11  ;;  %v8768_v33 = vadd.f32 %v8764_v46, %v12799_v44  ;;  %v8771_v12 = vmax.f32 %v8767_v42, 0.0  ;;  %v12077_v52 = vld [vmem:[%s15178_s3 + $0x590] sm:$0xff]   ;;  %v14992_v50 = vpop.f32.mrf.mxu1  ;;  %v12078_v36 = vld [vmem:[%s15178_s3 + $0x5c8] sm:$0xff]   ;;  %v12080_v46 = vld [vmem:[%s15178_s3 + $0x5c0] sm:$0xff]  }
 0x9ff   : > { %v12081_v62 = vld [vmem:[%s15178_s3 + $0x580] sm:$0xff]   ;;  %v15714_v16 = vld [vmem:[#allocation29_spill] sm:$0xff] }
 0xa00   : > { %v8769_v51 = vadd.f32 %v8765_v61, %v12803_v4  ;;  %v8766_v28 = vmax.f32 %v8760_v47, %v8762_v14  ;;  %v8772_v45 = vmax.f32 %v8768_v33, 0.0  ;;  %10121 = vmatpush1.bf16.msra.mxu1 %v15708_v26  ;;  %v15000_v7 = vpop.f32.mrf.mxu1 }
 0xa01   : > { %10212 = vmatprep.subr.bf16.mxu1 %v15709_v60  ;;  %v15716_v60 = vld [vmem:[#allocation22_spill] sm:$0xff] }
 0xa02   : > { %v8770_v17 = vadd.f32 %v8766_v28, %v12799_v44  ;;  %v8773_v20 = vmax.f32 %v8769_v51, 0.0  ;;  %v15008_v11 = vpop.f32.mrf.mxu1 }
 0xa04   : > { %v8774_v21 = vmax.f32 %v8770_v17, 0.0  ;;  %v8775_v13 = vpack.c.bf16 %v8773_v20, %v8771_v12  ;;  %v9032_v29 = vpop.f32.mrf.mxu1 }
 0xa06   : > { %v8776_v49 = vpack.c.bf16 %v8774_v21, %v8772_v45  ;;  %v9034_v14 = vpop.f32.mrf.mxu1 }
 0xa08   : > { %8938 = vmatprep.mubr.bf16.mxu0 %v8776_v49  ;;  %v9036_v61 = vpop.f32.mrf.mxu1 }
 0xa09   : > { %8939 = vmatmul.mubr.bf16.vlgmr.msra.gmra.mxu0 %v8775_v13 }
 0xa0a   : > { %9148 = vmatpush1.bf16.msra.mxu0 %v14887_v31  ;;  %9167 = vmatprep.mubr.bf16.mxu0 %v15428_v34  ;;  %v9038_v47 = vpop.f32.mrf.mxu1 }
 0xa0b   : > { %9149 = vmatprep.subr.bf16.mxu0 %v14894_v1 }
 0xa0c   : > { %v9075_v51 = vpop.f32.mrf.mxu1 }
 0xa0e   : > { %9150 = vmatpush1.bf16.msra.mxu0 %v14900_v10  ;;  %v9077_v28 = vpop.f32.mrf.mxu1 }
 0xa0f   : > { %9241 = vmatprep.subr.bf16.mxu0 %v14465_v48  ;;  %v15697_v48 = vld [vmem:[#allocation3_spill] sm:$0xff] }
 0xa10   : > { %v9079_v33 = vpop.f32.mrf.mxu1 }
 0xa11   : > { %11361 = vmatmul.mubr.msk.bf16.vlgmr.msra.gmra.mxu0 %vm629_vm0, %v14694_v2 }
 0xa12   : > { %9242 = vmatpush1.bf16.msra.mxu0 %v14661_v19  ;;  %9261 = vmatprep.mubr.bf16.mxu0 %v15428_v34  ;;  %v15011_v42 = vpop.f32.mrf.mxu1 }
 0xa13   : > { %9243 = vmatprep.subr.bf16.mxu0 %v14668_v37 }
 0xa14   : > { %v9118_v17 = vpop.f32.mrf.mxu1 }
 0xa16   : > { %9244 = vmatpush1.bf16.msra.mxu0 %v15694_v27  ;;  %v9120_v20 = vpop.f32.mrf.mxu1 }
 0xa17   : > { %9327 = vmatprep.subr.bf16.mxu0 %v15695_v41 }
 0xa18   : > { %v9122_v45 = vpop.f32.mrf.mxu1 }
 0xa19   : > { %11363 = vmatmul.mubr.msk.bf16.vlgmr.msra.gmra.mxu0 %vm629_vm0, %v14694_v2  ;;  %v15701_v2 = vld [vmem:[#allocation23_spill] sm:$0xff] }
 0xa1a   : > { %9328 = vmatpush1.bf16.msra.mxu0 %v15696_v53  ;;  %9347 = vmatprep.mubr.bf16.mxu0 %v15428_v34  ;;  %v9124_v21 = vpop.f32.mrf.mxu1 }
 0xa1b   : > { %9329 = vmatprep.subr.bf16.mxu0 %v15697_v48  ;;  %11432 = vmatmul.mubr.msk.bf16.vlgmr.msra.gmra.mxu1 %vm629_vm0, %v15701_v2 }
 0xa1c   : > { %10213 = vmatpush1.bf16.msra.mxu1 %v15710_v3  ;;  %10232 = vmatprep.mubr.bf16.mxu1 %v15428_v34  ;;  %v9212_v12 = vpop.f32.mrf.mxu1 }
 0xa1d   : > { %10214 = vmatprep.subr.bf16.mxu1 %v15711_v23 }
 0xa1e   : > { %9330 = vmatpush1.bf16.msra.mxu0 %v15698_v43  ;;  %v9214_v49 = vpop.f32.mrf.mxu1 }
 0xa1f   : > { %9421 = vmatprep.subr.bf16.mxu0 %v15699_v15 }
 0xa20   : > { %10215 = vmatpush1.bf16.msra.mxu1 %v15712_v56  ;;  %v9216_v13 = vpop.f32.mrf.mxu1 }
 0xa21   : > { %11365 = vmatmul.mubr.msk.bf16.vlgmr.msra.gmra.mxu0 %vm629_vm0, %v15700_v38 }
 0xa22   : > { %9422 = vmatpush1.bf16.msra.mxu0 %v14887_v31  ;;  %9441 = vmatprep.mubr.bf16.mxu0 %v15428_v34  ;;  %v9218_v41 = vpop.f32.mrf.mxu1 }
 0xa23   : > { %9423 = vmatprep.subr.bf16.mxu0 %v14894_v1  ;;  %11435 = vmatmul.mubr.msk.bf16.vlgmr.msra.gmra.mxu1 %vm629_vm0, %v14971_v39  ;;  %v9125_v39 = vadd.f32 %v9124_v21, %v9038_v47 }
 0xa24   : > { %v9306_v53 = vpop.f32.mrf.mxu1 }
 0xa26   : > { %9424 = vmatpush1.bf16.msra.mxu0 %v14900_v10  ;;  %v9308_v48 = vpop.f32.mrf.mxu1 }
 0xa27   : > { %11736 = vmatprep.subr.bf16.mxu0 %v12065_v32 }
 0xa28   : > { %v9310_v43 = vpop.f32.mrf.mxu1 }
 0xa29   : > { %11368 = vmatmul.mubr.msk.bf16.vlgmr.msra.gmra.mxu0 %vm629_vm0, %v15701_v2 }
 0xa2a   : > { %11737 = vmatpush3.bf16.msra.mxu0 %v12066_v59  ;;  %v9312_v38 = vpop.f32.mrf.mxu1 }
 0xa2b   : > { %11738 = vmatprep.subr.bf16.mxu0 %v12067_v24 }
 0xa2c   : > { %v9392_v9 = vpop.f32.mrf.mxu1 }
 0xa2e   : > { %11739 = vmatpush3.bf16.msra.mxu0 %v12068_v54  ;;  %v9394_v24 = vpop.f32.mrf.mxu1 }
 0xa2f   : > { %11740 = vmatprep.subr.bf16.mxu0 %v12069_v30 }
 0xa30   : > { %v9396_v23 = vpop.f32.mrf.mxu1 }
 0xa32   : > { %11741 = vmatpush3.bf16.msra.mxu0 %v12070_v5 }
 0xa33   : > { %11742 = vmatprep.subr.bf16.mxu0 %v12071_v40  ;;  %v9398_v40 = vpop.f32.mrf.mxu1 }
 0xa34   : > { %v9399_v27 = vadd.f32 %v9398_v40, %v9312_v38 }
 0xa36   : > { %11743 = vmatpush3.bf16.msra.mxu0 %v12072_v63 }
 0xa37   : > { %11744 = vmatprep.subr.bf16.mxu0 %v12074_v18 }
 0xa3a   : > { %11745 = vmatpush3.bf16.msra.mxu0 %v12075_v0  ;;  %v9486_v0 = vpop.f32.mrf.mxu1 }
 0xa3b   : > { %11746 = vmatprep.subr.bf16.mxu0 %v12076_v25 }
 0xa3e   : > { %11747 = vmatpush3.bf16.msra.mxu0 %v12077_v52 }
 0xa3f   : > { %11748 = vmatprep.subr.bf16.mxu0 %v12078_v36  ;;  %v9488_v36 = vpop.f32.mrf.mxu1 }
 0xa42   : > { %11749 = vmatpush3.bf16.msra.mxu0 %v12079_v6 }
 0xa43   : > { %11750 = vmatprep.subr.bf16.mxu0 %v12080_v46  ;;  %v9121_v46 = vadd.f32 %v9120_v20, %v9034_v14  ;;  %v9080_v14 = vadd.f32 %v9079_v33, %v15000_v7 }
 0xa45   : > { %v9224_v2 = vadd.f32 %v9214_v49, %v9121_v46  ;;  %v15719_v46 = vld [vmem:[#allocation28_spill] sm:$0xff] }
 0xa46   : > { %11751 = vmatpush3.bf16.msra.mxu0 %v12081_v62  ;;  %v9395_v62 = vadd.f32 %v9394_v24, %v9308_v48 }
 0xa47   : > { %9895 = vmatprep.subr.bf16.mxu0 %v15699_v15 }
 0xa48   : > { %v9498_v37 = vadd.f32 %v9488_v36, %v9395_v62  ;;  %v12200_v36 = vld [vmem:[%s15176_s1 + $0x64] ss:$16 sps:$4 sm:$0xff]  }
 0xa49   : > { %v15720_v62 = vld [vmem:[#allocation25_spill] sm:$0xff] }
 0xa4a   : > { %v9506_v21 = vmax.f32 %v9224_v2, %v9498_v37 }
 0xac9   : > { %v11730_v15 = vpop.f32.mrf.mxu0 }
 0xacb   : > { %v11731_v55 = vpop.f32.mrf.mxu0 }
 0xacc   : > { %v11732_v35 = vadd.f32 %v11731_v55, %v11730_v15  ;;  %v9119_v55 = vadd.f32 %v9118_v17, %v9032_v29 }
 0xacd   : > { %v11733_v8 = vpop.f32.mrf.mxu0 }
 0xace   : > { %v15014_v32 = vadd.f32 %v11732_v35, %v15714_v16  ;;  %v9490_v35 = vpop.f32.mrf.mxu1  ;;  %v9393_v16 = vadd.f32 %v9392_v9, %v9306_v53  ;;  %v9223_v20 = vadd.f32 %v9212_v12, %v9119_v55  ;;  %v12202_v55 = vld [vmem:[%s15176_s1 + $0x20] ss:$16 sps:$4 sm:$0xff]  }
 0xacf   : > { %v11734_v22 = vpop.f32.mrf.mxu0 }
 0xad0   : > { %15715 = vst [vmem:[#allocation27_spill] sm:$0xff] %v15014_v32  ;;  %v11735_v59 = vadd.f32 %v11734_v22, %v11733_v8  ;;  %v9123_v8 = vadd.f32 %v9122_v45, %v9036_v61  ;;  %v9397_v22 = vadd.f32 %v9396_v23, %v9310_v43  ;;  %v9492_v48 = vpop.f32.mrf.mxu1  ;;  %v9497_v45 = vadd.f32 %v9486_v0, %v9393_v16  ;;  %v15721_v16 = vld [vmem:[#allocation23_spill] sm:$0xff] }
 0xad1   : > { %v9169_v26 = vpop.f32.mrf.mxu0  ;;  %v9502_v49 = vadd.f32 %v9492_v48, %v9399_v27  ;;  %v12090_v48 = vld [vmem:[%s15178_s3 + $0x658] sm:$0xff]  }
 0xad2   : > { %v15017_v54 = vadd.f32 %v11735_v59, %v15716_v60  ;;  %v9076_v60 = vadd.f32 %v9075_v51, %v14984_v57  ;;  %v9227_v61 = vadd.f32 %v9216_v13, %v9123_v8  ;;  %v9501_v53 = vadd.f32 %v9490_v35, %v9397_v22  ;;  %v12203_v35 = vld [vmem:[%s15176_s1 + $0x4] ss:$16 sps:$4 sm:$0xff]   ;;  %v12204_v8 = vld [vmem:[%s15176_s1] ss:$16 sps:$4 sm:$0xff]   ;;  %v15722_v22 = vld [vmem:[#allocation26_spill] sm:$0xff] }
 0xad3   : > { %v9171_v3 = vpop.f32.mrf.mxu0  ;;  %v9082_v57 = vadd.f32 %v15011_v42, %v15008_v11  ;;  %v9505_v13 = vmax.f32 %v9223_v20, %v9497_v45  ;;  %v12089_v20 = vld [vmem:[%s15178_s3 + $0x620] sm:$0xff]   ;;  %v12093_v45 = vld [vmem:[%s15178_s3 + $0x610] sm:$0xff]  }
 0xad4   : > { %15717 = vst [vmem:[#allocation20_spill] sm:$0xff] %v15017_v54  ;;  %v9078_v54 = vadd.f32 %v9077_v28, %v14992_v50  ;;  %v9221_v43 = vadd.f32 %v9169_v26, %v9076_v60  ;;  %v9228_v28 = vadd.f32 %v9218_v41, %v9125_v39  ;;  %v12083_v60 = vld [vmem:[%s15178_s3 + $0x638] sm:$0xff]  }
 0xad5   : > { %v9173_v30 = vpop.f32.mrf.mxu0 }
 0xad6   : > { %v9222_v50 = vadd.f32 %v9171_v3, %v9078_v54  ;;  %v9225_v33 = vadd.f32 %v9173_v30, %v9080_v14  ;;  %v9510_v42 = vmax.f32 %v9228_v28, %v9502_v49  ;;  %v12088_v14 = vld [vmem:[%s15178_s3 + $0x660] sm:$0xff]  }
 0xad7   : > { %v9175_v5 = vpop.f32.mrf.mxu0 }
 0xad8   : > { %v9226_v26 = vadd.f32 %v9175_v5, %v9082_v57 }
 0xad9   : > { %v9263_v56 = vpop.f32.mrf.mxu0 }
 0xadb   : > { %v9265_v63 = vpop.f32.mrf.mxu0 }
 0xadd   : > { %v9267_v18 = vpop.f32.mrf.mxu0 }
 0xadf   : > { %v9269_v25 = vpop.f32.mrf.mxu0 }
 0xae1   : > { %v9349_v52 = vpop.f32.mrf.mxu0 }
 0xae2   : > { %v9350_v32 = vadd.f32 %v9349_v52, %v9263_v56 }
 0xae3   : > { %v9351_v6 = vpop.f32.mrf.mxu0 }
 0xae4   : > { %v9352_v29 = vadd.f32 %v9351_v6, %v9265_v63  ;;  %v15718_v6 = vld [vmem:[#allocation19_spill] sm:$0xff] }
 0xae5   : > { %v9353_v15 = vpop.f32.mrf.mxu0 }
 0xae6   : > { %v9354_v47 = vadd.f32 %v9353_v15, %v9267_v18  ;;  %v12201_v15 = vld [vmem:[%s15176_s1 + $0x24] ss:$16 sps:$4 sm:$0xff]  }
 0xae7   : > { %v9355_v59 = vpop.f32.mrf.mxu0 }
 0xae8   : > { %v9356_v12 = vadd.f32 %v9355_v59, %v9269_v25  ;;  %v12082_v59 = vld [vmem:[%s15178_s3 + $0x678] sm:$0xff]  }
 0xae9   : > { %v9443_v19 = vpop.f32.mrf.mxu0 }
 0xaea   : > { %v9495_v17 = vadd.f32 %v9443_v19, %v9350_v32  ;;  %v9509_v32 = vmax.f32 %v9227_v61, %v9501_v53  ;;  %v12092_v61 = vld [vmem:[%s15178_s3 + $0x650] sm:$0xff]  }
 0xaeb   : > { %v9445_v9 = vpop.f32.mrf.mxu0 }
 0xaec   : > { %v9496_v51 = vadd.f32 %v9445_v9, %v9352_v29  ;;  %v9503_v38 = vmax.f32 %v9221_v43, %v9495_v17  ;;  %v12091_v29 = vld [vmem:[%s15178_s3 + $0x618] sm:$0xff]   ;;  %v15097_v17 = vpop.f32.mrf.mxu1  ;;  %v12094_v43 = vld [vmem:[%s15178_s3 + $0x648] sm:$0xff]  }
 0xaed   : > { %v9447_v7 = vpop.f32.mrf.mxu0  ;;  %v12095_v9 = vld [vmem:[%s15178_s3 + $0x608] sm:$0xff]  }
 0xaee   : > { %v9504_v24 = vmax.f32 %v9222_v50, %v9496_v51  ;;  %v9499_v19 = vadd.f32 %v9447_v7, %v9354_v47  ;;  %v9511_v11 = vmax.f32 %v9503_v38, %v9505_v13  ;;  %v15105_v53 = vpop.f32.mrf.mxu1  ;;  %v12096_v50 = vld [vmem:[%s15178_s3 + $0x640] sm:$0xff]  }
 0xaef   : > { %v9449_v23 = vpop.f32.mrf.mxu0  ;;  %v12097_v47 = vld [vmem:[%s15178_s3 + $0x600] sm:$0xff]  }
 0xaf0   : > { %v9512_v56 = vmax.f32 %v9504_v24, %v9506_v21  ;;  %v9507_v40 = vmax.f32 %v9225_v33, %v9499_v19  ;;  %v9500_v63 = vadd.f32 %v9449_v23, %v9356_v12  ;;  %v9515_v39 = vadd.f32 %v9511_v11, %v12803_v4  ;;  %v15113_v57 = vpop.f32.mrf.mxu1 }
 0xaf2   : > { %v9513_v54 = vmax.f32 %v9507_v40, %v9509_v32  ;;  %v9508_v3 = vmax.f32 %v9226_v26, %v9500_v63  ;;  %v9516_v2 = vadd.f32 %v9512_v56, %v12799_v44  ;;  %v9519_v5 = vmax.f32 %v9515_v39, 0.0  ;;  %v15121_v51 = vpop.f32.mrf.mxu1 }
 0xaf4   : > { %v9517_v37 = vadd.f32 %v9513_v54, %v12803_v4  ;;  %v9514_v27 = vmax.f32 %v9508_v3, %v9510_v42  ;;  %v9520_v18 = vmax.f32 %v9516_v2, 0.0  ;;  %v9780_v28 = vpop.f32.mrf.mxu1 }
 0xaf6   : > { %v9518_v41 = vadd.f32 %v9514_v27, %v12799_v44  ;;  %v9521_v30 = vmax.f32 %v9517_v37, 0.0  ;;  %v9782_v21 = vpop.f32.mrf.mxu1 }
 0xaf8   : > { %v9522_v0 = vmax.f32 %v9518_v41, 0.0  ;;  %v9523_v52 = vpack.c.bf16 %v9521_v30, %v9519_v5  ;;  %v9784_v49 = vpop.f32.mrf.mxu1  ;;  %v15723_v30 = vld [vmem:[#allocation27_spill] sm:$0xff] }
 0xafa   : > { %v9524_v25 = vpack.c.bf16 %v9522_v0, %v9520_v18  ;;  %v9786_v38 = vpop.f32.mrf.mxu1 }
 0xafc   : > { %9686 = vmatprep.mubr.bf16.mxu0 %v9524_v25  ;;  %v9823_v7 = vpop.f32.mrf.mxu1 }
 0xafd   : > { %9687 = vmatmul.mubr.bf16.vlgmr.msra.gmra.mxu0 %v9523_v52 }
 0xafe   : > { %9896 = vmatpush1.bf16.msra.mxu0 %v14887_v31  ;;  %9915 = vmatprep.mubr.bf16.mxu0 %v15428_v34  ;;  %v9825_v33 = vpop.f32.mrf.mxu1 }
 0xaff   : > { %9897 = vmatprep.subr.bf16.mxu0 %v14894_v1 }
 0xb00   : > { %v9827_v12 = vpop.f32.mrf.mxu1 }
 0xb02   : > { %9898 = vmatpush1.bf16.msra.mxu0 %v14900_v10  ;;  %v15123_v24 = vpop.f32.mrf.mxu1 }
 0xb03   : > { %9989 = vmatprep.subr.bf16.mxu0 %v12200_v36  ;;  %v15724_v36 = vld [vmem:[#allocation20_spill] sm:$0xff] }
 0xb04   : > { %v9866_v19 = vpop.f32.mrf.mxu1 }
 0xb05   : > { %11427 = vmatmul.mubr.msk.bf16.vlgmr.msra.gmra.mxu0 %vm629_vm0, %v14927_v58 }
 0xb06   : > { %9990 = vmatpush1.bf16.msra.mxu0 %v15718_v6  ;;  %10009 = vmatprep.mubr.bf16.mxu0 %v15428_v34  ;;  %v9868_v13 = vpop.f32.mrf.mxu1 }
 0xb07   : > { %9991 = vmatprep.subr.bf16.mxu0 %v15719_v46 }
 0xb08   : > { %v9870_v32 = vpop.f32.mrf.mxu1 }
 0xb0a   : > { %9992 = vmatpush1.bf16.msra.mxu0 %v15720_v62  ;;  %v9872_v23 = vpop.f32.mrf.mxu1 }
 0xb0b   : > { %10075 = vmatprep.subr.bf16.mxu0 %v12201_v15 }
 0xb0c   : > { %v9960_v26 = vpop.f32.mrf.mxu1 }
 0xb0d   : > { %11429 = vmatmul.mubr.msk.bf16.vlgmr.msra.gmra.mxu0 %vm629_vm0, %v14927_v58  ;;  %v12205_v58 = vld [vmem:[%s15176_s1 + $0xa4] ss:$16 sps:$4 sm:$0xff]  }
 0xb0e   : > { %10076 = vmatpush1.bf16.msra.mxu0 %v12202_v55  ;;  %10095 = vmatprep.mubr.bf16.mxu0 %v15428_v34  ;;  %v9962_v56 = vpop.f32.mrf.mxu1 }
 0xb0f   : > { %10077 = vmatprep.subr.bf16.mxu0 %v12203_v35 }
 0xb10   : > { %v9964_v40 = vpop.f32.mrf.mxu1 }
 0xb12   : > { %10078 = vmatpush1.bf16.msra.mxu0 %v12204_v8  ;;  %v9966_v63 = vpop.f32.mrf.mxu1 }
 0xb13   : > { %10169 = vmatprep.subr.bf16.mxu0 %v12205_v58 }
 0xb14   : > { %v10054_v11 = vpop.f32.mrf.mxu1 }
 0xb15   : > { %11431 = vmatmul.mubr.msk.bf16.vlgmr.msra.gmra.mxu0 %vm629_vm0, %v15721_v16 }
 0xb16   : > { %10170 = vmatpush1.bf16.msra.mxu0 %v14887_v31  ;;  %10189 = vmatprep.mubr.bf16.mxu0 %v15428_v34  ;;  %v12084_v34 = vld [vmem:[%s15178_s3 + $0x670] sm:$0xff]   ;;  %v10056_v42 = vpop.f32.mrf.mxu1 }
 0xb17   : > { %10171 = vmatprep.subr.bf16.mxu0 %v14894_v1  ;;  %v12085_v31 = vld [vmem:[%s15178_s3 + $0x630] sm:$0xff]   ;;  %v12086_v1 = vld [vmem:[%s15178_s3 + $0x668] sm:$0xff]  }
 0xb18   : > { %v10058_v54 = vpop.f32.mrf.mxu1 }
 0xb1a   : > { %10172 = vmatpush1.bf16.msra.mxu0 %v14900_v10  ;;  %v12087_v10 = vld [vmem:[%s15178_s3 + $0x628] sm:$0xff]   ;;  %v10060_v37 = vpop.f32.mrf.mxu1 }
 0xb1b   : > { %11758 = vmatprep.subr.bf16.mxu0 %v12082_v59 }
 0xb1c   : > { %v10140_v41 = vpop.f32.mrf.mxu1 }
 0xb1d   : > { %11434 = vmatmul.mubr.msk.bf16.vlgmr.msra.gmra.mxu0 %vm629_vm0, %v15722_v22 }
 0xb1e   : > { %11759 = vmatpush3.bf16.msra.mxu0 %v12083_v60  ;;  %v10142_v52 = vpop.f32.mrf.mxu1 }
 0xb1f   : > { %11760 = vmatprep.subr.bf16.mxu0 %v12084_v34 }
 0xb20   : > { %v10144_v15 = vpop.f32.mrf.mxu1 }
 0xb22   : > { %11761 = vmatpush3.bf16.msra.mxu0 %v12085_v31  ;;  %v10146_v8 = vpop.f32.mrf.mxu1 }
 0xb23   : > { %11762 = vmatprep.subr.bf16.mxu0 %v12086_v1  ;;  %v9869_v1 = vadd.f32 %v9868_v13, %v9782_v21  ;;  %v9828_v21 = vadd.f32 %v9827_v12, %v15113_v57 }
 0xb24   : > { %v10234_v22 = vpop.f32.mrf.mxu1 }
 0xb26   : > { %11763 = vmatpush3.bf16.msra.mxu0 %v12087_v10  ;;  %v10236_v34 = vpop.f32.mrf.mxu1  ;;  %v10143_v10 = vadd.f32 %v10142_v52, %v10056_v42 }
 0xb27   : > { %11764 = vmatprep.subr.bf16.mxu0 %v12088_v14 }
 0xb2a   : > { %11765 = vmatpush3.bf16.msra.mxu0 %v12089_v20  ;;  %v9867_v20 = vadd.f32 %v9866_v19, %v9780_v28 }
 0xb2b   : > { %11766 = vmatprep.subr.bf16.mxu0 %v12090_v48  ;;  %v10238_v48 = vpop.f32.mrf.mxu1 }
 0xb2c   : > { %v9971_v13 = vadd.f32 %v9960_v26, %v9867_v20  ;;  %v12098_v20 = vld [vmem:[%s15180_s5 + $0x18] sm:$0xff]  }
 0xb2d   : > { %v10240_v42 = vpop.f32.mrf.mxu1 }
 0xb2e   : > { %11767 = vmatpush3.bf16.msra.mxu0 %v12091_v29  ;;  %v9871_v29 = vadd.f32 %v9870_v32, %v9784_v49 }
 0xb2f   : > { %11768 = vmatprep.subr.bf16.mxu0 %v12092_v61  ;;  %v10141_v61 = vadd.f32 %v10140_v41, %v10054_v11 }
 0xb30   : > { %v9975_v49 = vadd.f32 %v9964_v40, %v9871_v29 }
 0xb31   : > { %v10245_v32 = vadd.f32 %v10234_v22, %v10141_v61 }
 0xb32   : > { %11769 = vmatpush3.bf16.msra.mxu0 %v12093_v45  ;;  %v10145_v45 = vadd.f32 %v10144_v15, %v10058_v54 }
 0xb33   : > { %11770 = vmatprep.subr.bf16.mxu0 %v12094_v43  ;;  %v10253_v40 = vmax.f32 %v9971_v13, %v10245_v32 }
 0xb34   : > { %v10249_v11 = vadd.f32 %v10238_v48, %v10145_v45  ;;  %v12101_v48 = vld [vmem:[%s15180_s5] sm:$0xff]  }
 0xb36   : > { %11771 = vmatpush3.bf16.msra.mxu0 %v12095_v9  ;;  %v9824_v9 = vadd.f32 %v9823_v7, %v15097_v17  ;;  %v9830_v17 = vadd.f32 %v15123_v24, %v15121_v51  ;;  %v10257_v52 = vmax.f32 %v9975_v49, %v10249_v11 }
 0xb37   : > { %11772 = vmatprep.subr.bf16.mxu0 %v12096_v50  ;;  %v9826_v50 = vadd.f32 %v9825_v33, %v15105_v53 }
 0xb3a   : > { %11773 = vmatpush3.bf16.msra.mxu0 %v12097_v47 }
 0xbbd   : > { %v11752_v3 = vpop.f32.mrf.mxu0 }
 0xbbf   : > { %v11753_v27 = vpop.f32.mrf.mxu0 }
 0xbc0   : > { %v11754_v2 = vadd.f32 %v11753_v27, %v11752_v3  ;;  %v9873_v3 = vadd.f32 %v9872_v23, %v9786_v38  ;;  %v9972_v27 = vadd.f32 %v9962_v56, %v9869_v1 }
 0xbc1   : > { %v11755_v39 = vpop.f32.mrf.mxu0 }
 0xbc2   : > { %v15126_v18 = vadd.f32 %v11754_v2, %v15723_v30  ;;  %v10147_v2 = vadd.f32 %v10146_v8, %v10060_v37  ;;  %v9976_v33 = vadd.f32 %v9966_v63, %v9873_v3 }
 0xbc3   : > { %v11756_v0 = vpop.f32.mrf.mxu0 }
 0xbc4   : > { %v11757_v5 = vadd.f32 %v11756_v0, %v11755_v39  ;;  %v10246_v39 = vadd.f32 %v10236_v34, %v10143_v10  ;;  %v10250_v56 = vadd.f32 %v10240_v42, %v10147_v2 }
 0xbc5   : > { %v9917_v25 = vpop.f32.mrf.mxu0 }
 0xbc6   : > { %v15129_v6 = vadd.f32 %v11757_v5, %v15724_v36  ;;  %v9969_v54 = vadd.f32 %v9917_v25, %v9824_v9  ;;  %v10254_v23 = vmax.f32 %v9972_v27, %v10246_v39  ;;  %v10258_v24 = vmax.f32 %v9976_v33, %v10250_v56 }
 0xbc7   : > { %v9919_v46 = vpop.f32.mrf.mxu0 }
 0xbc8   : > { %v9970_v53 = vadd.f32 %v9919_v46, %v9826_v50  ;;  %v11484_v50 = vld [vmem:[%s15179_s4] ss:$0 sm:$0xff] }
 0xbc9   : > { %v9921_v62 = vpop.f32.mrf.mxu0 }
 0xbca   : > { %v9973_v12 = vadd.f32 %v9921_v62, %v9828_v21 }
 0xbcb   : > { %v9923_v55 = vpop.f32.mrf.mxu0 }
 0xbcc   : > { %v9974_v25 = vadd.f32 %v9923_v55, %v9830_v17 }
 0xbcd   : > { %v10011_v35 = vpop.f32.mrf.mxu0 }
 0xbcf   : > { %v10013_v58 = vpop.f32.mrf.mxu0 }
 0xbd1   : > { %v10015_v16 = vpop.f32.mrf.mxu0 }
 0xbd3   : > { %v10017_v59 = vpop.f32.mrf.mxu0 }
 0xbd5   : > { %v10097_v60 = vpop.f32.mrf.mxu0 }
 0xbd6   : > { %v10098_v47 = vadd.f32 %v10097_v60, %v10011_v35 }
 0xbd7   : > { %v10099_v31 = vpop.f32.mrf.mxu0 }
 0xbd8   : > { %v10100_v28 = vadd.f32 %v10099_v31, %v10013_v58 }
 0xbd9   : > { %v10101_v14 = vpop.f32.mrf.mxu0 }
 0xbda   : > { %v10102_v38 = vadd.f32 %v10101_v14, %v10015_v16  ;;  %v12231_v14 = vmov 0.0  }
 0xbdb   : > { %v10103_v43 = vpop.f32.mrf.mxu0  ;;  %11785 = vmatprep.subr.bf16.mxu1 %v12231_v14  ;;  %11793 = vmatprep.mubr.msk.bf16.mxu1 %vm12232_vm1, %v12231_v14 }
 0xbdc   : > { %v10104_v26 = vadd.f32 %v10103_v43, %v10017_v59  ;;  %11786 = vmatpush3.bf16.msra.mxu1 %v12098_v20 }
 0xbdd   : > { %v10191_v30 = vpop.f32.mrf.mxu0  ;;  %11787 = vmatprep.subr.bf16.mxu1 %v12231_v14 }
 0xbde   : > { %v10243_v19 = vadd.f32 %v10191_v30, %v10098_v47 }
 0xbdf   : > { %v10193_v41 = vpop.f32.mrf.mxu0 }
 0xbe0   : > { %v10244_v7 = vadd.f32 %v10193_v41, %v10100_v28  ;;  %v10251_v37 = vmax.f32 %v9969_v54, %v10243_v19 }
 0xbe1   : > { %v10195_v57 = vpop.f32.mrf.mxu0 }
 0xbe2   : > { %v10252_v0 = vmax.f32 %v9970_v53, %v10244_v7  ;;  %v10247_v5 = vadd.f32 %v10195_v57, %v10102_v38  ;;  %v10259_v51 = vmax.f32 %v10251_v37, %v10253_v40 }
 0xbe3   : > { %v10197_v36 = vpop.f32.mrf.mxu0 }
 0xbe4   : > { %v10260_v15 = vmax.f32 %v10252_v0, %v10254_v23  ;;  %v10255_v35 = vmax.f32 %v9973_v12, %v10247_v5  ;;  %v10248_v8 = vadd.f32 %v10197_v36, %v10104_v26  ;;  %v10263_v62 = vadd.f32 %v10259_v51, %v12803_v4 }
 0xbe6   : > { %v10261_v46 = vmax.f32 %v10255_v35, %v10257_v52  ;;  %v10256_v58 = vmax.f32 %v9974_v25, %v10248_v8  ;;  %v10264_v22 = vadd.f32 %v10260_v15, %v12799_v44  ;;  %v10267_v55 = vmax.f32 %v10263_v62, 0.0 }
 0xbe8   : > { %v10265_v63 = vadd.f32 %v10261_v46, %v12803_v4  ;;  %v10262_v16 = vmax.f32 %v10256_v58, %v10258_v24  ;;  %v10268_v34 = vmax.f32 %v10264_v22, 0.0  ;;  %v12100_v4 = vld [vmem:[%s15180_s5 + $0x8] sm:$0xff]  }
 0xbea   : > { %v10266_v59 = vadd.f32 %v10262_v16, %v12799_v44  ;;  %v10269_v60 = vmax.f32 %v10265_v63, 0.0  ;;  %v12099_v44 = vld [vmem:[%s15180_s5 + $0x10] sm:$0xff]  }
 0xbeb   : > { %11788 = vmatpush3.bf16.msra.mxu1 %v12099_v44 }
 0xbec   : > { %v10270_v31 = vmax.f32 %v10266_v59, 0.0  ;;  %v10271_v10 = vpack.c.bf16 %v10269_v60, %v10267_v55  ;;  %11789 = vmatprep.subr.bf16.mxu1 %v12231_v14 }
 0xbee   : > { %v10272_v1 = vpack.c.bf16 %v10270_v31, %v10268_v34 }
 0xbef   : > { %11790 = vmatpush3.bf16.msra.mxu1 %v12100_v4 }
 0xbf0   : > { %10434 = vmatprep.mubr.bf16.mxu0 %v10272_v1  ;;  %11791 = vmatprep.subr.bf16.mxu1 %v12231_v14 }
 0xbf1   : > { %10435 = vmatmul.mubr.bf16.vlgmr.msra.gmra.mxu0 %v10271_v10 }
 0xbf3   : > { %11792 = vmatpush3.bf16.msra.mxu1 %v12101_v48 }
 0xcb1   : > { %v11774_v29 = vpop.f32.mrf.mxu0 }
 0xcb3   : > { %v11775_v61 = vpop.f32.mrf.mxu0 }
 0xcb4   : > { %v11776_v45 = vadd.f32 %v11775_v61, %v11774_v29 }
 0xcb5   : > { %v11777_v43 = vpop.f32.mrf.mxu0 }
 0xcb6   : > { %v10443_v9 = vadd.f32 %v11776_v45, %v15126_v18  ;;  %v11485_v18 = vld [vmem:[%s15181_s6] ss:$0 sm:$0xff] }
 0xcb7   : > { %v11778_v47 = vpop.f32.mrf.mxu0 }
 0xcb8   : > { %v11779_v3 = vadd.f32 %v11778_v47, %v11777_v43  ;;  %v10452_v27 = vadd.f32 %v11484_v50, %v10443_v9 }
 0xcba   : > { %v10444_v2 = vadd.f32 %v11779_v3, %v15129_v6  ;;  %v10454_v30 = vmax.f32 %v10452_v27, 0.0 }
 0xcbc   : > { %v10453_v39 = vadd.f32 %v11484_v50, %v10444_v2 }
 0xcbe   : > { %v10455_v21 = vmax.f32 %v10453_v39, 0.0 }
 0xcc0   : > { %v10456_v13 = vpack.c.bf16 %v10455_v21, %v10454_v30 }
 0xcc2   : > { %11794 = vmatmul.mubr.msk.bf16.vlgmr.msra.gmra.mxu1 %vm10496_vm2, %v10456_v13 }
 0xd82   : > { %v10534_v6 = vpop.f32.mrf.mxu1 }
 0xd83   : > { %v10535_v42 = vadd.f32 %v11485_v18, %v10534_v6 }
 0xd84   : > { %v11795_v28 = vpop.f32.mrf.mxu1 }
 0xd85   : > { %10541 = vst [vmem:[%s543_s16] sm:$0xff] %v10535_v42 }
 0xd86   : > { %v10537_v19 = vpop.f32.mrf.mxu1 }
 0xd87   : > { %v10538_v49 = vadd.f32 %v11485_v18, %v10537_v19 }
 0xd88   : > { %v11796_v32 = vpop.f32.mrf.mxu1 }
 0xd89   : > { %10542 = vst [vmem:[%s543_s16 + $0x8] sm:$0xff] %v10538_v49 }
 0xd8a PF: > { %p14_p9 = scmp.ge.s32.totalorder %s12290_s28, 4   ;;  %s15725_s24 = smov %s12224_s25 }
 0xd8b   : > { %s15726_s25 = smov %s12299_s8  ;;  %s15727_s26 = smov %s12290_s28 }
 0xd8c   :  { %16 = sbr.rel (!%p14_p9) target bundleno = 2 (0x2), region = 165 }

</bundles_post_ra>
